<compile_context>
chip_gen: v5e
topology: v5e:2x2
jax: 0.10.0
libtpu: 0.0.40
codegen_flags: <defaults>
</compile_context>

<pallas_src>
import functools

import jax
import jax.numpy as jnp
from jax.experimental import pallas as pl
from jax.experimental.pallas import tpu as pltpu


# ----------------------------------------------------------------------------- fused kernel

def _make_trtr_kernel(names, *, L_enc, L_dec, L_gt, C, E, H, NE, ND, if_msk):
    n_in = len(names)
    Dh = E // H
    scale = 1.0 / float(Dh) ** 0.5

    def layer_norm(x, g, b):
        # PyTorch LayerNorm: biased variance, eps=1e-5, over last dim.
        mu = jnp.mean(x, axis=-1, keepdims=True)
        xc = x - mu
        var = jnp.mean(xc * xc, axis=-1, keepdims=True)
        return xc * jax.lax.rsqrt(var + 1e-5) * g + b

    def circ_conv(x, w_ref, pad_ref):
        # x: (L, Cin) value, w_ref: (3, Cin, Cout), pad_ref: (2L, Cin) VMEM scratch.
        # Circular kernel_size=3 conv == 3 shifted matmuls. Store x twice into the scratch so
        # all wrap-around taps are contiguous, aligned slices.
        L = x.shape[0]
        pad_ref[0:L, :] = x
        pad_ref[L:2 * L, :] = x
        padv = pad_ref[...]
        prev = padv[L - 1:2 * L - 1, :]        # x[(i-1) mod L]
        nxt = padv[1:L + 1, :]                 # x[(i+1) mod L]
        w = w_ref[...]
        return (jnp.dot(prev, w[0], preferred_element_type=jnp.float32)
                + jnp.dot(x, w[1], preferred_element_type=jnp.float32)
                + jnp.dot(nxt, w[2], preferred_element_type=jnp.float32))

    def mha(xq, xkv, in_w, in_b, out_w, out_b, mask, self_attn):
        # xq: (Lq, E), xkv: (Lk, E); in_w: (E, 3E); in_b: (1, 3E); out_w: (E, E); out_b: (1, E).
        if self_attn:
            qkv = jnp.dot(xq, in_w, preferred_element_type=jnp.float32) + in_b  # fused QKV
            q = qkv[:, 0:E]
            k = qkv[:, E:2 * E]
            v = qkv[:, 2 * E:3 * E]
        else:
            q = jnp.dot(xq, in_w[:, 0:E], preferred_element_type=jnp.float32) + in_b[:, 0:E]
            kv = jnp.dot(xkv, in_w[:, E:3 * E],
                         preferred_element_type=jnp.float32) + in_b[:, E:3 * E]
            k = kv[:, 0:E]
            v = kv[:, E:2 * E]
        dn = (((1,), (1,)), ((), ()))          # q @ k^T without materializing a transpose
        o = None
        for h in range(H):
            sl = slice(h * Dh, (h + 1) * Dh)
            s = jax.lax.dot_general(q[:, sl], k[:, sl], dn,
                                    preferred_element_type=jnp.float32) * scale
            if mask is not None:
                s = s + mask
            s = s - jnp.max(s, axis=-1, keepdims=True)
            p = jnp.exp(s)
            p = p / jnp.sum(p, axis=-1, keepdims=True)
            oh = jnp.dot(p, v[:, sl], preferred_element_type=jnp.float32)       # (Lq, Dh)
            # Fold the head directly into the output projection -> lane-dense (Lq, E) result.
            contrib = jnp.dot(oh, out_w[sl, :], preferred_element_type=jnp.float32)
            o = contrib if o is None else o + contrib
        return o + out_b

    def kernel(*refs):
        r = dict(zip(names, refs[:n_in]))
        out_ref = refs[n_in]
        sse_ref = refs[n_in + 1]
        pad_enc = refs[n_in + 2]
        pad_dec = refs[n_in + 3]
        pad_red = refs[n_in + 4]

        def ffn(x, w1, b1, w2, b2):
            h = jnp.dot(x, w1, preferred_element_type=jnp.float32) + b1
            h = jnp.maximum(h, 0.0)                     # relu; (L, dff) stays in VMEM
            return jnp.dot(h, w2, preferred_element_type=jnp.float32) + b2

        # --- embeddings: circular conv token embed + positional embed ---
        x = circ_conv(r['enc_x'][0], r['enc_conv_w'], pad_enc) + r['enc_pos'][...]
        y = circ_conv(r['dec_x'][0], r['dec_conv_w'], pad_dec) + r['dec_pos'][...]

        # --- decoder self-attention causal mask (compile-time flag) ---
        if if_msk:
            row = jax.lax.broadcasted_iota(jnp.int32, (L_dec, L_dec), 0)
            col = jax.lax.broadcasted_iota(jnp.int32, (L_dec, L_dec), 1)
            tgt_mask = jnp.where(col > row, -jnp.inf, 0.0).astype(jnp.float32)
        else:
            tgt_mask = None

        # --- encoder stack (post-norm layers) ---
        for l in range(NE):
            a = mha(x, x, r['e_in_w'][l], r['e_in_b'][l],
                    r['e_out_w'][l], r['e_out_b'][l], None, True)
            x = layer_norm(x + a, r['e_ln1_g'][l], r['e_ln1_b'][l])
            f = ffn(x, r['e_lin1_w'][l], r['e_lin1_b'][l],
                    r['e_lin2_w'][l], r['e_lin2_b'][l])
            x = layer_norm(x + f, r['e_ln2_g'][l], r['e_ln2_b'][l])
        mem = layer_norm(x, r['enc_ng'][...], r['enc_nb'][...])   # nn.Transformer encoder norm

        # --- decoder stack ---
        for l in range(ND):
            a = mha(y, y, r['d_sa_in_w'][l], r['d_sa_in_b'][l],
                    r['d_sa_out_w'][l], r['d_sa_out_b'][l], tgt_mask, True)
            y = layer_norm(y + a, r['d_ln1_g'][l], r['d_ln1_b'][l])
            c = mha(y, mem, r['d_ca_in_w'][l], r['d_ca_in_b'][l],
                    r['d_ca_out_w'][l], r['d_ca_out_b'][l], None, False)
            y = layer_norm(y + c, r['d_ln2_g'][l], r['d_ln2_b'][l])
            f = ffn(y, r['d_lin1_w'][l], r['d_lin1_b'][l],
                    r['d_lin2_w'][l], r['d_lin2_b'][l])
            y = layer_norm(y + f, r['d_ln3_g'][l], r['d_ln3_b'][l])
        y = layer_norm(y, r['dec_ng'][...], r['dec_nb'][...])     # nn.Transformer decoder norm

        # --- d_reduction circular conv, output slice, per-batch squared error ---
        red = circ_conv(y, r['red_w'], pad_red)                   # (L_dec, C)
        outputs = red[L_dec - L_gt:, :]                           # last L_gt positions
        out_ref[0] = outputs
        d = outputs - r['gt_x'][0]
        sse_ref[0] = jnp.sum(d * d).reshape(1, 1)

    return kernel


# ----------------------------------------------------------------------------- wrapper

@functools.partial(jax.jit, static_argnames=("H", "input_len", "if_msk"))
def trtr_forward(params, enc_x, dec_x, gt_x, *, H, input_len, if_msk=False):
    """Trtr.forward for model_type='nrml' (nn.Transformer), shared_pos_embed=False, dropout=0."""
    B, L_enc, C = enc_x.shape
    L_dec = dec_x.shape[1]
    L_gt = gt_x.shape[1]
    E = params['enc_emb']['conv_w'].shape[2]
    el = params['enc_layers']
    dl = params['dec_layers']
    NE, ND = len(el), len(dl)

    f32 = jnp.float32

    def b2(v):  # bias / gain -> (1, dim) so it broadcasts cleanly in-kernel
        return v.reshape(1, -1).astype(f32)

    enc_pos = params['enc_emb']['pos'][0, :L_enc, :]
    dec_pos = params['dec_emb']['pos'][0, input_len:input_len + L_dec, :]

    inputs = [
        # per-batch data (blocked over the grid)
        ('enc_x', enc_x.astype(f32)), ('dec_x', dec_x.astype(f32)), ('gt_x', gt_x.astype(f32)),
        # embeddings
        ('enc_conv_w', params['enc_emb']['conv_w']), ('enc_pos', enc_pos),
        ('dec_conv_w', params['dec_emb']['conv_w']), ('dec_pos', dec_pos),
        # encoder stack (stacked over layers)
        ('e_in_w', jnp.stack([p['attn']['in_w'] for p in el])),
        ('e_in_b', jnp.stack([b2(p['attn']['in_b']) for p in el])),
        ('e_out_w', jnp.stack([p['attn']['out_w'] for p in el])),
        ('e_out_b', jnp.stack([b2(p['attn']['out_b']) for p in el])),
        ('e_ln1_g', jnp.stack([b2(p['ln1_g']) for p in el])),
        ('e_ln1_b', jnp.stack([b2(p['ln1_b']) for p in el])),
        ('e_lin1_w', jnp.stack([p['lin1_w'] for p in el])),
        ('e_lin1_b', jnp.stack([b2(p['lin1_b']) for p in el])),
        ('e_lin2_w', jnp.stack([p['lin2_w'] for p in el])),
        ('e_lin2_b', jnp.stack([b2(p['lin2_b']) for p in el])),
        ('e_ln2_g', jnp.stack([b2(p['ln2_g']) for p in el])),
        ('e_ln2_b', jnp.stack([b2(p['ln2_b']) for p in el])),
        ('enc_ng', b2(params['enc_norm_g'])), ('enc_nb', b2(params['enc_norm_b'])),
        # decoder stack
        ('d_sa_in_w', jnp.stack([p['self_attn']['in_w'] for p in dl])),
        ('d_sa_in_b', jnp.stack([b2(p['self_attn']['in_b']) for p in dl])),
        ('d_sa_out_w', jnp.stack([p['self_attn']['out_w'] for p in dl])),
        ('d_sa_out_b', jnp.stack([b2(p['self_attn']['out_b']) for p in dl])),
        ('d_ca_in_w', jnp.stack([p['cross_attn']['in_w'] for p in dl])),
        ('d_ca_in_b', jnp.stack([b2(p['cross_attn']['in_b']) for p in dl])),
        ('d_ca_out_w', jnp.stack([p['cross_attn']['out_w'] for p in dl])),
        ('d_ca_out_b', jnp.stack([b2(p['cross_attn']['out_b']) for p in dl])),
        ('d_ln1_g', jnp.stack([b2(p['ln1_g']) for p in dl])),
        ('d_ln1_b', jnp.stack([b2(p['ln1_b']) for p in dl])),
        ('d_ln2_g', jnp.stack([b2(p['ln2_g']) for p in dl])),
        ('d_ln2_b', jnp.stack([b2(p['ln2_b']) for p in dl])),
        ('d_ln3_g', jnp.stack([b2(p['ln3_g']) for p in dl])),
        ('d_ln3_b', jnp.stack([b2(p['ln3_b']) for p in dl])),
        ('d_lin1_w', jnp.stack([p['lin1_w'] for p in dl])),
        ('d_lin1_b', jnp.stack([b2(p['lin1_b']) for p in dl])),
        ('d_lin2_w', jnp.stack([p['lin2_w'] for p in dl])),
        ('d_lin2_b', jnp.stack([b2(p['lin2_b']) for p in dl])),
        ('dec_ng', b2(params['dec_norm_g'])), ('dec_nb', b2(params['dec_norm_b'])),
        # d_reduction
        ('red_w', params['red_w']),
    ]
    names = tuple(n for n, _ in inputs)
    arrays = [a for _, a in inputs]

    per_batch = ('enc_x', 'dec_x', 'gt_x')
    in_specs = []
    for n, a in inputs:
        if n in per_batch:
            in_specs.append(pl.BlockSpec((1,) + a.shape[1:], lambda b: (b, 0, 0)))
        else:  # full array resident in VMEM, same block for every grid step
            in_specs.append(pl.BlockSpec(a.shape, lambda b, nd=a.ndim: (0,) * nd))

    out_shape = (jax.ShapeDtypeStruct((B, L_gt, C), f32),
                 jax.ShapeDtypeStruct((B, 1, 1), f32))
    out_specs = (pl.BlockSpec((1, L_gt, C), lambda b: (b, 0, 0)),
                 pl.BlockSpec((1, 1, 1), lambda b: (b, 0, 0)))

    scratch_shapes = [
        pltpu.VMEM((2 * L_enc, C), f32),   # circular-pad scratch: encoder embedding conv
        pltpu.VMEM((2 * L_dec, C), f32),   # circular-pad scratch: decoder embedding conv
        pltpu.VMEM((2 * L_dec, E), f32),   # circular-pad scratch: d_reduction conv
    ]

    kernel = _make_trtr_kernel(
        names, L_enc=L_enc, L_dec=L_dec, L_gt=L_gt, C=C, E=E, H=H,
        NE=NE, ND=ND, if_msk=bool(if_msk))

    outputs, sse = pl.pallas_call(
        kernel,
        out_shape=out_shape,
        grid=(B,),
        in_specs=in_specs,
        out_specs=out_specs,
        scratch_shapes=scratch_shapes,
        compiler_params=pltpu.CompilerParams(
            dimension_semantics=("parallel",),          # B=2 -> both TCs busy on v7x
            vmem_limit_bytes=32 * 1024 * 1024),         # explicit budget (usage ~4-6 MiB)
    )(*arrays)

    loss = jnp.sum(sse) / (B * L_gt * C)                # finish the MSE mean (one tiny op)
    return outputs, loss


# ----------------------------------------------------------------------------- params

def init_params(key, C, E, e_layers, d_layers, dff, total_len):
    keys = iter(jax.random.split(key, 256))

    def nrm(shape, scale=0.05):
        return scale * jax.random.normal(next(keys), shape, jnp.float32)

    def emb():
        return {'pos': jax.random.uniform(next(keys), (1, total_len, E), jnp.float32),
                'conv_w': nrm((3, C, E))}     # PyTorch (E, C, 3) transposed

    def attn():
        return {'in_w': nrm((E, 3 * E)), 'in_b': nrm((3 * E,)),
                'out_w': nrm((E, E)), 'out_b': nrm((E,))}

    def ffn():
        return {'lin1_w': nrm((E, dff)), 'lin1_b': nrm((dff,)),
                'lin2_w': nrm((dff, E)), 'lin2_b': nrm((E,))}

    def ln():
        return jnp.ones((E,), jnp.float32), jnp.zeros((E,), jnp.float32)

    def enc_layer():
        g1, b1 = ln(); g2, b2 = ln()
        return dict(attn=attn(), ln1_g=g1, ln1_b=b1, ln2_g=g2, ln2_b=b2, **ffn())

    def dec_layer():
        g1, b1 = ln(); g2, b2 = ln(); g3, b3 = ln()
        return dict(self_attn=attn(), cross_attn=attn(),
                    ln1_g=g1, ln1_b=b1, ln2_g=g2, ln2_b=b2, ln3_g=g3, ln3_b=b3, **ffn())

    enc_ng, enc_nb = ln()
    dec_ng, dec_nb = ln()
    return {
        'enc_emb': emb(),
        'dec_emb': emb(),
        'enc_layers': [enc_layer() for _ in range(e_layers)],
        'enc_norm_g': enc_ng, 'enc_norm_b': enc_nb,
        'dec_layers': [dec_layer() for _ in range(d_layers)],
        'dec_norm_g': dec_ng, 'dec_norm_b': dec_nb,
        'red_w': nrm((3, E, C)),              # d_reduction: PyTorch (C, E, 3) transposed
    }


# ----------------------------------------------------------------------------- main

if __name__ == "__main__":
    # config: model_type='nrml', task='pretrain' (dropout=0), activation='relu',
    #         shared_pos_embed=False, max_car_num=2 (C=8), d_model=32, n_heads=4,
    #         e_layers=2, d_layers=1, dim_feedforward=2048 (nn.Transformer default),
    #         input_len=16, pred_len=8
    B = 2
    C = 2 * 4
    E, H = 32, 4
    e_layers, d_layers = 2, 1
    dff = 2048
    input_len, pred_len = 16, 8

    key = jax.random.PRNGKey(0)
    k_params, k_enc, k_dec, k_gt = jax.random.split(key, 4)
    params = init_params(k_params, C, E, e_layers, d_layers, dff, input_len + pred_len)

    enc_x = jax.random.normal(k_enc, (B, input_len, C), jnp.float32)
    dec_x = jax.random.normal(k_dec, (B, pred_len, C), jnp.float32)
    gt_x = jax.random.normal(k_gt, (B, pred_len, C), jnp.float32)

    outputs, loss = trtr_forward(params, enc_x, dec_x, gt_x,
                                 H=H, input_len=input_len, if_msk=False)
    jax.block_until_ready((outputs, loss))
    assert outputs.shape == (B, pred_len, C)
    assert loss.shape == ()
    assert bool(jnp.isfinite(loss))
    print("KERNEL_OK")
</pallas_src>

<mosaic_0001>
module attributes {stable_mosaic.version = 11 : i64} {
  func.func @kernel(%arg0: i32, %arg1: memref<1x16x8xf32, #tpu.memory_space<vmem>>, %arg2: memref<1x8x8xf32, #tpu.memory_space<vmem>>, %arg3: memref<1x8x8xf32, #tpu.memory_space<vmem>>, %arg4: memref<3x8x32xf32, #tpu.memory_space<vmem>>, %arg5: memref<16x32xf32, #tpu.memory_space<vmem>>, %arg6: memref<3x8x32xf32, #tpu.memory_space<vmem>>, %arg7: memref<8x32xf32, #tpu.memory_space<vmem>>, %arg8: memref<2x32x96xf32, #tpu.memory_space<vmem>>, %arg9: memref<2x1x96xf32, #tpu.memory_space<vmem>>, %arg10: memref<2x32x32xf32, #tpu.memory_space<vmem>>, %arg11: memref<2x1x32xf32, #tpu.memory_space<vmem>>, %arg12: memref<2x1x32xf32, #tpu.memory_space<vmem>>, %arg13: memref<2x1x32xf32, #tpu.memory_space<vmem>>, %arg14: memref<2x32x2048xf32, #tpu.memory_space<vmem>>, %arg15: memref<2x1x2048xf32, #tpu.memory_space<vmem>>, %arg16: memref<2x2048x32xf32, #tpu.memory_space<vmem>>, %arg17: memref<2x1x32xf32, #tpu.memory_space<vmem>>, %arg18: memref<2x1x32xf32, #tpu.memory_space<vmem>>, %arg19: memref<2x1x32xf32, #tpu.memory_space<vmem>>, %arg20: memref<1x32xf32, #tpu.memory_space<vmem>>, %arg21: memref<1x32xf32, #tpu.memory_space<vmem>>, %arg22: memref<1x32x96xf32, #tpu.memory_space<vmem>>, %arg23: memref<1x1x96xf32, #tpu.memory_space<vmem>>, %arg24: memref<1x32x32xf32, #tpu.memory_space<vmem>>, %arg25: memref<1x1x32xf32, #tpu.memory_space<vmem>>, %arg26: memref<1x32x96xf32, #tpu.memory_space<vmem>>, %arg27: memref<1x1x96xf32, #tpu.memory_space<vmem>>, %arg28: memref<1x32x32xf32, #tpu.memory_space<vmem>>, %arg29: memref<1x1x32xf32, #tpu.memory_space<vmem>>, %arg30: memref<1x1x32xf32, #tpu.memory_space<vmem>>, %arg31: memref<1x1x32xf32, #tpu.memory_space<vmem>>, %arg32: memref<1x1x32xf32, #tpu.memory_space<vmem>>, %arg33: memref<1x1x32xf32, #tpu.memory_space<vmem>>, %arg34: memref<1x1x32xf32, #tpu.memory_space<vmem>>, %arg35: memref<1x1x32xf32, #tpu.memory_space<vmem>>, %arg36: memref<1x32x2048xf32, #tpu.memory_space<vmem>>, %arg37: memref<1x1x2048xf32, #tpu.memory_space<vmem>>, %arg38: memref<1x2048x32xf32, #tpu.memory_space<vmem>>, %arg39: memref<1x1x32xf32, #tpu.memory_space<vmem>>, %arg40: memref<1x32xf32, #tpu.memory_space<vmem>>, %arg41: memref<1x32xf32, #tpu.memory_space<vmem>>, %arg42: memref<3x32x8xf32, #tpu.memory_space<vmem>>, %arg43: memref<1x8x8xf32, #tpu.memory_space<vmem>>, %arg44: memref<1x1x1xf32, #tpu.memory_space<vmem>>, %arg45: memref<32x8xf32, #tpu.memory_space<vmem>>, %arg46: memref<16x8xf32, #tpu.memory_space<vmem>>, %arg47: memref<16x32xf32, #tpu.memory_space<vmem>>) attributes {dimension_semantics = [#tpu.dimension_semantics<parallel>], iteration_bounds = array<i64: 2>, scalar_prefetch = 0 : i64, scratch_operands = 3 : i64, tpu.core_type = #tpu.core_type<tc>, window_params = [{transform_indices = @transform_0, window_bounds = array<i64: 1, 16, 8>}, {transform_indices = @transform_1, window_bounds = array<i64: 1, 8, 8>}, {transform_indices = @transform_2, window_bounds = array<i64: 1, 8, 8>}, {pipeline_mode = #tpu.pipeline_mode<synchronous>, transform_indices = @transform_3, window_bounds = array<i64: 3, 8, 32>}, {pipeline_mode = #tpu.pipeline_mode<synchronous>, transform_indices = @transform_4, window_bounds = array<i64: 16, 32>}, {pipeline_mode = #tpu.pipeline_mode<synchronous>, transform_indices = @transform_5, window_bounds = array<i64: 3, 8, 32>}, {pipeline_mode = #tpu.pipeline_mode<synchronous>, transform_indices = @transform_6, window_bounds = array<i64: 8, 32>}, {pipeline_mode = #tpu.pipeline_mode<synchronous>, transform_indices = @transform_7, window_bounds = array<i64: 2, 32, 96>}, {pipeline_mode = #tpu.pipeline_mode<synchronous>, transform_indices = @transform_8, window_bounds = array<i64: 2, 1, 96>}, {pipeline_mode = #tpu.pipeline_mode<synchronous>, transform_indices = @transform_9, window_bounds = array<i64: 2, 32, 32>}, {pipeline_mode = #tpu.pipeline_mode<synchronous>, transform_indices = @transform_10, window_bounds = array<i64: 2, 1, 32>}, {pipeline_mode = #tpu.pipeline_mode<synchronous>, transform_indices = @transform_11, window_bounds = array<i64: 2, 1, 32>}, {pipeline_mode = #tpu.pipeline_mode<synchronous>, transform_indices = @transform_12, window_bounds = array<i64: 2, 1, 32>}, {pipeline_mode = #tpu.pipeline_mode<synchronous>, transform_indices = @transform_13, window_bounds = array<i64: 2, 32, 2048>}, {pipeline_mode = #tpu.pipeline_mode<synchronous>, transform_indices = @transform_14, window_bounds = array<i64: 2, 1, 2048>}, {pipeline_mode = #tpu.pipeline_mode<synchronous>, transform_indices = @transform_15, window_bounds = array<i64: 2, 2048, 32>}, {pipeline_mode = #tpu.pipeline_mode<synchronous>, transform_indices = @transform_16, window_bounds = array<i64: 2, 1, 32>}, {pipeline_mode = #tpu.pipeline_mode<synchronous>, transform_indices = @transform_17, window_bounds = array<i64: 2, 1, 32>}, {pipeline_mode = #tpu.pipeline_mode<synchronous>, transform_indices = @transform_18, window_bounds = array<i64: 2, 1, 32>}, {pipeline_mode = #tpu.pipeline_mode<synchronous>, transform_indices = @transform_19, window_bounds = array<i64: 1, 32>}, {pipeline_mode = #tpu.pipeline_mode<synchronous>, transform_indices = @transform_20, window_bounds = array<i64: 1, 32>}, {pipeline_mode = #tpu.pipeline_mode<synchronous>, transform_indices = @transform_21, window_bounds = array<i64: 1, 32, 96>}, {pipeline_mode = #tpu.pipeline_mode<synchronous>, transform_indices = @transform_22, window_bounds = array<i64: 1, 1, 96>}, {pipeline_mode = #tpu.pipeline_mode<synchronous>, transform_indices = @transform_23, window_bounds = array<i64: 1, 32, 32>}, {pipeline_mode = #tpu.pipeline_mode<synchronous>, transform_indices = @transform_24, window_bounds = array<i64: 1, 1, 32>}, {pipeline_mode = #tpu.pipeline_mode<synchronous>, transform_indices = @transform_25, window_bounds = array<i64: 1, 32, 96>}, {pipeline_mode = #tpu.pipeline_mode<synchronous>, transform_indices = @transform_26, window_bounds = array<i64: 1, 1, 96>}, {pipeline_mode = #tpu.pipeline_mode<synchronous>, transform_indices = @transform_27, window_bounds = array<i64: 1, 32, 32>}, {pipeline_mode = #tpu.pipeline_mode<synchronous>, transform_indices = @transform_28, window_bounds = array<i64: 1, 1, 32>}, {pipeline_mode = #tpu.pipeline_mode<synchronous>, transform_indices = @transform_29, window_bounds = array<i64: 1, 1, 32>}, {pipeline_mode = #tpu.pipeline_mode<synchronous>, transform_indices = @transform_30, window_bounds = array<i64: 1, 1, 32>}, {pipeline_mode = #tpu.pipeline_mode<synchronous>, transform_indices = @transform_31, window_bounds = array<i64: 1, 1, 32>}, {pipeline_mode = #tpu.pipeline_mode<synchronous>, transform_indices = @transform_32, window_bounds = array<i64: 1, 1, 32>}, {pipeline_mode = #tpu.pipeline_mode<synchronous>, transform_indices = @transform_33, window_bounds = array<i64: 1, 1, 32>}, {pipeline_mode = #tpu.pipeline_mode<synchronous>, transform_indices = @transform_34, window_bounds = array<i64: 1, 1, 32>}, {pipeline_mode = #tpu.pipeline_mode<synchronous>, transform_indices = @transform_35, window_bounds = array<i64: 1, 32, 2048>}, {pipeline_mode = #tpu.pipeline_mode<synchronous>, transform_indices = @transform_36, window_bounds = array<i64: 1, 1, 2048>}, {pipeline_mode = #tpu.pipeline_mode<synchronous>, transform_indices = @transform_37, window_bounds = array<i64: 1, 2048, 32>}, {pipeline_mode = #tpu.pipeline_mode<synchronous>, transform_indices = @transform_38, window_bounds = array<i64: 1, 1, 32>}, {pipeline_mode = #tpu.pipeline_mode<synchronous>, transform_indices = @transform_39, window_bounds = array<i64: 1, 32>}, {pipeline_mode = #tpu.pipeline_mode<synchronous>, transform_indices = @transform_40, window_bounds = array<i64: 1, 32>}, {pipeline_mode = #tpu.pipeline_mode<synchronous>, transform_indices = @transform_41, window_bounds = array<i64: 3, 32, 8>}, {transform_indices = @transform_42, window_bounds = array<i64: 1, 8, 8>}, {transform_indices = @transform_43, window_bounds = array<i64: 1, 1, 1>}]} {
    %c0 = arith.constant 0 : index
    %c0_0 = arith.constant 0 : index
    %c0_1 = arith.constant 0 : index
    %0 = vector.load %arg1[%c0, %c0_0, %c0_1] : memref<1x16x8xf32, #tpu.memory_space<vmem>>, vector<1x16x8xf32>
    %1 = vector.shape_cast %0 : vector<1x16x8xf32> to vector<16x8xf32>
    %c0_2 = arith.constant 0 : index
    %c0_3 = arith.constant 0 : index
    %2 = vector.load %arg45[%c0_2, %c0_3] : memref<32x8xf32, #tpu.memory_space<vmem>>, vector<16x8xf32>
    tpu.vector_store %arg45[%c0_2, %c0_3], %1 {strides = array<i32>} : memref<32x8xf32, #tpu.memory_space<vmem>>, vector<16x8xf32>,
    %c16 = arith.constant 16 : index
    %c0_4 = arith.constant 0 : index
    %3 = vector.load %arg45[%c16, %c0_4] : memref<32x8xf32, #tpu.memory_space<vmem>>, vector<16x8xf32>
    tpu.vector_store %arg45[%c16, %c0_4], %1 {strides = array<i32>} : memref<32x8xf32, #tpu.memory_space<vmem>>, vector<16x8xf32>,
    %c0_5 = arith.constant 0 : index
    %c0_6 = arith.constant 0 : index
    %4 = vector.load %arg45[%c0_5, %c0_6] : memref<32x8xf32, #tpu.memory_space<vmem>>, vector<32x8xf32>
    %5 = vector.extract_strided_slice %4 {offsets = [15, 0], sizes = [16, 8], strides = [1, 1]} : vector<32x8xf32> to vector<16x8xf32>
    %6 = vector.extract_strided_slice %4 {offsets = [1, 0], sizes = [16, 8], strides = [1, 1]} : vector<32x8xf32> to vector<16x8xf32>
    %c0_7 = arith.constant 0 : index
    %c0_8 = arith.constant 0 : index
    %c0_9 = arith.constant 0 : index
    %7 = vector.load %arg4[%c0_7, %c0_8, %c0_9] : memref<3x8x32xf32, #tpu.memory_space<vmem>>, vector<3x8x32xf32>
    %8 = vector.extract_strided_slice %7 {offsets = [0, 0, 0], sizes = [1, 8, 32], strides = [1, 1, 1]} : vector<3x8x32xf32> to vector<1x8x32xf32>
    %9 = vector.shape_cast %8 : vector<1x8x32xf32> to vector<8x32xf32>
    %cst = arith.constant dense<0.000000e+00> : vector<16x32xf32>
    %10 = tpu.matmul %5, %9, %cst {dimension_numbers = #tpu.dot_dimension_numbers<[1], [0], [0], [1], [0, 0, 1, 1], [], []>} : vector<16x8xf32>, vector<8x32xf32>, vector<16x32xf32> -> vector<16x32xf32>
    %11 = vector.extract_strided_slice %7 {offsets = [1, 0, 0], sizes = [1, 8, 32], strides = [1, 1, 1]} : vector<3x8x32xf32> to vector<1x8x32xf32>
    %12 = vector.shape_cast %11 : vector<1x8x32xf32> to vector<8x32xf32>
    %cst_10 = arith.constant dense<0.000000e+00> : vector<16x32xf32>
    %13 = tpu.matmul %1, %12, %cst_10 {dimension_numbers = #tpu.dot_dimension_numbers<[1], [0], [0], [1], [0, 0, 1, 1], [], []>} : vector<16x8xf32>, vector<8x32xf32>, vector<16x32xf32> -> vector<16x32xf32>
    %14 = arith.addf %10, %13 : vector<16x32xf32>
    %15 = vector.extract_strided_slice %7 {offsets = [2, 0, 0], sizes = [1, 8, 32], strides = [1, 1, 1]} : vector<3x8x32xf32> to vector<1x8x32xf32>
    %16 = vector.shape_cast %15 : vector<1x8x32xf32> to vector<8x32xf32>
    %cst_11 = arith.constant dense<0.000000e+00> : vector<16x32xf32>
    %17 = tpu.matmul %6, %16, %cst_11 {dimension_numbers = #tpu.dot_dimension_numbers<[1], [0], [0], [1], [0, 0, 1, 1], [], []>} : vector<16x8xf32>, vector<8x32xf32>, vector<16x32xf32> -> vector<16x32xf32>
    %18 = arith.addf %14, %17 : vector<16x32xf32>
    %c0_12 = arith.constant 0 : index
    %c0_13 = arith.constant 0 : index
    %19 = vector.load %arg5[%c0_12, %c0_13] : memref<16x32xf32, #tpu.memory_space<vmem>>, vector<16x32xf32>
    %20 = arith.addf %18, %19 : vector<16x32xf32>
    %c0_14 = arith.constant 0 : index
    %c0_15 = arith.constant 0 : index
    %c0_16 = arith.constant 0 : index
    %21 = vector.load %arg2[%c0_14, %c0_15, %c0_16] : memref<1x8x8xf32, #tpu.memory_space<vmem>>, vector<1x8x8xf32>
    %22 = vector.shape_cast %21 : vector<1x8x8xf32> to vector<8x8xf32>
    %c0_17 = arith.constant 0 : index
    %c0_18 = arith.constant 0 : index
    %23 = vector.load %arg46[%c0_17, %c0_18] : memref<16x8xf32, #tpu.memory_space<vmem>>, vector<8x8xf32>
    tpu.vector_store %arg46[%c0_17, %c0_18], %22 {strides = array<i32>} : memref<16x8xf32, #tpu.memory_space<vmem>>, vector<8x8xf32>,
    %c8 = arith.constant 8 : index
    %c0_19 = arith.constant 0 : index
    %24 = vector.load %arg46[%c8, %c0_19] : memref<16x8xf32, #tpu.memory_space<vmem>>, vector<8x8xf32>
    tpu.vector_store %arg46[%c8, %c0_19], %22 {strides = array<i32>} : memref<16x8xf32, #tpu.memory_space<vmem>>, vector<8x8xf32>,
    %c0_20 = arith.constant 0 : index
    %c0_21 = arith.constant 0 : index
    %25 = vector.load %arg46[%c0_20, %c0_21] : memref<16x8xf32, #tpu.memory_space<vmem>>, vector<16x8xf32>
    %26 = vector.extract_strided_slice %25 {offsets = [7, 0], sizes = [8, 8], strides = [1, 1]} : vector<16x8xf32> to vector<8x8xf32>
    %27 = vector.extract_strided_slice %25 {offsets = [1, 0], sizes = [8, 8], strides = [1, 1]} : vector<16x8xf32> to vector<8x8xf32>
    %c0_22 = arith.constant 0 : index
    %c0_23 = arith.constant 0 : index
    %c0_24 = arith.constant 0 : index
    %28 = vector.load %arg6[%c0_22, %c0_23, %c0_24] : memref<3x8x32xf32, #tpu.memory_space<vmem>>, vector<3x8x32xf32>
    %29 = vector.extract_strided_slice %28 {offsets = [0, 0, 0], sizes = [1, 8, 32], strides = [1, 1, 1]} : vector<3x8x32xf32> to vector<1x8x32xf32>
    %30 = vector.shape_cast %29 : vector<1x8x32xf32> to vector<8x32xf32>
    %cst_25 = arith.constant dense<0.000000e+00> : vector<8x32xf32>
    %31 = tpu.matmul %26, %30, %cst_25 {dimension_numbers = #tpu.dot_dimension_numbers<[1], [0], [0], [1], [0, 0, 1, 1], [], []>} : vector<8x8xf32>, vector<8x32xf32>, vector<8x32xf32> -> vector<8x32xf32>
    %32 = vector.extract_strided_slice %28 {offsets = [1, 0, 0], sizes = [1, 8, 32], strides = [1, 1, 1]} : vector<3x8x32xf32> to vector<1x8x32xf32>
    %33 = vector.shape_cast %32 : vector<1x8x32xf32> to vector<8x32xf32>
    %cst_26 = arith.constant dense<0.000000e+00> : vector<8x32xf32>
    %34 = tpu.matmul %22, %33, %cst_26 {dimension_numbers = #tpu.dot_dimension_numbers<[1], [0], [0], [1], [0, 0, 1, 1], [], []>} : vector<8x8xf32>, vector<8x32xf32>, vector<8x32xf32> -> vector<8x32xf32>
    %35 = arith.addf %31, %34 : vector<8x32xf32>
    %36 = vector.extract_strided_slice %28 {offsets = [2, 0, 0], sizes = [1, 8, 32], strides = [1, 1, 1]} : vector<3x8x32xf32> to vector<1x8x32xf32>
    %37 = vector.shape_cast %36 : vector<1x8x32xf32> to vector<8x32xf32>
    %cst_27 = arith.constant dense<0.000000e+00> : vector<8x32xf32>
    %38 = tpu.matmul %27, %37, %cst_27 {dimension_numbers = #tpu.dot_dimension_numbers<[1], [0], [0], [1], [0, 0, 1, 1], [], []>} : vector<8x8xf32>, vector<8x32xf32>, vector<8x32xf32> -> vector<8x32xf32>
    %39 = arith.addf %35, %38 : vector<8x32xf32>
    %c0_28 = arith.constant 0 : index
    %c0_29 = arith.constant 0 : index
    %40 = vector.load %arg7[%c0_28, %c0_29] : memref<8x32xf32, #tpu.memory_space<vmem>>, vector<8x32xf32>
    %41 = arith.addf %39, %40 : vector<8x32xf32>
    %c0_30 = arith.constant 0 : index
    %c0_31 = arith.constant 0 : index
    %c0_32 = arith.constant 0 : index
    %42 = vector.load %arg8[%c0_30, %c0_31, %c0_32] : memref<2x32x96xf32, #tpu.memory_space<vmem>>, vector<1x32x96xf32>
    %43 = vector.shape_cast %42 : vector<1x32x96xf32> to vector<32x96xf32>
    %c0_33 = arith.constant 0 : index
    %c0_34 = arith.constant 0 : index
    %c0_35 = arith.constant 0 : index
    %44 = vector.load %arg9[%c0_33, %c0_34, %c0_35] : memref<2x1x96xf32, #tpu.memory_space<vmem>>, vector<1x1x96xf32>
    %45 = vector.shape_cast %44 : vector<1x1x96xf32> to vector<1x96xf32>
    %c0_36 = arith.constant 0 : index
    %c0_37 = arith.constant 0 : index
    %c0_38 = arith.constant 0 : index
    %46 = vector.load %arg10[%c0_36, %c0_37, %c0_38] : memref<2x32x32xf32, #tpu.memory_space<vmem>>, vector<1x32x32xf32>
    %47 = vector.shape_cast %46 : vector<1x32x32xf32> to vector<32x32xf32>
    %c0_39 = arith.constant 0 : index
    %c0_40 = arith.constant 0 : index
    %c0_41 = arith.constant 0 : index
    %48 = vector.load %arg11[%c0_39, %c0_40, %c0_41] : memref<2x1x32xf32, #tpu.memory_space<vmem>>, vector<1x1x32xf32>
    %49 = vector.shape_cast %48 : vector<1x1x32xf32> to vector<1x32xf32>
    %cst_42 = arith.constant dense<0.000000e+00> : vector<16x96xf32>
    %50 = tpu.matmul %20, %43, %cst_42 {dimension_numbers = #tpu.dot_dimension_numbers<[1], [0], [0], [1], [0, 0, 1, 1], [], []>} : vector<16x32xf32>, vector<32x96xf32>, vector<16x96xf32> -> vector<16x96xf32>
    %51 = vector.broadcast %45 : vector<1x96xf32> to vector<16x96xf32>
    %52 = arith.addf %50, %51 : vector<16x96xf32>
    %53 = vector.extract_strided_slice %52 {offsets = [0, 0], sizes = [16, 32], strides = [1, 1]} : vector<16x96xf32> to vector<16x32xf32>
    %54 = vector.extract_strided_slice %52 {offsets = [0, 32], sizes = [16, 32], strides = [1, 1]} : vector<16x96xf32> to vector<16x32xf32>
    %55 = vector.extract_strided_slice %52 {offsets = [0, 64], sizes = [16, 32], strides = [1, 1]} : vector<16x96xf32> to vector<16x32xf32>
    %56 = vector.extract_strided_slice %53 {offsets = [0, 0], sizes = [16, 8], strides = [1, 1]} : vector<16x32xf32> to vector<16x8xf32>
    %57 = vector.extract_strided_slice %54 {offsets = [0, 0], sizes = [16, 8], strides = [1, 1]} : vector<16x32xf32> to vector<16x8xf32>
    %cst_43 = arith.constant dense<0.000000e+00> : vector<16x16xf32>
    %58 = tpu.matmul %56, %57, %cst_43 {dimension_numbers = #tpu.dot_dimension_numbers<[1], [1], [0], [0], [0, 0, 1, 0], [], []>} : vector<16x8xf32>, vector<16x8xf32>, vector<16x16xf32> -> vector<16x16xf32>
    %cst_44 = arith.constant 0.353553385 : f32
    %59 = vector.broadcast %cst_44 : f32 to vector<16x16xf32>
    %60 = arith.mulf %58, %59 : vector<16x16xf32>
    %cst_45 = arith.constant dense<0xFF800000> : vector<16xf32>
    %61 = vector.multi_reduction <maximumf>, %60, %cst_45 [1] : vector<16x16xf32> to vector<16xf32>
    %62 = vector.shape_cast %61 : vector<16xf32> to vector<16x1xf32>
    %63 = vector.broadcast %62 : vector<16x1xf32> to vector<16x16xf32>
    %64 = arith.subf %60, %63 : vector<16x16xf32>
    %65 = math.exp %64 : vector<16x16xf32>
    %cst_46 = arith.constant dense<0.000000e+00> : vector<16xf32>
    %66 = vector.multi_reduction <add>, %65, %cst_46 [1] : vector<16x16xf32> to vector<16xf32>
    %67 = vector.shape_cast %66 : vector<16xf32> to vector<16x1xf32>
    %68 = vector.broadcast %67 : vector<16x1xf32> to vector<16x16xf32>
    %69 = arith.divf %65, %68 : vector<16x16xf32>
    %70 = vector.extract_strided_slice %55 {offsets = [0, 0], sizes = [16, 8], strides = [1, 1]} : vector<16x32xf32> to vector<16x8xf32>
    %cst_47 = arith.constant dense<0.000000e+00> : vector<16x8xf32>
    %71 = tpu.matmul %69, %70, %cst_47 {dimension_numbers = #tpu.dot_dimension_numbers<[1], [0], [0], [1], [0, 0, 1, 1], [], []>} : vector<16x16xf32>, vector<16x8xf32>, vector<16x8xf32> -> vector<16x8xf32>
    %72 = vector.extract_strided_slice %47 {offsets = [0, 0], sizes = [8, 32], strides = [1, 1]} : vector<32x32xf32> to vector<8x32xf32>
    %cst_48 = arith.constant dense<0.000000e+00> : vector<16x32xf32>
    %73 = tpu.matmul %71, %72, %cst_48 {dimension_numbers = #tpu.dot_dimension_numbers<[1], [0], [0], [1], [0, 0, 1, 1], [], []>} : vector<16x8xf32>, vector<8x32xf32>, vector<16x32xf32> -> vector<16x32xf32>
    %74 = vector.extract_strided_slice %53 {offsets = [0, 8], sizes = [16, 8], strides = [1, 1]} : vector<16x32xf32> to vector<16x8xf32>
    %75 = vector.extract_strided_slice %54 {offsets = [0, 8], sizes = [16, 8], strides = [1, 1]} : vector<16x32xf32> to vector<16x8xf32>
    %cst_49 = arith.constant dense<0.000000e+00> : vector<16x16xf32>
    %76 = tpu.matmul %74, %75, %cst_49 {dimension_numbers = #tpu.dot_dimension_numbers<[1], [1], [0], [0], [0, 0, 1, 0], [], []>} : vector<16x8xf32>, vector<16x8xf32>, vector<16x16xf32> -> vector<16x16xf32>
    %cst_50 = arith.constant 0.353553385 : f32
    %77 = vector.broadcast %cst_50 : f32 to vector<16x16xf32>
    %78 = arith.mulf %76, %77 : vector<16x16xf32>
    %cst_51 = arith.constant dense<0xFF800000> : vector<16xf32>
    %79 = vector.multi_reduction <maximumf>, %78, %cst_51 [1] : vector<16x16xf32> to vector<16xf32>
    %80 = vector.shape_cast %79 : vector<16xf32> to vector<16x1xf32>
    %81 = vector.broadcast %80 : vector<16x1xf32> to vector<16x16xf32>
    %82 = arith.subf %78, %81 : vector<16x16xf32>
    %83 = math.exp %82 : vector<16x16xf32>
    %cst_52 = arith.constant dense<0.000000e+00> : vector<16xf32>
    %84 = vector.multi_reduction <add>, %83, %cst_52 [1] : vector<16x16xf32> to vector<16xf32>
    %85 = vector.shape_cast %84 : vector<16xf32> to vector<16x1xf32>
    %86 = vector.broadcast %85 : vector<16x1xf32> to vector<16x16xf32>
    %87 = arith.divf %83, %86 : vector<16x16xf32>
    %88 = vector.extract_strided_slice %55 {offsets = [0, 8], sizes = [16, 8], strides = [1, 1]} : vector<16x32xf32> to vector<16x8xf32>
    %cst_53 = arith.constant dense<0.000000e+00> : vector<16x8xf32>
    %89 = tpu.matmul %87, %88, %cst_53 {dimension_numbers = #tpu.dot_dimension_numbers<[1], [0], [0], [1], [0, 0, 1, 1], [], []>} : vector<16x16xf32>, vector<16x8xf32>, vector<16x8xf32> -> vector<16x8xf32>
    %90 = vector.extract_strided_slice %47 {offsets = [8, 0], sizes = [8, 32], strides = [1, 1]} : vector<32x32xf32> to vector<8x32xf32>
    %cst_54 = arith.constant dense<0.000000e+00> : vector<16x32xf32>
    %91 = tpu.matmul %89, %90, %cst_54 {dimension_numbers = #tpu.dot_dimension_numbers<[1], [0], [0], [1], [0, 0, 1, 1], [], []>} : vector<16x8xf32>, vector<8x32xf32>, vector<16x32xf32> -> vector<16x32xf32>
    %92 = arith.addf %73, %91 : vector<16x32xf32>
    %93 = vector.extract_strided_slice %53 {offsets = [0, 16], sizes = [16, 8], strides = [1, 1]} : vector<16x32xf32> to vector<16x8xf32>
    %94 = vector.extract_strided_slice %54 {offsets = [0, 16], sizes = [16, 8], strides = [1, 1]} : vector<16x32xf32> to vector<16x8xf32>
    %cst_55 = arith.constant dense<0.000000e+00> : vector<16x16xf32>
    %95 = tpu.matmul %93, %94, %cst_55 {dimension_numbers = #tpu.dot_dimension_numbers<[1], [1], [0], [0], [0, 0, 1, 0], [], []>} : vector<16x8xf32>, vector<16x8xf32>, vector<16x16xf32> -> vector<16x16xf32>
    %cst_56 = arith.constant 0.353553385 : f32
    %96 = vector.broadcast %cst_56 : f32 to vector<16x16xf32>
    %97 = arith.mulf %95, %96 : vector<16x16xf32>
    %cst_57 = arith.constant dense<0xFF800000> : vector<16xf32>
    %98 = vector.multi_reduction <maximumf>, %97, %cst_57 [1] : vector<16x16xf32> to vector<16xf32>
    %99 = vector.shape_cast %98 : vector<16xf32> to vector<16x1xf32>
    %100 = vector.broadcast %99 : vector<16x1xf32> to vector<16x16xf32>
    %101 = arith.subf %97, %100 : vector<16x16xf32>
    %102 = math.exp %101 : vector<16x16xf32>
    %cst_58 = arith.constant dense<0.000000e+00> : vector<16xf32>
    %103 = vector.multi_reduction <add>, %102, %cst_58 [1] : vector<16x16xf32> to vector<16xf32>
    %104 = vector.shape_cast %103 : vector<16xf32> to vector<16x1xf32>
    %105 = vector.broadcast %104 : vector<16x1xf32> to vector<16x16xf32>
    %106 = arith.divf %102, %105 : vector<16x16xf32>
    %107 = vector.extract_strided_slice %55 {offsets = [0, 16], sizes = [16, 8], strides = [1, 1]} : vector<16x32xf32> to vector<16x8xf32>
    %cst_59 = arith.constant dense<0.000000e+00> : vector<16x8xf32>
    %108 = tpu.matmul %106, %107, %cst_59 {dimension_numbers = #tpu.dot_dimension_numbers<[1], [0], [0], [1], [0, 0, 1, 1], [], []>} : vector<16x16xf32>, vector<16x8xf32>, vector<16x8xf32> -> vector<16x8xf32>
    %109 = vector.extract_strided_slice %47 {offsets = [16, 0], sizes = [8, 32], strides = [1, 1]} : vector<32x32xf32> to vector<8x32xf32>
    %cst_60 = arith.constant dense<0.000000e+00> : vector<16x32xf32>
    %110 = tpu.matmul %108, %109, %cst_60 {dimension_numbers = #tpu.dot_dimension_numbers<[1], [0], [0], [1], [0, 0, 1, 1], [], []>} : vector<16x8xf32>, vector<8x32xf32>, vector<16x32xf32> -> vector<16x32xf32>
    %111 = arith.addf %92, %110 : vector<16x32xf32>
    %112 = vector.extract_strided_slice %53 {offsets = [0, 24], sizes = [16, 8], strides = [1, 1]} : vector<16x32xf32> to vector<16x8xf32>
    %113 = vector.extract_strided_slice %54 {offsets = [0, 24], sizes = [16, 8], strides = [1, 1]} : vector<16x32xf32> to vector<16x8xf32>
    %cst_61 = arith.constant dense<0.000000e+00> : vector<16x16xf32>
    %114 = tpu.matmul %112, %113, %cst_61 {dimension_numbers = #tpu.dot_dimension_numbers<[1], [1], [0], [0], [0, 0, 1, 0], [], []>} : vector<16x8xf32>, vector<16x8xf32>, vector<16x16xf32> -> vector<16x16xf32>
    %cst_62 = arith.constant 0.353553385 : f32
    %115 = vector.broadcast %cst_62 : f32 to vector<16x16xf32>
    %116 = arith.mulf %114, %115 : vector<16x16xf32>
    %cst_63 = arith.constant dense<0xFF800000> : vector<16xf32>
    %117 = vector.multi_reduction <maximumf>, %116, %cst_63 [1] : vector<16x16xf32> to vector<16xf32>
    %118 = vector.shape_cast %117 : vector<16xf32> to vector<16x1xf32>
    %119 = vector.broadcast %118 : vector<16x1xf32> to vector<16x16xf32>
    %120 = arith.subf %116, %119 : vector<16x16xf32>
    %121 = math.exp %120 : vector<16x16xf32>
    %cst_64 = arith.constant dense<0.000000e+00> : vector<16xf32>
    %122 = vector.multi_reduction <add>, %121, %cst_64 [1] : vector<16x16xf32> to vector<16xf32>
    %123 = vector.shape_cast %122 : vector<16xf32> to vector<16x1xf32>
    %124 = vector.broadcast %123 : vector<16x1xf32> to vector<16x16xf32>
    %125 = arith.divf %121, %124 : vector<16x16xf32>
    %126 = vector.extract_strided_slice %55 {offsets = [0, 24], sizes = [16, 8], strides = [1, 1]} : vector<16x32xf32> to vector<16x8xf32>
    %cst_65 = arith.constant dense<0.000000e+00> : vector<16x8xf32>
    %127 = tpu.matmul %125, %126, %cst_65 {dimension_numbers = #tpu.dot_dimension_numbers<[1], [0], [0], [1], [0, 0, 1, 1], [], []>} : vector<16x16xf32>, vector<16x8xf32>, vector<16x8xf32> -> vector<16x8xf32>
    %128 = vector.extract_strided_slice %47 {offsets = [24, 0], sizes = [8, 32], strides = [1, 1]} : vector<32x32xf32> to vector<8x32xf32>
    %cst_66 = arith.constant dense<0.000000e+00> : vector<16x32xf32>
    %129 = tpu.matmul %127, %128, %cst_66 {dimension_numbers = #tpu.dot_dimension_numbers<[1], [0], [0], [1], [0, 0, 1, 1], [], []>} : vector<16x8xf32>, vector<8x32xf32>, vector<16x32xf32> -> vector<16x32xf32>
    %130 = arith.addf %111, %129 : vector<16x32xf32>
    %131 = vector.broadcast %49 : vector<1x32xf32> to vector<16x32xf32>
    %132 = arith.addf %130, %131 : vector<16x32xf32>
    %133 = arith.addf %20, %132 : vector<16x32xf32>
    %c0_67 = arith.constant 0 : index
    %c0_68 = arith.constant 0 : index
    %c0_69 = arith.constant 0 : index
    %134 = vector.load %arg12[%c0_67, %c0_68, %c0_69] : memref<2x1x32xf32, #tpu.memory_space<vmem>>, vector<1x1x32xf32>
    %135 = vector.shape_cast %134 : vector<1x1x32xf32> to vector<1x32xf32>
    %c0_70 = arith.constant 0 : index
    %c0_71 = arith.constant 0 : index
    %c0_72 = arith.constant 0 : index
    %136 = vector.load %arg13[%c0_70, %c0_71, %c0_72] : memref<2x1x32xf32, #tpu.memory_space<vmem>>, vector<1x1x32xf32>
    %137 = vector.shape_cast %136 : vector<1x1x32xf32> to vector<1x32xf32>
    %cst_73 = arith.constant dense<0.000000e+00> : vector<16xf32>
    %138 = vector.multi_reduction <add>, %133, %cst_73 [1] : vector<16x32xf32> to vector<16xf32>
    %139 = vector.shape_cast %138 : vector<16xf32> to vector<16x1xf32>
    %cst_74 = arith.constant 3.200000e+01 : f32
    %140 = vector.broadcast %cst_74 : f32 to vector<16x1xf32>
    %141 = arith.divf %139, %140 : vector<16x1xf32>
    %142 = vector.broadcast %141 : vector<16x1xf32> to vector<16x32xf32>
    %143 = arith.subf %133, %142 : vector<16x32xf32>
    %144 = arith.mulf %143, %143 : vector<16x32xf32>
    %cst_75 = arith.constant dense<0.000000e+00> : vector<16xf32>
    %145 = vector.multi_reduction <add>, %144, %cst_75 [1] : vector<16x32xf32> to vector<16xf32>
    %146 = vector.shape_cast %145 : vector<16xf32> to vector<16x1xf32>
    %cst_76 = arith.constant 3.200000e+01 : f32
    %147 = vector.broadcast %cst_76 : f32 to vector<16x1xf32>
    %148 = arith.divf %146, %147 : vector<16x1xf32>
    %cst_77 = arith.constant 9.99999974E-6 : f32
    %149 = vector.broadcast %cst_77 : f32 to vector<16x1xf32>
    %150 = arith.addf %148, %149 : vector<16x1xf32>
    %151 = math.rsqrt %150 : vector<16x1xf32>
    %152 = vector.broadcast %151 : vector<16x1xf32> to vector<16x32xf32>
    %153 = arith.mulf %143, %152 : vector<16x32xf32>
    %154 = vector.broadcast %135 : vector<1x32xf32> to vector<16x32xf32>
    %155 = arith.mulf %153, %154 : vector<16x32xf32>
    %156 = vector.broadcast %137 : vector<1x32xf32> to vector<16x32xf32>
    %157 = arith.addf %155, %156 : vector<16x32xf32>
    %c0_78 = arith.constant 0 : index
    %c0_79 = arith.constant 0 : index
    %c0_80 = arith.constant 0 : index
    %158 = vector.load %arg14[%c0_78, %c0_79, %c0_80] : memref<2x32x2048xf32, #tpu.memory_space<vmem>>, vector<1x32x2048xf32>
    %159 = vector.shape_cast %158 : vector<1x32x2048xf32> to vector<32x2048xf32>
    %c0_81 = arith.constant 0 : index
    %c0_82 = arith.constant 0 : index
    %c0_83 = arith.constant 0 : index
    %160 = vector.load %arg15[%c0_81, %c0_82, %c0_83] : memref<2x1x2048xf32, #tpu.memory_space<vmem>>, vector<1x1x2048xf32>
    %161 = vector.shape_cast %160 : vector<1x1x2048xf32> to vector<1x2048xf32>
    %c0_84 = arith.constant 0 : index
    %c0_85 = arith.constant 0 : index
    %c0_86 = arith.constant 0 : index
    %162 = vector.load %arg16[%c0_84, %c0_85, %c0_86] : memref<2x2048x32xf32, #tpu.memory_space<vmem>>, vector<1x2048x32xf32>
    %163 = vector.shape_cast %162 : vector<1x2048x32xf32> to vector<2048x32xf32>
    %c0_87 = arith.constant 0 : index
    %c0_88 = arith.constant 0 : index
    %c0_89 = arith.constant 0 : index
    %164 = vector.load %arg17[%c0_87, %c0_88, %c0_89] : memref<2x1x32xf32, #tpu.memory_space<vmem>>, vector<1x1x32xf32>
    %165 = vector.shape_cast %164 : vector<1x1x32xf32> to vector<1x32xf32>
    %cst_90 = arith.constant dense<0.000000e+00> : vector<16x2048xf32>
    %166 = tpu.matmul %157, %159, %cst_90 {dimension_numbers = #tpu.dot_dimension_numbers<[1], [0], [0], [1], [0, 0, 1, 1], [], []>} : vector<16x32xf32>, vector<32x2048xf32>, vector<16x2048xf32> -> vector<16x2048xf32>
    %167 = vector.broadcast %161 : vector<1x2048xf32> to vector<16x2048xf32>
    %168 = arith.addf %166, %167 : vector<16x2048xf32>
    %cst_91 = arith.constant 0.000000e+00 : f32
    %169 = vector.broadcast %cst_91 : f32 to vector<16x2048xf32>
    %170 = arith.maximumf %168, %169 : vector<16x2048xf32>
    %cst_92 = arith.constant dense<0.000000e+00> : vector<16x32xf32>
    %171 = tpu.matmul %170, %163, %cst_92 {dimension_numbers = #tpu.dot_dimension_numbers<[1], [0], [0], [1], [0, 0, 1, 1], [], []>} : vector<16x2048xf32>, vector<2048x32xf32>, vector<16x32xf32> -> vector<16x32xf32>
    %172 = vector.broadcast %165 : vector<1x32xf32> to vector<16x32xf32>
    %173 = arith.addf %171, %172 : vector<16x32xf32>
    %174 = arith.addf %157, %173 : vector<16x32xf32>
    %c0_93 = arith.constant 0 : index
    %c0_94 = arith.constant 0 : index
    %c0_95 = arith.constant 0 : index
    %175 = vector.load %arg18[%c0_93, %c0_94, %c0_95] : memref<2x1x32xf32, #tpu.memory_space<vmem>>, vector<1x1x32xf32>
    %176 = vector.shape_cast %175 : vector<1x1x32xf32> to vector<1x32xf32>
    %c0_96 = arith.constant 0 : index
    %c0_97 = arith.constant 0 : index
    %c0_98 = arith.constant 0 : index
    %177 = vector.load %arg19[%c0_96, %c0_97, %c0_98] : memref<2x1x32xf32, #tpu.memory_space<vmem>>, vector<1x1x32xf32>
    %178 = vector.shape_cast %177 : vector<1x1x32xf32> to vector<1x32xf32>
    %cst_99 = arith.constant dense<0.000000e+00> : vector<16xf32>
    %179 = vector.multi_reduction <add>, %174, %cst_99 [1] : vector<16x32xf32> to vector<16xf32>
    %180 = vector.shape_cast %179 : vector<16xf32> to vector<16x1xf32>
    %cst_100 = arith.constant 3.200000e+01 : f32
    %181 = vector.broadcast %cst_100 : f32 to vector<16x1xf32>
    %182 = arith.divf %180, %181 : vector<16x1xf32>
    %183 = vector.broadcast %182 : vector<16x1xf32> to vector<16x32xf32>
    %184 = arith.subf %174, %183 : vector<16x32xf32>
    %185 = arith.mulf %184, %184 : vector<16x32xf32>
    %cst_101 = arith.constant dense<0.000000e+00> : vector<16xf32>
    %186 = vector.multi_reduction <add>, %185, %cst_101 [1] : vector<16x32xf32> to vector<16xf32>
    %187 = vector.shape_cast %186 : vector<16xf32> to vector<16x1xf32>
    %cst_102 = arith.constant 3.200000e+01 : f32
    %188 = vector.broadcast %cst_102 : f32 to vector<16x1xf32>
    %189 = arith.divf %187, %188 : vector<16x1xf32>
    %cst_103 = arith.constant 9.99999974E-6 : f32
    %190 = vector.broadcast %cst_103 : f32 to vector<16x1xf32>
    %191 = arith.addf %189, %190 : vector<16x1xf32>
    %192 = math.rsqrt %191 : vector<16x1xf32>
    %193 = vector.broadcast %192 : vector<16x1xf32> to vector<16x32xf32>
    %194 = arith.mulf %184, %193 : vector<16x32xf32>
    %195 = vector.broadcast %176 : vector<1x32xf32> to vector<16x32xf32>
    %196 = arith.mulf %194, %195 : vector<16x32xf32>
    %197 = vector.broadcast %178 : vector<1x32xf32> to vector<16x32xf32>
    %198 = arith.addf %196, %197 : vector<16x32xf32>
    %c1 = arith.constant 1 : index
    %c0_104 = arith.constant 0 : index
    %c0_105 = arith.constant 0 : index
    %199 = vector.load %arg8[%c1, %c0_104, %c0_105] : memref<2x32x96xf32, #tpu.memory_space<vmem>>, vector<1x32x96xf32>
    %200 = vector.shape_cast %199 : vector<1x32x96xf32> to vector<32x96xf32>
    %c1_106 = arith.constant 1 : index
    %c0_107 = arith.constant 0 : index
    %c0_108 = arith.constant 0 : index
    %201 = vector.load %arg9[%c1_106, %c0_107, %c0_108] : memref<2x1x96xf32, #tpu.memory_space<vmem>>, vector<1x1x96xf32>
    %202 = vector.shape_cast %201 : vector<1x1x96xf32> to vector<1x96xf32>
    %c1_109 = arith.constant 1 : index
    %c0_110 = arith.constant 0 : index
    %c0_111 = arith.constant 0 : index
    %203 = vector.load %arg10[%c1_109, %c0_110, %c0_111] : memref<2x32x32xf32, #tpu.memory_space<vmem>>, vector<1x32x32xf32>
    %204 = vector.shape_cast %203 : vector<1x32x32xf32> to vector<32x32xf32>
    %c1_112 = arith.constant 1 : index
    %c0_113 = arith.constant 0 : index
    %c0_114 = arith.constant 0 : index
    %205 = vector.load %arg11[%c1_112, %c0_113, %c0_114] : memref<2x1x32xf32, #tpu.memory_space<vmem>>, vector<1x1x32xf32>
    %206 = vector.shape_cast %205 : vector<1x1x32xf32> to vector<1x32xf32>
    %cst_115 = arith.constant dense<0.000000e+00> : vector<16x96xf32>
    %207 = tpu.matmul %198, %200, %cst_115 {dimension_numbers = #tpu.dot_dimension_numbers<[1], [0], [0], [1], [0, 0, 1, 1], [], []>} : vector<16x32xf32>, vector<32x96xf32>, vector<16x96xf32> -> vector<16x96xf32>
    %208 = vector.broadcast %202 : vector<1x96xf32> to vector<16x96xf32>
    %209 = arith.addf %207, %208 : vector<16x96xf32>
    %210 = vector.extract_strided_slice %209 {offsets = [0, 0], sizes = [16, 32], strides = [1, 1]} : vector<16x96xf32> to vector<16x32xf32>
    %211 = vector.extract_strided_slice %209 {offsets = [0, 32], sizes = [16, 32], strides = [1, 1]} : vector<16x96xf32> to vector<16x32xf32>
    %212 = vector.extract_strided_slice %209 {offsets = [0, 64], sizes = [16, 32], strides = [1, 1]} : vector<16x96xf32> to vector<16x32xf32>
    %213 = vector.extract_strided_slice %210 {offsets = [0, 0], sizes = [16, 8], strides = [1, 1]} : vector<16x32xf32> to vector<16x8xf32>
    %214 = vector.extract_strided_slice %211 {offsets = [0, 0], sizes = [16, 8], strides = [1, 1]} : vector<16x32xf32> to vector<16x8xf32>
    %cst_116 = arith.constant dense<0.000000e+00> : vector<16x16xf32>
    %215 = tpu.matmul %213, %214, %cst_116 {dimension_numbers = #tpu.dot_dimension_numbers<[1], [1], [0], [0], [0, 0, 1, 0], [], []>} : vector<16x8xf32>, vector<16x8xf32>, vector<16x16xf32> -> vector<16x16xf32>
    %cst_117 = arith.constant 0.353553385 : f32
    %216 = vector.broadcast %cst_117 : f32 to vector<16x16xf32>
    %217 = arith.mulf %215, %216 : vector<16x16xf32>
    %cst_118 = arith.constant dense<0xFF800000> : vector<16xf32>
    %218 = vector.multi_reduction <maximumf>, %217, %cst_118 [1] : vector<16x16xf32> to vector<16xf32>
    %219 = vector.shape_cast %218 : vector<16xf32> to vector<16x1xf32>
    %220 = vector.broadcast %219 : vector<16x1xf32> to vector<16x16xf32>
    %221 = arith.subf %217, %220 : vector<16x16xf32>
    %222 = math.exp %221 : vector<16x16xf32>
    %cst_119 = arith.constant dense<0.000000e+00> : vector<16xf32>
    %223 = vector.multi_reduction <add>, %222, %cst_119 [1] : vector<16x16xf32> to vector<16xf32>
    %224 = vector.shape_cast %223 : vector<16xf32> to vector<16x1xf32>
    %225 = vector.broadcast %224 : vector<16x1xf32> to vector<16x16xf32>
    %226 = arith.divf %222, %225 : vector<16x16xf32>
    %227 = vector.extract_strided_slice %212 {offsets = [0, 0], sizes = [16, 8], strides = [1, 1]} : vector<16x32xf32> to vector<16x8xf32>
    %cst_120 = arith.constant dense<0.000000e+00> : vector<16x8xf32>
    %228 = tpu.matmul %226, %227, %cst_120 {dimension_numbers = #tpu.dot_dimension_numbers<[1], [0], [0], [1], [0, 0, 1, 1], [], []>} : vector<16x16xf32>, vector<16x8xf32>, vector<16x8xf32> -> vector<16x8xf32>
    %229 = vector.extract_strided_slice %204 {offsets = [0, 0], sizes = [8, 32], strides = [1, 1]} : vector<32x32xf32> to vector<8x32xf32>
    %cst_121 = arith.constant dense<0.000000e+00> : vector<16x32xf32>
    %230 = tpu.matmul %228, %229, %cst_121 {dimension_numbers = #tpu.dot_dimension_numbers<[1], [0], [0], [1], [0, 0, 1, 1], [], []>} : vector<16x8xf32>, vector<8x32xf32>, vector<16x32xf32> -> vector<16x32xf32>
    %231 = vector.extract_strided_slice %210 {offsets = [0, 8], sizes = [16, 8], strides = [1, 1]} : vector<16x32xf32> to vector<16x8xf32>
    %232 = vector.extract_strided_slice %211 {offsets = [0, 8], sizes = [16, 8], strides = [1, 1]} : vector<16x32xf32> to vector<16x8xf32>
    %cst_122 = arith.constant dense<0.000000e+00> : vector<16x16xf32>
    %233 = tpu.matmul %231, %232, %cst_122 {dimension_numbers = #tpu.dot_dimension_numbers<[1], [1], [0], [0], [0, 0, 1, 0], [], []>} : vector<16x8xf32>, vector<16x8xf32>, vector<16x16xf32> -> vector<16x16xf32>
    %cst_123 = arith.constant 0.353553385 : f32
    %234 = vector.broadcast %cst_123 : f32 to vector<16x16xf32>
    %235 = arith.mulf %233, %234 : vector<16x16xf32>
    %cst_124 = arith.constant dense<0xFF800000> : vector<16xf32>
    %236 = vector.multi_reduction <maximumf>, %235, %cst_124 [1] : vector<16x16xf32> to vector<16xf32>
    %237 = vector.shape_cast %236 : vector<16xf32> to vector<16x1xf32>
    %238 = vector.broadcast %237 : vector<16x1xf32> to vector<16x16xf32>
    %239 = arith.subf %235, %238 : vector<16x16xf32>
    %240 = math.exp %239 : vector<16x16xf32>
    %cst_125 = arith.constant dense<0.000000e+00> : vector<16xf32>
    %241 = vector.multi_reduction <add>, %240, %cst_125 [1] : vector<16x16xf32> to vector<16xf32>
    %242 = vector.shape_cast %241 : vector<16xf32> to vector<16x1xf32>
    %243 = vector.broadcast %242 : vector<16x1xf32> to vector<16x16xf32>
    %244 = arith.divf %240, %243 : vector<16x16xf32>
    %245 = vector.extract_strided_slice %212 {offsets = [0, 8], sizes = [16, 8], strides = [1, 1]} : vector<16x32xf32> to vector<16x8xf32>
    %cst_126 = arith.constant dense<0.000000e+00> : vector<16x8xf32>
    %246 = tpu.matmul %244, %245, %cst_126 {dimension_numbers = #tpu.dot_dimension_numbers<[1], [0], [0], [1], [0, 0, 1, 1], [], []>} : vector<16x16xf32>, vector<16x8xf32>, vector<16x8xf32> -> vector<16x8xf32>
    %247 = vector.extract_strided_slice %204 {offsets = [8, 0], sizes = [8, 32], strides = [1, 1]} : vector<32x32xf32> to vector<8x32xf32>
    %cst_127 = arith.constant dense<0.000000e+00> : vector<16x32xf32>
    %248 = tpu.matmul %246, %247, %cst_127 {dimension_numbers = #tpu.dot_dimension_numbers<[1], [0], [0], [1], [0, 0, 1, 1], [], []>} : vector<16x8xf32>, vector<8x32xf32>, vector<16x32xf32> -> vector<16x32xf32>
    %249 = arith.addf %230, %248 : vector<16x32xf32>
    %250 = vector.extract_strided_slice %210 {offsets = [0, 16], sizes = [16, 8], strides = [1, 1]} : vector<16x32xf32> to vector<16x8xf32>
    %251 = vector.extract_strided_slice %211 {offsets = [0, 16], sizes = [16, 8], strides = [1, 1]} : vector<16x32xf32> to vector<16x8xf32>
    %cst_128 = arith.constant dense<0.000000e+00> : vector<16x16xf32>
    %252 = tpu.matmul %250, %251, %cst_128 {dimension_numbers = #tpu.dot_dimension_numbers<[1], [1], [0], [0], [0, 0, 1, 0], [], []>} : vector<16x8xf32>, vector<16x8xf32>, vector<16x16xf32> -> vector<16x16xf32>
    %cst_129 = arith.constant 0.353553385 : f32
    %253 = vector.broadcast %cst_129 : f32 to vector<16x16xf32>
    %254 = arith.mulf %252, %253 : vector<16x16xf32>
    %cst_130 = arith.constant dense<0xFF800000> : vector<16xf32>
    %255 = vector.multi_reduction <maximumf>, %254, %cst_130 [1] : vector<16x16xf32> to vector<16xf32>
    %256 = vector.shape_cast %255 : vector<16xf32> to vector<16x1xf32>
    %257 = vector.broadcast %256 : vector<16x1xf32> to vector<16x16xf32>
    %258 = arith.subf %254, %257 : vector<16x16xf32>
    %259 = math.exp %258 : vector<16x16xf32>
    %cst_131 = arith.constant dense<0.000000e+00> : vector<16xf32>
    %260 = vector.multi_reduction <add>, %259, %cst_131 [1] : vector<16x16xf32> to vector<16xf32>
    %261 = vector.shape_cast %260 : vector<16xf32> to vector<16x1xf32>
    %262 = vector.broadcast %261 : vector<16x1xf32> to vector<16x16xf32>
    %263 = arith.divf %259, %262 : vector<16x16xf32>
    %264 = vector.extract_strided_slice %212 {offsets = [0, 16], sizes = [16, 8], strides = [1, 1]} : vector<16x32xf32> to vector<16x8xf32>
    %cst_132 = arith.constant dense<0.000000e+00> : vector<16x8xf32>
    %265 = tpu.matmul %263, %264, %cst_132 {dimension_numbers = #tpu.dot_dimension_numbers<[1], [0], [0], [1], [0, 0, 1, 1], [], []>} : vector<16x16xf32>, vector<16x8xf32>, vector<16x8xf32> -> vector<16x8xf32>
    %266 = vector.extract_strided_slice %204 {offsets = [16, 0], sizes = [8, 32], strides = [1, 1]} : vector<32x32xf32> to vector<8x32xf32>
    %cst_133 = arith.constant dense<0.000000e+00> : vector<16x32xf32>
    %267 = tpu.matmul %265, %266, %cst_133 {dimension_numbers = #tpu.dot_dimension_numbers<[1], [0], [0], [1], [0, 0, 1, 1], [], []>} : vector<16x8xf32>, vector<8x32xf32>, vector<16x32xf32> -> vector<16x32xf32>
    %268 = arith.addf %249, %267 : vector<16x32xf32>
    %269 = vector.extract_strided_slice %210 {offsets = [0, 24], sizes = [16, 8], strides = [1, 1]} : vector<16x32xf32> to vector<16x8xf32>
    %270 = vector.extract_strided_slice %211 {offsets = [0, 24], sizes = [16, 8], strides = [1, 1]} : vector<16x32xf32> to vector<16x8xf32>
    %cst_134 = arith.constant dense<0.000000e+00> : vector<16x16xf32>
    %271 = tpu.matmul %269, %270, %cst_134 {dimension_numbers = #tpu.dot_dimension_numbers<[1], [1], [0], [0], [0, 0, 1, 0], [], []>} : vector<16x8xf32>, vector<16x8xf32>, vector<16x16xf32> -> vector<16x16xf32>
    %cst_135 = arith.constant 0.353553385 : f32
    %272 = vector.broadcast %cst_135 : f32 to vector<16x16xf32>
    %273 = arith.mulf %271, %272 : vector<16x16xf32>
    %cst_136 = arith.constant dense<0xFF800000> : vector<16xf32>
    %274 = vector.multi_reduction <maximumf>, %273, %cst_136 [1] : vector<16x16xf32> to vector<16xf32>
    %275 = vector.shape_cast %274 : vector<16xf32> to vector<16x1xf32>
    %276 = vector.broadcast %275 : vector<16x1xf32> to vector<16x16xf32>
    %277 = arith.subf %273, %276 : vector<16x16xf32>
    %278 = math.exp %277 : vector<16x16xf32>
    %cst_137 = arith.constant dense<0.000000e+00> : vector<16xf32>
    %279 = vector.multi_reduction <add>, %278, %cst_137 [1] : vector<16x16xf32> to vector<16xf32>
    %280 = vector.shape_cast %279 : vector<16xf32> to vector<16x1xf32>
    %281 = vector.broadcast %280 : vector<16x1xf32> to vector<16x16xf32>
    %282 = arith.divf %278, %281 : vector<16x16xf32>
    %283 = vector.extract_strided_slice %212 {offsets = [0, 24], sizes = [16, 8], strides = [1, 1]} : vector<16x32xf32> to vector<16x8xf32>
    %cst_138 = arith.constant dense<0.000000e+00> : vector<16x8xf32>
    %284 = tpu.matmul %282, %283, %cst_138 {dimension_numbers = #tpu.dot_dimension_numbers<[1], [0], [0], [1], [0, 0, 1, 1], [], []>} : vector<16x16xf32>, vector<16x8xf32>, vector<16x8xf32> -> vector<16x8xf32>
    %285 = vector.extract_strided_slice %204 {offsets = [24, 0], sizes = [8, 32], strides = [1, 1]} : vector<32x32xf32> to vector<8x32xf32>
    %cst_139 = arith.constant dense<0.000000e+00> : vector<16x32xf32>
    %286 = tpu.matmul %284, %285, %cst_139 {dimension_numbers = #tpu.dot_dimension_numbers<[1], [0], [0], [1], [0, 0, 1, 1], [], []>} : vector<16x8xf32>, vector<8x32xf32>, vector<16x32xf32> -> vector<16x32xf32>
    %287 = arith.addf %268, %286 : vector<16x32xf32>
    %288 = vector.broadcast %206 : vector<1x32xf32> to vector<16x32xf32>
    %289 = arith.addf %287, %288 : vector<16x32xf32>
    %290 = arith.addf %198, %289 : vector<16x32xf32>
    %c1_140 = arith.constant 1 : index
    %c0_141 = arith.constant 0 : index
    %c0_142 = arith.constant 0 : index
    %291 = vector.load %arg12[%c1_140, %c0_141, %c0_142] : memref<2x1x32xf32, #tpu.memory_space<vmem>>, vector<1x1x32xf32>
    %292 = vector.shape_cast %291 : vector<1x1x32xf32> to vector<1x32xf32>
    %c1_143 = arith.constant 1 : index
    %c0_144 = arith.constant 0 : index
    %c0_145 = arith.constant 0 : index
    %293 = vector.load %arg13[%c1_143, %c0_144, %c0_145] : memref<2x1x32xf32, #tpu.memory_space<vmem>>, vector<1x1x32xf32>
    %294 = vector.shape_cast %293 : vector<1x1x32xf32> to vector<1x32xf32>
    %cst_146 = arith.constant dense<0.000000e+00> : vector<16xf32>
    %295 = vector.multi_reduction <add>, %290, %cst_146 [1] : vector<16x32xf32> to vector<16xf32>
    %296 = vector.shape_cast %295 : vector<16xf32> to vector<16x1xf32>
    %cst_147 = arith.constant 3.200000e+01 : f32
    %297 = vector.broadcast %cst_147 : f32 to vector<16x1xf32>
    %298 = arith.divf %296, %297 : vector<16x1xf32>
    %299 = vector.broadcast %298 : vector<16x1xf32> to vector<16x32xf32>
    %300 = arith.subf %290, %299 : vector<16x32xf32>
    %301 = arith.mulf %300, %300 : vector<16x32xf32>
    %cst_148 = arith.constant dense<0.000000e+00> : vector<16xf32>
    %302 = vector.multi_reduction <add>, %301, %cst_148 [1] : vector<16x32xf32> to vector<16xf32>
    %303 = vector.shape_cast %302 : vector<16xf32> to vector<16x1xf32>
    %cst_149 = arith.constant 3.200000e+01 : f32
    %304 = vector.broadcast %cst_149 : f32 to vector<16x1xf32>
    %305 = arith.divf %303, %304 : vector<16x1xf32>
    %cst_150 = arith.constant 9.99999974E-6 : f32
    %306 = vector.broadcast %cst_150 : f32 to vector<16x1xf32>
    %307 = arith.addf %305, %306 : vector<16x1xf32>
    %308 = math.rsqrt %307 : vector<16x1xf32>
    %309 = vector.broadcast %308 : vector<16x1xf32> to vector<16x32xf32>
    %310 = arith.mulf %300, %309 : vector<16x32xf32>
    %311 = vector.broadcast %292 : vector<1x32xf32> to vector<16x32xf32>
    %312 = arith.mulf %310, %311 : vector<16x32xf32>
    %313 = vector.broadcast %294 : vector<1x32xf32> to vector<16x32xf32>
    %314 = arith.addf %312, %313 : vector<16x32xf32>
    %c1_151 = arith.constant 1 : index
    %c0_152 = arith.constant 0 : index
    %c0_153 = arith.constant 0 : index
    %315 = vector.load %arg14[%c1_151, %c0_152, %c0_153] : memref<2x32x2048xf32, #tpu.memory_space<vmem>>, vector<1x32x2048xf32>
    %316 = vector.shape_cast %315 : vector<1x32x2048xf32> to vector<32x2048xf32>
    %c1_154 = arith.constant 1 : index
    %c0_155 = arith.constant 0 : index
    %c0_156 = arith.constant 0 : index
    %317 = vector.load %arg15[%c1_154, %c0_155, %c0_156] : memref<2x1x2048xf32, #tpu.memory_space<vmem>>, vector<1x1x2048xf32>
    %318 = vector.shape_cast %317 : vector<1x1x2048xf32> to vector<1x2048xf32>
    %c1_157 = arith.constant 1 : index
    %c0_158 = arith.constant 0 : index
    %c0_159 = arith.constant 0 : index
    %319 = vector.load %arg16[%c1_157, %c0_158, %c0_159] : memref<2x2048x32xf32, #tpu.memory_space<vmem>>, vector<1x2048x32xf32>
    %320 = vector.shape_cast %319 : vector<1x2048x32xf32> to vector<2048x32xf32>
    %c1_160 = arith.constant 1 : index
    %c0_161 = arith.constant 0 : index
    %c0_162 = arith.constant 0 : index
    %321 = vector.load %arg17[%c1_160, %c0_161, %c0_162] : memref<2x1x32xf32, #tpu.memory_space<vmem>>, vector<1x1x32xf32>
    %322 = vector.shape_cast %321 : vector<1x1x32xf32> to vector<1x32xf32>
    %cst_163 = arith.constant dense<0.000000e+00> : vector<16x2048xf32>
    %323 = tpu.matmul %314, %316, %cst_163 {dimension_numbers = #tpu.dot_dimension_numbers<[1], [0], [0], [1], [0, 0, 1, 1], [], []>} : vector<16x32xf32>, vector<32x2048xf32>, vector<16x2048xf32> -> vector<16x2048xf32>
    %324 = vector.broadcast %318 : vector<1x2048xf32> to vector<16x2048xf32>
    %325 = arith.addf %323, %324 : vector<16x2048xf32>
    %cst_164 = arith.constant 0.000000e+00 : f32
    %326 = vector.broadcast %cst_164 : f32 to vector<16x2048xf32>
    %327 = arith.maximumf %325, %326 : vector<16x2048xf32>
    %cst_165 = arith.constant dense<0.000000e+00> : vector<16x32xf32>
    %328 = tpu.matmul %327, %320, %cst_165 {dimension_numbers = #tpu.dot_dimension_numbers<[1], [0], [0], [1], [0, 0, 1, 1], [], []>} : vector<16x2048xf32>, vector<2048x32xf32>, vector<16x32xf32> -> vector<16x32xf32>
    %329 = vector.broadcast %322 : vector<1x32xf32> to vector<16x32xf32>
    %330 = arith.addf %328, %329 : vector<16x32xf32>
    %331 = arith.addf %314, %330 : vector<16x32xf32>
    %c1_166 = arith.constant 1 : index
    %c0_167 = arith.constant 0 : index
    %c0_168 = arith.constant 0 : index
    %332 = vector.load %arg18[%c1_166, %c0_167, %c0_168] : memref<2x1x32xf32, #tpu.memory_space<vmem>>, vector<1x1x32xf32>
    %333 = vector.shape_cast %332 : vector<1x1x32xf32> to vector<1x32xf32>
    %c1_169 = arith.constant 1 : index
    %c0_170 = arith.constant 0 : index
    %c0_171 = arith.constant 0 : index
    %334 = vector.load %arg19[%c1_169, %c0_170, %c0_171] : memref<2x1x32xf32, #tpu.memory_space<vmem>>, vector<1x1x32xf32>
    %335 = vector.shape_cast %334 : vector<1x1x32xf32> to vector<1x32xf32>
    %cst_172 = arith.constant dense<0.000000e+00> : vector<16xf32>
    %336 = vector.multi_reduction <add>, %331, %cst_172 [1] : vector<16x32xf32> to vector<16xf32>
    %337 = vector.shape_cast %336 : vector<16xf32> to vector<16x1xf32>
    %cst_173 = arith.constant 3.200000e+01 : f32
    %338 = vector.broadcast %cst_173 : f32 to vector<16x1xf32>
    %339 = arith.divf %337, %338 : vector<16x1xf32>
    %340 = vector.broadcast %339 : vector<16x1xf32> to vector<16x32xf32>
    %341 = arith.subf %331, %340 : vector<16x32xf32>
    %342 = arith.mulf %341, %341 : vector<16x32xf32>
    %cst_174 = arith.constant dense<0.000000e+00> : vector<16xf32>
    %343 = vector.multi_reduction <add>, %342, %cst_174 [1] : vector<16x32xf32> to vector<16xf32>
    %344 = vector.shape_cast %343 : vector<16xf32> to vector<16x1xf32>
    %cst_175 = arith.constant 3.200000e+01 : f32
    %345 = vector.broadcast %cst_175 : f32 to vector<16x1xf32>
    %346 = arith.divf %344, %345 : vector<16x1xf32>
    %cst_176 = arith.constant 9.99999974E-6 : f32
    %347 = vector.broadcast %cst_176 : f32 to vector<16x1xf32>
    %348 = arith.addf %346, %347 : vector<16x1xf32>
    %349 = math.rsqrt %348 : vector<16x1xf32>
    %350 = vector.broadcast %349 : vector<16x1xf32> to vector<16x32xf32>
    %351 = arith.mulf %341, %350 : vector<16x32xf32>
    %352 = vector.broadcast %333 : vector<1x32xf32> to vector<16x32xf32>
    %353 = arith.mulf %351, %352 : vector<16x32xf32>
    %354 = vector.broadcast %335 : vector<1x32xf32> to vector<16x32xf32>
    %355 = arith.addf %353, %354 : vector<16x32xf32>
    %c0_177 = arith.constant 0 : index
    %c0_178 = arith.constant 0 : index
    %356 = vector.load %arg20[%c0_177, %c0_178] : memref<1x32xf32, #tpu.memory_space<vmem>>, vector<1x32xf32>
    %c0_179 = arith.constant 0 : index
    %c0_180 = arith.constant 0 : index
    %357 = vector.load %arg21[%c0_179, %c0_180] : memref<1x32xf32, #tpu.memory_space<vmem>>, vector<1x32xf32>
    %cst_181 = arith.constant dense<0.000000e+00> : vector<16xf32>
    %358 = vector.multi_reduction <add>, %355, %cst_181 [1] : vector<16x32xf32> to vector<16xf32>
    %359 = vector.shape_cast %358 : vector<16xf32> to vector<16x1xf32>
    %cst_182 = arith.constant 3.200000e+01 : f32
    %360 = vector.broadcast %cst_182 : f32 to vector<16x1xf32>
    %361 = arith.divf %359, %360 : vector<16x1xf32>
    %362 = vector.broadcast %361 : vector<16x1xf32> to vector<16x32xf32>
    %363 = arith.subf %355, %362 : vector<16x32xf32>
    %364 = arith.mulf %363, %363 : vector<16x32xf32>
    %cst_183 = arith.constant dense<0.000000e+00> : vector<16xf32>
    %365 = vector.multi_reduction <add>, %364, %cst_183 [1] : vector<16x32xf32> to vector<16xf32>
    %366 = vector.shape_cast %365 : vector<16xf32> to vector<16x1xf32>
    %cst_184 = arith.constant 3.200000e+01 : f32
    %367 = vector.broadcast %cst_184 : f32 to vector<16x1xf32>
    %368 = arith.divf %366, %367 : vector<16x1xf32>
    %cst_185 = arith.constant 9.99999974E-6 : f32
    %369 = vector.broadcast %cst_185 : f32 to vector<16x1xf32>
    %370 = arith.addf %368, %369 : vector<16x1xf32>
    %371 = math.rsqrt %370 : vector<16x1xf32>
    %372 = vector.broadcast %371 : vector<16x1xf32> to vector<16x32xf32>
    %373 = arith.mulf %363, %372 : vector<16x32xf32>
    %374 = vector.broadcast %356 : vector<1x32xf32> to vector<16x32xf32>
    %375 = arith.mulf %373, %374 : vector<16x32xf32>
    %376 = vector.broadcast %357 : vector<1x32xf32> to vector<16x32xf32>
    %377 = arith.addf %375, %376 : vector<16x32xf32>
    %c0_186 = arith.constant 0 : index
    %c0_187 = arith.constant 0 : index
    %c0_188 = arith.constant 0 : index
    %378 = vector.load %arg22[%c0_186, %c0_187, %c0_188] : memref<1x32x96xf32, #tpu.memory_space<vmem>>, vector<1x32x96xf32>
    %379 = vector.shape_cast %378 : vector<1x32x96xf32> to vector<32x96xf32>
    %c0_189 = arith.constant 0 : index
    %c0_190 = arith.constant 0 : index
    %c0_191 = arith.constant 0 : index
    %380 = vector.load %arg23[%c0_189, %c0_190, %c0_191] : memref<1x1x96xf32, #tpu.memory_space<vmem>>, vector<1x1x96xf32>
    %381 = vector.shape_cast %380 : vector<1x1x96xf32> to vector<1x96xf32>
    %c0_192 = arith.constant 0 : index
    %c0_193 = arith.constant 0 : index
    %c0_194 = arith.constant 0 : index
    %382 = vector.load %arg24[%c0_192, %c0_193, %c0_194] : memref<1x32x32xf32, #tpu.memory_space<vmem>>, vector<1x32x32xf32>
    %383 = vector.shape_cast %382 : vector<1x32x32xf32> to vector<32x32xf32>
    %c0_195 = arith.constant 0 : index
    %c0_196 = arith.constant 0 : index
    %c0_197 = arith.constant 0 : index
    %384 = vector.load %arg25[%c0_195, %c0_196, %c0_197] : memref<1x1x32xf32, #tpu.memory_space<vmem>>, vector<1x1x32xf32>
    %385 = vector.shape_cast %384 : vector<1x1x32xf32> to vector<1x32xf32>
    %cst_198 = arith.constant dense<0.000000e+00> : vector<8x96xf32>
    %386 = tpu.matmul %41, %379, %cst_198 {dimension_numbers = #tpu.dot_dimension_numbers<[1], [0], [0], [1], [0, 0, 1, 1], [], []>} : vector<8x32xf32>, vector<32x96xf32>, vector<8x96xf32> -> vector<8x96xf32>
    %387 = vector.broadcast %381 : vector<1x96xf32> to vector<8x96xf32>
    %388 = arith.addf %386, %387 : vector<8x96xf32>
    %389 = vector.extract_strided_slice %388 {offsets = [0, 0], sizes = [8, 32], strides = [1, 1]} : vector<8x96xf32> to vector<8x32xf32>
    %390 = vector.extract_strided_slice %388 {offsets = [0, 32], sizes = [8, 32], strides = [1, 1]} : vector<8x96xf32> to vector<8x32xf32>
    %391 = vector.extract_strided_slice %388 {offsets = [0, 64], sizes = [8, 32], strides = [1, 1]} : vector<8x96xf32> to vector<8x32xf32>
    %392 = vector.extract_strided_slice %389 {offsets = [0, 0], sizes = [8, 8], strides = [1, 1]} : vector<8x32xf32> to vector<8x8xf32>
    %393 = vector.extract_strided_slice %390 {offsets = [0, 0], sizes = [8, 8], strides = [1, 1]} : vector<8x32xf32> to vector<8x8xf32>
    %cst_199 = arith.constant dense<0.000000e+00> : vector<8x8xf32>
    %394 = tpu.matmul %392, %393, %cst_199 {dimension_numbers = #tpu.dot_dimension_numbers<[1], [1], [0], [0], [0, 0, 1, 0], [], []>} : vector<8x8xf32>, vector<8x8xf32>, vector<8x8xf32> -> vector<8x8xf32>
    %cst_200 = arith.constant 0.353553385 : f32
    %395 = vector.broadcast %cst_200 : f32 to vector<8x8xf32>
    %396 = arith.mulf %394, %395 : vector<8x8xf32>
    %cst_201 = arith.constant dense<0xFF800000> : vector<8xf32>
    %397 = vector.multi_reduction <maximumf>, %396, %cst_201 [1] : vector<8x8xf32> to vector<8xf32>
    %398 = vector.shape_cast %397 : vector<8xf32> to vector<8x1xf32>
    %399 = vector.broadcast %398 : vector<8x1xf32> to vector<8x8xf32>
    %400 = arith.subf %396, %399 : vector<8x8xf32>
    %401 = math.exp %400 : vector<8x8xf32>
    %cst_202 = arith.constant dense<0.000000e+00> : vector<8xf32>
    %402 = vector.multi_reduction <add>, %401, %cst_202 [1] : vector<8x8xf32> to vector<8xf32>
    %403 = vector.shape_cast %402 : vector<8xf32> to vector<8x1xf32>
    %404 = vector.broadcast %403 : vector<8x1xf32> to vector<8x8xf32>
    %405 = arith.divf %401, %404 : vector<8x8xf32>
    %406 = vector.extract_strided_slice %391 {offsets = [0, 0], sizes = [8, 8], strides = [1, 1]} : vector<8x32xf32> to vector<8x8xf32>
    %cst_203 = arith.constant dense<0.000000e+00> : vector<8x8xf32>
    %407 = tpu.matmul %405, %406, %cst_203 {dimension_numbers = #tpu.dot_dimension_numbers<[1], [0], [0], [1], [0, 0, 1, 1], [], []>} : vector<8x8xf32>, vector<8x8xf32>, vector<8x8xf32> -> vector<8x8xf32>
    %408 = vector.extract_strided_slice %383 {offsets = [0, 0], sizes = [8, 32], strides = [1, 1]} : vector<32x32xf32> to vector<8x32xf32>
    %cst_204 = arith.constant dense<0.000000e+00> : vector<8x32xf32>
    %409 = tpu.matmul %407, %408, %cst_204 {dimension_numbers = #tpu.dot_dimension_numbers<[1], [0], [0], [1], [0, 0, 1, 1], [], []>} : vector<8x8xf32>, vector<8x32xf32>, vector<8x32xf32> -> vector<8x32xf32>
    %410 = vector.extract_strided_slice %389 {offsets = [0, 8], sizes = [8, 8], strides = [1, 1]} : vector<8x32xf32> to vector<8x8xf32>
    %411 = vector.extract_strided_slice %390 {offsets = [0, 8], sizes = [8, 8], strides = [1, 1]} : vector<8x32xf32> to vector<8x8xf32>
    %cst_205 = arith.constant dense<0.000000e+00> : vector<8x8xf32>
    %412 = tpu.matmul %410, %411, %cst_205 {dimension_numbers = #tpu.dot_dimension_numbers<[1], [1], [0], [0], [0, 0, 1, 0], [], []>} : vector<8x8xf32>, vector<8x8xf32>, vector<8x8xf32> -> vector<8x8xf32>
    %cst_206 = arith.constant 0.353553385 : f32
    %413 = vector.broadcast %cst_206 : f32 to vector<8x8xf32>
    %414 = arith.mulf %412, %413 : vector<8x8xf32>
    %cst_207 = arith.constant dense<0xFF800000> : vector<8xf32>
    %415 = vector.multi_reduction <maximumf>, %414, %cst_207 [1] : vector<8x8xf32> to vector<8xf32>
    %416 = vector.shape_cast %415 : vector<8xf32> to vector<8x1xf32>
    %417 = vector.broadcast %416 : vector<8x1xf32> to vector<8x8xf32>
    %418 = arith.subf %414, %417 : vector<8x8xf32>
    %419 = math.exp %418 : vector<8x8xf32>
    %cst_208 = arith.constant dense<0.000000e+00> : vector<8xf32>
    %420 = vector.multi_reduction <add>, %419, %cst_208 [1] : vector<8x8xf32> to vector<8xf32>
    %421 = vector.shape_cast %420 : vector<8xf32> to vector<8x1xf32>
    %422 = vector.broadcast %421 : vector<8x1xf32> to vector<8x8xf32>
    %423 = arith.divf %419, %422 : vector<8x8xf32>
    %424 = vector.extract_strided_slice %391 {offsets = [0, 8], sizes = [8, 8], strides = [1, 1]} : vector<8x32xf32> to vector<8x8xf32>
    %cst_209 = arith.constant dense<0.000000e+00> : vector<8x8xf32>
    %425 = tpu.matmul %423, %424, %cst_209 {dimension_numbers = #tpu.dot_dimension_numbers<[1], [0], [0], [1], [0, 0, 1, 1], [], []>} : vector<8x8xf32>, vector<8x8xf32>, vector<8x8xf32> -> vector<8x8xf32>
    %426 = vector.extract_strided_slice %383 {offsets = [8, 0], sizes = [8, 32], strides = [1, 1]} : vector<32x32xf32> to vector<8x32xf32>
    %cst_210 = arith.constant dense<0.000000e+00> : vector<8x32xf32>
    %427 = tpu.matmul %425, %426, %cst_210 {dimension_numbers = #tpu.dot_dimension_numbers<[1], [0], [0], [1], [0, 0, 1, 1], [], []>} : vector<8x8xf32>, vector<8x32xf32>, vector<8x32xf32> -> vector<8x32xf32>
    %428 = arith.addf %409, %427 : vector<8x32xf32>
    %429 = vector.extract_strided_slice %389 {offsets = [0, 16], sizes = [8, 8], strides = [1, 1]} : vector<8x32xf32> to vector<8x8xf32>
    %430 = vector.extract_strided_slice %390 {offsets = [0, 16], sizes = [8, 8], strides = [1, 1]} : vector<8x32xf32> to vector<8x8xf32>
    %cst_211 = arith.constant dense<0.000000e+00> : vector<8x8xf32>
    %431 = tpu.matmul %429, %430, %cst_211 {dimension_numbers = #tpu.dot_dimension_numbers<[1], [1], [0], [0], [0, 0, 1, 0], [], []>} : vector<8x8xf32>, vector<8x8xf32>, vector<8x8xf32> -> vector<8x8xf32>
    %cst_212 = arith.constant 0.353553385 : f32
    %432 = vector.broadcast %cst_212 : f32 to vector<8x8xf32>
    %433 = arith.mulf %431, %432 : vector<8x8xf32>
    %cst_213 = arith.constant dense<0xFF800000> : vector<8xf32>
    %434 = vector.multi_reduction <maximumf>, %433, %cst_213 [1] : vector<8x8xf32> to vector<8xf32>
    %435 = vector.shape_cast %434 : vector<8xf32> to vector<8x1xf32>
    %436 = vector.broadcast %435 : vector<8x1xf32> to vector<8x8xf32>
    %437 = arith.subf %433, %436 : vector<8x8xf32>
    %438 = math.exp %437 : vector<8x8xf32>
    %cst_214 = arith.constant dense<0.000000e+00> : vector<8xf32>
    %439 = vector.multi_reduction <add>, %438, %cst_214 [1] : vector<8x8xf32> to vector<8xf32>
    %440 = vector.shape_cast %439 : vector<8xf32> to vector<8x1xf32>
    %441 = vector.broadcast %440 : vector<8x1xf32> to vector<8x8xf32>
    %442 = arith.divf %438, %441 : vector<8x8xf32>
    %443 = vector.extract_strided_slice %391 {offsets = [0, 16], sizes = [8, 8], strides = [1, 1]} : vector<8x32xf32> to vector<8x8xf32>
    %cst_215 = arith.constant dense<0.000000e+00> : vector<8x8xf32>
    %444 = tpu.matmul %442, %443, %cst_215 {dimension_numbers = #tpu.dot_dimension_numbers<[1], [0], [0], [1], [0, 0, 1, 1], [], []>} : vector<8x8xf32>, vector<8x8xf32>, vector<8x8xf32> -> vector<8x8xf32>
    %445 = vector.extract_strided_slice %383 {offsets = [16, 0], sizes = [8, 32], strides = [1, 1]} : vector<32x32xf32> to vector<8x32xf32>
    %cst_216 = arith.constant dense<0.000000e+00> : vector<8x32xf32>
    %446 = tpu.matmul %444, %445, %cst_216 {dimension_numbers = #tpu.dot_dimension_numbers<[1], [0], [0], [1], [0, 0, 1, 1], [], []>} : vector<8x8xf32>, vector<8x32xf32>, vector<8x32xf32> -> vector<8x32xf32>
    %447 = arith.addf %428, %446 : vector<8x32xf32>
    %448 = vector.extract_strided_slice %389 {offsets = [0, 24], sizes = [8, 8], strides = [1, 1]} : vector<8x32xf32> to vector<8x8xf32>
    %449 = vector.extract_strided_slice %390 {offsets = [0, 24], sizes = [8, 8], strides = [1, 1]} : vector<8x32xf32> to vector<8x8xf32>
    %cst_217 = arith.constant dense<0.000000e+00> : vector<8x8xf32>
    %450 = tpu.matmul %448, %449, %cst_217 {dimension_numbers = #tpu.dot_dimension_numbers<[1], [1], [0], [0], [0, 0, 1, 0], [], []>} : vector<8x8xf32>, vector<8x8xf32>, vector<8x8xf32> -> vector<8x8xf32>
    %cst_218 = arith.constant 0.353553385 : f32
    %451 = vector.broadcast %cst_218 : f32 to vector<8x8xf32>
    %452 = arith.mulf %450, %451 : vector<8x8xf32>
    %cst_219 = arith.constant dense<0xFF800000> : vector<8xf32>
    %453 = vector.multi_reduction <maximumf>, %452, %cst_219 [1] : vector<8x8xf32> to vector<8xf32>
    %454 = vector.shape_cast %453 : vector<8xf32> to vector<8x1xf32>
    %455 = vector.broadcast %454 : vector<8x1xf32> to vector<8x8xf32>
    %456 = arith.subf %452, %455 : vector<8x8xf32>
    %457 = math.exp %456 : vector<8x8xf32>
    %cst_220 = arith.constant dense<0.000000e+00> : vector<8xf32>
    %458 = vector.multi_reduction <add>, %457, %cst_220 [1] : vector<8x8xf32> to vector<8xf32>
    %459 = vector.shape_cast %458 : vector<8xf32> to vector<8x1xf32>
    %460 = vector.broadcast %459 : vector<8x1xf32> to vector<8x8xf32>
    %461 = arith.divf %457, %460 : vector<8x8xf32>
    %462 = vector.extract_strided_slice %391 {offsets = [0, 24], sizes = [8, 8], strides = [1, 1]} : vector<8x32xf32> to vector<8x8xf32>
    %cst_221 = arith.constant dense<0.000000e+00> : vector<8x8xf32>
    %463 = tpu.matmul %461, %462, %cst_221 {dimension_numbers = #tpu.dot_dimension_numbers<[1], [0], [0], [1], [0, 0, 1, 1], [], []>} : vector<8x8xf32>, vector<8x8xf32>, vector<8x8xf32> -> vector<8x8xf32>
    %464 = vector.extract_strided_slice %383 {offsets = [24, 0], sizes = [8, 32], strides = [1, 1]} : vector<32x32xf32> to vector<8x32xf32>
    %cst_222 = arith.constant dense<0.000000e+00> : vector<8x32xf32>
    %465 = tpu.matmul %463, %464, %cst_222 {dimension_numbers = #tpu.dot_dimension_numbers<[1], [0], [0], [1], [0, 0, 1, 1], [], []>} : vector<8x8xf32>, vector<8x32xf32>, vector<8x32xf32> -> vector<8x32xf32>
    %466 = arith.addf %447, %465 : vector<8x32xf32>
    %467 = vector.broadcast %385 : vector<1x32xf32> to vector<8x32xf32>
    %468 = arith.addf %466, %467 : vector<8x32xf32>
    %469 = arith.addf %41, %468 : vector<8x32xf32>
    %c0_223 = arith.constant 0 : index
    %c0_224 = arith.constant 0 : index
    %c0_225 = arith.constant 0 : index
    %470 = vector.load %arg30[%c0_223, %c0_224, %c0_225] : memref<1x1x32xf32, #tpu.memory_space<vmem>>, vector<1x1x32xf32>
    %471 = vector.shape_cast %470 : vector<1x1x32xf32> to vector<1x32xf32>
    %c0_226 = arith.constant 0 : index
    %c0_227 = arith.constant 0 : index
    %c0_228 = arith.constant 0 : index
    %472 = vector.load %arg31[%c0_226, %c0_227, %c0_228] : memref<1x1x32xf32, #tpu.memory_space<vmem>>, vector<1x1x32xf32>
    %473 = vector.shape_cast %472 : vector<1x1x32xf32> to vector<1x32xf32>
    %cst_229 = arith.constant dense<0.000000e+00> : vector<8xf32>
    %474 = vector.multi_reduction <add>, %469, %cst_229 [1] : vector<8x32xf32> to vector<8xf32>
    %475 = vector.shape_cast %474 : vector<8xf32> to vector<8x1xf32>
    %cst_230 = arith.constant 3.200000e+01 : f32
    %476 = vector.broadcast %cst_230 : f32 to vector<8x1xf32>
    %477 = arith.divf %475, %476 : vector<8x1xf32>
    %478 = vector.broadcast %477 : vector<8x1xf32> to vector<8x32xf32>
    %479 = arith.subf %469, %478 : vector<8x32xf32>
    %480 = arith.mulf %479, %479 : vector<8x32xf32>
    %cst_231 = arith.constant dense<0.000000e+00> : vector<8xf32>
    %481 = vector.multi_reduction <add>, %480, %cst_231 [1] : vector<8x32xf32> to vector<8xf32>
    %482 = vector.shape_cast %481 : vector<8xf32> to vector<8x1xf32>
    %cst_232 = arith.constant 3.200000e+01 : f32
    %483 = vector.broadcast %cst_232 : f32 to vector<8x1xf32>
    %484 = arith.divf %482, %483 : vector<8x1xf32>
    %cst_233 = arith.constant 9.99999974E-6 : f32
    %485 = vector.broadcast %cst_233 : f32 to vector<8x1xf32>
    %486 = arith.addf %484, %485 : vector<8x1xf32>
    %487 = math.rsqrt %486 : vector<8x1xf32>
    %488 = vector.broadcast %487 : vector<8x1xf32> to vector<8x32xf32>
    %489 = arith.mulf %479, %488 : vector<8x32xf32>
    %490 = vector.broadcast %471 : vector<1x32xf32> to vector<8x32xf32>
    %491 = arith.mulf %489, %490 : vector<8x32xf32>
    %492 = vector.broadcast %473 : vector<1x32xf32> to vector<8x32xf32>
    %493 = arith.addf %491, %492 : vector<8x32xf32>
    %c0_234 = arith.constant 0 : index
    %c0_235 = arith.constant 0 : index
    %c0_236 = arith.constant 0 : index
    %494 = vector.load %arg26[%c0_234, %c0_235, %c0_236] : memref<1x32x96xf32, #tpu.memory_space<vmem>>, vector<1x32x96xf32>
    %495 = vector.shape_cast %494 : vector<1x32x96xf32> to vector<32x96xf32>
    %c0_237 = arith.constant 0 : index
    %c0_238 = arith.constant 0 : index
    %c0_239 = arith.constant 0 : index
    %496 = vector.load %arg27[%c0_237, %c0_238, %c0_239] : memref<1x1x96xf32, #tpu.memory_space<vmem>>, vector<1x1x96xf32>
    %497 = vector.shape_cast %496 : vector<1x1x96xf32> to vector<1x96xf32>
    %c0_240 = arith.constant 0 : index
    %c0_241 = arith.constant 0 : index
    %c0_242 = arith.constant 0 : index
    %498 = vector.load %arg28[%c0_240, %c0_241, %c0_242] : memref<1x32x32xf32, #tpu.memory_space<vmem>>, vector<1x32x32xf32>
    %499 = vector.shape_cast %498 : vector<1x32x32xf32> to vector<32x32xf32>
    %c0_243 = arith.constant 0 : index
    %c0_244 = arith.constant 0 : index
    %c0_245 = arith.constant 0 : index
    %500 = vector.load %arg29[%c0_243, %c0_244, %c0_245] : memref<1x1x32xf32, #tpu.memory_space<vmem>>, vector<1x1x32xf32>
    %501 = vector.shape_cast %500 : vector<1x1x32xf32> to vector<1x32xf32>
    %502 = vector.extract_strided_slice %495 {offsets = [0, 0], sizes = [32, 32], strides = [1, 1]} : vector<32x96xf32> to vector<32x32xf32>
    %cst_246 = arith.constant dense<0.000000e+00> : vector<8x32xf32>
    %503 = tpu.matmul %493, %502, %cst_246 {dimension_numbers = #tpu.dot_dimension_numbers<[1], [0], [0], [1], [0, 0, 1, 1], [], []>} : vector<8x32xf32>, vector<32x32xf32>, vector<8x32xf32> -> vector<8x32xf32>
    %504 = vector.extract_strided_slice %497 {offsets = [0, 0], sizes = [1, 32], strides = [1, 1]} : vector<1x96xf32> to vector<1x32xf32>
    %505 = vector.broadcast %504 : vector<1x32xf32> to vector<8x32xf32>
    %506 = arith.addf %503, %505 : vector<8x32xf32>
    %507 = vector.extract_strided_slice %495 {offsets = [0, 32], sizes = [32, 64], strides = [1, 1]} : vector<32x96xf32> to vector<32x64xf32>
    %cst_247 = arith.constant dense<0.000000e+00> : vector<16x64xf32>
    %508 = tpu.matmul %377, %507, %cst_247 {dimension_numbers = #tpu.dot_dimension_numbers<[1], [0], [0], [1], [0, 0, 1, 1], [], []>} : vector<16x32xf32>, vector<32x64xf32>, vector<16x64xf32> -> vector<16x64xf32>
    %509 = vector.extract_strided_slice %497 {offsets = [0, 32], sizes = [1, 64], strides = [1, 1]} : vector<1x96xf32> to vector<1x64xf32>
    %510 = vector.broadcast %509 : vector<1x64xf32> to vector<16x64xf32>
    %511 = arith.addf %508, %510 : vector<16x64xf32>
    %512 = vector.extract_strided_slice %511 {offsets = [0, 0], sizes = [16, 32], strides = [1, 1]} : vector<16x64xf32> to vector<16x32xf32>
    %513 = vector.extract_strided_slice %511 {offsets = [0, 32], sizes = [16, 32], strides = [1, 1]} : vector<16x64xf32> to vector<16x32xf32>
    %514 = vector.extract_strided_slice %506 {offsets = [0, 0], sizes = [8, 8], strides = [1, 1]} : vector<8x32xf32> to vector<8x8xf32>
    %515 = vector.extract_strided_slice %512 {offsets = [0, 0], sizes = [16, 8], strides = [1, 1]} : vector<16x32xf32> to vector<16x8xf32>
    %cst_248 = arith.constant dense<0.000000e+00> : vector<8x16xf32>
    %516 = tpu.matmul %514, %515, %cst_248 {dimension_numbers = #tpu.dot_dimension_numbers<[1], [1], [0], [0], [0, 0, 1, 0], [], []>} : vector<8x8xf32>, vector<16x8xf32>, vector<8x16xf32> -> vector<8x16xf32>
    %cst_249 = arith.constant 0.353553385 : f32
    %517 = vector.broadcast %cst_249 : f32 to vector<8x16xf32>
    %518 = arith.mulf %516, %517 : vector<8x16xf32>
    %cst_250 = arith.constant dense<0xFF800000> : vector<8xf32>
    %519 = vector.multi_reduction <maximumf>, %518, %cst_250 [1] : vector<8x16xf32> to vector<8xf32>
    %520 = vector.shape_cast %519 : vector<8xf32> to vector<8x1xf32>
    %521 = vector.broadcast %520 : vector<8x1xf32> to vector<8x16xf32>
    %522 = arith.subf %518, %521 : vector<8x16xf32>
    %523 = math.exp %522 : vector<8x16xf32>
    %cst_251 = arith.constant dense<0.000000e+00> : vector<8xf32>
    %524 = vector.multi_reduction <add>, %523, %cst_251 [1] : vector<8x16xf32> to vector<8xf32>
    %525 = vector.shape_cast %524 : vector<8xf32> to vector<8x1xf32>
    %526 = vector.broadcast %525 : vector<8x1xf32> to vector<8x16xf32>
    %527 = arith.divf %523, %526 : vector<8x16xf32>
    %528 = vector.extract_strided_slice %513 {offsets = [0, 0], sizes = [16, 8], strides = [1, 1]} : vector<16x32xf32> to vector<16x8xf32>
    %cst_252 = arith.constant dense<0.000000e+00> : vector<8x8xf32>
    %529 = tpu.matmul %527, %528, %cst_252 {dimension_numbers = #tpu.dot_dimension_numbers<[1], [0], [0], [1], [0, 0, 1, 1], [], []>} : vector<8x16xf32>, vector<16x8xf32>, vector<8x8xf32> -> vector<8x8xf32>
    %530 = vector.extract_strided_slice %499 {offsets = [0, 0], sizes = [8, 32], strides = [1, 1]} : vector<32x32xf32> to vector<8x32xf32>
    %cst_253 = arith.constant dense<0.000000e+00> : vector<8x32xf32>
    %531 = tpu.matmul %529, %530, %cst_253 {dimension_numbers = #tpu.dot_dimension_numbers<[1], [0], [0], [1], [0, 0, 1, 1], [], []>} : vector<8x8xf32>, vector<8x32xf32>, vector<8x32xf32> -> vector<8x32xf32>
    %532 = vector.extract_strided_slice %506 {offsets = [0, 8], sizes = [8, 8], strides = [1, 1]} : vector<8x32xf32> to vector<8x8xf32>
    %533 = vector.extract_strided_slice %512 {offsets = [0, 8], sizes = [16, 8], strides = [1, 1]} : vector<16x32xf32> to vector<16x8xf32>
    %cst_254 = arith.constant dense<0.000000e+00> : vector<8x16xf32>
    %534 = tpu.matmul %532, %533, %cst_254 {dimension_numbers = #tpu.dot_dimension_numbers<[1], [1], [0], [0], [0, 0, 1, 0], [], []>} : vector<8x8xf32>, vector<16x8xf32>, vector<8x16xf32> -> vector<8x16xf32>
    %cst_255 = arith.constant 0.353553385 : f32
    %535 = vector.broadcast %cst_255 : f32 to vector<8x16xf32>
    %536 = arith.mulf %534, %535 : vector<8x16xf32>
    %cst_256 = arith.constant dense<0xFF800000> : vector<8xf32>
    %537 = vector.multi_reduction <maximumf>, %536, %cst_256 [1] : vector<8x16xf32> to vector<8xf32>
    %538 = vector.shape_cast %537 : vector<8xf32> to vector<8x1xf32>
    %539 = vector.broadcast %538 : vector<8x1xf32> to vector<8x16xf32>
    %540 = arith.subf %536, %539 : vector<8x16xf32>
    %541 = math.exp %540 : vector<8x16xf32>
    %cst_257 = arith.constant dense<0.000000e+00> : vector<8xf32>
    %542 = vector.multi_reduction <add>, %541, %cst_257 [1] : vector<8x16xf32> to vector<8xf32>
    %543 = vector.shape_cast %542 : vector<8xf32> to vector<8x1xf32>
    %544 = vector.broadcast %543 : vector<8x1xf32> to vector<8x16xf32>
    %545 = arith.divf %541, %544 : vector<8x16xf32>
    %546 = vector.extract_strided_slice %513 {offsets = [0, 8], sizes = [16, 8], strides = [1, 1]} : vector<16x32xf32> to vector<16x8xf32>
    %cst_258 = arith.constant dense<0.000000e+00> : vector<8x8xf32>
    %547 = tpu.matmul %545, %546, %cst_258 {dimension_numbers = #tpu.dot_dimension_numbers<[1], [0], [0], [1], [0, 0, 1, 1], [], []>} : vector<8x16xf32>, vector<16x8xf32>, vector<8x8xf32> -> vector<8x8xf32>
    %548 = vector.extract_strided_slice %499 {offsets = [8, 0], sizes = [8, 32], strides = [1, 1]} : vector<32x32xf32> to vector<8x32xf32>
    %cst_259 = arith.constant dense<0.000000e+00> : vector<8x32xf32>
    %549 = tpu.matmul %547, %548, %cst_259 {dimension_numbers = #tpu.dot_dimension_numbers<[1], [0], [0], [1], [0, 0, 1, 1], [], []>} : vector<8x8xf32>, vector<8x32xf32>, vector<8x32xf32> -> vector<8x32xf32>
    %550 = arith.addf %531, %549 : vector<8x32xf32>
    %551 = vector.extract_strided_slice %506 {offsets = [0, 16], sizes = [8, 8], strides = [1, 1]} : vector<8x32xf32> to vector<8x8xf32>
    %552 = vector.extract_strided_slice %512 {offsets = [0, 16], sizes = [16, 8], strides = [1, 1]} : vector<16x32xf32> to vector<16x8xf32>
    %cst_260 = arith.constant dense<0.000000e+00> : vector<8x16xf32>
    %553 = tpu.matmul %551, %552, %cst_260 {dimension_numbers = #tpu.dot_dimension_numbers<[1], [1], [0], [0], [0, 0, 1, 0], [], []>} : vector<8x8xf32>, vector<16x8xf32>, vector<8x16xf32> -> vector<8x16xf32>
    %cst_261 = arith.constant 0.353553385 : f32
    %554 = vector.broadcast %cst_261 : f32 to vector<8x16xf32>
    %555 = arith.mulf %553, %554 : vector<8x16xf32>
    %cst_262 = arith.constant dense<0xFF800000> : vector<8xf32>
    %556 = vector.multi_reduction <maximumf>, %555, %cst_262 [1] : vector<8x16xf32> to vector<8xf32>
    %557 = vector.shape_cast %556 : vector<8xf32> to vector<8x1xf32>
    %558 = vector.broadcast %557 : vector<8x1xf32> to vector<8x16xf32>
    %559 = arith.subf %555, %558 : vector<8x16xf32>
    %560 = math.exp %559 : vector<8x16xf32>
    %cst_263 = arith.constant dense<0.000000e+00> : vector<8xf32>
    %561 = vector.multi_reduction <add>, %560, %cst_263 [1] : vector<8x16xf32> to vector<8xf32>
    %562 = vector.shape_cast %561 : vector<8xf32> to vector<8x1xf32>
    %563 = vector.broadcast %562 : vector<8x1xf32> to vector<8x16xf32>
    %564 = arith.divf %560, %563 : vector<8x16xf32>
    %565 = vector.extract_strided_slice %513 {offsets = [0, 16], sizes = [16, 8], strides = [1, 1]} : vector<16x32xf32> to vector<16x8xf32>
    %cst_264 = arith.constant dense<0.000000e+00> : vector<8x8xf32>
    %566 = tpu.matmul %564, %565, %cst_264 {dimension_numbers = #tpu.dot_dimension_numbers<[1], [0], [0], [1], [0, 0, 1, 1], [], []>} : vector<8x16xf32>, vector<16x8xf32>, vector<8x8xf32> -> vector<8x8xf32>
    %567 = vector.extract_strided_slice %499 {offsets = [16, 0], sizes = [8, 32], strides = [1, 1]} : vector<32x32xf32> to vector<8x32xf32>
    %cst_265 = arith.constant dense<0.000000e+00> : vector<8x32xf32>
    %568 = tpu.matmul %566, %567, %cst_265 {dimension_numbers = #tpu.dot_dimension_numbers<[1], [0], [0], [1], [0, 0, 1, 1], [], []>} : vector<8x8xf32>, vector<8x32xf32>, vector<8x32xf32> -> vector<8x32xf32>
    %569 = arith.addf %550, %568 : vector<8x32xf32>
    %570 = vector.extract_strided_slice %506 {offsets = [0, 24], sizes = [8, 8], strides = [1, 1]} : vector<8x32xf32> to vector<8x8xf32>
    %571 = vector.extract_strided_slice %512 {offsets = [0, 24], sizes = [16, 8], strides = [1, 1]} : vector<16x32xf32> to vector<16x8xf32>
    %cst_266 = arith.constant dense<0.000000e+00> : vector<8x16xf32>
    %572 = tpu.matmul %570, %571, %cst_266 {dimension_numbers = #tpu.dot_dimension_numbers<[1], [1], [0], [0], [0, 0, 1, 0], [], []>} : vector<8x8xf32>, vector<16x8xf32>, vector<8x16xf32> -> vector<8x16xf32>
    %cst_267 = arith.constant 0.353553385 : f32
    %573 = vector.broadcast %cst_267 : f32 to vector<8x16xf32>
    %574 = arith.mulf %572, %573 : vector<8x16xf32>
    %cst_268 = arith.constant dense<0xFF800000> : vector<8xf32>
    %575 = vector.multi_reduction <maximumf>, %574, %cst_268 [1] : vector<8x16xf32> to vector<8xf32>
    %576 = vector.shape_cast %575 : vector<8xf32> to vector<8x1xf32>
    %577 = vector.broadcast %576 : vector<8x1xf32> to vector<8x16xf32>
    %578 = arith.subf %574, %577 : vector<8x16xf32>
    %579 = math.exp %578 : vector<8x16xf32>
    %cst_269 = arith.constant dense<0.000000e+00> : vector<8xf32>
    %580 = vector.multi_reduction <add>, %579, %cst_269 [1] : vector<8x16xf32> to vector<8xf32>
    %581 = vector.shape_cast %580 : vector<8xf32> to vector<8x1xf32>
    %582 = vector.broadcast %581 : vector<8x1xf32> to vector<8x16xf32>
    %583 = arith.divf %579, %582 : vector<8x16xf32>
    %584 = vector.extract_strided_slice %513 {offsets = [0, 24], sizes = [16, 8], strides = [1, 1]} : vector<16x32xf32> to vector<16x8xf32>
    %cst_270 = arith.constant dense<0.000000e+00> : vector<8x8xf32>
    %585 = tpu.matmul %583, %584, %cst_270 {dimension_numbers = #tpu.dot_dimension_numbers<[1], [0], [0], [1], [0, 0, 1, 1], [], []>} : vector<8x16xf32>, vector<16x8xf32>, vector<8x8xf32> -> vector<8x8xf32>
    %586 = vector.extract_strided_slice %499 {offsets = [24, 0], sizes = [8, 32], strides = [1, 1]} : vector<32x32xf32> to vector<8x32xf32>
    %cst_271 = arith.constant dense<0.000000e+00> : vector<8x32xf32>
    %587 = tpu.matmul %585, %586, %cst_271 {dimension_numbers = #tpu.dot_dimension_numbers<[1], [0], [0], [1], [0, 0, 1, 1], [], []>} : vector<8x8xf32>, vector<8x32xf32>, vector<8x32xf32> -> vector<8x32xf32>
    %588 = arith.addf %569, %587 : vector<8x32xf32>
    %589 = vector.broadcast %501 : vector<1x32xf32> to vector<8x32xf32>
    %590 = arith.addf %588, %589 : vector<8x32xf32>
    %591 = arith.addf %493, %590 : vector<8x32xf32>
    %c0_272 = arith.constant 0 : index
    %c0_273 = arith.constant 0 : index
    %c0_274 = arith.constant 0 : index
    %592 = vector.load %arg32[%c0_272, %c0_273, %c0_274] : memref<1x1x32xf32, #tpu.memory_space<vmem>>, vector<1x1x32xf32>
    %593 = vector.shape_cast %592 : vector<1x1x32xf32> to vector<1x32xf32>
    %c0_275 = arith.constant 0 : index
    %c0_276 = arith.constant 0 : index
    %c0_277 = arith.constant 0 : index
    %594 = vector.load %arg33[%c0_275, %c0_276, %c0_277] : memref<1x1x32xf32, #tpu.memory_space<vmem>>, vector<1x1x32xf32>
    %595 = vector.shape_cast %594 : vector<1x1x32xf32> to vector<1x32xf32>
    %cst_278 = arith.constant dense<0.000000e+00> : vector<8xf32>
    %596 = vector.multi_reduction <add>, %591, %cst_278 [1] : vector<8x32xf32> to vector<8xf32>
    %597 = vector.shape_cast %596 : vector<8xf32> to vector<8x1xf32>
    %cst_279 = arith.constant 3.200000e+01 : f32
    %598 = vector.broadcast %cst_279 : f32 to vector<8x1xf32>
    %599 = arith.divf %597, %598 : vector<8x1xf32>
    %600 = vector.broadcast %599 : vector<8x1xf32> to vector<8x32xf32>
    %601 = arith.subf %591, %600 : vector<8x32xf32>
    %602 = arith.mulf %601, %601 : vector<8x32xf32>
    %cst_280 = arith.constant dense<0.000000e+00> : vector<8xf32>
    %603 = vector.multi_reduction <add>, %602, %cst_280 [1] : vector<8x32xf32> to vector<8xf32>
    %604 = vector.shape_cast %603 : vector<8xf32> to vector<8x1xf32>
    %cst_281 = arith.constant 3.200000e+01 : f32
    %605 = vector.broadcast %cst_281 : f32 to vector<8x1xf32>
    %606 = arith.divf %604, %605 : vector<8x1xf32>
    %cst_282 = arith.constant 9.99999974E-6 : f32
    %607 = vector.broadcast %cst_282 : f32 to vector<8x1xf32>
    %608 = arith.addf %606, %607 : vector<8x1xf32>
    %609 = math.rsqrt %608 : vector<8x1xf32>
    %610 = vector.broadcast %609 : vector<8x1xf32> to vector<8x32xf32>
    %611 = arith.mulf %601, %610 : vector<8x32xf32>
    %612 = vector.broadcast %593 : vector<1x32xf32> to vector<8x32xf32>
    %613 = arith.mulf %611, %612 : vector<8x32xf32>
    %614 = vector.broadcast %595 : vector<1x32xf32> to vector<8x32xf32>
    %615 = arith.addf %613, %614 : vector<8x32xf32>
    %c0_283 = arith.constant 0 : index
    %c0_284 = arith.constant 0 : index
    %c0_285 = arith.constant 0 : index
    %616 = vector.load %arg36[%c0_283, %c0_284, %c0_285] : memref<1x32x2048xf32, #tpu.memory_space<vmem>>, vector<1x32x2048xf32>
    %617 = vector.shape_cast %616 : vector<1x32x2048xf32> to vector<32x2048xf32>
    %c0_286 = arith.constant 0 : index
    %c0_287 = arith.constant 0 : index
    %c0_288 = arith.constant 0 : index
    %618 = vector.load %arg37[%c0_286, %c0_287, %c0_288] : memref<1x1x2048xf32, #tpu.memory_space<vmem>>, vector<1x1x2048xf32>
    %619 = vector.shape_cast %618 : vector<1x1x2048xf32> to vector<1x2048xf32>
    %c0_289 = arith.constant 0 : index
    %c0_290 = arith.constant 0 : index
    %c0_291 = arith.constant 0 : index
    %620 = vector.load %arg38[%c0_289, %c0_290, %c0_291] : memref<1x2048x32xf32, #tpu.memory_space<vmem>>, vector<1x2048x32xf32>
    %621 = vector.shape_cast %620 : vector<1x2048x32xf32> to vector<2048x32xf32>
    %c0_292 = arith.constant 0 : index
    %c0_293 = arith.constant 0 : index
    %c0_294 = arith.constant 0 : index
    %622 = vector.load %arg39[%c0_292, %c0_293, %c0_294] : memref<1x1x32xf32, #tpu.memory_space<vmem>>, vector<1x1x32xf32>
    %623 = vector.shape_cast %622 : vector<1x1x32xf32> to vector<1x32xf32>
    %cst_295 = arith.constant dense<0.000000e+00> : vector<8x2048xf32>
    %624 = tpu.matmul %615, %617, %cst_295 {dimension_numbers = #tpu.dot_dimension_numbers<[1], [0], [0], [1], [0, 0, 1, 1], [], []>} : vector<8x32xf32>, vector<32x2048xf32>, vector<8x2048xf32> -> vector<8x2048xf32>
    %625 = vector.broadcast %619 : vector<1x2048xf32> to vector<8x2048xf32>
    %626 = arith.addf %624, %625 : vector<8x2048xf32>
    %cst_296 = arith.constant 0.000000e+00 : f32
    %627 = vector.broadcast %cst_296 : f32 to vector<8x2048xf32>
    %628 = arith.maximumf %626, %627 : vector<8x2048xf32>
    %cst_297 = arith.constant dense<0.000000e+00> : vector<8x32xf32>
    %629 = tpu.matmul %628, %621, %cst_297 {dimension_numbers = #tpu.dot_dimension_numbers<[1], [0], [0], [1], [0, 0, 1, 1], [], []>} : vector<8x2048xf32>, vector<2048x32xf32>, vector<8x32xf32> -> vector<8x32xf32>
    %630 = vector.broadcast %623 : vector<1x32xf32> to vector<8x32xf32>
    %631 = arith.addf %629, %630 : vector<8x32xf32>
    %632 = arith.addf %615, %631 : vector<8x32xf32>
    %c0_298 = arith.constant 0 : index
    %c0_299 = arith.constant 0 : index
    %c0_300 = arith.constant 0 : index
    %633 = vector.load %arg34[%c0_298, %c0_299, %c0_300] : memref<1x1x32xf32, #tpu.memory_space<vmem>>, vector<1x1x32xf32>
    %634 = vector.shape_cast %633 : vector<1x1x32xf32> to vector<1x32xf32>
    %c0_301 = arith.constant 0 : index
    %c0_302 = arith.constant 0 : index
    %c0_303 = arith.constant 0 : index
    %635 = vector.load %arg35[%c0_301, %c0_302, %c0_303] : memref<1x1x32xf32, #tpu.memory_space<vmem>>, vector<1x1x32xf32>
    %636 = vector.shape_cast %635 : vector<1x1x32xf32> to vector<1x32xf32>
    %cst_304 = arith.constant dense<0.000000e+00> : vector<8xf32>
    %637 = vector.multi_reduction <add>, %632, %cst_304 [1] : vector<8x32xf32> to vector<8xf32>
    %638 = vector.shape_cast %637 : vector<8xf32> to vector<8x1xf32>
    %cst_305 = arith.constant 3.200000e+01 : f32
    %639 = vector.broadcast %cst_305 : f32 to vector<8x1xf32>
    %640 = arith.divf %638, %639 : vector<8x1xf32>
    %641 = vector.broadcast %640 : vector<8x1xf32> to vector<8x32xf32>
    %642 = arith.subf %632, %641 : vector<8x32xf32>
    %643 = arith.mulf %642, %642 : vector<8x32xf32>
    %cst_306 = arith.constant dense<0.000000e+00> : vector<8xf32>
    %644 = vector.multi_reduction <add>, %643, %cst_306 [1] : vector<8x32xf32> to vector<8xf32>
    %645 = vector.shape_cast %644 : vector<8xf32> to vector<8x1xf32>
    %cst_307 = arith.constant 3.200000e+01 : f32
    %646 = vector.broadcast %cst_307 : f32 to vector<8x1xf32>
    %647 = arith.divf %645, %646 : vector<8x1xf32>
    %cst_308 = arith.constant 9.99999974E-6 : f32
    %648 = vector.broadcast %cst_308 : f32 to vector<8x1xf32>
    %649 = arith.addf %647, %648 : vector<8x1xf32>
    %650 = math.rsqrt %649 : vector<8x1xf32>
    %651 = vector.broadcast %650 : vector<8x1xf32> to vector<8x32xf32>
    %652 = arith.mulf %642, %651 : vector<8x32xf32>
    %653 = vector.broadcast %634 : vector<1x32xf32> to vector<8x32xf32>
    %654 = arith.mulf %652, %653 : vector<8x32xf32>
    %655 = vector.broadcast %636 : vector<1x32xf32> to vector<8x32xf32>
    %656 = arith.addf %654, %655 : vector<8x32xf32>
    %c0_309 = arith.constant 0 : index
    %c0_310 = arith.constant 0 : index
    %657 = vector.load %arg40[%c0_309, %c0_310] : memref<1x32xf32, #tpu.memory_space<vmem>>, vector<1x32xf32>
    %c0_311 = arith.constant 0 : index
    %c0_312 = arith.constant 0 : index
    %658 = vector.load %arg41[%c0_311, %c0_312] : memref<1x32xf32, #tpu.memory_space<vmem>>, vector<1x32xf32>
    %cst_313 = arith.constant dense<0.000000e+00> : vector<8xf32>
    %659 = vector.multi_reduction <add>, %656, %cst_313 [1] : vector<8x32xf32> to vector<8xf32>
    %660 = vector.shape_cast %659 : vector<8xf32> to vector<8x1xf32>
    %cst_314 = arith.constant 3.200000e+01 : f32
    %661 = vector.broadcast %cst_314 : f32 to vector<8x1xf32>
    %662 = arith.divf %660, %661 : vector<8x1xf32>
    %663 = vector.broadcast %662 : vector<8x1xf32> to vector<8x32xf32>
    %664 = arith.subf %656, %663 : vector<8x32xf32>
    %665 = arith.mulf %664, %664 : vector<8x32xf32>
    %cst_315 = arith.constant dense<0.000000e+00> : vector<8xf32>
    %666 = vector.multi_reduction <add>, %665, %cst_315 [1] : vector<8x32xf32> to vector<8xf32>
    %667 = vector.shape_cast %666 : vector<8xf32> to vector<8x1xf32>
    %cst_316 = arith.constant 3.200000e+01 : f32
    %668 = vector.broadcast %cst_316 : f32 to vector<8x1xf32>
    %669 = arith.divf %667, %668 : vector<8x1xf32>
    %cst_317 = arith.constant 9.99999974E-6 : f32
    %670 = vector.broadcast %cst_317 : f32 to vector<8x1xf32>
    %671 = arith.addf %669, %670 : vector<8x1xf32>
    %672 = math.rsqrt %671 : vector<8x1xf32>
    %673 = vector.broadcast %672 : vector<8x1xf32> to vector<8x32xf32>
    %674 = arith.mulf %664, %673 : vector<8x32xf32>
    %675 = vector.broadcast %657 : vector<1x32xf32> to vector<8x32xf32>
    %676 = arith.mulf %674, %675 : vector<8x32xf32>
    %677 = vector.broadcast %658 : vector<1x32xf32> to vector<8x32xf32>
    %678 = arith.addf %676, %677 : vector<8x32xf32>
    %c0_318 = arith.constant 0 : index
    %c0_319 = arith.constant 0 : index
    %679 = vector.load %arg47[%c0_318, %c0_319] : memref<16x32xf32, #tpu.memory_space<vmem>>, vector<8x32xf32>
    tpu.vector_store %arg47[%c0_318, %c0_319], %678 {strides = array<i32>} : memref<16x32xf32, #tpu.memory_space<vmem>>, vector<8x32xf32>,
    %c8_320 = arith.constant 8 : index
    %c0_321 = arith.constant 0 : index
    %680 = vector.load %arg47[%c8_320, %c0_321] : memref<16x32xf32, #tpu.memory_space<vmem>>, vector<8x32xf32>
    tpu.vector_store %arg47[%c8_320, %c0_321], %678 {strides = array<i32>} : memref<16x32xf32, #tpu.memory_space<vmem>>, vector<8x32xf32>,
    %c0_322 = arith.constant 0 : index
    %c0_323 = arith.constant 0 : index
    %681 = vector.load %arg47[%c0_322, %c0_323] : memref<16x32xf32, #tpu.memory_space<vmem>>, vector<16x32xf32>
    %682 = vector.extract_strided_slice %681 {offsets = [7, 0], sizes = [8, 32], strides = [1, 1]} : vector<16x32xf32> to vector<8x32xf32>
    %683 = vector.extract_strided_slice %681 {offsets = [1, 0], sizes = [8, 32], strides = [1, 1]} : vector<16x32xf32> to vector<8x32xf32>
    %c0_324 = arith.constant 0 : index
    %c0_325 = arith.constant 0 : index
    %c0_326 = arith.constant 0 : index
    %684 = vector.load %arg42[%c0_324, %c0_325, %c0_326] : memref<3x32x8xf32, #tpu.memory_space<vmem>>, vector<3x32x8xf32>
    %685 = vector.extract_strided_slice %684 {offsets = [0, 0, 0], sizes = [1, 32, 8], strides = [1, 1, 1]} : vector<3x32x8xf32> to vector<1x32x8xf32>
    %686 = vector.shape_cast %685 : vector<1x32x8xf32> to vector<32x8xf32>
    %cst_327 = arith.constant dense<0.000000e+00> : vector<8x8xf32>
    %687 = tpu.matmul %682, %686, %cst_327 {dimension_numbers = #tpu.dot_dimension_numbers<[1], [0], [0], [1], [0, 0, 1, 1], [], []>} : vector<8x32xf32>, vector<32x8xf32>, vector<8x8xf32> -> vector<8x8xf32>
    %688 = vector.extract_strided_slice %684 {offsets = [1, 0, 0], sizes = [1, 32, 8], strides = [1, 1, 1]} : vector<3x32x8xf32> to vector<1x32x8xf32>
    %689 = vector.shape_cast %688 : vector<1x32x8xf32> to vector<32x8xf32>
    %cst_328 = arith.constant dense<0.000000e+00> : vector<8x8xf32>
    %690 = tpu.matmul %678, %689, %cst_328 {dimension_numbers = #tpu.dot_dimension_numbers<[1], [0], [0], [1], [0, 0, 1, 1], [], []>} : vector<8x32xf32>, vector<32x8xf32>, vector<8x8xf32> -> vector<8x8xf32>
    %691 = arith.addf %687, %690 : vector<8x8xf32>
    %692 = vector.extract_strided_slice %684 {offsets = [2, 0, 0], sizes = [1, 32, 8], strides = [1, 1, 1]} : vector<3x32x8xf32> to vector<1x32x8xf32>
    %693 = vector.shape_cast %692 : vector<1x32x8xf32> to vector<32x8xf32>
    %cst_329 = arith.constant dense<0.000000e+00> : vector<8x8xf32>
    %694 = tpu.matmul %683, %693, %cst_329 {dimension_numbers = #tpu.dot_dimension_numbers<[1], [0], [0], [1], [0, 0, 1, 1], [], []>} : vector<8x32xf32>, vector<32x8xf32>, vector<8x8xf32> -> vector<8x8xf32>
    %695 = arith.addf %691, %694 : vector<8x8xf32>
    %c0_330 = arith.constant 0 : index
    %c0_331 = arith.constant 0 : index
    %c0_332 = arith.constant 0 : index
    %696 = vector.load %arg43[%c0_330, %c0_331, %c0_332] : memref<1x8x8xf32, #tpu.memory_space<vmem>>, vector<1x8x8xf32>
    %697 = vector.shape_cast %696 : vector<1x8x8xf32> to vector<8x8xf32>
    %698 = vector.shape_cast %695 : vector<8x8xf32> to vector<1x8x8xf32>
    tpu.vector_store %arg43[%c0_330, %c0_331, %c0_332], %698 {strides = array<i32>} : memref<1x8x8xf32, #tpu.memory_space<vmem>>, vector<1x8x8xf32>,
    %c0_333 = arith.constant 0 : index
    %c0_334 = arith.constant 0 : index
    %c0_335 = arith.constant 0 : index
    %699 = vector.load %arg3[%c0_333, %c0_334, %c0_335] : memref<1x8x8xf32, #tpu.memory_space<vmem>>, vector<1x8x8xf32>
    %700 = vector.shape_cast %699 : vector<1x8x8xf32> to vector<8x8xf32>
    %701 = arith.subf %695, %700 : vector<8x8xf32>
    %702 = arith.mulf %701, %701 : vector<8x8xf32>
    %703 = vector.shape_cast %702 : vector<8x8xf32> to vector<1x8x8xf32>
    %cst_336 = arith.constant dense<0.000000e+00> : vector<1xf32>
    %704 = vector.multi_reduction <add>, %703, %cst_336 [1, 2] : vector<1x8x8xf32> to vector<1xf32>
    %705 = vector.shape_cast %704 : vector<1xf32> to vector<1x1x1xf32>
    %706 = vector.extract %705[0, 0, 0] : f32 from vector<1x1x1xf32>
    %707 = vector.broadcast %706 : f32 to vector<1x1xf32>
    %c0_337 = arith.constant 0 : index
    %c0_338 = arith.constant 0 : index
    %c0_339 = arith.constant 0 : index
    %708 = vector.load %arg44[%c0_337, %c0_338, %c0_339] : memref<1x1x1xf32, #tpu.memory_space<vmem>>, vector<1x1x1xf32>
    %709 = vector.shape_cast %708 : vector<1x1x1xf32> to vector<1x1xf32>
    %710 = vector.shape_cast %707 : vector<1x1xf32> to vector<1x1x1xf32>
    tpu.vector_store %arg44[%c0_337, %c0_338, %c0_339], %710 {strides = array<i32>} : memref<1x1x1xf32, #tpu.memory_space<vmem>>, vector<1x1x1xf32>,
    return
  }
  func.func @transform_0(%arg0: i32) -> (i32, i32, i32) {
    %c0_i32 = arith.constant 0 : i32
    %c0_i32_0 = arith.constant 0 : i32
    %c0_i32_1 = arith.constant 0 : i32
    return %arg0, %c0_i32, %c0_i32_0 : i32, i32, i32
  }
  func.func @transform_1(%arg0: i32) -> (i32, i32, i32) {
    %c0_i32 = arith.constant 0 : i32
    %c0_i32_0 = arith.constant 0 : i32
    %c0_i32_1 = arith.constant 0 : i32
    return %arg0, %c0_i32, %c0_i32_0 : i32, i32, i32
  }
  func.func @transform_2(%arg0: i32) -> (i32, i32, i32) {
    %c0_i32 = arith.constant 0 : i32
    %c0_i32_0 = arith.constant 0 : i32
    %c0_i32_1 = arith.constant 0 : i32
    return %arg0, %c0_i32, %c0_i32_0 : i32, i32, i32
  }
  func.func @transform_3(%arg0: i32) -> (i32, i32, i32) {
    %c0_i32 = arith.constant 0 : i32
    %c0_i32_0 = arith.constant 0 : i32
    %c0_i32_1 = arith.constant 0 : i32
    %c0_i32_2 = arith.constant 0 : i32
    return %c0_i32, %c0_i32_0, %c0_i32_1 : i32, i32, i32
  }
  func.func @transform_4(%arg0: i32) -> (i32, i32) {
    %c0_i32 = arith.constant 0 : i32
    %c0_i32_0 = arith.constant 0 : i32
    %c0_i32_1 = arith.constant 0 : i32
    return %c0_i32, %c0_i32_0 : i32, i32
  }
  func.func @transform_5(%arg0: i32) -> (i32, i32, i32) {
    %c0_i32 = arith.constant 0 : i32
    %c0_i32_0 = arith.constant 0 : i32
    %c0_i32_1 = arith.constant 0 : i32
    %c0_i32_2 = arith.constant 0 : i32
    return %c0_i32, %c0_i32_0, %c0_i32_1 : i32, i32, i32
  }
  func.func @transform_6(%arg0: i32) -> (i32, i32) {
    %c0_i32 = arith.constant 0 : i32
    %c0_i32_0 = arith.constant 0 : i32
    %c0_i32_1 = arith.constant 0 : i32
    return %c0_i32, %c0_i32_0 : i32, i32
  }
  func.func @transform_7(%arg0: i32) -> (i32, i32, i32) {
    %c0_i32 = arith.constant 0 : i32
    %c0_i32_0 = arith.constant 0 : i32
    %c0_i32_1 = arith.constant 0 : i32
    %c0_i32_2 = arith.constant 0 : i32
    return %c0_i32, %c0_i32_0, %c0_i32_1 : i32, i32, i32
  }
  func.func @transform_8(%arg0: i32) -> (i32, i32, i32) {
    %c0_i32 = arith.constant 0 : i32
    %c0_i32_0 = arith.constant 0 : i32
    %c0_i32_1 = arith.constant 0 : i32
    %c0_i32_2 = arith.constant 0 : i32
    return %c0_i32, %c0_i32_0, %c0_i32_1 : i32, i32, i32
  }
  func.func @transform_9(%arg0: i32) -> (i32, i32, i32) {
    %c0_i32 = arith.constant 0 : i32
    %c0_i32_0 = arith.constant 0 : i32
    %c0_i32_1 = arith.constant 0 : i32
    %c0_i32_2 = arith.constant 0 : i32
    return %c0_i32, %c0_i32_0, %c0_i32_1 : i32, i32, i32
  }
  func.func @transform_10(%arg0: i32) -> (i32, i32, i32) {
    %c0_i32 = arith.constant 0 : i32
    %c0_i32_0 = arith.constant 0 : i32
    %c0_i32_1 = arith.constant 0 : i32
    %c0_i32_2 = arith.constant 0 : i32
    return %c0_i32, %c0_i32_0, %c0_i32_1 : i32, i32, i32
  }
  func.func @transform_11(%arg0: i32) -> (i32, i32, i32) {
    %c0_i32 = arith.constant 0 : i32
    %c0_i32_0 = arith.constant 0 : i32
    %c0_i32_1 = arith.constant 0 : i32
    %c0_i32_2 = arith.constant 0 : i32
    return %c0_i32, %c0_i32_0, %c0_i32_1 : i32, i32, i32
  }
  func.func @transform_12(%arg0: i32) -> (i32, i32, i32) {
    %c0_i32 = arith.constant 0 : i32
    %c0_i32_0 = arith.constant 0 : i32
    %c0_i32_1 = arith.constant 0 : i32
    %c0_i32_2 = arith.constant 0 : i32
    return %c0_i32, %c0_i32_0, %c0_i32_1 : i32, i32, i32
  }
  func.func @transform_13(%arg0: i32) -> (i32, i32, i32) {
    %c0_i32 = arith.constant 0 : i32
    %c0_i32_0 = arith.constant 0 : i32
    %c0_i32_1 = arith.constant 0 : i32
    %c0_i32_2 = arith.constant 0 : i32
    return %c0_i32, %c0_i32_0, %c0_i32_1 : i32, i32, i32
  }
  func.func @transform_14(%arg0: i32) -> (i32, i32, i32) {
    %c0_i32 = arith.constant 0 : i32
    %c0_i32_0 = arith.constant 0 : i32
    %c0_i32_1 = arith.constant 0 : i32
    %c0_i32_2 = arith.constant 0 : i32
    return %c0_i32, %c0_i32_0, %c0_i32_1 : i32, i32, i32
  }
  func.func @transform_15(%arg0: i32) -> (i32, i32, i32) {
    %c0_i32 = arith.constant 0 : i32
    %c0_i32_0 = arith.constant 0 : i32
    %c0_i32_1 = arith.constant 0 : i32
    %c0_i32_2 = arith.constant 0 : i32
    return %c0_i32, %c0_i32_0, %c0_i32_1 : i32, i32, i32
  }
  func.func @transform_16(%arg0: i32) -> (i32, i32, i32) {
    %c0_i32 = arith.constant 0 : i32
    %c0_i32_0 = arith.constant 0 : i32
    %c0_i32_1 = arith.constant 0 : i32
    %c0_i32_2 = arith.constant 0 : i32
    return %c0_i32, %c0_i32_0, %c0_i32_1 : i32, i32, i32
  }
  func.func @transform_17(%arg0: i32) -> (i32, i32, i32) {
    %c0_i32 = arith.constant 0 : i32
    %c0_i32_0 = arith.constant 0 : i32
    %c0_i32_1 = arith.constant 0 : i32
    %c0_i32_2 = arith.constant 0 : i32
    return %c0_i32, %c0_i32_0, %c0_i32_1 : i32, i32, i32
  }
  func.func @transform_18(%arg0: i32) -> (i32, i32, i32) {
    %c0_i32 = arith.constant 0 : i32
    %c0_i32_0 = arith.constant 0 : i32
    %c0_i32_1 = arith.constant 0 : i32
    %c0_i32_2 = arith.constant 0 : i32
    return %c0_i32, %c0_i32_0, %c0_i32_1 : i32, i32, i32
  }
  func.func @transform_19(%arg0: i32) -> (i32, i32) {
    %c0_i32 = arith.constant 0 : i32
    %c0_i32_0 = arith.constant 0 : i32
    %c0_i32_1 = arith.constant 0 : i32
    return %c0_i32, %c0_i32_0 : i32, i32
  }
  func.func @transform_20(%arg0: i32) -> (i32, i32) {
    %c0_i32 = arith.constant 0 : i32
    %c0_i32_0 = arith.constant 0 : i32
    %c0_i32_1 = arith.constant 0 : i32
    return %c0_i32, %c0_i32_0 : i32, i32
  }
  func.func @transform_21(%arg0: i32) -> (i32, i32, i32) {
    %c0_i32 = arith.constant 0 : i32
    %c0_i32_0 = arith.constant 0 : i32
    %c0_i32_1 = arith.constant 0 : i32
    %c0_i32_2 = arith.constant 0 : i32
    return %c0_i32, %c0_i32_0, %c0_i32_1 : i32, i32, i32
  }
  func.func @transform_22(%arg0: i32) -> (i32, i32, i32) {
    %c0_i32 = arith.constant 0 : i32
    %c0_i32_0 = arith.constant 0 : i32
    %c0_i32_1 = arith.constant 0 : i32
    %c0_i32_2 = arith.constant 0 : i32
    return %c0_i32, %c0_i32_0, %c0_i32_1 : i32, i32, i32
  }
  func.func @transform_23(%arg0: i32) -> (i32, i32, i32) {
    %c0_i32 = arith.constant 0 : i32
    %c0_i32_0 = arith.constant 0 : i32
    %c0_i32_1 = arith.constant 0 : i32
    %c0_i32_2 = arith.constant 0 : i32
    return %c0_i32, %c0_i32_0, %c0_i32_1 : i32, i32, i32
  }
  func.func @transform_24(%arg0: i32) -> (i32, i32, i32) {
    %c0_i32 = arith.constant 0 : i32
    %c0_i32_0 = arith.constant 0 : i32
    %c0_i32_1 = arith.constant 0 : i32
    %c0_i32_2 = arith.constant 0 : i32
    return %c0_i32, %c0_i32_0, %c0_i32_1 : i32, i32, i32
  }
  func.func @transform_25(%arg0: i32) -> (i32, i32, i32) {
    %c0_i32 = arith.constant 0 : i32
    %c0_i32_0 = arith.constant 0 : i32
    %c0_i32_1 = arith.constant 0 : i32
    %c0_i32_2 = arith.constant 0 : i32
    return %c0_i32, %c0_i32_0, %c0_i32_1 : i32, i32, i32
  }
  func.func @transform_26(%arg0: i32) -> (i32, i32, i32) {
    %c0_i32 = arith.constant 0 : i32
    %c0_i32_0 = arith.constant 0 : i32
    %c0_i32_1 = arith.constant 0 : i32
    %c0_i32_2 = arith.constant 0 : i32
    return %c0_i32, %c0_i32_0, %c0_i32_1 : i32, i32, i32
  }
  func.func @transform_27(%arg0: i32) -> (i32, i32, i32) {
    %c0_i32 = arith.constant 0 : i32
    %c0_i32_0 = arith.constant 0 : i32
    %c0_i32_1 = arith.constant 0 : i32
    %c0_i32_2 = arith.constant 0 : i32
    return %c0_i32, %c0_i32_0, %c0_i32_1 : i32, i32, i32
  }
  func.func @transform_28(%arg0: i32) -> (i32, i32, i32) {
    %c0_i32 = arith.constant 0 : i32
    %c0_i32_0 = arith.constant 0 : i32
    %c0_i32_1 = arith.constant 0 : i32
    %c0_i32_2 = arith.constant 0 : i32
    return %c0_i32, %c0_i32_0, %c0_i32_1 : i32, i32, i32
  }
  func.func @transform_29(%arg0: i32) -> (i32, i32, i32) {
    %c0_i32 = arith.constant 0 : i32
    %c0_i32_0 = arith.constant 0 : i32
    %c0_i32_1 = arith.constant 0 : i32
    %c0_i32_2 = arith.constant 0 : i32
    return %c0_i32, %c0_i32_0, %c0_i32_1 : i32, i32, i32
  }
  func.func @transform_30(%arg0: i32) -> (i32, i32, i32) {
    %c0_i32 = arith.constant 0 : i32
    %c0_i32_0 = arith.constant 0 : i32
    %c0_i32_1 = arith.constant 0 : i32
    %c0_i32_2 = arith.constant 0 : i32
    return %c0_i32, %c0_i32_0, %c0_i32_1 : i32, i32, i32
  }
  func.func @transform_31(%arg0: i32) -> (i32, i32, i32) {
    %c0_i32 = arith.constant 0 : i32
    %c0_i32_0 = arith.constant 0 : i32
    %c0_i32_1 = arith.constant 0 : i32
    %c0_i32_2 = arith.constant 0 : i32
    return %c0_i32, %c0_i32_0, %c0_i32_1 : i32, i32, i32
  }
  func.func @transform_32(%arg0: i32) -> (i32, i32, i32) {
    %c0_i32 = arith.constant 0 : i32
    %c0_i32_0 = arith.constant 0 : i32
    %c0_i32_1 = arith.constant 0 : i32
    %c0_i32_2 = arith.constant 0 : i32
    return %c0_i32, %c0_i32_0, %c0_i32_1 : i32, i32, i32
  }
  func.func @transform_33(%arg0: i32) -> (i32, i32, i32) {
    %c0_i32 = arith.constant 0 : i32
    %c0_i32_0 = arith.constant 0 : i32
    %c0_i32_1 = arith.constant 0 : i32
    %c0_i32_2 = arith.constant 0 : i32
    return %c0_i32, %c0_i32_0, %c0_i32_1 : i32, i32, i32
  }
  func.func @transform_34(%arg0: i32) -> (i32, i32, i32) {
    %c0_i32 = arith.constant 0 : i32
    %c0_i32_0 = arith.constant 0 : i32
    %c0_i32_1 = arith.constant 0 : i32
    %c0_i32_2 = arith.constant 0 : i32
    return %c0_i32, %c0_i32_0, %c0_i32_1 : i32, i32, i32
  }
  func.func @transform_35(%arg0: i32) -> (i32, i32, i32) {
    %c0_i32 = arith.constant 0 : i32
    %c0_i32_0 = arith.constant 0 : i32
    %c0_i32_1 = arith.constant 0 : i32
    %c0_i32_2 = arith.constant 0 : i32
    return %c0_i32, %c0_i32_0, %c0_i32_1 : i32, i32, i32
  }
  func.func @transform_36(%arg0: i32) -> (i32, i32, i32) {
    %c0_i32 = arith.constant 0 : i32
    %c0_i32_0 = arith.constant 0 : i32
    %c0_i32_1 = arith.constant 0 : i32
    %c0_i32_2 = arith.constant 0 : i32
    return %c0_i32, %c0_i32_0, %c0_i32_1 : i32, i32, i32
  }
  func.func @transform_37(%arg0: i32) -> (i32, i32, i32) {
    %c0_i32 = arith.constant 0 : i32
    %c0_i32_0 = arith.constant 0 : i32
    %c0_i32_1 = arith.constant 0 : i32
    %c0_i32_2 = arith.constant 0 : i32
    return %c0_i32, %c0_i32_0, %c0_i32_1 : i32, i32, i32
  }
  func.func @transform_38(%arg0: i32) -> (i32, i32, i32) {
    %c0_i32 = arith.constant 0 : i32
    %c0_i32_0 = arith.constant 0 : i32
    %c0_i32_1 = arith.constant 0 : i32
    %c0_i32_2 = arith.constant 0 : i32
    return %c0_i32, %c0_i32_0, %c0_i32_1 : i32, i32, i32
  }
  func.func @transform_39(%arg0: i32) -> (i32, i32) {
    %c0_i32 = arith.constant 0 : i32
    %c0_i32_0 = arith.constant 0 : i32
    %c0_i32_1 = arith.constant 0 : i32
    return %c0_i32, %c0_i32_0 : i32, i32
  }
  func.func @transform_40(%arg0: i32) -> (i32, i32) {
    %c0_i32 = arith.constant 0 : i32
    %c0_i32_0 = arith.constant 0 : i32
    %c0_i32_1 = arith.constant 0 : i32
    return %c0_i32, %c0_i32_0 : i32, i32
  }
  func.func @transform_41(%arg0: i32) -> (i32, i32, i32) {
    %c0_i32 = arith.constant 0 : i32
    %c0_i32_0 = arith.constant 0 : i32
    %c0_i32_1 = arith.constant 0 : i32
    %c0_i32_2 = arith.constant 0 : i32
    return %c0_i32, %c0_i32_0, %c0_i32_1 : i32, i32, i32
  }
  func.func @transform_42(%arg0: i32) -> (i32, i32, i32) {
    %c0_i32 = arith.constant 0 : i32
    %c0_i32_0 = arith.constant 0 : i32
    %c0_i32_1 = arith.constant 0 : i32
    return %arg0, %c0_i32, %c0_i32_0 : i32, i32, i32
  }
  func.func @transform_43(%arg0: i32) -> (i32, i32, i32) {
    %c0_i32 = arith.constant 0 : i32
    %c0_i32_0 = arith.constant 0 : i32
    %c0_i32_1 = arith.constant 0 : i32
    return %arg0, %c0_i32, %c0_i32_0 : i32, i32, i32
  }
}

</mosaic_0001>

<bundles_post_ra>
// kernel: trtr_forward.1
= control target key start
LH: loop header
LB: loop body
LE: loop exit
PB: predicated region body
PF: predicated region fallthrough
CT: control target
= control target key end

     0   :  { %s9528_s6 = smov 1   ;;  %s9529_s10 = smov 2   ;;  %s11934_s0 = inlined_call_operand.smem [shape: u32[44], index: -1, kind: input, shape index: {}] }
   0x1   :  { %s9602_s5 = sld [smem:[%s11934_s0]]   ;;  %s9530_s14 = smov 3  }
   0x2   :  { %s9607_s9 = sld [smem:[%s11934_s0 + %s9528_s6]]   ;;  %s9531_s18 = smov 4  }
   0x3   :  { %s9612_s13 = sld [smem:[%s11934_s0 + %s9529_s10]]   ;;  %s9532_s22 = smov 5  }
   0x4   :  { %s9617_s17 = sld [smem:[%s11934_s0 + %s9530_s14]]   ;;  %s9533_s26 = smov 6  }
   0x5   :  { %s9622_s21 = sld [smem:[%s11934_s0 + %s9531_s18]]   ;;  %s9534_s30 = smov 7  }
   0x6   :  { %s9627_s25 = sld [smem:[%s11934_s0 + %s9532_s22]]   ;;  %s9535_s4 = smov 8  }
   0x7   :  { %12004 = sst [smem:[#allocation31_spill]] %s9602_s5  ;;  %s9536_s10 = smov 9  }
   0x8   :  { %12005 = sst [smem:[#allocation32_spill]] %s9607_s9  ;;  %s9537_s15 = smov 10  }
   0x9   :  { %12006 = sst [smem:[#allocation33_spill]] %s9612_s13  ;;  %s9538_s20 = smov 11  }
   0xa   :  { %12007 = sst [smem:[#allocation34_spill]] %s9617_s17  ;;  %s9540_s1 = smov 13  }
   0xb   :  { %s9632_s29 = sld [smem:[%s11934_s0 + %s9533_s26]]   ;;  %s9539_s26 = smov 12  }
   0xc   :  { %12008 = sst [smem:[#allocation35_spill]] %s9627_s25  ;;  %s9541_s7 = smov 14  }
   0xd   :  { %s9637_s3 = sld [smem:[%s11934_s0 + %s9534_s30]]   ;;  %s9543_s22 = smov 16  }
   0xe   :  { %s9642_s8 = sld [smem:[%s11934_s0 + %s9535_s4]]   ;;  %s9544_s28 = smov 17  }
   0xf   :  { %s9647_s14 = sld [smem:[%s11934_s0 + %s9536_s10]]  }
  0x10   :  { %s9652_s19 = sld [smem:[%s11934_s0 + %s9537_s15]]   ;;  %s9542_s15 = smov 15  }
  0x11   :  { %12009 = sst [smem:[#allocation36_spill]] %s9632_s29 }
  0x12   :  { %s9657_s24 = sld [smem:[%s11934_s0 + %s9538_s20]]  }
  0x13   :  { %12010 = sst [smem:[#allocation37_spill]] %s9637_s3 }
  0x14   :  { %12011 = sst [smem:[#allocation38_spill]] %s9642_s8 }
  0x15   :  { %12012 = sst [smem:[#allocation39_spill]] %s9647_s14 }
  0x16   :  { %12013 = sst [smem:[#allocation40_spill]] %s9652_s19 }
  0x17   :  { %s9662_s30 = sld [smem:[%s11934_s0 + %s9539_s26]]  }
  0x18   :  { %12014 = sst [smem:[#allocation41_spill]] %s9657_s24 }
  0x19   :  { %s9667_s6 = sld [smem:[%s11934_s0 + %s9540_s1]]  }
  0x1a   :  { %s9672_s12 = sld [smem:[%s11934_s0 + %s9541_s7]]   ;;  %s9545_s7 = smov 18  }
  0x1b   :  { %s9677_s20 = sld [smem:[%s11934_s0 + %s9542_s15]]   ;;  %s9546_s15 = smov 19  }
  0x1c   :  { %s9682_s27 = sld [smem:[%s11934_s0 + %s9543_s22]]   ;;  %s9547_s22 = smov 20  }
  0x1d   :  { %12015 = sst [smem:[#allocation42_spill]] %s9662_s30 }
  0x1e   :  { %s9687_s4 = sld [smem:[%s11934_s0 + %s9544_s28]]   ;;  %s9548_s28 = smov 21  }
  0x1f   :  { %12016 = sst [smem:[#allocation43_spill]] %s9667_s6 }
  0x20   :  { %12017 = sst [smem:[#allocation44_spill]] %s9672_s12 }
  0x21   :  { %12018 = sst [smem:[#allocation45_spill]] %s9677_s20 }
  0x22   :  { %12019 = sst [smem:[#allocation46_spill]] %s9682_s27 }
  0x23   :  { %s9692_s13 = sld [smem:[%s11934_s0 + %s9545_s7]]   ;;  %s9549_s7 = smov 22  }
  0x24   :  { %12020 = sst [smem:[#allocation47_spill]] %s9687_s4 }
  0x25   :  { %s9697_s29 = sld [smem:[%s11934_s0 + %s9546_s15]]   ;;  %s9550_s15 = smov 23  }
  0x26   :  { %s9702_s27 = sld [smem:[%s11934_s0 + %s9547_s22]]   ;;  %s9551_s22 = smov 24  }
  0x27   :  { %s9707_s4 = sld [smem:[%s11934_s0 + %s9548_s28]]   ;;  %s9552_s28 = smov 25  }
  0x29   :  { %12021 = sst [smem:[#allocation48_spill]] %s9692_s13 }
  0x2a   :  { %s9712_s13 = sld [smem:[%s11934_s0 + %s9549_s7]]   ;;  %s9553_s7 = smov 26  }
  0x2b   :  { %12022 = sst [smem:[#allocation49_spill]] %s9697_s29 }
  0x2c   :  { %12023 = sst [smem:[#allocation50_spill]] %s9702_s27 }
  0x2d   :  { %12024 = sst [smem:[#allocation51_spill]] %s9707_s4 }
  0x2e   :  { %s9717_s29 = sld [smem:[%s11934_s0 + %s9550_s15]]   ;;  %s9554_s15 = smov 27  }
  0x2f   :  { %s9722_s27 = sld [smem:[%s11934_s0 + %s9551_s22]]   ;;  %s9555_s22 = smov 28  }
  0x30   :  { %12025 = sst [smem:[#allocation52_spill]] %s9712_s13 }
  0x31   :  { %s9727_s4 = sld [smem:[%s11934_s0 + %s9552_s28]]   ;;  %s9556_s28 = smov 29  }
  0x32   :  { %s9732_s13 = sld [smem:[%s11934_s0 + %s9553_s7]]   ;;  %s9557_s7 = smov 30  }
  0x33   :  { %s9752_s12 = sld [smem:[%s11934_s0 + %s9557_s7]]   ;;  %s9561_s7 = smov 34  }
  0x34   :  { %12026 = sst [smem:[#allocation53_spill]] %s9717_s29 }
  0x35   :  { %12027 = sst [smem:[#allocation54_spill]] %s9722_s27 }
  0x36   :  { %s9737_s29 = sld [smem:[%s11934_s0 + %s9554_s15]]   ;;  %s9558_s15 = smov 31  }
  0x37   :  { %12028 = sst [smem:[#allocation55_spill]] %s9727_s4 }
  0x38   :  { %12029 = sst [smem:[#allocation56_spill]] %s9732_s13 }
  0x39   :  { %s9742_s27 = sld [smem:[%s11934_s0 + %s9555_s22]]   ;;  %s9559_s22 = smov 32  }
  0x3a   :  { %s9747_s4 = sld [smem:[%s11934_s0 + %s9556_s28]]   ;;  %s9560_s28 = smov 33  }
  0x3b   :  { %12032 = sst [smem:[#allocation59_spill]] %s9752_s12 }
  0x3c   :  { %12030 = sst [smem:[#allocation57_spill]] %s9737_s29 }
  0x3d   :  { %s9757_s29 = sld [smem:[%s11934_s0 + %s9558_s15]]   ;;  %s9562_s15 = smov 35  }
  0x3e   :  { %s9762_s20 = sld [smem:[%s11934_s0 + %s9559_s22]]   ;;  %s9563_s22 = smov 36  }
  0x3f   :  { %s9767_s30 = sld [smem:[%s11934_s0 + %s9560_s28]]   ;;  %s9564_s28 = smov 37  }
  0x40   :  { %12031 = sst [smem:[#allocation58_spill]] %s9747_s4 }
  0x41   :  { %s9772_s24 = sld [smem:[%s11934_s0 + %s9561_s7]]   ;;  %s9565_s7 = smov 38  }
  0x42   :  { %s9777_s6 = sld [smem:[%s11934_s0 + %s9562_s15]]   ;;  %s9566_s15 = smov 39  }
  0x43   :  { %s9782_s19 = sld [smem:[%s11934_s0 + %s9563_s22]]   ;;  %s9567_s22 = smov 40  }
  0x44   :  { %12033 = sst [smem:[#allocation60_spill]] %s9762_s20 }
  0x45   :  { %s9787_s14 = sld [smem:[%s11934_s0 + %s9564_s28]]   ;;  %s9568_s28 = smov 41  }
  0x46   :  { %s9792_s25 = sld [smem:[%s11934_s0 + %s9565_s7]]   ;;  %s9569_s7 = smov 42  }
  0x47   :  { %s9812_s9 = sld [smem:[%s11934_s0 + %s9569_s7]]  }
  0x48   :  { %12034 = sst [smem:[#allocation61_spill]] %s9777_s6 }
  0x49   :  { %12035 = sst [smem:[#allocation62_spill]] %s9782_s19 }
  0x4a   :  { %s9797_s6 = sld [smem:[%s11934_s0 + %s9566_s15]]   ;;  %s9570_s15 = smov 43  }
  0x4b   :  { %12036 = sst [smem:[#allocation63_spill]] %s9787_s14 }
  0x4c   :  { %s9802_s19 = sld [smem:[%s11934_s0 + %s9567_s22]]  }
  0x4d   :  { %s9807_s14 = sld [smem:[%s11934_s0 + %s9568_s28]]  }
  0x4e   :  { %12039 = sst [smem:[#allocation66_spill]] %s9812_s9 }
  0x4f   :  { %s9817_s8 = sld [smem:[%s11934_s0 + %s9570_s15]]  }
  0x50   :  { %12037 = sst [smem:[#allocation64_spill]] %s9797_s6 }
  0x52   :  { %12038 = sst [smem:[#allocation65_spill]] %s9802_s19 }
  0x55   :  { %12040 = sst [smem:[#allocation67_spill]] %s9817_s8 }
  0x56   :  { %93 = vsyncpa [#allocation6], 0 }
  0x57   :  { %94 = vsyncpa [#allocation9], 0 }
  0x58   :  { %95 = vsyncpa [#allocation12], 0 }
  0x59   :  { %96 = vsyncpa [#allocation15], 0 }
  0x5a   :  { %97 = vsyncpa [#allocation18], 0 }
  0x5b   :  { %98 = vsyncpa [#allocation21], 0 }
  0x5c   :  { %99 = vsyncpa [#allocation7], 0 }
  0x5d   :  { %101 = vsyncpa [#allocation7 + $0x1], 0  ;;  %s9819_s22 = smov 0   ;;  %s9821_s23 = smov 0  }
  0x5e   :  { %s9823_s26 = smov 0   ;;  %s9825_s28 = smov 0  }
  0x5f LB: > { %s12041_s20 = sld [smem:[#allocation60_spill]]  ;;  %s9840_s0 = sadd.s32 4294967295, %s9526_s28   ;;  %s9526_s28 = sphi %s9825_s28, %s12117_s28   ;;  %s9522_s26 = sphi %s9823_s26, %s12119_s26   ;;  %s9518_s23 = sphi %s9821_s23, %s12121_s23   ;;  %s9514_s22 = sphi %s9819_s22, %s12120_s22  }
  0x60   : > { %s12042_s19 = sld [smem:[#allocation65_spill]]  ;;  %s8105_s1 = sadd.s32 4294967294, %s9526_s28  }
  0x61   : > { %s12043_s17 = sld [smem:[#allocation34_spill]]  ;;  %s9844_s2 = sadd.s32 1, %s9526_s28  }
  0x62   : > { %s12044_s13 = sld [smem:[#allocation56_spill]]  ;;  %s1011_s7 = sadd.s32 1, %s9522_s26 }
  0x63   : > { %s12045_s12 = sld [smem:[#allocation59_spill]]  ;;  %s1008_s10 = ssub.s32 %s9526_s28, %s9844_s2 }
  0x64   : > { %s12046_s6 = sld [smem:[#allocation64_spill]]  ;;  %p1021_p0 = scmp.ne.s32.totalorder %s9522_s26, %s9518_s23 }
  0x65   : > { %s12047_s3 = sld [smem:[#allocation37_spill]]  ;;  %p1009_p1 = scmp.eq.s32.totalorder %s1008_s10, 0 }
  0x66   : > { %s12048_s4 = sld [smem:[#allocation58_spill]]  ;;  %p1022_p2 = scmp.eq.s32.totalorder %s9840_s0, 1 }
  0x67   : > { %12049 = sst [smem:[#allocation68_spill]] %s9514_s22  ;;  %p1027_p3 = scmp.ne.s32.totalorder %s9518_s23, %s9514_s22 }
  0x68   : > { %12050 = sst [smem:[#allocation69_spill]] %s9522_s26  ;;  %p1028_p4 = scmp.eq.s32.totalorder %s8105_s1, 1 }
  0x69   : > { %12051 = sst [smem:[#allocation70_spill]] %s9526_s28  ;;  %p9857_p5 = por %p1022_p2, %p1021_p0 }
  0x6a   : > { %12052 = sst [smem:[#allocation71_spill]] %s9844_s2  ;;  %p9861_p6 = por %p1028_p4, %p1027_p3 }
  0x6b   : > { %s9855_s11 = scalar_select %p1009_p1, %s9522_s26, %s1011_s7  }
  0x6c   : > { %s12054_s15 = scalar_select %p9857_p5, 1, 0 }
  0x6d   : > { %12053 = sst [smem:[#allocation72_spill]] %s9855_s11  ;;  %p8106_p7 = scmp.ge.s32.totalorder %s9526_s28, 1 }
  0x6e   : > { %12055 = sst [smem:[#allocation73_spill]] %s12054_s15  ;;  %p1061_p8 = scmp.lt.s32.totalorder %s9526_s28, 3 }
  0x6f   : > { %s12056_s16 = scalar_select %p9861_p6, 1, 0 }
  0x70   : > { %p8764_p9 = scmp.eq.s32.totalorder %s9840_s0, 0  ;;  %p9868_p10 = pnand %p8106_p7, %p1061_p8 }
  0x71   : > { %12057 = sst [smem:[#allocation74_spill]] %s12056_s16  ;;  %s1157_s1 = sshll.u32 %s9742_s27, 4  ;;  %s1158_s1 = int_to_ptr.hbm [resolvable:$true] %s1157_s1 }
  0x72   : > { %p8726_p11 = pneg %p9868_p10  ;;  %s9571_s7 = smov [#allocation8]  }
  0x73   : > { %s1159_s10 = sshll.u32 %s9571_s7, 4  ;;  %s1181_s11 = sshll.u32 %s12045_s12, 4  ;;  %s1160_s10 = int_to_ptr.vmem [resolvable:$true] %s1159_s10  ;;  %s9882_s11 = int_to_ptr.hbm [resolvable:$true] %s1181_s11 }
  0x74   : > { %p9878_p12 = pnand %p8764_p9, %p8726_p11  ;;  %s1205_s2 = sshll.u32 %s12041_s20, 4  ;;  %s9900_s2 = int_to_ptr.hbm [resolvable:$true] %s1205_s2 }
  0x75   : > { %s9572_s16 = smov [#allocation11]   ;;  %s9110_s28 = sshra.s32 %s1158_s1, 4  ;;  %s9111_s28 = int_to_ptr.hbm [resolvable:$true] %s9110_s28 }
  0x76   : > { %s9885_s22 = sshll.u32 %s9572_s16, 4  ;;  %s9112_s8 = scalar_lea.hbm %s9111_s28, 1  ;;  %s1184_s22 = int_to_ptr.vmem [resolvable:$true] %s9885_s22 }
  0x77   : > { %p9113_p13 = scmp.ne.s32.totalorder %s9111_s28, %s9112_s8  ;;  %p9889_p0 = pneg %p9878_p12 }
  0x78   : > { %s9117_s15 = scalar_lea.hbm %s9742_s27, 1  ;;  %p9118_p3 = scmp.lt.s32.totalorder %s9111_s28, %s9742_s27 }
  0x79   : > { %p9115_p1 = pnand %p9889_p0, %p9113_p13  ;;  %p9119_p4 = scmp.lt.s32.totalorder %s9117_s15, %s9112_s8 }
  0x7b   : > { %p9116_p2 = pneg %p9115_p1  ;;  %p9120_p7 = por %p9119_p4, %p9118_p3 }
  0x7d   : > { %p9121_p8 = pnand %p9120_p7, %p9116_p2 }
  0x7f   : > { %9124 = shalt.err (!%p9121_p8)
}
  0x80   : > { %8732 = dma.hbm_to_vmem [thread:$0]  (!%p9878_p12), %s1158_s1, 16, %s1160_s10, [#allocation9]  }
  0x81   : > { %s9140_s16 = sshra.s32 %s9882_s11, 4  ;;  %s9147_s8 = scalar_lea.hbm %s12045_s12, 1  ;;  %s9141_s16 = int_to_ptr.hbm [resolvable:$true] %s9140_s16 }
  0x82   : > { %s9142_s9 = scalar_lea.hbm %s9141_s16, 1  ;;  %p9148_p2 = scmp.lt.s32.totalorder %s9141_s16, %s12045_s12 }
  0x83   : > { %p9143_p11 = scmp.ne.s32.totalorder %s9141_s16, %s9142_s9  ;;  %p9149_p3 = scmp.lt.s32.totalorder %s9147_s8, %s9142_s9 }
  0x85   : > { %p9145_p13 = pnand %p9143_p11, %p9889_p0  ;;  %p9150_p4 = por %p9149_p3, %p9148_p2 }
  0x87   : > { %p9146_p1 = pneg %p9145_p13 }
  0x89   : > { %p9151_p7 = pnand %p9150_p4, %p9146_p1 }
  0x8b   : > { %9154 = shalt.err (!%p9151_p7)
}
  0x8c   : > { %8738 = dma.hbm_to_vmem [thread:$0]  (!%p9878_p12), %s9882_s11, 16, %s1184_s22, [#allocation12]  }
  0x8d   : > { %s1229_s28 = sshll.u32 %s9772_s24, 4  ;;  %s9573_s15 = smov [#allocation14]   ;;  %s9911_s28 = int_to_ptr.hbm [resolvable:$true] %s1229_s28 }
  0x8e   : > { %s1207_s1 = sshll.u32 %s9573_s15, 4  ;;  %s9170_s10 = sshra.s32 %s9900_s2, 4  ;;  %s1208_s1 = int_to_ptr.vmem [resolvable:$true] %s1207_s1  ;;  %s9171_s10 = int_to_ptr.hbm [resolvable:$true] %s9170_s10 }
  0x8f   : > { %s9172_s9 = scalar_lea.hbm %s9171_s10, 1  ;;  %s9177_s16 = scalar_lea.hbm %s12041_s20, 1 }
  0x90   : > { %p9173_p8 = scmp.ne.s32.totalorder %s9171_s10, %s9172_s9  ;;  %p9178_p1 = scmp.lt.s32.totalorder %s9171_s10, %s12041_s20 }
  0x91   : > { %p9179_p2 = scmp.lt.s32.totalorder %s9177_s16, %s9172_s9 }
  0x92   : > { %p9175_p11 = pnand %p9173_p8, %p9889_p0 }
  0x93   : > { %p9180_p3 = por %p9179_p2, %p9178_p1 }
  0x94   : > { %p9176_p13 = pneg %p9175_p11 }
  0x96   : > { %p9181_p4 = pnand %p9180_p3, %p9176_p13 }
  0x98   : > { %9184 = shalt.err (!%p9181_p4)
}
  0x99   : > { %8744 = dma.hbm_to_vmem [thread:$0]  (!%p9878_p12), %s9900_s2, 16, %s1208_s1, [#allocation15]  }
  0x9a   : > { %s9574_s22 = smov [#allocation17]   ;;  %s1262_s8 = sshll.u32 %s12046_s6, 4  ;;  %s9922_s8 = int_to_ptr.hbm [resolvable:$true] %s1262_s8 }
  0x9b   : > { %s1231_s11 = sshll.u32 %s9574_s22, 4  ;;  %s9200_s15 = sshra.s32 %s9911_s28, 4  ;;  %s1232_s11 = int_to_ptr.vmem [resolvable:$true] %s1231_s11  ;;  %s9201_s15 = int_to_ptr.hbm [resolvable:$true] %s9200_s15 }
  0x9c   : > { %s9202_s10 = scalar_lea.hbm %s9201_s15, 1  ;;  %s9207_s9 = scalar_lea.hbm %s9772_s24, 1 }
  0x9d   : > { %p9203_p7 = scmp.ne.s32.totalorder %s9201_s15, %s9202_s10  ;;  %p9208_p13 = scmp.lt.s32.totalorder %s9201_s15, %s9772_s24 }
  0x9e   : > { %p9209_p1 = scmp.lt.s32.totalorder %s9207_s9, %s9202_s10 }
  0x9f   : > { %p9205_p8 = pnand %p9203_p7, %p9889_p0 }
  0xa0   : > { %p9210_p2 = por %p9209_p1, %p9208_p13 }
  0xa1   : > { %p9206_p11 = pneg %p9205_p8 }
  0xa3   : > { %p9211_p3 = pnand %p9210_p2, %p9206_p11 }
  0xa5   : > { %9214 = shalt.err (!%p9211_p3)
}
  0xa6   : > { %8750 = dma.hbm_to_vmem [thread:$0]  (!%p9878_p12), %s9911_s28, 16, %s1232_s11, [#allocation18]  }
  0xa7   : > { %s1142_s2 = sshll.u32 %s12044_s13, 4  ;;  %s9575_s1 = smov [#allocation20]   ;;  %s9933_s2 = int_to_ptr.hbm [resolvable:$true] %s1142_s2 }
  0xa8   : > { %s1264_s16 = sshll.u32 %s9575_s1, 4  ;;  %s9230_s22 = sshra.s32 %s9922_s8, 4  ;;  %s1265_s16 = int_to_ptr.vmem [resolvable:$true] %s1264_s16  ;;  %s9231_s22 = int_to_ptr.hbm [resolvable:$true] %s9230_s22 }
  0xa9   : > { %s9232_s15 = scalar_lea.hbm %s9231_s22, 1  ;;  %s9237_s10 = scalar_lea.hbm %s12046_s6, 1 }
  0xaa   : > { %p9233_p4 = scmp.ne.s32.totalorder %s9231_s22, %s9232_s15  ;;  %p9238_p11 = scmp.lt.s32.totalorder %s9231_s22, %s12046_s6 }
  0xab   : > { %p9239_p13 = scmp.lt.s32.totalorder %s9237_s10, %s9232_s15 }
  0xac   : > { %p9235_p7 = pnand %p9233_p4, %p9889_p0 }
  0xad   : > { %p9240_p1 = por %p9239_p13, %p9238_p11 }
  0xae   : > { %p9236_p8 = pneg %p9235_p7 }
  0xb0   : > { %p9241_p2 = pnand %p9240_p1, %p9236_p8 }
  0xb2   : > { %9244 = shalt.err (!%p9241_p2)
}
  0xb3   : > { %8756 = dma.hbm_to_vmem [thread:$0]  (!%p9878_p12), %s9922_s8, 16, %s1265_s16, [#allocation21]  }
  0xb4   : > { %s9576_s28 = smov [#allocation5]   ;;  %s1169_s9 = sshll.u32 %s12048_s4, 4  ;;  %s9944_s9 = int_to_ptr.hbm [resolvable:$true] %s1169_s9 }
  0xb5   : > { %s1144_s11 = sshll.u32 %s9576_s28, 4  ;;  %s9260_s1 = sshra.s32 %s9933_s2, 4  ;;  %s1145_s11 = int_to_ptr.vmem [resolvable:$true] %s1144_s11  ;;  %s9261_s1 = int_to_ptr.hbm [resolvable:$true] %s9260_s1 }
  0xb6   : > { %s9262_s22 = scalar_lea.hbm %s9261_s1, 1  ;;  %s9267_s15 = scalar_lea.hbm %s12044_s13, 1 }
  0xb7   : > { %p9263_p3 = scmp.ne.s32.totalorder %s9261_s1, %s9262_s22  ;;  %p9268_p8 = scmp.lt.s32.totalorder %s9261_s1, %s12044_s13 }
  0xb8   : > { %p9269_p11 = scmp.lt.s32.totalorder %s9267_s15, %s9262_s22 }
  0xb9   : > { %p9265_p4 = pnand %p9263_p3, %p9889_p0 }
  0xba   : > { %p9270_p13 = por %p9269_p11, %p9268_p8 }
  0xbb   : > { %p9266_p7 = pneg %p9265_p4 }
  0xbd   : > { %p9271_p1 = pnand %p9270_p13, %p9266_p7 }
  0xbf   : > { %9274 = shalt.err (!%p9271_p1)
}
  0xc0   : > { %8729 = dma.hbm_to_vmem [thread:$0]  (!%p9878_p12), %s9933_s2, 16, %s1145_s11, [#allocation6]  }
  0xc1   : > { %s1193_s8 = sshll.u32 %s9757_s29, 4  ;;  %s9577_s16 = smov [#allocation10]   ;;  %s9955_s8 = int_to_ptr.hbm [resolvable:$true] %s1193_s8 }
  0xc2   : > { %s1171_s10 = sshll.u32 %s9577_s16, 4  ;;  %s9290_s28 = sshra.s32 %s9944_s9, 4  ;;  %s1172_s10 = int_to_ptr.vmem [resolvable:$true] %s1171_s10  ;;  %s9291_s28 = int_to_ptr.hbm [resolvable:$true] %s9290_s28 }
  0xc3   : > { %s9292_s1 = scalar_lea.hbm %s9291_s28, 1  ;;  %s9297_s22 = scalar_lea.hbm %s12048_s4, 1 }
  0xc4   : > { %p9293_p2 = scmp.ne.s32.totalorder %s9291_s28, %s9292_s1  ;;  %p9298_p7 = scmp.lt.s32.totalorder %s9291_s28, %s12048_s4 }
  0xc5   : > { %p9299_p8 = scmp.lt.s32.totalorder %s9297_s22, %s9292_s1 }
  0xc6   : > { %p9295_p3 = pnand %p9293_p2, %p9889_p0 }
  0xc7   : > { %p9300_p11 = por %p9299_p8, %p9298_p7 }
  0xc8   : > { %p9296_p4 = pneg %p9295_p3 }
  0xca   : > { %p9301_p13 = pnand %p9300_p11, %p9296_p4 }
  0xcc   : > { %9304 = shalt.err (!%p9301_p13)
}
  0xcd   : > { %8735 = dma.hbm_to_vmem [thread:$0]  (!%p9878_p12), %s9944_s9, 16, %s1172_s10, [#allocation9]  }
  0xce   : > { %s9578_s2 = smov [#allocation13]   ;;  %s1217_s15 = sshll.u32 %s9767_s30, 4  ;;  %s9966_s15 = int_to_ptr.hbm [resolvable:$true] %s1217_s15 }
  0xcf   : > { %s1195_s11 = sshll.u32 %s9578_s2, 4  ;;  %s9320_s16 = sshra.s32 %s9955_s8, 4  ;;  %s1196_s11 = int_to_ptr.vmem [resolvable:$true] %s1195_s11  ;;  %s9321_s16 = int_to_ptr.hbm [resolvable:$true] %s9320_s16 }
  0xd0   : > { %s9322_s28 = scalar_lea.hbm %s9321_s16, 1  ;;  %s9327_s1 = scalar_lea.hbm %s9757_s29, 1 }
  0xd1   : > { %p9323_p1 = scmp.ne.s32.totalorder %s9321_s16, %s9322_s28  ;;  %p9328_p4 = scmp.lt.s32.totalorder %s9321_s16, %s9757_s29 }
  0xd2   : > { %p9329_p7 = scmp.lt.s32.totalorder %s9327_s1, %s9322_s28 }
  0xd3   : > { %p9325_p2 = pnand %p9323_p1, %p9889_p0 }
  0xd4   : > { %p9330_p8 = por %p9329_p7, %p9328_p4 }
  0xd5   : > { %p9326_p3 = pneg %p9325_p2 }
  0xd7   : > { %p9331_p11 = pnand %p9330_p8, %p9326_p3 }
  0xd9   : > { %9334 = shalt.err (!%p9331_p11)
}
  0xda   : > { %8741 = dma.hbm_to_vmem [thread:$0]  (!%p9878_p12), %s9955_s8, 16, %s1196_s11, [#allocation12]  }
  0xdb   : > { %s1250_s9 = sshll.u32 %s9792_s25, 4  ;;  %s9579_s10 = smov [#allocation16]   ;;  %s9977_s9 = int_to_ptr.hbm [resolvable:$true] %s1250_s9 }
  0xdc   : > { %s1219_s22 = sshll.u32 %s9579_s10, 4  ;;  %s9350_s2 = sshra.s32 %s9966_s15, 4  ;;  %s1220_s22 = int_to_ptr.vmem [resolvable:$true] %s1219_s22  ;;  %s9351_s2 = int_to_ptr.hbm [resolvable:$true] %s9350_s2 }
  0xdd   : > { %s9352_s16 = scalar_lea.hbm %s9351_s2, 1  ;;  %s9357_s28 = scalar_lea.hbm %s9767_s30, 1 }
  0xde   : > { %p9353_p13 = scmp.ne.s32.totalorder %s9351_s2, %s9352_s16  ;;  %p9358_p3 = scmp.lt.s32.totalorder %s9351_s2, %s9767_s30 }
  0xdf   : > { %p9359_p4 = scmp.lt.s32.totalorder %s9357_s28, %s9352_s16 }
  0xe0   : > { %p9355_p1 = pnand %p9353_p13, %p9889_p0 }
  0xe1   : > { %p9360_p7 = por %p9359_p4, %p9358_p3 }
  0xe2   : > { %p9356_p2 = pneg %p9355_p1 }
  0xe4   : > { %p9361_p8 = pnand %p9360_p7, %p9356_p2 }
  0xe6   : > { %9364 = shalt.err (!%p9361_p8)
}
  0xe7   : > { %8747 = dma.hbm_to_vmem [thread:$0]  (!%p9878_p12), %s9966_s15, 16, %s1220_s22, [#allocation15]  }
  0xe8   : > { %s9580_s8 = smov [#allocation19]   ;;  %s1274_s1 = sshll.u32 %s12042_s19, 4  ;;  %s1275_s1 = int_to_ptr.hbm [resolvable:$true] %s1274_s1 }
  0xe9   : > { %s1252_s11 = sshll.u32 %s9580_s8, 4  ;;  %s9380_s10 = sshra.s32 %s9977_s9, 4  ;;  %s1253_s11 = int_to_ptr.vmem [resolvable:$true] %s1252_s11  ;;  %s9381_s10 = int_to_ptr.hbm [resolvable:$true] %s9380_s10 }
  0xea   : > { %s9382_s2 = scalar_lea.hbm %s9381_s10, 1  ;;  %s9387_s16 = scalar_lea.hbm %s9792_s25, 1 }
  0xeb   : > { %p9383_p11 = scmp.ne.s32.totalorder %s9381_s10, %s9382_s2  ;;  %p9388_p2 = scmp.lt.s32.totalorder %s9381_s10, %s9792_s25 }
  0xec   : > { %p9389_p3 = scmp.lt.s32.totalorder %s9387_s16, %s9382_s2 }
  0xed   : > { %p9385_p13 = pnand %p9383_p11, %p9889_p0 }
  0xee   : > { %p9390_p4 = por %p9389_p3, %p9388_p2 }
  0xef   : > { %p9386_p1 = pneg %p9385_p13 }
  0xf1   : > { %p9391_p7 = pnand %p9390_p4, %p9386_p1 }
  0xf3   : > { %9394 = shalt.err (!%p9391_p7)
}
  0xf4   : > { %8753 = dma.hbm_to_vmem [thread:$0]  (!%p9878_p12), %s9977_s9, 16, %s1253_s11, [#allocation18]  }
  0xf5   : > { %s9581_s15 = smov [#allocation22]   ;;  %s9410_s28 = sshra.s32 %s1275_s1, 4  ;;  %s9411_s28 = int_to_ptr.hbm [resolvable:$true] %s9410_s28 }
  0xf6   : > { %s1276_s22 = sshll.u32 %s9581_s15, 4  ;;  %s9412_s8 = scalar_lea.hbm %s9411_s28, 1  ;;  %s1277_s22 = int_to_ptr.vmem [resolvable:$true] %s1276_s22 }
  0xf7   : > { %p9413_p8 = scmp.ne.s32.totalorder %s9411_s28, %s9412_s8  ;;  %s9417_s10 = scalar_lea.hbm %s12042_s19, 1 }
  0xf8   : > { %p9418_p1 = scmp.lt.s32.totalorder %s9411_s28, %s12042_s19  ;;  %p9419_p2 = scmp.lt.s32.totalorder %s9417_s10, %s9412_s8 }
  0xf9   : > { %p9415_p11 = pnand %p9413_p8, %p9889_p0 }
  0xfa   : > { %p9420_p3 = por %p9419_p2, %p9418_p1 }
  0xfb   : > { %p9416_p13 = pneg %p9415_p11 }
  0xfd   : > { %p9421_p4 = pnand %p9420_p3, %p9416_p13 }
  0xff   : > { %9424 = shalt.err (!%p9421_p4)
}
 0x100   : > { %8759 = dma.hbm_to_vmem [thread:$0]  (!%p9878_p12), %s1275_s1, 16, %s1277_s22, [#allocation21]  }
 0x101   : > { %1314 = sbr.rel (%p9868_p10) target bundleno = 9275 (0x243b), region = 188 }
 0x106   : > { %9485 = dma.done.wait (%p8764_p9), [#allocation6], 16  }
 0x107   : > { %9487 = vsyncadd (%p8764_p9), [#allocation6], 4294967280 }
 0x108   : > { %9489 = dma.done.wait (%p8764_p9), [#allocation9], 32  }
 0x109   : > { %9491 = vsyncadd (%p8764_p9), [#allocation9], 4294967264 }
 0x10a   : > { %9493 = dma.done.wait (%p8764_p9), [#allocation12], 32  }
 0x10b   : > { %9495 = vsyncadd (%p8764_p9), [#allocation12], 4294967264 }
 0x10c   : > { %9497 = dma.done.wait (%p8764_p9), [#allocation15], 32  }
 0x10d   : > { %9499 = vsyncadd (%p8764_p9), [#allocation15], 4294967264 }
 0x10e   : > { %9501 = dma.done.wait (%p8764_p9), [#allocation18], 32  }
 0x10f   : > { %9503 = vsyncadd (%p8764_p9), [#allocation18], 4294967264 }
 0x110   : > { %9505 = dma.done.wait (%p8764_p9), [#allocation21], 32  }
 0x111   : > { %9507 = vsyncadd (%p8764_p9), [#allocation21], 4294967264  ;;  %s12061_s5 = sld [smem:[#allocation31_spill]]  ;;  %p1480_p10 = scmp.lt.s32.totalorder %s9840_s0, 1  ;;  %vm1498_vm0 = vcmask 64512   ;;  %v1509_v0 = vld [vmem:[%s12043_s17 + $0x10] sm:$0xff] }
 0x112   : > { %1601 = vmatpush.msra.mxu2 %v1509_v0  ;;  %v1508_v3 = vld [vmem:[%s12043_s17 + $0x8] sm:$0xff]  ;;  %v1507_v4 = vld [vmem:[%s12043_s17] sm:$0xff]  ;;  %vm1576_vm1 = vcmask 1046528   ;;  %vm1542_vm2 = vcmask 1040384   ;;  %v1704_v19 = vld [vmem:[%s12047_s3 + $0x18] sm:$0xff]  ;;  %s12062_s9 = sld [smem:[#allocation38_spill]] }
 0x113   : > { %s10030_s26 = scalar_select %p1480_p10, %s9840_s0, 1  ;;  %1531 = vmatpush.msra.mxu0 %v1508_v3  ;;  %1567 = vmatpush.msra.mxu1 %v1507_v4  ;;  %v1703_v20 = vld [vmem:[%s12047_s3 + $0x10] sm:$0xff]  ;;  %v1702_v21 = vld [vmem:[%s12047_s3 + $0x8] sm:$0xff]  ;;  %v1701_v22 = vld [vmem:[%s12047_s3] sm:$0xff]  ;;  %vm1714_vm3 = vcmask 261120   ;;  %vm1783_vm4 = vcmask 130048  }
 0x114   : > { %v1611_v27 = vld [vmem:[%s9622_s21] sm:$0xff]  ;;  %v1612_v34 = vld [vmem:[%s9622_s21 + $0x8] sm:$0xff]  ;;  %s11984_s11 = smov 96   ;;  %s12063_s1 = sld [smem:[#allocation32_spill]] }
 0x115   : > { %s8677_s18 = sshll.u32 %s10030_s26, 4  ;;  %1733 = vmatpush.msrb.mxu1 %v1704_v19  ;;  %s12064_s2 = sld [smem:[#allocation35_spill]] }
 0x116   : > { %s11982_s16 = smov 64   ;;  %s11978_s15 = smov 120  }
 0x117   : > { %s1484_s7 = scalar_lea.vmem %s12061_s5, %s8677_s18  ;;  %1734 = vmatpush.msrb.mxu1 %v1703_v20  ;;  %s11976_s22 = smov 80  }
 0x118   : > { %v1496_v1 = vld [vmem:[%s1484_s7] sm:$0xff]  ;;  %v1497_v2 = vld [vmem:[%s1484_s7 + $0x8] sm:$0xff]  ;;  %s11966_s28 = smov 72   ;;  %s11974_s8 = smov 112  }
 0x119   : > { %1499 = vst.msk [vmem:[#allocation2] sm:$0xff] %vm1498_vm0, %v1496_v1  ;;  %8136 = vmatmul.msk.f32.vlgmr.msra.gmra.mxu0 %vm1498_vm0, %v1496_v1  ;;  %1735 = vmatpush.msrb.mxu1 %v1702_v21  ;;  %v8955_v38 = vld [vmem:[%s12062_s9] ss:$0 sm:$0xff]  ;;  %s11963_s10 = sshll.u32 %s10030_s26, 3  ;;  %s11980_s7 = smov 88  }
 0x11a   : > { %1500 = vst.msk [vmem:[#allocation2 + $0x8] sm:$0xff] %vm1498_vm0, %v1497_v2  ;;  %s1488_s18 = scalar_lea.vmem %s12063_s1, %s11963_s10  ;;  %s11972_s1 = smov 104  }
 0x11b   : > { %1501 = vst.msk [vmem:[#allocation2 + $0x10] sm:$0xff] %vm1498_vm0, %v1496_v1  ;;  %1736 = vmatpush.msrb.mxu1 %v1701_v22  ;;  %v1621_v43 = vld [vmem:[%s12064_s2 + $0x8] sm:$0xff]  ;;  %v1620_v44 = vld [vmem:[%s12064_s2] sm:$0xff]  ;;  %v1622_v57 = vld [vmem:[%s12064_s2 + $0x10] sm:$0xff]  ;;  %s11964_s10 = smov 56   ;;  %s12089_s5 = smov 120  }
 0x11c   : > { %1502 = vst.msk [vmem:[#allocation2 + $0x18] sm:$0xff] %vm1498_vm0, %v1497_v2  ;;  %1641 = vmatpush.msra.mxu3 %v1621_v43  ;;  %v1615_v45 = vld [vmem:[%s1488_s18] sm:$0xff]  ;;  %1693 = vmatpush.msrb.mxu0 %v1622_v57  ;;  %s12065_s18 = sld [smem:[#allocation39_spill]]  ;;  %s12090_s6 = smov 80  }
 0x11d   : > { %1616 = vst.msk [vmem:[#allocation3] sm:$0xff] %vm1498_vm0, %v1615_v45  ;;  %8142 = vmatmul.msk.f32.vlgmr.msra.gmra.mxu3 %vm1498_vm0, %v1615_v45  ;;  %s12092_s12 = smov 104   ;;  %s12093_s13 = smov 72  }
 0x11e   : > { %1668 = vmatpush.msrb.mxu3 %v1620_v44  ;;  %1617 = vst.msk [vmem:[#allocation3 + $0x8] sm:$0xff] %vm1498_vm0, %v1615_v45  ;;  %s12094_s17 = smov 56   ;;  %s12095_s19 = smov 48  }
 0x11f   : > { %s12096_s20 = smov 40  }
 0x120   : > { %v1503_v5 = vld [vmem:[#allocation2] sm:$0xff] }
 0x121   : > { %v1504_v6 = vld [vmem:[#allocation2 + $0x8] sm:$0xff]  ;;  %v1577_v7 = vrot.slane %v1503_v5, 1  ;;  %8137 = vmatmul.msk.f32.gmra.mxu0 %vm1498_vm0, %v1497_v2 }
 0x122   : > { %v1578_v8 = vrot.slane %v1504_v6, 1  ;;  %v1505_v9 = vld [vmem:[#allocation2 + $0x10] sm:$0xff]  ;;  %v1543_v10 = vrot.slane %v1504_v6, 7 }
 0x123   : > { %v1544_v11 = vrot.slane %v1505_v9, 7  ;;  %v1506_v13 = vld [vmem:[#allocation2 + $0x18] sm:$0xff]  ;;  %v1580_v15 = vrot.slane %v1505_v9, 1 }
 0x124   : > { %v1579_v12 = vsel %vm1576_vm1, %v1577_v7, %v1578_v8  ;;  %v1546_v16 = vrot.slane %v1506_v13, 7  ;;  %v1618_v5 = vld [vmem:[#allocation3] sm:$0xff] }
 0x125   : > { %8140 = vmatmul.msk.f32.vlgmr.msra.gmra.mxu2 %vm1498_vm0, %v1579_v12  ;;  %v1545_v14 = vsel %vm1542_vm2, %v1543_v10, %v1544_v11  ;;  %v1581_v17 = vsel %vm1576_vm1, %v1578_v8, %v1580_v15  ;;  %v1619_v6 = vld [vmem:[#allocation3 + $0x8] sm:$0xff]  ;;  %v1648_v7 = vrot.slane %v1618_v5, 7  ;;  %v1673_v10 = vrot.slane %v1618_v5, 1  ;;  %v1706_v13 = vld [vmem:[%s12065_s18] sm:$0xff] }
 0x126   : > { %8138 = vmatmul.msk.f32.vlgmr.msra.gmra.mxu1 %vm1498_vm0, %v1545_v14  ;;  %v1547_v18 = vsel %vm1542_vm2, %v1544_v11, %v1546_v16  ;;  %v1649_v8 = vrot.slane %v1619_v6, 7  ;;  %v1674_v11 = vrot.slane %v1619_v6, 1 }
 0x128   : > { %v1650_v9 = vsel %vm1542_vm2, %v1648_v7, %v1649_v8  ;;  %v1675_v12 = vsel %vm1576_vm1, %v1673_v10, %v1674_v11 }
 0x129   : > { %8143 = vmatmul.msk.f32.vlgmr.msrb.gmra.mxu3 %vm1498_vm0, %v1650_v9  ;;  %8144 = vmatmul.msk.f32.vlgmr.msrb.gmra.mxu0 %vm1498_vm0, %v1675_v12 }
 0x12d   : > { %8141 = vmatmul.msk.f32.gmra.mxu2 %vm1498_vm0, %v1581_v17 }
 0x12e   : > { %8139 = vmatmul.msk.f32.gmra.mxu1 %vm1498_vm0, %v1547_v18 }
 0x196   : > { %v1533_v23 = vpop.f32.mrf.mxu0 }
 0x19e   : > { %v1536_v29 = vpop.f32.mrf.mxu0 }
 0x1a3   : > { %v1569_v24 = vpop.f32.mrf.mxu1 }
 0x1a4   : > { %v1570_v25 = vadd.f32 %v1569_v24, %v1533_v23 }
 0x1a8   : > { %v1603_v26 = vpop.f32.mrf.mxu2 }
 0x1a9   : > { %v1609_v28 = vadd.f32 %v1603_v26, %v1570_v25 }
 0x1ab   : > { %v10056_v30 = vadd.f32 %v1611_v27, %v1609_v28  ;;  %v1572_v31 = vpop.f32.mrf.mxu1 }
 0x1ac   : > { %v1573_v32 = vadd.f32 %v1572_v31, %v1536_v29 }
 0x1ad   : > { %8145 = vmatmul.msk.f32.vlgmr.msrb.gmra.mxu1 %vm1714_vm3, %v10056_v30 }
 0x1b0   : > { %v1606_v33 = vpop.f32.mrf.mxu2 }
 0x1b1   : > { %v1610_v35 = vadd.f32 %v1606_v33, %v1573_v32 }
 0x1b3   : > { %v10061_v36 = vadd.f32 %v1612_v34, %v1610_v35 }
 0x1b5   : > { %8146 = vmatmul.msk.f32.gmra.mxu1 %vm1714_vm3, %v10061_v36 }
 0x22a   : > { %v1738_v37 = vpop.f32.mrf.mxu1 }
 0x22b   : > { %v10070_v41 = vadd.f32 %v8955_v38, %v1738_v37 }
 0x232   : > { %v1741_v39 = vpop.f32.mrf.mxu1 }
 0x233   : > { %v10066_v40 = vadd.f32 %v8955_v38, %v1741_v39 }
 0x235   : > { %1748 = vrot.lane.b32.xlu0 %v10066_v40, %s11984_s11  ;;  %v10076_v42 = vpack.i.bf16 %v10070_v41, %v10066_v40 }
 0x23d   : > { %1746 = vrot.lane.b32.xlu0 %v10070_v41, %s11984_s11 }
 0x245   : > { %8886 = vrot.lane.b32.xlu0 %v10076_v42, %s11982_s16 }
 0x24d   : > { %1867 = vrot.lane.b32.xlu0 %v10070_v41, %s11978_s15 }
 0x255   : > { %1869 = vrot.lane.b32.xlu0 %v10066_v40, %s11978_s15 }
 0x25d   : > { %2055 = vrot.lane.b32.xlu0 %v10066_v40, %s11976_s22 }
 0x265   : > { %2208 = vrot.lane.b32.xlu0 %v10070_v41, %s11966_s28 }
 0x26d   : > { %2051 = vrot.lane.b32.xlu0 %v10066_v40, %s11974_s8 }
 0x2a7   : > { %v1749_v46 = vpop.permute.xlu0 %1748 }
 0x2a8   : > { %8147 = vmatpush.xpose.msk.msrb.mxu2 %vm1498_vm0, %v1749_v46 }
 0x2af   : > { %v1747_v47 = vpop.permute.xlu0 %1746 }
 0x2b0   : > { %8148 = vmatpush.xpose.msk.msrb.mxu2 %vm1498_vm0, %v1747_v47 }
 0x2b3   : > { %8149 = vmatmul.msk.f32.vlgmr.msrb.gmra.mxu2 %vm1498_vm0, %v10070_v41 }
 0x2b7   : > { %v8887_v48 = vpop.permute.xlu0 %8886 }
 0x2b8   : > { %v8888_v49 = vunpack.i.l.bf16 %v8887_v48  ;;  %v8889_v50 = vunpack.i.h.bf16 %v8887_v48 }
 0x2ba   : > { %1858 = vmatpush.msra.mxu3 %v8888_v49 }
 0x2bb   : > { %8150 = vmatmul.msk.f32.gmra.mxu2 %vm1498_vm0, %v10066_v40 }
 0x2bc   : > { %1859 = vmatpush.msra.mxu3 %v8889_v50  ;;  %v10145_v50 = vpop.f32.mrf.mxu3 }
 0x2be   : > { %2041 = vmatpush.msrb.mxu3 %v1706_v13 }
 0x2bf   : > { %v1868_v14 = vpop.permute.xlu0 %1867 }
 0x2c7   : > { %v1870_v17 = vpop.permute.xlu0 %1869 }
 0x2cf   : > { %v2056_v31 = vpop.permute.xlu0 %2055 }
 0x2d7   : > { %v2209_v47 = vpop.permute.xlu0 %2208 }
 0x2df   : > { %v2052_v49 = vpop.permute.xlu0 %2051 }
 0x336   : > { %v1775_v51 = vpop.f32.mrf.mxu2 }
 0x337   : > { %v1781_v52 = vmul.f32 0.35355338, %v1775_v51  ;;  %v10147_v51 = vpop.f32.mrf.mxu0 }
 0x339   : > { %v1784_v53 = vsel %vm1783_vm4, %v1781_v52, -inf }
 0x33a   : > { %1785 = vmax.xlane.f32.xlu1 %v1784_v53 }
 0x33e   : > { %v1778_v54 = vpop.f32.mrf.mxu2 }
 0x33f   : > { %v1782_v55 = vmul.f32 0.35355338, %v1778_v54 }
 0x341   : > { %v1787_v56 = vsel %vm1783_vm4, %v1782_v55, -inf }
 0x342   : > { %1788 = vmax.xlane.f32.xlu1 %v1787_v56 }
 0x35b   : > { %1873 = vrot.lane.b32.xlu1 %v10066_v40, %s11980_s7 }
 0x363   : > { %2053 = vrot.lane.b32.xlu1 %v10070_v41, %s11976_s22  ;;  %s12074_s22 = sld [smem:[#allocation42_spill]] }
 0x369   : > { %s12075_s15 = smov %s12074_s22 }
 0x36b   : > { %2204 = vrot.lane.b32.xlu1 %v10070_v41, %s11972_s1 }
 0x3ad   : > { %v1786_v58 = vpop.xlane.xlu1 %1785 }
 0x3ae   : > { %v1790_v59 = vsub.f32 %v1781_v52, %v1786_v58  ;;  %v10149_v52 = vpop.f32.mrf.mxu3 }
 0x3b0   : > { %v1792_v60 = vmul.f32 1.442695, %v1790_v59 }
 0x3b2   : > { %8984 = vpow2.f32 %v1792_v60 }
 0x3b5   : > { %v1789_v61 = vpop.xlane.xlu1 %1788 }
 0x3b6   : > { %v1791_v62 = vsub.f32 %v1782_v55, %v1789_v61 }
 0x3b8   : > { %v8985_v63 = vpop.eup %8984  ;;  %v1794_v0 = vmul.f32 1.442695, %v1791_v62 }
 0x3b9   : > { %v1796_v1 = vsel %vm1783_vm4, %v8985_v63, 0.0 }
 0x3ba   : > { %8986 = vpow2.f32 %v1794_v0  ;;  %1797 = vadd.xlane.f32.xlu2 %v1796_v1 }
 0x3c0   : > { %v10115_v2 = vpop.eup %8986 }
 0x3c1   : > { %v1799_v3 = vsel %vm1783_vm4, %v10115_v2, 0.0 }
 0x3c2   : > { %1800 = vadd.xlane.f32.xlu2 %v1799_v3 }
 0x3cd   : > { %v1874_v4 = vpop.permute.xlu1 %1873 }
 0x3ce   : > { %8153 = vmatpush.xpose.msk.msra.mxu0 %vm1498_vm0, %v1874_v4 }
 0x3d5   : > { %v2054_v39 = vpop.permute.xlu1 %2053 }
 0x3da   : > { %1871 = vrot.lane.b32.xlu2 %v10070_v41, %s11980_s7 }
 0x3dd   : > { %v2205_v0 = vpop.permute.xlu1 %2204 }
 0x3e2   : > { %2210 = vrot.lane.b32.xlu2 %v10066_v40, %s11966_s28  ;;  %s11968_s28 = smov 40  }
 0x3ea   : > { %2049 = vrot.lane.b32.xlu2 %v10070_v41, %s11974_s8 }
 0x3f2   : > { %2206 = vrot.lane.b32.xlu2 %v10066_v40, %s11972_s1 }
 0x42d   : > { %v1798_v15 = vpop.xlane.xlu2 %1797 }
 0x42e   : > { %8988 = vrcp.f32 %v1798_v15  ;;  %v1813_v21 = vand.u32 2147483648, %v1798_v15  ;;  %v1811_v23 = vand.u32 2147483647, %v1798_v15  ;;  %vm1807_vm6 = vweird.f32 %v1798_v15 }
 0x430   : > { %v1814_v26 = vor.u32 1.1754944e-38, %v1813_v21  ;;  %vm1812_vm8 = vcmp.eq.f32.partialorder %v1811_v23, 8.507059e+37 }
 0x434   : > { %v8989_v16 = vpop.eup %8988 }
 0x435   : > { %v1803_v18 = vmul.f32 %v8989_v16, %v1798_v15  ;;  %v1801_v19 = vpop.xlane.xlu2 %1800  ;;  %vm1808_vm5 = vweird.f32 %v8989_v16 }
 0x436   : > { %8990 = vrcp.f32 %v1801_v19  ;;  %vm1809_vm7 = vmor %vm1807_vm6, %vm1808_vm5  ;;  %v1828_v35 = vand.u32 2147483648, %v1801_v19  ;;  %v1826_v38 = vand.u32 2147483647, %v1801_v19  ;;  %vm1822_vm10 = vweird.f32 %v1801_v19 }
 0x437   : > { %v1804_v20 = vsub.f32 1.0, %v1803_v18 }
 0x438   : > { %v1829_v41 = vor.u32 1.1754944e-38, %v1828_v35  ;;  %vm1827_vm12 = vcmp.eq.f32.partialorder %v1826_v38, 8.507059e+37 }
 0x439   : > { %v1805_v22 = vmul.f32 %v8989_v16, %v1804_v20 }
 0x43b   : > { %v1806_v24 = vadd.f32 %v8989_v16, %v1805_v22 }
 0x43c   : > { %v8991_v25 = vpop.eup %8990 }
 0x43d   : > { %v1810_v27 = vsel %vm1809_vm7, %v8989_v16, %v1806_v24  ;;  %v1818_v28 = vmul.f32 %v8991_v25, %v1801_v19  ;;  %v1872_v29 = vpop.permute.xlu2 %1871  ;;  %vm1823_vm9 = vweird.f32 %v8991_v25 }
 0x43e   : > { %v1815_v32 = vsel %vm1812_vm8, %v1814_v26, %v1810_v27  ;;  %8154 = vmatpush.xpose.msk.msra.mxu0 %vm1498_vm0, %v1872_v29  ;;  %vm1824_vm11 = vmor %vm1822_vm10, %vm1823_vm9 }
 0x43f   : > { %v1819_v33 = vsub.f32 1.0, %v1818_v28  ;;  %v1816_v34 = vmul.f32 %v8985_v63, %v1815_v32 }
 0x441   : > { %v1820_v37 = vmul.f32 %v8991_v25, %v1819_v33  ;;  %8151 = vmatmul.msk.f32.vlgmr.msra.gmra.mxu3 %vm1783_vm4, %v1816_v34  ;;  %8155 = vmatmul.msk.f32.vlgmr.msra.gmra.mxu0 %vm1498_vm0, %v1868_v14 }
 0x442   : > { %8163 = vmatpush.xpose.msk.msrb.mxu0 %vm1498_vm0, %v2056_v31 }
 0x443   : > { %v1821_v40 = vadd.f32 %v8991_v25, %v1820_v37 }
 0x445   : > { %v2211_v43 = vpop.permute.xlu2 %2210  ;;  %v1825_v44 = vsel %vm1824_vm11, %v8991_v25, %v1821_v40 }
 0x446   : > { %8164 = vmatpush.xpose.msk.msrb.mxu0 %vm1498_vm0, %v2054_v39  ;;  %8171 = vmatpush.xpose.msk.msra.mxu3 %vm1498_vm0, %v2211_v43  ;;  %v1830_v45 = vsel %vm1827_vm12, %v1829_v41, %v1825_v44 }
 0x447   : > { %v1831_v46 = vmul.f32 %v10115_v2, %v1830_v45 }
 0x449   : > { %8152 = vmatmul.msk.f32.gmra.mxu3 %vm1783_vm4, %v1831_v46  ;;  %8156 = vmatmul.msk.f32.gmra.mxu0 %vm1498_vm0, %v1870_v17 }
 0x44a   : > { %8172 = vmatpush.xpose.msk.msra.mxu3 %vm1498_vm0, %v2209_v47 }
 0x44d   : > { %v2050_v48 = vpop.permute.xlu2 %2049 }
 0x451   : > { %8165 = vmatmul.msk.f32.vlgmr.msrb.gmra.mxu0 %vm1498_vm0, %v2050_v48 }
 0x455   : > { %v2207_v4 = vpop.permute.xlu2 %2206 }
 0x459   : > { %8166 = vmatmul.msk.f32.gmra.mxu0 %vm1498_vm0, %v2052_v49 }
 0x4be   : > { %v1900_v53 = vpop.f32.mrf.mxu0 }
 0x4bf   : > { %v1906_v54 = vmul.f32 0.35355338, %v1900_v53 }
 0x4c1   : > { %v1908_v55 = vsel %vm1783_vm4, %v1906_v54, -inf }
 0x4c2   : > { %1909 = vmax.xlane.f32.xlu1 %v1908_v55 }
 0x4c4   : > { %v1861_v56 = vpop.f32.mrf.mxu3 }
 0x4c5   : > { %8161 = vmatmul.msk.f32.vlgmr.msrb.gmra.mxu3 %vm1498_vm0, %v1861_v56 }
 0x4c6   : > { %v1903_v57 = vpop.f32.mrf.mxu0 }
 0x4c7   : > { %v1907_v58 = vmul.f32 0.35355338, %v1903_v57 }
 0x4c9   : > { %v1911_v59 = vsel %vm1783_vm4, %v1907_v58, -inf }
 0x4ca   : > { %1912 = vmax.xlane.f32.xlu0 %v1911_v59 }
 0x4cc   : > { %v1864_v60 = vpop.f32.mrf.mxu3 }
 0x4cd   : > { %8162 = vmatmul.msk.f32.gmra.mxu3 %vm1498_vm0, %v1864_v60 }
 0x4ce   : > { %v2082_v61 = vpop.f32.mrf.mxu0 }
 0x4cf   : > { %v2088_v62 = vmul.f32 0.35355338, %v2082_v61 }
 0x4d1   : > { %v2090_v63 = vsel %vm1783_vm4, %v2088_v62, -inf }
 0x4d2   : > { %2091 = vmax.xlane.f32.xlu2 %v2090_v63 }
 0x4d5   : > { %8173 = vmatmul.msk.f32.vlgmr.msra.gmra.mxu3 %vm1498_vm0, %v2205_v0 }
 0x4d6   : > { %v2085_v1 = vpop.f32.mrf.mxu0 }
 0x4d7   : > { %v2089_v2 = vmul.f32 0.35355338, %v2085_v1 }
 0x4d9   : > { %v2093_v3 = vsel %vm1783_vm4, %v2089_v2, -inf }
 0x4da   : > { %2094 = vmax.xlane.f32.xlu1 %v2093_v3 }
 0x4dd   : > { %8174 = vmatmul.msk.f32.gmra.mxu3 %vm1498_vm0, %v2207_v4 }
 0x535   : > { %v1910_v5 = vpop.xlane.xlu1 %1909 }
 0x536   : > { %v1914_v6 = vsub.f32 %v1906_v54, %v1910_v5 }
 0x538   : > { %v1916_v7 = vmul.f32 1.442695, %v1914_v6 }
 0x53a   : > { %8992 = vpow2.f32 %v1916_v7 }
 0x53d   : > { %v1913_v11 = vpop.xlane.xlu0 %1912 }
 0x53e   : > { %v1915_v13 = vsub.f32 %v1907_v58, %v1913_v11 }
 0x540   : > { %v8993_v8 = vpop.eup %8992  ;;  %v1918_v14 = vmul.f32 1.442695, %v1915_v13 }
 0x541   : > { %v1920_v9 = vsel %vm1783_vm4, %v8993_v8, 0.0 }
 0x542   : > { %1921 = vadd.xlane.f32.xlu1 %v1920_v9  ;;  %8994 = vpow2.f32 %v1918_v14  ;;  %v1707_v14 = vld [vmem:[%s12065_s18 + $0x8] sm:$0xff] }
 0x543   : > { %2012 = vmatpush.msra.mxu2 %v1707_v14 }
 0x545   : > { %v2092_v15 = vpop.xlane.xlu2 %2091 }
 0x546   : > { %v2096_v18 = vsub.f32 %v2088_v62, %v2092_v15 }
 0x548   : > { %v10160_v10 = vpop.f32.mrf.mxu3  ;;  %v2098_v22 = vmul.f32 1.442695, %v2096_v18  ;;  %v10167_v24 = vpop.eup %8994 }
 0x549   : > { %v1923_v27 = vsel %vm1783_vm4, %v10167_v24, 0.0 }
 0x54a   : > { %8996 = vpow2.f32 %v2098_v22 }
 0x54d   : > { %v2095_v16 = vpop.xlane.xlu1 %2094 }
 0x54e   : > { %v2097_v20 = vsub.f32 %v2089_v2, %v2095_v16 }
 0x550   : > { %v10162_v12 = vpop.f32.mrf.mxu3  ;;  %v2100_v23 = vmul.f32 1.442695, %v2097_v20  ;;  %v10172_v29 = vpop.eup %8996 }
 0x551   : > { %v2102_v33 = vsel %vm1783_vm4, %v10172_v29, 0.0 }
 0x552   : > { %8998 = vpow2.f32 %v2100_v23 }
 0x558   : > { %v2237_v17 = vpop.f32.mrf.mxu3  ;;  %v10174_v31 = vpop.eup %8998 }
 0x559   : > { %v2243_v19 = vmul.f32 0.35355338, %v2237_v17  ;;  %v2105_v32 = vsel %vm1783_vm4, %v10174_v31, 0.0 }
 0x55b   : > { %8891 = vrot.lane.b32.xlu1 %v10076_v42, %s11964_s10  ;;  %v2245_v21 = vsel %vm1783_vm4, %v2243_v19, -inf  ;;  %s11970_s10 = smov 48  }
 0x55c   : > { %2246 = vmax.xlane.f32.xlu2 %v2245_v21 }
 0x560   : > { %v2240_v25 = vpop.f32.mrf.mxu3 }
 0x561   : > { %v2244_v26 = vmul.f32 0.35355338, %v2240_v25 }
 0x563   : > { %v2248_v28 = vsel %vm1783_vm4, %v2244_v26, -inf }
 0x564   : > { %1924 = vadd.xlane.f32.xlu2 %v1923_v27  ;;  %2249 = vmax.xlane.f32.xlu0 %v2248_v28 }
 0x56c   : > { %2106 = vadd.xlane.f32.xlu2 %v2105_v32  ;;  %2103 = vadd.xlane.f32.xlu0 %v2102_v33 }
 0x5b5   : > { %v1922_v34 = vpop.xlane.xlu1 %1921 }
 0x5b6   : > { %9000 = vrcp.f32 %v1922_v34  ;;  %v1937_v41 = vand.u32 2147483648, %v1922_v34  ;;  %vm1931_vm14 = vweird.f32 %v1922_v34  ;;  %v1935_v43 = vand.u32 2147483647, %v1922_v34 }
 0x5b8   : > { %v1938_v45 = vor.u32 1.1754944e-38, %v1937_v41  ;;  %vm1936_vm5 = vcmp.eq.f32.partialorder %v1935_v43, 8.507059e+37 }
 0x5bc   : > { %v9001_v35 = vpop.eup %9000 }
 0x5bd   : > { %v1927_v37 = vmul.f32 %v9001_v35, %v1922_v34  ;;  %vm1932_vm13 = vweird.f32 %v9001_v35 }
 0x5be   : > { %vm1933_vm15 = vmor %vm1931_vm14, %vm1932_vm13 }
 0x5bf   : > { %v1928_v38 = vsub.f32 1.0, %v1927_v37 }
 0x5c1   : > { %v1929_v39 = vmul.f32 %v9001_v35, %v1928_v38 }
 0x5c3   : > { %v1930_v40 = vadd.f32 %v9001_v35, %v1929_v39 }
 0x5c5   : > { %v1934_v44 = vsel %vm1933_vm15, %v9001_v35, %v1930_v40 }
 0x5c6   : > { %v1939_v47 = vsel %vm1936_vm5, %v1938_v45, %v1934_v44 }
 0x5c7   : > { %v1940_v55 = vmul.f32 %v8993_v8, %v1939_v47 }
 0x5cd   : > { %v8892_v46 = vpop.permute.xlu1 %8891 }
 0x5ce   : > { %v8893_v48 = vunpack.i.l.bf16 %v8892_v46  ;;  %v8894_v53 = vunpack.i.h.bf16 %v8892_v46 }
 0x5cf   : > { %v2247_v49 = vpop.xlane.xlu2 %2246 }
 0x5d0   : > { %v2251_v54 = vsub.f32 %v2243_v19, %v2247_v49  ;;  %1982 = vmatpush.msra.mxu1 %v8893_v48 }
 0x5d2   : > { %v2253_v56 = vmul.f32 1.442695, %v2251_v54  ;;  %1983 = vmatpush.msra.mxu1 %v8894_v53 }
 0x5d3   : > { %8157 = vmatmul.msk.f32.vlgmr.msra.gmra.mxu1 %vm1783_vm4, %v1940_v55 }
 0x5d4   : > { %9002 = vpow2.f32 %v2253_v56 }
 0x5d7   : > { %v1925_v57 = vpop.xlane.xlu2 %1924  ;;  %v2250_v58 = vpop.xlane.xlu0 %2249 }
 0x5d8   : > { %9004 = vrcp.f32 %v1925_v57  ;;  %v2252_v59 = vsub.f32 %v2244_v26, %v2250_v58  ;;  %v1952_v3 = vand.u32 2147483648, %v1925_v57  ;;  %v1950_v6 = vand.u32 2147483647, %v1925_v57 }
 0x5d9   : > { %vm1946_vm7 = vweird.f32 %v1925_v57 }
 0x5da   : > { %v10181_v60 = vpop.eup %9002  ;;  %v2255_v61 = vmul.f32 1.442695, %v2252_v59  ;;  %v1953_v8 = vor.u32 1.1754944e-38, %v1952_v3  ;;  %vm1951_vm9 = vcmp.eq.f32.partialorder %v1950_v6, 8.507059e+37 }
 0x5db   : > { %v2257_v62 = vsel %vm1783_vm4, %v10181_v60, 0.0 }
 0x5dc   : > { %9006 = vpow2.f32 %v2255_v61  ;;  %2258 = vadd.xlane.f32.xlu0 %v2257_v62 }
 0x5de   : > { %v9005_v63 = vpop.eup %9004 }
 0x5df   : > { %v1942_v0 = vmul.f32 %v9005_v63, %v1925_v57  ;;  %vm1947_vm6 = vweird.f32 %v9005_v63  ;;  %v2104_v15 = vpop.xlane.xlu0 %2103  ;;  %v10196_v17 = vpop.xlane.xlu2 %2106 }
 0x5e0   : > { %vm1948_vm8 = vmor %vm1946_vm7, %vm1947_vm6  ;;  %9008 = vrcp.f32 %v2104_v15  ;;  %vm2113_vm12 = vweird.f32 %v2104_v15  ;;  %v2119_v37 = vand.u32 2147483648, %v2104_v15  ;;  %v2117_v39 = vand.u32 2147483647, %v2104_v15 }
 0x5e1   : > { %v1943_v1 = vsub.f32 1.0, %v1942_v0  ;;  %9010 = vrcp.f32 %v10196_v17  ;;  %v2134_v3 = vand.u32 2147483648, %v10196_v17 }
 0x5e2   : > { %v10185_v2 = vpop.eup %9006  ;;  %v2120_v49 = vor.u32 1.1754944e-38, %v2119_v37  ;;  %vm2118_vm6 = vcmp.eq.f32.partialorder %v2117_v39, 8.507059e+37 }
 0x5e3   : > { %v1944_v4 = vmul.f32 %v9005_v63, %v1943_v1  ;;  %v2260_v5 = vsel %vm1783_vm4, %v10185_v2, 0.0  ;;  %v2135_v14 = vor.u32 1.1754944e-38, %v2134_v3 }
 0x5e4   : > { %2261 = vadd.xlane.f32.xlu2 %v2260_v5 }
 0x5e5   : > { %v1945_v7 = vadd.f32 %v9005_v63, %v1944_v4 }
 0x5e6   : > { %v9009_v16 = vpop.eup %9008 }
 0x5e7   : > { %v1949_v9 = vsel %vm1948_vm8, %v9005_v63, %v1945_v7  ;;  %v2109_v18 = vmul.f32 %v9009_v16, %v2104_v15  ;;  %v10200_v22 = vpop.eup %9010  ;;  %vm2114_vm10 = vweird.f32 %v9009_v16 }
 0x5e8   : > { %v1954_v11 = vsel %vm1951_vm9, %v1953_v8, %v1949_v9  ;;  %v2124_v26 = vmul.f32 %v10200_v22, %v10196_v17  ;;  %vm10204_vm13 = vmor %vm2113_vm12, %vm2114_vm10  ;;  %vm2129_vm8 = vweird.f32 %v10200_v22  ;;  %vm2128_vm10 = vweird.f32 %v10196_v17 }
 0x5e9   : > { %v1955_v13 = vmul.f32 %v10167_v24, %v1954_v11  ;;  %v2110_v21 = vsub.f32 1.0, %v2109_v18  ;;  %v1708_v18 = vld [vmem:[%s12065_s18 + $0x10] sm:$0xff] }
 0x5ea   : > { %v2125_v35 = vsub.f32 1.0, %v2124_v26  ;;  %2194 = vmatpush.msrb.mxu2 %v1708_v18 }
 0x5eb   : > { %8158 = vmatmul.msk.f32.gmra.mxu1 %vm1783_vm4, %v1955_v13 }
 0x5ec   : > { %v2126_v48 = vmul.f32 %v10200_v22, %v2125_v35 }
 0x5ee   : > { %v2127_v1 = vadd.f32 %v10200_v22, %v2126_v48 }
 0x5f0   : > { %8896 = vrot.lane.b32.xlu0 %v10076_v42, %s11970_s10 }
 0x5fc   : > { %8901 = vrot.lane.b32.xlu2 %v10076_v42, %s11968_s28  ;;  %v2111_v42 = vmul.f32 %v9009_v16, %v2110_v21  ;;  %s12068_s28 = sld [smem:[#allocation40_spill]] }
 0x5fe   : > { %v2112_v32 = vadd.f32 %v9009_v16, %v2111_v42 }
 0x600   : > { %v2116_v44 = vsel %vm10204_vm13, %v9009_v16, %v2112_v32  ;;  %vm2130_vm13 = vmor %vm2128_vm10, %vm2129_vm8 }
 0x601   : > { %v2121_v56 = vsel %vm2118_vm6, %v2120_v49, %v2116_v44  ;;  %v2131_v13 = vsel %vm2130_vm13, %v10200_v22, %v2127_v1 }
 0x602   : > { %v2122_v7 = vmul.f32 %v10172_v29, %v2121_v56  ;;  %s12069_s10 = smov %s12068_s28  ;;  %v8956_v26 = vld [vmem:[%s12068_s28] ss:$0 sm:$0xff]  ;;  %s12070_s28 = sld [smem:[#allocation43_spill]] }
 0x608   : > { %s12071_s1 = smov %s12070_s28 }
 0x609   : > { %v2461_v1 = vld [vmem:[%s12071_s1 + $0x100] sm:$0xff]  ;;  %v2462_v3 = vld [vmem:[%s12071_s1 + $0x108] sm:$0xff] }
 0x60a   : > { %v2482_v18 = vld [vmem:[%s12071_s1 + $0x1a8] sm:$0xff] }
 0x64f   : > { %v2259_v19 = vpop.xlane.xlu0 %2258 }
 0x650   : > { %9012 = vrcp.f32 %v2259_v19  ;;  %v1985_v20 = vpop.f32.mrf.mxu1  ;;  %v2274_v28 = vand.u32 2147483648, %v2259_v19  ;;  %v2272_v34 = vand.u32 2147483647, %v2259_v19  ;;  %vm2268_vm14 = vweird.f32 %v2259_v19 }
 0x651   : > { %8159 = vmatmul.msk.f32.vlgmr.msra.gmra.mxu2 %vm1498_vm0, %v1985_v20 }
 0x652   : > { %v2275_v43 = vor.u32 1.1754944e-38, %v2274_v28  ;;  %vm2273_vm5 = vcmp.eq.f32.partialorder %v2272_v34, 8.507059e+37 }
 0x656   : > { %v9013_v23 = vpop.eup %9012 }
 0x657   : > { %v2264_v24 = vmul.f32 %v9013_v23, %v2259_v19  ;;  %v2262_v25 = vpop.xlane.xlu2 %2261  ;;  %vm2269_vm11 = vweird.f32 %v9013_v23 }
 0x658   : > { %9014 = vrcp.f32 %v2262_v25  ;;  %vm2270_vm15 = vmor %vm2268_vm14, %vm2269_vm11  ;;  %v2289_v57 = vand.u32 2147483648, %v2262_v25  ;;  %v2287_v61 = vand.u32 2147483647, %v2262_v25  ;;  %vm2283_vm9 = vweird.f32 %v2262_v25 }
 0x659   : > { %v2265_v27 = vsub.f32 1.0, %v2264_v24 }
 0x65a   : > { %v2290_v6 = vor.u32 1.1754944e-38, %v2289_v57  ;;  %vm2288_vm12 = vcmp.eq.f32.partialorder %v2287_v61, 8.507059e+37  ;;  %v2477_v61 = vld [vmem:[%s12070_s28 + $0x180] sm:$0xff]  ;;  %s12072_s28 = sld [smem:[#allocation41_spill]] }
 0x65b   : > { %v2266_v33 = vmul.f32 %v9013_v23, %v2265_v27  ;;  %2804 = vmatpush.msra.mxu2 %v2477_v61  ;;  %v2488_v61 = vld [vmem:[%s12071_s1 + $0x1d8] sm:$0xff] }
 0x65d   : > { %v2267_v40 = vadd.f32 %v9013_v23, %v2266_v33  ;;  %2805 = vmatpush.msra.mxu2 %v2461_v1 }
 0x65e   : > { %v9015_v41 = vpop.eup %9014 }
 0x65f   : > { %v2271_v45 = vsel %vm2270_vm15, %v9013_v23, %v2267_v40  ;;  %v2279_v46 = vmul.f32 %v9015_v41, %v2262_v25  ;;  %v8902_v47 = vpop.permute.xlu2 %8901  ;;  %vm2284_vm7 = vweird.f32 %v9015_v41 }
 0x660   : > { %v2276_v53 = vsel %vm2273_vm5, %v2275_v43, %v2271_v45  ;;  %v8903_v54 = vunpack.i.l.bf16 %v8902_v47  ;;  %v8904_v58 = vunpack.i.h.bf16 %v8902_v47  ;;  %vm2285_vm11 = vmor %vm2283_vm9, %vm2284_vm7  ;;  %v9593_v43 = vmov 32.0   ;;  %s12073_s8 = smov %s12072_s28 }
 0x661   : > { %v2280_v55 = vsub.f32 1.0, %v2279_v46  ;;  %v2277_v0 = vmul.f32 %v10181_v60, %v2276_v53  ;;  %v2132_v60 = vand.u32 2147483647, %v10196_v17  ;;  %v1709_v17 = vld [vmem:[%s12065_s18 + $0x18] sm:$0xff]  ;;  %9016 = vrcp.f32 %v9593_v43 }
 0x662   : > { %2319 = vmatpush.msra.mxu0 %v8903_v54  ;;  %v8897_v59 = vpop.permute.xlu0 %8896 }
 0x663   : > { %v2281_v62 = vmul.f32 %v9015_v41, %v2280_v55  ;;  %v8898_v63 = vunpack.i.l.bf16 %v8897_v59  ;;  %v8899_v4 = vunpack.i.h.bf16 %v8897_v59  ;;  %vm2133_vm14 = vcmp.eq.f32.partialorder %v2132_v60, 8.507059e+37  ;;  %v2447_v60 = vld [vmem:[%s12071_s1 + $0x90] sm:$0xff] }
 0x664   : > { %2320 = vmatpush.msra.mxu0 %v8904_v58  ;;  %v2136_v15 = vsel %vm2133_vm14, %v2135_v14, %v2131_v13  ;;  %v2431_v13 = vld [vmem:[%s12071_s1 + $0x10] sm:$0xff]  ;;  %v2432_v14 = vld [vmem:[%s12071_s1 + $0x18] sm:$0xff] }
 0x665   : > { %2164 = vmatpush.msrb.mxu1 %v8898_v63  ;;  %8175 = vmatmul.msk.f32.vlgmr.msra.gmra.mxu0 %vm1783_vm4, %v2277_v0  ;;  %v2282_v5 = vadd.f32 %v9015_v41, %v2281_v62  ;;  %v2137_v16 = vmul.f32 %v10174_v31, %v2136_v15  ;;  %v2478_v62 = vld [vmem:[%s12071_s1 + $0x188] sm:$0xff]  ;;  %v2479_v63 = vld [vmem:[%s12071_s1 + $0x190] sm:$0xff]  ;;  %v2480_v0 = vld [vmem:[%s12071_s1 + $0x198] sm:$0xff] }
 0x666   : > { %2827 = vmatpush.msrb.mxu3 %v2478_v62  ;;  %2850 = vmatpush.msrb.mxu0 %v2479_v63  ;;  %v2469_v63 = vld [vmem:[%s12071_s1 + $0x140] sm:$0xff] }
 0x667   : > { %2165 = vmatpush.msrb.mxu1 %v8899_v4  ;;  %v2286_v8 = vsel %vm2285_vm11, %v9015_v41, %v2282_v5  ;;  %v9017_v44 = vpop.eup %9016  ;;  %v2463_v4 = vld [vmem:[%s12071_s1 + $0x110] sm:$0xff]  ;;  %v2464_v5 = vld [vmem:[%s12071_s1 + $0x118] sm:$0xff] }
 0x668   : > { %v1988_v9 = vpop.f32.mrf.mxu1  ;;  %8167 = vmatmul.msk.f32.vlgmr.msrb.gmra.mxu1 %vm1783_vm4, %v2122_v7  ;;  %v2291_v11 = vsel %vm2288_vm12, %v2290_v6, %v2286_v8  ;;  %v2375_v45 = vmul.f32 32.0, %v9017_v44  ;;  %vm2379_vm15 = vweird.f32 %v9017_v44  ;;  %2828 = vmatpush.msrb.mxu3 %v2462_v3  ;;  %v2445_v6 = vld [vmem:[%s12071_s1 + $0x80] sm:$0xff]  ;;  %v2446_v7 = vld [vmem:[%s12071_s1 + $0x88] sm:$0xff]  ;;  %v2448_v8 = vld [vmem:[%s12071_s1 + $0x98] sm:$0xff] }
 0x669   : > { %8160 = vmatmul.msk.f32.gmra.mxu2 %vm1498_vm0, %v1988_v9  ;;  %v2292_v29 = vmul.f32 %v10185_v2, %v2291_v11  ;;  %2349 = vmatpush.msra.mxu1 %v1709_v17  ;;  %v2429_v9 = vld [vmem:[%s12071_s1] sm:$0xff]  ;;  %v2430_v11 = vld [vmem:[%s12071_s1 + $0x8] sm:$0xff]  ;;  %v2471_v3 = vld [vmem:[%s12071_s1 + $0x150] sm:$0xff] }
 0x66a   : > { %2851 = vmatpush.msrb.mxu0 %v2463_v4  ;;  %2806 = vmatpush.msra.mxu2 %v2445_v6  ;;  %v2481_v17 = vld [vmem:[%s12071_s1 + $0x1a0] sm:$0xff]  ;;  %v2472_v4 = vld [vmem:[%s12071_s1 + $0x158] sm:$0xff]  ;;  %v2454_v6 = vld [vmem:[%s12071_s1 + $0xc8] sm:$0xff] }
 0x66b   : > { %2873 = vmatpush.msrb.mxu1 %v2480_v0  ;;  %2829 = vmatpush.msrb.mxu3 %v2446_v7  ;;  %v2470_v0 = vld [vmem:[%s12071_s1 + $0x148] sm:$0xff] }
 0x66c   : > { %2852 = vmatpush.msrb.mxu0 %v2447_v60  ;;  %2807 = vmatpush.msra.mxu2 %v2429_v9  ;;  %v2455_v60 = vld [vmem:[%s12071_s1 + $0xd0] sm:$0xff]  ;;  %v2437_v9 = vld [vmem:[%s12071_s1 + $0x40] sm:$0xff] }
 0x66d   : > { %8176 = vmatmul.msk.f32.gmra.mxu0 %vm1783_vm4, %v2292_v29  ;;  %2874 = vmatpush.msrb.mxu1 %v2464_v5  ;;  %v2453_v5 = vld [vmem:[%s12071_s1 + $0xc0] sm:$0xff] }
 0x66e   : > { %2830 = vmatpush.msrb.mxu3 %v2430_v11  ;;  %2853 = vmatpush.msrb.mxu0 %v2431_v13  ;;  %v2438_v11 = vld [vmem:[%s12071_s1 + $0x48] sm:$0xff]  ;;  %v2439_v13 = vld [vmem:[%s12071_s1 + $0x50] sm:$0xff] }
 0x66f   : > { %2875 = vmatpush.msrb.mxu1 %v2448_v8  ;;  %v2456_v8 = vld [vmem:[%s12071_s1 + $0xd8] sm:$0xff] }
 0x670   : > { %8168 = vmatmul.msk.f32.gmra.mxu1 %vm1783_vm4, %v2137_v16  ;;  %2919 = vmatpush.msra.mxu3 %v2482_v18  ;;  %v2473_v18 = vld [vmem:[%s12071_s1 + $0x160] sm:$0xff] }
 0x671   : > { %2876 = vmatpush.msrb.mxu1 %v2432_v14  ;;  %v2440_v14 = vld [vmem:[%s12071_s1 + $0x58] sm:$0xff] }
 0x6d4   : > { %v2014_v31 = vpop.f32.mrf.mxu2 }
 0x6d5   : > { %v2044_v23 = vadd.f32 %v10160_v10, %v2014_v31 }
 0x6e2   : > { %v2322_v19 = vpop.f32.mrf.mxu0 }
 0x6e3   : > { %8177 = vmatmul.msk.f32.vlgmr.msra.gmra.mxu1 %vm1498_vm0, %v2322_v19  ;;  %v2483_v19 = vld [vmem:[%s12071_s1 + $0x1b0] sm:$0xff] }
 0x6e4   : > { %2942 = vmatpush.msra.mxu0 %v2483_v19  ;;  %v2474_v19 = vld [vmem:[%s12071_s1 + $0x168] sm:$0xff] }
 0x6e5   : > { %v2167_v20 = vpop.f32.mrf.mxu1 }
 0x6e6   : > { %8169 = vmatmul.msk.f32.vlgmr.msrb.gmra.mxu2 %vm1498_vm0, %v2167_v20  ;;  %v2484_v20 = vld [vmem:[%s12071_s1 + $0x1b8] sm:$0xff] }
 0x6e7   : > { %2896 = vmatpush.msrb.mxu2 %v2481_v17  ;;  %2965 = vmatpush.msra.mxu1 %v2484_v20  ;;  %v2492_v17 = vld [vmem:[%s12071_s1 + $0x1f8] sm:$0xff]  ;;  %v2475_v20 = vld [vmem:[%s12071_s1 + $0x170] sm:$0xff] }
 0x6ea   : > { %v2325_v21 = vpop.f32.mrf.mxu0 }
 0x6eb   : > { %8178 = vmatmul.msk.f32.gmra.mxu1 %vm1498_vm0, %v2325_v21  ;;  %v2465_v21 = vld [vmem:[%s12071_s1 + $0x120] sm:$0xff] }
 0x6ec   : > { %v2017_v22 = vpop.f32.mrf.mxu2  ;;  %2897 = vmatpush.msrb.mxu2 %v2465_v21  ;;  %v2476_v21 = vld [vmem:[%s12071_s1 + $0x178] sm:$0xff] }
 0x6ed   : > { %v2170_v2 = vpop.f32.mrf.mxu1  ;;  %v2047_v32 = vadd.f32 %v10162_v12, %v2017_v22  ;;  %v2376_v12 = vsub.f32 1.0, %v2375_v45  ;;  %v2467_v22 = vld [vmem:[%s12071_s1 + $0x130] sm:$0xff]  ;;  %v8957_v45 = vld [vmem:[%s12072_s28] ss:$0 sm:$0xff]  ;;  %s12078_s28 = sld [smem:[#allocation44_spill]] }
 0x6ee   : > { %8170 = vmatmul.msk.f32.gmra.mxu2 %vm1498_vm0, %v2170_v2  ;;  %v2466_v2 = vld [vmem:[%s12071_s1 + $0x128] sm:$0xff]  ;;  %2943 = vmatpush.msra.mxu0 %v2467_v22  ;;  %v2459_v22 = vld [vmem:[%s12071_s1 + $0xf0] sm:$0xff] }
 0x6ef   : > { %v2377_v46 = vmul.f32 %v9017_v44, %v2376_v12  ;;  %2920 = vmatpush.msra.mxu3 %v2466_v2  ;;  %v2457_v2 = vld [vmem:[%s12071_s1 + $0xe0] sm:$0xff] }
 0x6f3   : > { %s12079_s16 = smov %s12078_s28 }
 0x760   : > { %v2351_v42 = vpop.f32.mrf.mxu1 }
 0x768   : > { %v2354_v38 = vpop.f32.mrf.mxu1 }
 0x769   : > { %v2196_v24 = vpop.f32.mrf.mxu2 }
 0x76a   : > { %v2202_v25 = vadd.f32 %v2196_v24, %v2044_v23  ;;  %v2468_v23 = vld [vmem:[%s12071_s1 + $0x138] sm:$0xff] }
 0x76b   : > { %2966 = vmatpush.msra.mxu1 %v2468_v23  ;;  %v2460_v23 = vld [vmem:[%s12071_s1 + $0xf8] sm:$0xff] }
 0x76c   : > { %v2357_v27 = vadd.f32 %v2351_v42, %v2202_v25  ;;  %v2449_v42 = vld [vmem:[%s12071_s1 + $0xa0] sm:$0xff]  ;;  %v2450_v25 = vld [vmem:[%s12071_s1 + $0xa8] sm:$0xff] }
 0x76d   : > { %2898 = vmatpush.msrb.mxu2 %v2449_v42  ;;  %2921 = vmatpush.msra.mxu3 %v2450_v25  ;;  %v2441_v42 = vld [vmem:[%s12071_s1 + $0x60] sm:$0xff]  ;;  %v2443_v25 = vld [vmem:[%s12071_s1 + $0x70] sm:$0xff] }
 0x76e   : > { %v2362_v28 = vadd.f32 %v8956_v26, %v2357_v27  ;;  %v2452_v27 = vld [vmem:[%s12071_s1 + $0xb8] sm:$0xff] }
 0x76f   : > { %2967 = vmatpush.msra.mxu1 %v2452_v27 }
 0x770   : > { %v2364_v33 = vadd.f32 %v2362_v28, %v10056_v30  ;;  %v2378_v30 = vadd.f32 %v9017_v44, %v2377_v46  ;;  %v2433_v28 = vld [vmem:[%s12071_s1 + $0x20] sm:$0xff] }
 0x771   : > { %v2199_v34 = vpop.f32.mrf.mxu2  ;;  %2899 = vmatpush.msrb.mxu2 %v2433_v28 }
 0x772   : > { %v2203_v35 = vadd.f32 %v2199_v34, %v2047_v32  ;;  %v2368_v37 = vsel %vm1714_vm3, %v2364_v33, 0.0  ;;  %v10241_v47 = vsel %vm2379_vm15, %v9017_v44, %v2378_v30  ;;  %v2434_v32 = vld [vmem:[%s12071_s1 + $0x28] sm:$0xff]  ;;  %v8958_v30 = vld [vmem:[%s12074_s22] ss:$0 sm:$0xff]  ;;  %s12076_s22 = sld [smem:[#allocation45_spill]] }
 0x773   : > { %2369 = vadd.xlane.f32.xlu1 %v2368_v37  ;;  %v2436_v37 = vld [vmem:[%s12071_s1 + $0x38] sm:$0xff]  ;;  %2922 = vmatpush.msra.mxu3 %v2434_v32 }
 0x774   : > { %v2358_v39 = vadd.f32 %v2354_v38, %v2203_v35  ;;  %v2435_v35 = vld [vmem:[%s12071_s1 + $0x30] sm:$0xff]  ;;  %2968 = vmatpush.msra.mxu1 %v2436_v37 }
 0x776   : > { %v2363_v40 = vadd.f32 %v8956_v26, %v2358_v39  ;;  %v2451_v26 = vld [vmem:[%s12071_s1 + $0xb0] sm:$0xff] }
 0x777   : > { %2944 = vmatpush.msra.mxu0 %v2451_v26  ;;  %v2444_v26 = vld [vmem:[%s12071_s1 + $0x78] sm:$0xff] }
 0x778   : > { %v2365_v10 = vadd.f32 %v2363_v40, %v10061_v36  ;;  %s12077_s7 = smov %s12076_s22  ;;  %v2542_v27 = vld [vmem:[%s12076_s22 + $0x178] sm:$0xff]  ;;  %s12080_s22 = sld [smem:[#allocation46_spill]] }
 0x779   : > { %2945 = vmatpush.msra.mxu0 %v2435_v35  ;;  %v2558_v28 = vld [vmem:[%s12077_s7 + $0x1f8] sm:$0xff]  ;;  %v2557_v35 = vld [vmem:[%s12077_s7 + $0x1f0] sm:$0xff] }
 0x77a   : > { %v2371_v41 = vsel %vm1714_vm3, %v2365_v10, 0.0  ;;  %v2510_v32 = vld [vmem:[%s12077_s7 + $0x78] sm:$0xff]  ;;  %v2509_v37 = vld [vmem:[%s12077_s7 + $0x70] sm:$0xff] }
 0x77b   : > { %2372 = vadd.xlane.f32.xlu0 %v2371_v41 }
 0x77e   : > { %s12081_s11 = smov %s12080_s22 }
 0x7e6   : > { %v2370_v48 = vpop.xlane.xlu1 %2369 }
 0x7e7   : > { %v2381_v49 = vmul.f32 %v10241_v47, %v2370_v48 }
 0x7e9   : > { %v10244_v36 = vsub.f32 %v2364_v33, %v2381_v49 }
 0x7eb   : > { %v2385_v53 = vmul.f32 %v10244_v36, %v10244_v36 }
 0x7ed   : > { %v2387_v54 = vsel %vm1714_vm3, %v2385_v53, 0.0 }
 0x7ee   : > { %v2373_v55 = vpop.xlane.xlu0 %2372  ;;  %2388 = vadd.xlane.f32.xlu2 %v2387_v54 }
 0x7ef   : > { %v2382_v56 = vmul.f32 %v10241_v47, %v2373_v55 }
 0x7f1   : > { %v10250_v57 = vsub.f32 %v2365_v10, %v2382_v56 }
 0x7f3   : > { %v2386_v58 = vmul.f32 %v10250_v57, %v10250_v57 }
 0x7f5   : > { %v2390_v59 = vsel %vm1714_vm3, %v2386_v58, 0.0  ;;  %v2485_v58 = vld [vmem:[%s12071_s1 + $0x1c0] sm:$0xff] }
 0x7f6   : > { %2391 = vadd.xlane.f32.xlu1 %v2390_v59  ;;  %v2486_v59 = vld [vmem:[%s12071_s1 + $0x1c8] sm:$0xff] }
 0x861   : > { %v2389_v29 = vpop.xlane.xlu2 %2388 }
 0x862   : > { %v2393_v15 = vmul.f32 %v2389_v29, %v10241_v47  ;;  %v2489_v29 = vld [vmem:[%s12071_s1 + $0x1e0] sm:$0xff] }
 0x864   : > { %v2395_v16 = vadd.f32 1e-05, %v2393_v15  ;;  %v2490_v15 = vld [vmem:[%s12071_s1 + $0x1e8] sm:$0xff] }
 0x866   : > { %9018 = vrsqrt.f32 %v2395_v16  ;;  %vm2403_vm6 = vweird.f32 %v2395_v16 }
 0x869   : > { %v2392_v31 = vpop.xlane.xlu1 %2391 }
 0x86a   : > { %v2394_v24 = vmul.f32 %v2392_v31, %v10241_v47  ;;  %v2458_v31 = vld [vmem:[%s12071_s1 + $0xe8] sm:$0xff] }
 0x86c   : > { %v9019_v33 = vpop.eup %9018  ;;  %v2396_v34 = vadd.f32 1e-05, %v2394_v24  ;;  %v2442_v24 = vld [vmem:[%s12071_s1 + $0x68] sm:$0xff] }
 0x86d   : > { %v2398_v38 = vmul.f32 %v9019_v33, %v2395_v16  ;;  %vm2404_vm5 = vweird.f32 %v9019_v33  ;;  %v2491_v16 = vld [vmem:[%s12071_s1 + $0x1f0] sm:$0xff] }
 0x86e   : > { %9020 = vrsqrt.f32 %v2396_v34  ;;  %vm2405_vm7 = vmor %vm2403_vm6, %vm2404_vm5  ;;  %vm2413_vm9 = vweird.f32 %v2396_v34 }
 0x86f   : > { %v2399_v39 = vmul.f32 %v9019_v33, %v2398_v38  ;;  %v2525_v38 = vld [vmem:[%s12077_s7 + $0xf0] sm:$0xff] }
 0x871   : > { %v2400_v40 = vmul.f32 0.5, %v2399_v39  ;;  %v2540_v39 = vld [vmem:[%s12077_s7 + $0x168] sm:$0xff] }
 0x873   : > { %v2401_v10 = vsub.f32 1.5, %v2400_v40  ;;  %v2556_v40 = vld [vmem:[%s12077_s7 + $0x1e8] sm:$0xff] }
 0x874   : > { %v9021_v41 = vpop.eup %9020 }
 0x875   : > { %v2402_v43 = vmul.f32 %v9019_v33, %v2401_v10  ;;  %v2408_v44 = vmul.f32 %v9021_v41, %v2396_v34  ;;  %vm2414_vm8 = vweird.f32 %v9021_v41  ;;  %v2541_v34 = vld [vmem:[%s12077_s7 + $0x170] sm:$0xff]  ;;  %v2508_v10 = vld [vmem:[%s12077_s7 + $0x68] sm:$0xff] }
 0x876   : > { %vm2415_vm10 = vmor %vm2413_vm9, %vm2414_vm8 }
 0x877   : > { %v2406_v12 = vsel %vm2405_vm7, %v9019_v33, %v2402_v43  ;;  %v2409_v46 = vmul.f32 %v9021_v41, %v2408_v44  ;;  %v2526_v33 = vld [vmem:[%s12077_s7 + $0xf8] sm:$0xff]  ;;  %v2539_v43 = vld [vmem:[%s12077_s7 + $0x160] sm:$0xff] }
 0x878   : > { %v2417_v48 = vmul.f32 %v2406_v12, %v10244_v36  ;;  %v2487_v36 = vld [vmem:[%s12071_s1 + $0x1d0] sm:$0xff]  ;;  %v2555_v44 = vld [vmem:[%s12077_s7 + $0x1e0] sm:$0xff] }
 0x879   : > { %v2410_v49 = vmul.f32 0.5, %v2409_v46  ;;  %v2523_v12 = vld [vmem:[%s12077_s7 + $0xe0] sm:$0xff]  ;;  %v2538_v46 = vld [vmem:[%s12077_s7 + $0x158] sm:$0xff] }
 0x87a   : > { %v2422_v53 = vmul.f32 %v8957_v45, %v2417_v48  ;;  %v2506_v48 = vld [vmem:[%s12077_s7 + $0x58] sm:$0xff] }
 0x87b   : > { %v2411_v54 = vsub.f32 1.5, %v2410_v49  ;;  %v2522_v49 = vld [vmem:[%s12077_s7 + $0xd8] sm:$0xff] }
 0x87c   : > { %v10292_v55 = vadd.f32 %v8958_v30, %v2422_v53  ;;  %v2537_v53 = vld [vmem:[%s12077_s7 + $0x150] sm:$0xff] }
 0x87d   : > { %v2412_v56 = vmul.f32 %v9021_v41, %v2411_v54  ;;  %v2553_v54 = vld [vmem:[%s12077_s7 + $0x1d0] sm:$0xff] }
 0x87e   : > { %8179 = vmatmul.msk.f32.vlgmr.msra.gmra.mxu2 %vm1714_vm3, %v10292_v55  ;;  %8181 = vmatmul.msk.f32.vlgmr.msrb.gmra.mxu3 %vm1714_vm3, %v10292_v55 }
 0x87f   : > { %v2416_v62 = vsel %vm2415_vm10, %v9021_v41, %v2412_v56  ;;  %8183 = vmatmul.msk.f32.vlgmr.msrb.gmra.mxu0 %vm1714_vm3, %v10292_v55  ;;  %8185 = vmatmul.msk.f32.vlgmr.msrb.gmra.mxu1 %vm1714_vm3, %v10292_v55  ;;  %v2524_v41 = vld [vmem:[%s12077_s7 + $0xe8] sm:$0xff]  ;;  %v2505_v56 = vld [vmem:[%s12077_s7 + $0x50] sm:$0xff] }
 0x880   : > { %v2418_v1 = vmul.f32 %v2416_v62, %v10250_v57  ;;  %2988 = vmatpush.msra.mxu2 %v2485_v58  ;;  %3011 = vmatpush.msrb.mxu3 %v2486_v59  ;;  %v2521_v58 = vld [vmem:[%s12077_s7 + $0xd0] sm:$0xff]  ;;  %v2536_v59 = vld [vmem:[%s12077_s7 + $0x148] sm:$0xff] }
 0x881   : > { %3034 = vmatpush.msrb.mxu0 %v2487_v36  ;;  %3057 = vmatpush.msrb.mxu1 %v2488_v61  ;;  %v2552_v36 = vld [vmem:[%s12077_s7 + $0x1c8] sm:$0xff] }
 0x882   : > { %v2423_v7 = vmul.f32 %v8957_v45, %v2418_v1  ;;  %2989 = vmatpush.msra.mxu2 %v2469_v63  ;;  %3012 = vmatpush.msrb.mxu3 %v2470_v0  ;;  %v2507_v45 = vld [vmem:[%s12077_s7 + $0x60] sm:$0xff]  ;;  %v2504_v61 = vld [vmem:[%s12077_s7 + $0x48] sm:$0xff] }
 0x883   : > { %3035 = vmatpush.msrb.mxu0 %v2471_v3  ;;  %3058 = vmatpush.msrb.mxu1 %v2472_v4  ;;  %v2520_v62 = vld [vmem:[%s12077_s7 + $0xc8] sm:$0xff]  ;;  %v2535_v63 = vld [vmem:[%s12077_s7 + $0x140] sm:$0xff]  ;;  %v2534_v4 = vld [vmem:[%s12077_s7 + $0x138] sm:$0xff] }
 0x884   : > { %v10315_v57 = vadd.f32 %v8958_v30, %v2423_v7  ;;  %2990 = vmatpush.msra.mxu2 %v2453_v5  ;;  %3013 = vmatpush.msrb.mxu3 %v2454_v6  ;;  %v2554_v30 = vld [vmem:[%s12077_s7 + $0x1d8] sm:$0xff]  ;;  %v2551_v0 = vld [vmem:[%s12077_s7 + $0x1c0] sm:$0xff] }
 0x885   : > { %3036 = vmatpush.msrb.mxu0 %v2455_v60  ;;  %3059 = vmatpush.msrb.mxu1 %v2456_v8  ;;  %v2503_v1 = vld [vmem:[%s12077_s7 + $0x40] sm:$0xff]  ;;  %v2550_v5 = vld [vmem:[%s12077_s7 + $0x1b8] sm:$0xff]  ;;  %v2533_v60 = vld [vmem:[%s12077_s7 + $0x130] sm:$0xff] }
 0x886   : > { %8180 = vmatmul.msk.f32.gmra.mxu2 %vm1714_vm3, %v10315_v57  ;;  %8182 = vmatmul.msk.f32.gmra.mxu3 %vm1714_vm3, %v10315_v57  ;;  %v2519_v3 = vld [vmem:[%s12077_s7 + $0xc0] sm:$0xff]  ;;  %v2502_v6 = vld [vmem:[%s12077_s7 + $0x38] sm:$0xff]  ;;  %v2549_v8 = vld [vmem:[%s12077_s7 + $0x1b0] sm:$0xff] }
 0x887   : > { %8184 = vmatmul.msk.f32.gmra.mxu0 %vm1714_vm3, %v10315_v57  ;;  %8186 = vmatmul.msk.f32.gmra.mxu1 %vm1714_vm3, %v10315_v57  ;;  %v2518_v7 = vld [vmem:[%s12077_s7 + $0xb8] sm:$0xff] }
 0x888   : > { %2991 = vmatpush.msra.mxu2 %v2437_v9  ;;  %3014 = vmatpush.msrb.mxu3 %v2438_v11  ;;  %v2501_v9 = vld [vmem:[%s12077_s7 + $0x30] sm:$0xff] }
 0x889   : > { %3037 = vmatpush.msrb.mxu0 %v2439_v13  ;;  %3060 = vmatpush.msrb.mxu1 %v2440_v14  ;;  %v2517_v11 = vld [vmem:[%s12077_s7 + $0xb0] sm:$0xff]  ;;  %v2532_v13 = vld [vmem:[%s12077_s7 + $0x128] sm:$0xff] }
 0x88a   : > { %v2548_v14 = vld [vmem:[%s12077_s7 + $0x1a8] sm:$0xff] }
 0x88e   : > { %8187 = vmatmul.msk.f32.vlgmr.msrb.gmra.mxu2 %vm1714_vm3, %v10292_v55  ;;  %8189 = vmatmul.msk.f32.vlgmr.msra.gmra.mxu3 %vm1714_vm3, %v10292_v55 }
 0x88f   : > { %8191 = vmatmul.msk.f32.vlgmr.msra.gmra.mxu0 %vm1714_vm3, %v10292_v55  ;;  %8193 = vmatmul.msk.f32.vlgmr.msra.gmra.mxu1 %vm1714_vm3, %v10292_v55 }
 0x890   : > { %3080 = vmatpush.msrb.mxu2 %v2489_v29  ;;  %3103 = vmatpush.msra.mxu3 %v2490_v15  ;;  %v2500_v29 = vld [vmem:[%s12077_s7 + $0x28] sm:$0xff] }
 0x891   : > { %3126 = vmatpush.msra.mxu0 %v2491_v16  ;;  %3149 = vmatpush.msra.mxu1 %v2492_v17  ;;  %v2516_v15 = vld [vmem:[%s12077_s7 + $0xa8] sm:$0xff]  ;;  %v2531_v16 = vld [vmem:[%s12077_s7 + $0x120] sm:$0xff] }
 0x892   : > { %3081 = vmatpush.msrb.mxu2 %v2473_v18  ;;  %3104 = vmatpush.msra.mxu3 %v2474_v19  ;;  %v2547_v17 = vld [vmem:[%s12077_s7 + $0x1a0] sm:$0xff] }
 0x893   : > { %3127 = vmatpush.msra.mxu0 %v2475_v20  ;;  %3150 = vmatpush.msra.mxu1 %v2476_v21  ;;  %v2499_v18 = vld [vmem:[%s12077_s7 + $0x20] sm:$0xff]  ;;  %v2530_v20 = vld [vmem:[%s12077_s7 + $0x118] sm:$0xff] }
 0x894   : > { %3082 = vmatpush.msrb.mxu2 %v2457_v2  ;;  %3105 = vmatpush.msra.mxu3 %v2458_v31  ;;  %v2515_v19 = vld [vmem:[%s12077_s7 + $0xa0] sm:$0xff]  ;;  %v2546_v21 = vld [vmem:[%s12077_s7 + $0x198] sm:$0xff] }
 0x895   : > { %3128 = vmatpush.msra.mxu0 %v2459_v22  ;;  %3151 = vmatpush.msra.mxu1 %v2460_v23  ;;  %v2498_v2 = vld [vmem:[%s12077_s7 + $0x18] sm:$0xff]  ;;  %v2529_v22 = vld [vmem:[%s12077_s7 + $0x110] sm:$0xff] }
 0x896   : > { %8188 = vmatmul.msk.f32.gmra.mxu2 %vm1714_vm3, %v10315_v57  ;;  %8190 = vmatmul.msk.f32.gmra.mxu3 %vm1714_vm3, %v10315_v57  ;;  %v2514_v31 = vld [vmem:[%s12077_s7 + $0x98] sm:$0xff]  ;;  %v2545_v23 = vld [vmem:[%s12077_s7 + $0x190] sm:$0xff] }
 0x897   : > { %8192 = vmatmul.msk.f32.gmra.mxu0 %vm1714_vm3, %v10315_v57  ;;  %8194 = vmatmul.msk.f32.gmra.mxu1 %vm1714_vm3, %v10315_v57 }
 0x898   : > { %3083 = vmatpush.msrb.mxu2 %v2441_v42  ;;  %3106 = vmatpush.msra.mxu3 %v2442_v24  ;;  %v2497_v42 = vld [vmem:[%s12077_s7 + $0x10] sm:$0xff] }
 0x899   : > { %3129 = vmatpush.msra.mxu0 %v2443_v25  ;;  %3152 = vmatpush.msra.mxu1 %v2444_v26  ;;  %v2513_v24 = vld [vmem:[%s12077_s7 + $0x90] sm:$0xff]  ;;  %v2528_v25 = vld [vmem:[%s12077_s7 + $0x108] sm:$0xff] }
 0x89a   : > { %v2544_v26 = vld [vmem:[%s12077_s7 + $0x188] sm:$0xff] }
 0x89e   : > { %8195 = vmatmul.msk.f32.vlgmr.msra.gmra.mxu2 %vm1714_vm3, %v10292_v55  ;;  %8197 = vmatmul.msk.f32.vlgmr.msrb.gmra.mxu3 %vm1714_vm3, %v10292_v55 }
 0x89f   : > { %8199 = vmatmul.msk.f32.vlgmr.msrb.gmra.mxu0 %vm1714_vm3, %v10292_v55  ;;  %8201 = vmatmul.msk.f32.vlgmr.msrb.gmra.mxu1 %vm1714_vm3, %v10292_v55 }
 0x8a0   : > { %3241 = vmatpush.msrb.mxu0 %v2542_v27  ;;  %3264 = vmatpush.msrb.mxu1 %v2558_v28  ;;  %v2496_v27 = vld [vmem:[%s12077_s7 + $0x8] sm:$0xff] }
 0x8a1   : > { %3195 = vmatpush.msra.mxu2 %v2510_v32  ;;  %3218 = vmatpush.msrb.mxu3 %v2526_v33  ;;  %v2512_v28 = vld [vmem:[%s12077_s7 + $0x88] sm:$0xff]  ;;  %v2527_v32 = vld [vmem:[%s12077_s7 + $0x100] sm:$0xff] }
 0x8a2   : > { %3242 = vmatpush.msrb.mxu0 %v2541_v34  ;;  %3265 = vmatpush.msrb.mxu1 %v2557_v35  ;;  %v2543_v33 = vld [vmem:[%s12077_s7 + $0x180] sm:$0xff]  ;;  %v2606_v34 = vld [vmem:[%s12077_s7 + $0x378] sm:$0xff] }
 0x8a3   : > { %3196 = vmatpush.msra.mxu2 %v2509_v37  ;;  %3219 = vmatpush.msrb.mxu3 %v2525_v38  ;;  %v2622_v35 = vld [vmem:[%s12077_s7 + $0x3f8] sm:$0xff]  ;;  %v2495_v37 = vld [vmem:[%s12077_s7] sm:$0xff] }
 0x8a4   : > { %3243 = vmatpush.msrb.mxu0 %v2540_v39  ;;  %3266 = vmatpush.msrb.mxu1 %v2556_v40  ;;  %v2511_v38 = vld [vmem:[%s12077_s7 + $0x80] sm:$0xff]  ;;  %v2605_v39 = vld [vmem:[%s12077_s7 + $0x370] sm:$0xff] }
 0x8a5   : > { %3197 = vmatpush.msra.mxu2 %v2508_v10  ;;  %3220 = vmatpush.msrb.mxu3 %v2524_v41  ;;  %v2621_v40 = vld [vmem:[%s12077_s7 + $0x3f0] sm:$0xff]  ;;  %v2574_v10 = vld [vmem:[%s12077_s7 + $0x278] sm:$0xff] }
 0x8a6   : > { %8196 = vmatmul.msk.f32.gmra.mxu2 %vm1714_vm3, %v10315_v57  ;;  %8198 = vmatmul.msk.f32.gmra.mxu3 %vm1714_vm3, %v10315_v57  ;;  %v2590_v41 = vld [vmem:[%s12077_s7 + $0x2f8] sm:$0xff] }
 0x8a7   : > { %8200 = vmatmul.msk.f32.gmra.mxu0 %vm1714_vm3, %v10315_v57  ;;  %8202 = vmatmul.msk.f32.gmra.mxu1 %vm1714_vm3, %v10315_v57 }
 0x8a8   : > { %3244 = vmatpush.msrb.mxu0 %v2539_v43  ;;  %3267 = vmatpush.msrb.mxu1 %v2555_v44  ;;  %v2604_v43 = vld [vmem:[%s12077_s7 + $0x368] sm:$0xff] }
 0x8a9   : > { %3198 = vmatpush.msra.mxu2 %v2507_v45  ;;  %3221 = vmatpush.msrb.mxu3 %v2523_v12  ;;  %v2620_v44 = vld [vmem:[%s12077_s7 + $0x3e8] sm:$0xff]  ;;  %v2573_v45 = vld [vmem:[%s12077_s7 + $0x270] sm:$0xff] }
 0x8aa   : > { %3245 = vmatpush.msrb.mxu0 %v2538_v46  ;;  %3268 = vmatpush.msrb.mxu1 %v2554_v30  ;;  %v2589_v12 = vld [vmem:[%s12077_s7 + $0x2f0] sm:$0xff]  ;;  %v2603_v46 = vld [vmem:[%s12077_s7 + $0x360] sm:$0xff] }
 0x8ab   : > { %3199 = vmatpush.msra.mxu2 %v2506_v48  ;;  %3222 = vmatpush.msrb.mxu3 %v2522_v49  ;;  %v2619_v30 = vld [vmem:[%s12077_s7 + $0x3e0] sm:$0xff]  ;;  %v2572_v48 = vld [vmem:[%s12077_s7 + $0x268] sm:$0xff] }
 0x8ac   : > { %3246 = vmatpush.msrb.mxu0 %v2537_v53  ;;  %3269 = vmatpush.msrb.mxu1 %v2553_v54  ;;  %v2588_v49 = vld [vmem:[%s12077_s7 + $0x2e8] sm:$0xff]  ;;  %v2602_v53 = vld [vmem:[%s12077_s7 + $0x358] sm:$0xff] }
 0x8ad   : > { %3200 = vmatpush.msra.mxu2 %v2505_v56  ;;  %3223 = vmatpush.msrb.mxu3 %v2521_v58  ;;  %v2618_v54 = vld [vmem:[%s12077_s7 + $0x3d8] sm:$0xff]  ;;  %v2571_v56 = vld [vmem:[%s12077_s7 + $0x260] sm:$0xff] }
 0x8ae   : > { %8203 = vmatmul.msk.f32.vlgmr.msrb.gmra.mxu2 %vm1714_vm3, %v10292_v55  ;;  %8205 = vmatmul.msk.f32.vlgmr.msra.gmra.mxu3 %vm1714_vm3, %v10292_v55  ;;  %v2587_v58 = vld [vmem:[%s12077_s7 + $0x2e0] sm:$0xff] }
 0x8af   : > { %8207 = vmatmul.msk.f32.vlgmr.msra.gmra.mxu0 %vm1714_vm3, %v10292_v55  ;;  %8209 = vmatmul.msk.f32.vlgmr.msra.gmra.mxu1 %vm1714_vm3, %v10292_v55 }
 0x8b0   : > { %3247 = vmatpush.msrb.mxu0 %v2536_v59  ;;  %3270 = vmatpush.msrb.mxu1 %v2552_v36  ;;  %v2601_v59 = vld [vmem:[%s12077_s7 + $0x350] sm:$0xff] }
 0x8b1   : > { %3201 = vmatpush.msra.mxu2 %v2504_v61  ;;  %3224 = vmatpush.msrb.mxu3 %v2520_v62  ;;  %v2617_v36 = vld [vmem:[%s12077_s7 + $0x3d0] sm:$0xff]  ;;  %v2570_v61 = vld [vmem:[%s12077_s7 + $0x258] sm:$0xff] }
 0x8b2   : > { %3248 = vmatpush.msrb.mxu0 %v2535_v63  ;;  %3271 = vmatpush.msrb.mxu1 %v2551_v0  ;;  %v2586_v62 = vld [vmem:[%s12077_s7 + $0x2d8] sm:$0xff]  ;;  %v2600_v63 = vld [vmem:[%s12077_s7 + $0x348] sm:$0xff] }
 0x8b3   : > { %3202 = vmatpush.msra.mxu2 %v2503_v1  ;;  %3225 = vmatpush.msrb.mxu3 %v2519_v3  ;;  %v2616_v0 = vld [vmem:[%s12077_s7 + $0x3c8] sm:$0xff]  ;;  %v2569_v1 = vld [vmem:[%s12077_s7 + $0x250] sm:$0xff] }
 0x8b4   : > { %3249 = vmatpush.msrb.mxu0 %v2534_v4  ;;  %3272 = vmatpush.msrb.mxu1 %v2550_v5  ;;  %v2585_v3 = vld [vmem:[%s12077_s7 + $0x2d0] sm:$0xff]  ;;  %v2599_v4 = vld [vmem:[%s12077_s7 + $0x340] sm:$0xff] }
 0x8b5   : > { %3203 = vmatpush.msra.mxu2 %v2502_v6  ;;  %3226 = vmatpush.msrb.mxu3 %v2518_v7  ;;  %v2615_v5 = vld [vmem:[%s12077_s7 + $0x3c0] sm:$0xff]  ;;  %v2568_v6 = vld [vmem:[%s12077_s7 + $0x248] sm:$0xff] }
 0x8b6   : > { %8204 = vmatmul.msk.f32.gmra.mxu2 %vm1714_vm3, %v10315_v57  ;;  %8206 = vmatmul.msk.f32.gmra.mxu3 %vm1714_vm3, %v10315_v57  ;;  %v2584_v7 = vld [vmem:[%s12077_s7 + $0x2c8] sm:$0xff] }
 0x8b7   : > { %8208 = vmatmul.msk.f32.gmra.mxu0 %vm1714_vm3, %v10315_v57  ;;  %8210 = vmatmul.msk.f32.gmra.mxu1 %vm1714_vm3, %v10315_v57 }
 0x8b8   : > { %3250 = vmatpush.msrb.mxu0 %v2533_v60  ;;  %3273 = vmatpush.msrb.mxu1 %v2549_v8  ;;  %v2598_v60 = vld [vmem:[%s12077_s7 + $0x338] sm:$0xff] }
 0x8b9   : > { %3204 = vmatpush.msra.mxu2 %v2501_v9  ;;  %3227 = vmatpush.msrb.mxu3 %v2517_v11  ;;  %v2614_v8 = vld [vmem:[%s12077_s7 + $0x3b8] sm:$0xff]  ;;  %v2567_v9 = vld [vmem:[%s12077_s7 + $0x240] sm:$0xff] }
 0x8ba   : > { %3251 = vmatpush.msrb.mxu0 %v2532_v13  ;;  %3274 = vmatpush.msrb.mxu1 %v2548_v14  ;;  %v2583_v11 = vld [vmem:[%s12077_s7 + $0x2c0] sm:$0xff]  ;;  %v2597_v13 = vld [vmem:[%s12077_s7 + $0x330] sm:$0xff] }
 0x8bb   : > { %3205 = vmatpush.msra.mxu2 %v2500_v29  ;;  %3228 = vmatpush.msrb.mxu3 %v2516_v15  ;;  %v2613_v14 = vld [vmem:[%s12077_s7 + $0x3b0] sm:$0xff]  ;;  %v2566_v29 = vld [vmem:[%s12077_s7 + $0x238] sm:$0xff] }
 0x8bc   : > { %3252 = vmatpush.msrb.mxu0 %v2531_v16  ;;  %3275 = vmatpush.msrb.mxu1 %v2547_v17  ;;  %v2582_v15 = vld [vmem:[%s12077_s7 + $0x2b8] sm:$0xff]  ;;  %v2596_v16 = vld [vmem:[%s12077_s7 + $0x328] sm:$0xff] }
 0x8bd   : > { %3206 = vmatpush.msra.mxu2 %v2499_v18  ;;  %3229 = vmatpush.msrb.mxu3 %v2515_v19  ;;  %v2612_v17 = vld [vmem:[%s12077_s7 + $0x3a8] sm:$0xff]  ;;  %v2565_v18 = vld [vmem:[%s12077_s7 + $0x230] sm:$0xff] }
 0x8be   : > { %3253 = vmatpush.msrb.mxu0 %v2530_v20  ;;  %3276 = vmatpush.msrb.mxu1 %v2546_v21  ;;  %v2581_v19 = vld [vmem:[%s12077_s7 + $0x2b0] sm:$0xff]  ;;  %v2595_v20 = vld [vmem:[%s12077_s7 + $0x320] sm:$0xff] }
 0x8bf   : > { %3207 = vmatpush.msra.mxu2 %v2498_v2  ;;  %3230 = vmatpush.msrb.mxu3 %v2514_v31  ;;  %v2611_v21 = vld [vmem:[%s12077_s7 + $0x3a0] sm:$0xff]  ;;  %v2594_v2 = vld [vmem:[%s12077_s7 + $0x318] sm:$0xff] }
 0x8c0   : > { %3254 = vmatpush.msrb.mxu0 %v2529_v22  ;;  %3277 = vmatpush.msrb.mxu1 %v2545_v23  ;;  %v2610_v31 = vld [vmem:[%s12077_s7 + $0x398] sm:$0xff]  ;;  %v2564_v22 = vld [vmem:[%s12077_s7 + $0x228] sm:$0xff] }
 0x8c1   : > { %3208 = vmatpush.msra.mxu2 %v2497_v42  ;;  %3231 = vmatpush.msrb.mxu3 %v2513_v24  ;;  %v2580_v23 = vld [vmem:[%s12077_s7 + $0x2a8] sm:$0xff]  ;;  %v2593_v42 = vld [vmem:[%s12077_s7 + $0x310] sm:$0xff] }
 0x8c2   : > { %3255 = vmatpush.msrb.mxu0 %v2528_v25  ;;  %3278 = vmatpush.msrb.mxu1 %v2544_v26  ;;  %v2609_v24 = vld [vmem:[%s12077_s7 + $0x390] sm:$0xff]  ;;  %v2563_v25 = vld [vmem:[%s12077_s7 + $0x220] sm:$0xff] }
 0x8c3   : > { %3209 = vmatpush.msra.mxu2 %v2496_v27  ;;  %3232 = vmatpush.msrb.mxu3 %v2512_v28  ;;  %v2579_v26 = vld [vmem:[%s12077_s7 + $0x2a0] sm:$0xff]  ;;  %v2592_v27 = vld [vmem:[%s12077_s7 + $0x308] sm:$0xff] }
 0x8c4   : > { %3256 = vmatpush.msrb.mxu0 %v2527_v32  ;;  %3279 = vmatpush.msrb.mxu1 %v2543_v33  ;;  %v2608_v28 = vld [vmem:[%s12077_s7 + $0x388] sm:$0xff]  ;;  %v2562_v32 = vld [vmem:[%s12077_s7 + $0x218] sm:$0xff] }
 0x8c5   : > { %3210 = vmatpush.msra.mxu2 %v2495_v37  ;;  %3233 = vmatpush.msrb.mxu3 %v2511_v38  ;;  %v2578_v33 = vld [vmem:[%s12077_s7 + $0x298] sm:$0xff]  ;;  %v2561_v37 = vld [vmem:[%s12077_s7 + $0x210] sm:$0xff] }
 0x8c6   : > { %3333 = vmatpush.msra.mxu0 %v2606_v34  ;;  %3356 = vmatpush.msra.mxu1 %v2622_v35  ;;  %v2591_v34 = vld [vmem:[%s12077_s7 + $0x300] sm:$0xff]  ;;  %v2577_v38 = vld [vmem:[%s12077_s7 + $0x290] sm:$0xff] }
 0x8c7   : > { %3287 = vmatpush.msrb.mxu2 %v2574_v10  ;;  %3310 = vmatpush.msra.mxu3 %v2590_v41  ;;  %v2607_v35 = vld [vmem:[%s12077_s7 + $0x380] sm:$0xff] }
 0x8c8   : > { %3334 = vmatpush.msra.mxu0 %v2605_v39  ;;  %3357 = vmatpush.msra.mxu1 %v2621_v40  ;;  %v2560_v39 = vld [vmem:[%s12077_s7 + $0x208] sm:$0xff]  ;;  %v2559_v10 = vld [vmem:[%s12077_s7 + $0x200] sm:$0xff] }
 0x8c9   : > { %3288 = vmatpush.msrb.mxu2 %v2573_v45  ;;  %3311 = vmatpush.msra.mxu3 %v2589_v12  ;;  %v2576_v40 = vld [vmem:[%s12077_s7 + $0x288] sm:$0xff]  ;;  %v2575_v41 = vld [vmem:[%s12077_s7 + $0x280] sm:$0xff] }
 0x8ca   : > { %3335 = vmatpush.msra.mxu0 %v2604_v43  ;;  %3358 = vmatpush.msra.mxu1 %v2620_v44  ;;  %v10522_v43 = vld [vmem:[%s12078_s28] sm:$0xff]  ;;  %s12082_s28 = sld [smem:[#allocation47_spill]] }
 0x8cb   : > { %3289 = vmatpush.msrb.mxu2 %v2572_v48  ;;  %3312 = vmatpush.msra.mxu3 %v2588_v49  ;;  %v2756_v44 = vperm.slane %v10522_v43, 2  ;;  %v2757_v45 = vperm.slane %v10522_v43, 3  ;;  %v2754_v49 = vperm.slane %v10522_v43, 0 }
 0x8cc   : > { %3336 = vmatpush.msra.mxu0 %v2603_v46  ;;  %3359 = vmatpush.msra.mxu1 %v2619_v30 }
 0x8cd   : > { %3290 = vmatpush.msrb.mxu2 %v2571_v56  ;;  %3313 = vmatpush.msra.mxu3 %v2587_v58  ;;  %v2670_v58 = vld [vmem:[%s12077_s7 + $0x578] sm:$0xff] }
 0x8ce   : > { %3337 = vmatpush.msra.mxu0 %v2602_v53  ;;  %3360 = vmatpush.msra.mxu1 %v2618_v54  ;;  %v2755_v53 = vperm.slane %v10522_v43, 1 }
 0x8cf   : > { %3291 = vmatpush.msrb.mxu2 %v2570_v61  ;;  %3314 = vmatpush.msra.mxu3 %v2586_v62  ;;  %v2669_v62 = vld [vmem:[%s12077_s7 + $0x570] sm:$0xff] }
 0x8d0   : > { %3338 = vmatpush.msra.mxu0 %v2601_v59  ;;  %3361 = vmatpush.msra.mxu1 %v2617_v36  ;;  %v2686_v59 = vld [vmem:[%s12077_s7 + $0x5f8] sm:$0xff]  ;;  %s12083_s2 = smov %s12082_s28 }
 0x8d1   : > { %3292 = vmatpush.msrb.mxu2 %v2569_v1  ;;  %3315 = vmatpush.msra.mxu3 %v2585_v3  ;;  %v2668_v3 = vld [vmem:[%s12077_s7 + $0x568] sm:$0xff] }
 0x8d2   : > { %3339 = vmatpush.msra.mxu0 %v2600_v63  ;;  %3362 = vmatpush.msra.mxu1 %v2616_v0  ;;  %v2685_v63 = vld [vmem:[%s12077_s7 + $0x5f0] sm:$0xff] }
 0x8d3   : > { %3293 = vmatpush.msrb.mxu2 %v2568_v6  ;;  %3316 = vmatpush.msra.mxu3 %v2584_v7 }
 0x8d4   : > { %3340 = vmatpush.msra.mxu0 %v2599_v4  ;;  %3363 = vmatpush.msra.mxu1 %v2615_v5  ;;  %v2684_v4 = vld [vmem:[%s12077_s7 + $0x5e8] sm:$0xff] }
 0x8d5   : > { %3294 = vmatpush.msrb.mxu2 %v2567_v9  ;;  %3317 = vmatpush.msra.mxu3 %v2583_v11  ;;  %v2638_v11 = vld [vmem:[%s12077_s7 + $0x478] sm:$0xff] }
 0x8d6   : > { %3341 = vmatpush.msra.mxu0 %v2598_v60  ;;  %3364 = vmatpush.msra.mxu1 %v2614_v8 }
 0x8d7   : > { %3295 = vmatpush.msrb.mxu2 %v2566_v29  ;;  %3318 = vmatpush.msra.mxu3 %v2582_v15  ;;  %v2683_v29 = vld [vmem:[%s12077_s7 + $0x5e0] sm:$0xff] }
 0x8d8   : > { %3342 = vmatpush.msra.mxu0 %v2597_v13  ;;  %3365 = vmatpush.msra.mxu1 %v2613_v14  ;;  %v2654_v13 = vld [vmem:[%s12077_s7 + $0x4f8] sm:$0xff]  ;;  %v2667_v14 = vld [vmem:[%s12077_s7 + $0x560] sm:$0xff] }
 0x8d9   : > { %3296 = vmatpush.msrb.mxu2 %v2565_v18  ;;  %3319 = vmatpush.msra.mxu3 %v2581_v19  ;;  %v2653_v18 = vld [vmem:[%s12077_s7 + $0x4f0] sm:$0xff]  ;;  %v2666_v19 = vld [vmem:[%s12077_s7 + $0x558] sm:$0xff] }
 0x8da   : > { %3343 = vmatpush.msra.mxu0 %v2596_v16  ;;  %3366 = vmatpush.msra.mxu1 %v2612_v17  ;;  %v2637_v17 = vld [vmem:[%s12077_s7 + $0x470] sm:$0xff] }
 0x8db   : > { %3297 = vmatpush.msrb.mxu2 %v2564_v22  ;;  %3320 = vmatpush.msra.mxu3 %v2580_v23  ;;  %v2761_v22 = vperm.slane %v10522_v43, 7 }
 0x8dc   : > { %3344 = vmatpush.msra.mxu0 %v2595_v20  ;;  %3367 = vmatpush.msra.mxu1 %v2611_v21  ;;  %v2682_v20 = vld [vmem:[%s12077_s7 + $0x5d8] sm:$0xff] }
 0x8dd   : > { %3298 = vmatpush.msrb.mxu2 %v2563_v25  ;;  %3321 = vmatpush.msra.mxu3 %v2579_v26  ;;  %v2652_v25 = vld [vmem:[%s12077_s7 + $0x4e8] sm:$0xff]  ;;  %v2665_v26 = vld [vmem:[%s12077_s7 + $0x550] sm:$0xff] }
 0x8de   : > { %3345 = vmatpush.msra.mxu0 %v2594_v2  ;;  %3368 = vmatpush.msra.mxu1 %v2610_v31  ;;  %v2760_v31 = vperm.slane %v10522_v43, 6 }
 0x8df   : > { %3299 = vmatpush.msrb.mxu2 %v2562_v32  ;;  %3322 = vmatpush.msra.mxu3 %v2578_v33  ;;  %v2635_v33 = vld [vmem:[%s12077_s7 + $0x460] sm:$0xff] }
 0x8e0   : > { %3346 = vmatpush.msra.mxu0 %v2593_v42  ;;  %3369 = vmatpush.msra.mxu1 %v2609_v24  ;;  %v2636_v24 = vld [vmem:[%s12077_s7 + $0x468] sm:$0xff] }
 0x8e1   : > { %3300 = vmatpush.msrb.mxu2 %v2561_v37  ;;  %3323 = vmatpush.msra.mxu3 %v2577_v38  ;;  %v2664_v38 = vld [vmem:[%s12077_s7 + $0x548] sm:$0xff] }
 0x8e2   : > { %3347 = vmatpush.msra.mxu0 %v2592_v27  ;;  %3370 = vmatpush.msra.mxu1 %v2608_v28  ;;  %v2681_v27 = vld [vmem:[%s12077_s7 + $0x5d0] sm:$0xff] }
 0x8e3   : > { %3301 = vmatpush.msrb.mxu2 %v2560_v39  ;;  %3324 = vmatpush.msra.mxu3 %v2576_v40  ;;  %v2680_v39 = vld [vmem:[%s12077_s7 + $0x5c8] sm:$0xff] }
 0x8e4   : > { %3348 = vmatpush.msra.mxu0 %v2591_v34  ;;  %3371 = vmatpush.msra.mxu1 %v2607_v35  ;;  %v2651_v34 = vld [vmem:[%s12077_s7 + $0x4e0] sm:$0xff] }
 0x8e5   : > { %3302 = vmatpush.msrb.mxu2 %v2559_v10  ;;  %3325 = vmatpush.msra.mxu3 %v2575_v41  ;;  %v2634_v41 = vld [vmem:[%s12077_s7 + $0x458] sm:$0xff] }
 0x8fc   : > { %v2855_v12 = vpop.f32.mrf.mxu0  ;;  %v2878_v46 = vpop.f32.mrf.mxu1 }
 0x8fd   : > { %v2856_v30 = vadd.f32 %v2855_v12, %v2756_v44  ;;  %v2879_v48 = vadd.f32 %v2878_v46, %v2757_v45  ;;  %v2759_v12 = vperm.slane %v10522_v43, 5 }
 0x8ff   : > { %v3162_v54 = vmax.f32 %v2856_v30, 0.0  ;;  %v3163_v56 = vmax.f32 %v2879_v48, 0.0  ;;  %v2663_v48 = vld [vmem:[%s12077_s7 + $0x540] sm:$0xff] }
 0x901   : > { %3257 = vmatmul.f32.vlgmr.msrb.gmra.mxu0 %v3162_v54  ;;  %3280 = vmatmul.f32.vlgmr.msrb.gmra.mxu1 %v3163_v56  ;;  %v2809_v36 = vpop.f32.mrf.mxu2  ;;  %v2832_v61 = vpop.f32.mrf.mxu3  ;;  %v2633_v56 = vld [vmem:[%s12077_s7 + $0x450] sm:$0xff] }
 0x902   : > { %3425 = vmatpush.msrb.mxu0 %v2670_v58  ;;  %3448 = vmatpush.msrb.mxu1 %v2686_v59  ;;  %v2810_v0 = vadd.f32 %v2809_v36, %v2754_v49  ;;  %v2833_v1 = vadd.f32 %v2832_v61, %v2755_v53  ;;  %v2649_v58 = vld [vmem:[%s12077_s7 + $0x4d0] sm:$0xff]  ;;  %v2662_v59 = vld [vmem:[%s12077_s7 + $0x538] sm:$0xff] }
 0x903   : > { %v2678_v36 = vld [vmem:[%s12077_s7 + $0x5b8] sm:$0xff] }
 0x904   : > { %v3160_v5 = vmax.f32 %v2810_v0, 0.0  ;;  %v3161_v6 = vmax.f32 %v2833_v1, 0.0  ;;  %3426 = vmatpush.msrb.mxu0 %v2669_v62  ;;  %3449 = vmatpush.msrb.mxu1 %v2685_v63  ;;  %v2858_v7 = vpop.f32.mrf.mxu0  ;;  %v2881_v60 = vpop.f32.mrf.mxu1  ;;  %v2632_v63 = vld [vmem:[%s12077_s7 + $0x448] sm:$0xff] }
 0x905   : > { %v2859_v8 = vadd.f32 %v2858_v7, %v2756_v44  ;;  %v2882_v9 = vadd.f32 %v2881_v60, %v2757_v45  ;;  %v2650_v44 = vld [vmem:[%s12077_s7 + $0x4d8] sm:$0xff]  ;;  %v2758_v45 = vperm.slane %v10522_v43, 4  ;;  %v2648_v0 = vld [vmem:[%s12077_s7 + $0x4c8] sm:$0xff]  ;;  %v2631_v60 = vld [vmem:[%s12077_s7 + $0x440] sm:$0xff] }
 0x906   : > { %3427 = vmatpush.msrb.mxu0 %v2668_v3  ;;  %3450 = vmatpush.msrb.mxu1 %v2684_v4  ;;  %v2661_v4 = vld [vmem:[%s12077_s7 + $0x530] sm:$0xff]  ;;  %v2627_v43 = vld [vmem:[%s12077_s7 + $0x420] sm:$0xff] }
 0x907   : > { %3211 = vmatmul.f32.vlgmr.msra.gmra.mxu2 %v3160_v5  ;;  %3234 = vmatmul.f32.vlgmr.msrb.gmra.mxu3 %v3161_v6  ;;  %v3178_v15 = vmax.f32 %v2859_v8, 0.0  ;;  %v3179_v16 = vmax.f32 %v2882_v9, 0.0  ;;  %v2677_v5 = vld [vmem:[%s12077_s7 + $0x5b0] sm:$0xff]  ;;  %v2647_v8 = vld [vmem:[%s12077_s7 + $0x4c0] sm:$0xff] }
 0x908   : > { %3379 = vmatpush.msra.mxu2 %v2638_v11  ;;  %3402 = vmatpush.msrb.mxu3 %v2654_v13  ;;  %v2660_v13 = vld [vmem:[%s12077_s7 + $0x528] sm:$0xff] }
 0x909   : > { %3428 = vmatpush.msrb.mxu0 %v2667_v14  ;;  %3451 = vmatpush.msrb.mxu1 %v2683_v29  ;;  %v2812_v21 = vpop.f32.mrf.mxu2  ;;  %v2835_v2 = vpop.f32.mrf.mxu3  ;;  %v2676_v14 = vld [vmem:[%s12077_s7 + $0x5a8] sm:$0xff]  ;;  %v2630_v29 = vld [vmem:[%s12077_s7 + $0x438] sm:$0xff] }
 0x90a   : > { %3260 = vmatmul.f32.gmra.mxu0 %v3178_v15  ;;  %3283 = vmatmul.f32.gmra.mxu1 %v3179_v16  ;;  %v2813_v23 = vadd.f32 %v2812_v21, %v2754_v49  ;;  %v2836_v42 = vadd.f32 %v2835_v2, %v2755_v53  ;;  %v2679_v49 = vld [vmem:[%s12077_s7 + $0x5c0] sm:$0xff]  ;;  %v2646_v15 = vld [vmem:[%s12077_s7 + $0x4b8] sm:$0xff]  ;;  %v10587_v2 = vld [vmem:[%s12079_s16 + $0x8] sm:$0xff] }
 0x90b   : > { %3380 = vmatpush.msra.mxu2 %v2637_v17  ;;  %3403 = vmatpush.msrb.mxu3 %v2653_v18  ;;  %v2659_v16 = vld [vmem:[%s12077_s7 + $0x520] sm:$0xff] }
 0x90c   : > { %3429 = vmatpush.msrb.mxu0 %v2666_v19  ;;  %3452 = vmatpush.msrb.mxu1 %v2682_v20  ;;  %v2947_v28 = vpop.f32.mrf.mxu0  ;;  %v2970_v32 = vpop.f32.mrf.mxu1  ;;  %v3176_v40 = vmax.f32 %v2813_v23, 0.0  ;;  %v3177_v10 = vmax.f32 %v2836_v42, 0.0  ;;  %v2675_v17 = vld [vmem:[%s12077_s7 + $0x5a0] sm:$0xff]  ;;  %v2658_v23 = vld [vmem:[%s12077_s7 + $0x518] sm:$0xff] }
 0x90d   : > { %3381 = vmatpush.msra.mxu2 %v2636_v24  ;;  %3404 = vmatpush.msrb.mxu3 %v2652_v25  ;;  %v2948_v35 = vadd.f32 %v2947_v28, %v2760_v31  ;;  %v2971_v37 = vadd.f32 %v2970_v32, %v2761_v22  ;;  %v2674_v42 = vld [vmem:[%s12077_s7 + $0x598] sm:$0xff]  ;;  %v2764_v28 = vperm.slane %v10587_v2, 2  ;;  %v2765_v32 = vperm.slane %v10587_v2, 3 }
 0x90e   : > { %3430 = vmatpush.msrb.mxu0 %v2665_v26  ;;  %3453 = vmatpush.msrb.mxu1 %v2681_v27  ;;  %v2628_v26 = vld [vmem:[%s12077_s7 + $0x428] sm:$0xff] }
 0x90f   : > { %3382 = vmatpush.msra.mxu2 %v2635_v33  ;;  %3405 = vmatpush.msrb.mxu3 %v2651_v34  ;;  %v3166_v46 = vmax.f32 %v2948_v35, 0.0  ;;  %v3167_v30 = vmax.f32 %v2971_v37, 0.0  ;;  %v2644_v27 = vld [vmem:[%s12077_s7 + $0x4a8] sm:$0xff]  ;;  %v2657_v33 = vld [vmem:[%s12077_s7 + $0x510] sm:$0xff] }
 0x910   : > { %3431 = vmatpush.msrb.mxu0 %v2664_v38  ;;  %3454 = vmatpush.msrb.mxu1 %v2680_v39  ;;  %v2673_v34 = vld [vmem:[%s12077_s7 + $0x590] sm:$0xff]  ;;  %v2643_v38 = vld [vmem:[%s12077_s7 + $0x4a0] sm:$0xff]  ;;  %v2656_v39 = vld [vmem:[%s12077_s7 + $0x508] sm:$0xff] }
 0x911   : > { %3214 = vmatmul.f32.gmra.mxu2 %v3176_v40  ;;  %3237 = vmatmul.f32.gmra.mxu3 %v3177_v10  ;;  %v2901_v53 = vpop.f32.mrf.mxu2  ;;  %v2924_v54 = vpop.f32.mrf.mxu3  ;;  %v2672_v40 = vld [vmem:[%s12077_s7 + $0x588] sm:$0xff] }
 0x912   : > { %3383 = vmatpush.msra.mxu2 %v2634_v41  ;;  %3406 = vmatpush.msrb.mxu3 %v2650_v44  ;;  %v2902_v61 = vadd.f32 %v2901_v53, %v2758_v45  ;;  %v2925_v62 = vadd.f32 %v2924_v54, %v2759_v12  ;;  %v2750_v53 = vld [vmem:[%s12077_s7 + $0x7f8] sm:$0xff]  ;;  %v2762_v54 = vperm.slane %v10587_v2, 0 }
 0x913   : > { %3432 = vmatpush.msrb.mxu0 %v2663_v48  ;;  %3455 = vmatpush.msrb.mxu1 %v2679_v49  ;;  %v2671_v48 = vld [vmem:[%s12077_s7 + $0x580] sm:$0xff]  ;;  %v2734_v49 = vld [vmem:[%s12077_s7 + $0x778] sm:$0xff] }
 0x914   : > { %3349 = vmatmul.f32.vlgmr.msra.gmra.mxu0 %v3166_v46  ;;  %3372 = vmatmul.f32.vlgmr.msra.gmra.mxu1 %v3167_v30  ;;  %v2950_v1 = vpop.f32.mrf.mxu0  ;;  %v2973_v3 = vpop.f32.mrf.mxu1  ;;  %v3164_v9 = vmax.f32 %v2902_v61, 0.0  ;;  %v3165_v11 = vmax.f32 %v2925_v62, 0.0  ;;  %v2642_v46 = vld [vmem:[%s12077_s7 + $0x498] sm:$0xff]  ;;  %v2655_v30 = vld [vmem:[%s12077_s7 + $0x500] sm:$0xff]  ;;  %v2641_v61 = vld [vmem:[%s12077_s7 + $0x490] sm:$0xff] }
 0x915   : > { %3384 = vmatpush.msra.mxu2 %v2633_v56  ;;  %3407 = vmatpush.msrb.mxu3 %v2649_v58  ;;  %v2951_v6 = vadd.f32 %v2950_v1, %v2760_v31  ;;  %v2974_v7 = vadd.f32 %v2973_v3, %v2761_v22  ;;  %v2629_v31 = vld [vmem:[%s12077_s7 + $0x430] sm:$0xff]  ;;  %v2763_v56 = vperm.slane %v10587_v2, 1 }
 0x916   : > { %3433 = vmatpush.msrb.mxu0 %v2662_v59  ;;  %3456 = vmatpush.msrb.mxu1 %v2678_v36  ;;  %v2645_v22 = vld [vmem:[%s12077_s7 + $0x4b0] sm:$0xff] }
 0x917   : > { %3385 = vmatpush.msra.mxu2 %v2632_v63  ;;  %3408 = vmatpush.msrb.mxu3 %v2648_v0  ;;  %v3182_v18 = vmax.f32 %v2951_v6, 0.0  ;;  %v3183_v19 = vmax.f32 %v2974_v7, 0.0  ;;  %v2625_v36 = vld [vmem:[%s12077_s7 + $0x410] sm:$0xff]  ;;  %v2640_v6 = vld [vmem:[%s12077_s7 + $0x488] sm:$0xff] }
 0x918   : > { %3434 = vmatpush.msrb.mxu0 %v2661_v4  ;;  %3457 = vmatpush.msrb.mxu1 %v2677_v5  ;;  %v2733_v0 = vld [vmem:[%s12077_s7 + $0x770] sm:$0xff]  ;;  %v2624_v5 = vld [vmem:[%s12077_s7 + $0x408] sm:$0xff] }
 0x919   : > { %3386 = vmatpush.msra.mxu2 %v2631_v60  ;;  %3409 = vmatpush.msrb.mxu3 %v2647_v8  ;;  %v2904_v20 = vpop.f32.mrf.mxu2  ;;  %v2927_v21 = vpop.f32.mrf.mxu3  ;;  %v2749_v1 = vld [vmem:[%s12077_s7 + $0x7f0] sm:$0xff]  ;;  %v2732_v8 = vld [vmem:[%s12077_s7 + $0x768] sm:$0xff] }
 0x91a   : > { %3435 = vmatpush.msrb.mxu0 %v2660_v13  ;;  %3458 = vmatpush.msrb.mxu1 %v2676_v14  ;;  %v2905_v24 = vadd.f32 %v2904_v20, %v2758_v45  ;;  %v2928_v25 = vadd.f32 %v2927_v21, %v2759_v12  ;;  %v2626_v12 = vld [vmem:[%s12077_s7 + $0x418] sm:$0xff]  ;;  %v2639_v13 = vld [vmem:[%s12077_s7 + $0x480] sm:$0xff]  ;;  %v2701_v21 = vld [vmem:[%s12077_s7 + $0x670] sm:$0xff] }
 0x91b   : > { %3303 = vmatmul.f32.vlgmr.msrb.gmra.mxu2 %v3164_v9  ;;  %3326 = vmatmul.f32.vlgmr.msra.gmra.mxu3 %v3165_v11  ;;  %v2748_v9 = vld [vmem:[%s12077_s7 + $0x7e8] sm:$0xff]  ;;  %v2623_v11 = vld [vmem:[%s12077_s7 + $0x400] sm:$0xff] }
 0x91c   : > { %3387 = vmatpush.msra.mxu2 %v2630_v29  ;;  %3410 = vmatpush.msrb.mxu3 %v2646_v15  ;;  %v3039_v35 = vpop.f32.mrf.mxu0  ;;  %v3062_v37 = vpop.f32.mrf.mxu1  ;;  %v3180_v10 = vmax.f32 %v2905_v24, 0.0  ;;  %v3181_v41 = vmax.f32 %v2928_v25, 0.0  ;;  %v2702_v15 = vld [vmem:[%s12077_s7 + $0x678] sm:$0xff]  ;;  %v2747_v20 = vld [vmem:[%s12077_s7 + $0x7e0] sm:$0xff] }
 0x91d   : > { %3436 = vmatpush.msrb.mxu0 %v2659_v16  ;;  %3459 = vmatpush.msrb.mxu1 %v2675_v17  ;;  %v3040_v44 = vadd.f32 %v3039_v35, %v2764_v28  ;;  %v3063_v45 = vadd.f32 %v3062_v37, %v2765_v32  ;;  %v2718_v16 = vld [vmem:[%s12077_s7 + $0x6f8] sm:$0xff]  ;;  %v2745_v35 = vld [vmem:[%s12077_s7 + $0x7d0] sm:$0xff]  ;;  %v2699_v37 = vld [vmem:[%s12077_s7 + $0x660] sm:$0xff] }
 0x91e   : > { %3352 = vmatmul.f32.gmra.mxu0 %v3182_v18  ;;  %3375 = vmatmul.f32.gmra.mxu1 %v3183_v19  ;;  %v2731_v19 = vld [vmem:[%s12077_s7 + $0x760] sm:$0xff] }
 0x91f   : > { %3388 = vmatpush.msra.mxu2 %v2629_v31  ;;  %3411 = vmatpush.msrb.mxu3 %v2645_v22  ;;  %v3170_v58 = vmax.f32 %v3040_v44, 0.0  ;;  %v3171_v59 = vmax.f32 %v3063_v45, 0.0  ;;  %v2717_v31 = vld [vmem:[%s12077_s7 + $0x6f0] sm:$0xff]  ;;  %v2730_v22 = vld [vmem:[%s12077_s7 + $0x758] sm:$0xff]  ;;  %v2743_v44 = vld [vmem:[%s12077_s7 + $0x7c0] sm:$0xff] }
 0x920   : > { %3437 = vmatpush.msrb.mxu0 %v2658_v23  ;;  %3460 = vmatpush.msrb.mxu1 %v2674_v42  ;;  %v2746_v23 = vld [vmem:[%s12077_s7 + $0x7d8] sm:$0xff] }
 0x921   : > { %3389 = vmatpush.msra.mxu2 %v2628_v26  ;;  %3412 = vmatpush.msrb.mxu3 %v2644_v27  ;;  %v2993_v62 = vpop.f32.mrf.mxu2  ;;  %v3016_v63 = vpop.f32.mrf.mxu3  ;;  %v2700_v27 = vld [vmem:[%s12077_s7 + $0x668] sm:$0xff] }
 0x922   : > { %3438 = vmatpush.msrb.mxu0 %v2657_v33  ;;  %3461 = vmatpush.msrb.mxu1 %v2673_v34  ;;  %v2994_v3 = vadd.f32 %v2993_v62, %v2762_v54  ;;  %v3017_v4 = vadd.f32 %v3016_v63, %v2763_v56  ;;  %v2729_v34 = vld [vmem:[%s12077_s7 + $0x750] sm:$0xff]  ;;  %v2740_v62 = vld [vmem:[%s12077_s7 + $0x7a8] sm:$0xff]  ;;  %v2694_v63 = vld [vmem:[%s12077_s7 + $0x638] sm:$0xff] }
 0x923   : > { %3390 = vmatpush.msra.mxu2 %v2627_v43  ;;  %3413 = vmatpush.msrb.mxu3 %v2643_v38  ;;  %v2715_v43 = vld [vmem:[%s12077_s7 + $0x6e0] sm:$0xff]  ;;  %v2728_v38 = vld [vmem:[%s12077_s7 + $0x748] sm:$0xff] }
 0x924   : > { %3439 = vmatpush.msrb.mxu0 %v2656_v39  ;;  %3462 = vmatpush.msrb.mxu1 %v2672_v40  ;;  %v3042_v7 = vpop.f32.mrf.mxu0  ;;  %v3065_v60 = vpop.f32.mrf.mxu1  ;;  %v3168_v17 = vmax.f32 %v2994_v3, 0.0  ;;  %v3169_v18 = vmax.f32 %v3017_v4, 0.0  ;;  %v2744_v39 = vld [vmem:[%s12077_s7 + $0x7c8] sm:$0xff]  ;;  %v2698_v40 = vld [vmem:[%s12077_s7 + $0x658] sm:$0xff]  ;;  %v2739_v3 = vld [vmem:[%s12077_s7 + $0x7a0] sm:$0xff] }
 0x925   : > { %3306 = vmatmul.f32.gmra.mxu2 %v3180_v10  ;;  %3329 = vmatmul.f32.gmra.mxu3 %v3181_v41  ;;  %v3043_v14 = vadd.f32 %v3042_v7, %v2764_v28  ;;  %v3066_v29 = vadd.f32 %v3065_v60, %v2765_v32  ;;  %v2716_v28 = vld [vmem:[%s12077_s7 + $0x6e8] sm:$0xff]  ;;  %v2714_v10 = vld [vmem:[%s12077_s7 + $0x6d8] sm:$0xff]  ;;  %v2727_v41 = vld [vmem:[%s12077_s7 + $0x740] sm:$0xff]  ;;  %v2768_v60 = vperm.slane %v10587_v2, 6 }
 0x926   : > { %3391 = vmatpush.msra.mxu2 %v2626_v12  ;;  %3414 = vmatpush.msrb.mxu3 %v2642_v46  ;;  %v2697_v46 = vld [vmem:[%s12077_s7 + $0x650] sm:$0xff] }
 0x927   : > { %3440 = vmatpush.msrb.mxu0 %v2655_v30  ;;  %3463 = vmatpush.msrb.mxu1 %v2671_v48  ;;  %v3186_v42 = vmax.f32 %v3043_v14, 0.0  ;;  %v3187_v24 = vmax.f32 %v3066_v29, 0.0  ;;  %v2713_v30 = vld [vmem:[%s12077_s7 + $0x6d0] sm:$0xff]  ;;  %v2726_v48 = vld [vmem:[%s12077_s7 + $0x738] sm:$0xff]  ;;  %v2708_v14 = vld [vmem:[%s12077_s7 + $0x6a8] sm:$0xff] }
 0x928   : > { %3392 = vmatpush.msra.mxu2 %v2625_v36  ;;  %3415 = vmatpush.msrb.mxu3 %v2641_v61  ;;  %v2711_v36 = vld [vmem:[%s12077_s7 + $0x6c0] sm:$0xff]  ;;  %v2724_v61 = vld [vmem:[%s12077_s7 + $0x728] sm:$0xff]  ;;  %v2709_v7 = vld [vmem:[%s12077_s7 + $0x6b0] sm:$0xff] }
 0x929   : > { %3517 = vmatpush.msra.mxu0 %v2734_v49  ;;  %3540 = vmatpush.msra.mxu1 %v2750_v53  ;;  %v2996_v25 = vpop.f32.mrf.mxu2  ;;  %v3019_v26 = vpop.f32.mrf.mxu3  ;;  %v2742_v49 = vld [vmem:[%s12077_s7 + $0x7b8] sm:$0xff]  ;;  %v2696_v53 = vld [vmem:[%s12077_s7 + $0x648] sm:$0xff]  ;;  %v2721_v29 = vld [vmem:[%s12077_s7 + $0x710] sm:$0xff] }
 0x92a   : > { %3441 = vmatmul.f32.vlgmr.msrb.gmra.mxu0 %v3170_v58  ;;  %3464 = vmatmul.f32.vlgmr.msrb.gmra.mxu1 %v3171_v59  ;;  %v2997_v32 = vadd.f32 %v2996_v25, %v2762_v54  ;;  %v3020_v33 = vadd.f32 %v3019_v26, %v2763_v56  ;;  %v2712_v54 = vld [vmem:[%s12077_s7 + $0x6c8] sm:$0xff]  ;;  %v2725_v56 = vld [vmem:[%s12077_s7 + $0x730] sm:$0xff]  ;;  %v2695_v59 = vld [vmem:[%s12077_s7 + $0x640] sm:$0xff]  ;;  %v2767_v25 = vperm.slane %v10587_v2, 5 }
 0x92b   : > { %3518 = vmatpush.msra.mxu0 %v2733_v0  ;;  %3541 = vmatpush.msra.mxu1 %v2749_v1  ;;  %v2741_v58 = vld [vmem:[%s12077_s7 + $0x7b0] sm:$0xff]  ;;  %v2710_v0 = vld [vmem:[%s12077_s7 + $0x6b8] sm:$0xff]  ;;  %v2723_v1 = vld [vmem:[%s12077_s7 + $0x720] sm:$0xff] }
 0x92c   : > { %3393 = vmatpush.msra.mxu2 %v2624_v5  ;;  %3416 = vmatpush.msrb.mxu3 %v2640_v6  ;;  %v3184_v45 = vmax.f32 %v2997_v32, 0.0  ;;  %v3185_v12 = vmax.f32 %v3020_v33, 0.0  ;;  %v3131_v4 = vpop.f32.mrf.mxu0  ;;  %v3154_v5 = vpop.f32.mrf.mxu1  ;;  %v2693_v6 = vld [vmem:[%s12077_s7 + $0x630] sm:$0xff]  ;;  %v2719_v26 = vld [vmem:[%s12077_s7 + $0x700] sm:$0xff] }
 0x92d   : > { %3519 = vmatpush.msra.mxu0 %v2732_v8  ;;  %3542 = vmatpush.msra.mxu1 %v2748_v9  ;;  %v2769_v8 = vperm.slane %v10587_v2, 7  ;;  %v2722_v9 = vld [vmem:[%s12077_s7 + $0x718] sm:$0xff]  ;;  %v2689_v33 = vld [vmem:[%s12077_s7 + $0x610] sm:$0xff] }
 0x92e   : > { %3394 = vmatpush.msra.mxu2 %v2623_v11  ;;  %3417 = vmatpush.msrb.mxu3 %v2639_v13  ;;  %v2738_v11 = vld [vmem:[%s12077_s7 + $0x798] sm:$0xff]  ;;  %v2692_v13 = vld [vmem:[%s12077_s7 + $0x628] sm:$0xff] }
 0x92f   : > { %3520 = vmatpush.msra.mxu0 %v2731_v19  ;;  %3543 = vmatpush.msra.mxu1 %v2747_v20  ;;  %v3155_v19 = vadd.f32 %v3154_v5, %v2769_v8  ;;  %v2720_v20 = vld [vmem:[%s12077_s7 + $0x708] sm:$0xff] }
 0x930   : > { %3471 = vmatpush.msrb.mxu2 %v2702_v15  ;;  %3494 = vmatpush.msra.mxu3 %v2718_v16  ;;  %v2737_v15 = vld [vmem:[%s12077_s7 + $0x790] sm:$0xff]  ;;  %v2691_v16 = vld [vmem:[%s12077_s7 + $0x620] sm:$0xff] }
 0x931   : > { %3395 = vmatmul.f32.vlgmr.msra.gmra.mxu2 %v3168_v17  ;;  %3418 = vmatmul.f32.vlgmr.msrb.gmra.mxu3 %v3169_v18  ;;  %v2707_v17 = vld [vmem:[%s12077_s7 + $0x6a0] sm:$0xff]  ;;  %v3132_v18 = vadd.f32 %v3131_v4, %v2768_v60  ;;  %v3175_v32 = vmax.f32 %v3155_v19, 0.0 }
 0x932   : > { %3472 = vmatpush.msrb.mxu2 %v2701_v21  ;;  %3495 = vmatpush.msra.mxu3 %v2717_v31  ;;  %v2736_v21 = vld [vmem:[%s12077_s7 + $0x788] sm:$0xff]  ;;  %v3085_v31 = vpop.f32.mrf.mxu2 }
 0x933   : > { %3521 = vmatpush.msra.mxu0 %v2730_v22  ;;  %3544 = vmatpush.msra.mxu1 %v2746_v23  ;;  %v3108_v22 = vpop.f32.mrf.mxu3  ;;  %v2690_v23 = vld [vmem:[%s12077_s7 + $0x618] sm:$0xff] }
 0x934   : > { %3444 = vmatmul.f32.gmra.mxu0 %v3186_v42  ;;  %3467 = vmatmul.f32.gmra.mxu1 %v3187_v24  ;;  %v2706_v42 = vld [vmem:[%s12077_s7 + $0x698] sm:$0xff]  ;;  %v2766_v24 = vperm.slane %v10587_v2, 4 }
 0x935   : > { %3473 = vmatpush.msrb.mxu2 %v2700_v27  ;;  %3496 = vmatpush.msra.mxu3 %v2716_v28  ;;  %v2735_v27 = vld [vmem:[%s12077_s7 + $0x780] sm:$0xff]  ;;  %v3174_v28 = vmax.f32 %v3132_v18, 0.0 }
 0x936   : > { %3522 = vmatpush.msra.mxu0 %v2729_v34  ;;  %3545 = vmatpush.msra.mxu1 %v2745_v35  ;;  %v2705_v34 = vld [vmem:[%s12077_s7 + $0x690] sm:$0xff]  ;;  %v3134_v35 = vpop.f32.mrf.mxu0  ;;  %v3086_v2 = vadd.f32 %v3085_v31, %v2766_v24 }
 0x937   : > { %3474 = vmatpush.msrb.mxu2 %v2699_v37  ;;  %3497 = vmatpush.msra.mxu3 %v2715_v43  ;;  %v3157_v37 = vpop.f32.mrf.mxu1  ;;  %v3109_v43 = vadd.f32 %v3108_v22, %v2767_v25 }
 0x938   : > { %3523 = vmatpush.msra.mxu0 %v2728_v38  ;;  %3546 = vmatpush.msra.mxu1 %v2744_v39  ;;  %v2688_v38 = vld [vmem:[%s12077_s7 + $0x608] sm:$0xff] }
 0x939   : > { %3475 = vmatpush.msrb.mxu2 %v2698_v40  ;;  %3498 = vmatpush.msra.mxu3 %v2714_v10  ;;  %v2704_v39 = vld [vmem:[%s12077_s7 + $0x688] sm:$0xff]  ;;  %v3135_v40 = vadd.f32 %v3134_v35, %v2768_v60  ;;  %v3158_v10 = vadd.f32 %v3157_v37, %v2769_v8 }
 0x93a   : > { %3524 = vmatpush.msra.mxu0 %v2727_v41  ;;  %3547 = vmatpush.msra.mxu1 %v2743_v44  ;;  %v2687_v41 = vld [vmem:[%s12077_s7 + $0x600] sm:$0xff] }
 0x93b   : > { %3398 = vmatmul.f32.gmra.mxu2 %v3184_v45  ;;  %3421 = vmatmul.f32.gmra.mxu3 %v3185_v12  ;;  %v2703_v44 = vld [vmem:[%s12077_s7 + $0x680] sm:$0xff]  ;;  %v3172_v45 = vmax.f32 %v3086_v2, 0.0  ;;  %v3173_v12 = vmax.f32 %v3109_v43, 0.0 }
 0x93c   : > { %3476 = vmatpush.msrb.mxu2 %v2697_v46  ;;  %3499 = vmatpush.msra.mxu3 %v2713_v30  ;;  %v3088_v46 = vpop.f32.mrf.mxu2  ;;  %v3111_v30 = vpop.f32.mrf.mxu3 }
 0x93d   : > { %3525 = vmatpush.msra.mxu0 %v2726_v48  ;;  %3548 = vmatpush.msra.mxu1 %v2742_v49  ;;  %v3190_v48 = vmax.f32 %v3135_v40, 0.0  ;;  %v3191_v49 = vmax.f32 %v3158_v10, 0.0 }
 0x93e   : > { %3477 = vmatpush.msrb.mxu2 %v2696_v53  ;;  %3500 = vmatpush.msra.mxu3 %v2712_v54  ;;  %v3089_v53 = vadd.f32 %v3088_v46, %v2766_v24  ;;  %v3112_v54 = vadd.f32 %v3111_v30, %v2767_v25 }
 0x93f   : > { %3526 = vmatpush.msra.mxu0 %v2725_v56  ;;  %3549 = vmatpush.msra.mxu1 %v2741_v58 }
 0x940   : > { %3478 = vmatpush.msrb.mxu2 %v2695_v59  ;;  %3501 = vmatpush.msra.mxu3 %v2711_v36  ;;  %v3188_v56 = vmax.f32 %v3089_v53, 0.0  ;;  %v3189_v58 = vmax.f32 %v3112_v54, 0.0 }
 0x941   : > { %3527 = vmatpush.msra.mxu0 %v2724_v61  ;;  %3550 = vmatpush.msra.mxu1 %v2740_v62 }
 0x942   : > { %3479 = vmatpush.msrb.mxu2 %v2694_v63  ;;  %3502 = vmatpush.msra.mxu3 %v2710_v0 }
 0x943   : > { %3528 = vmatpush.msra.mxu0 %v2723_v1  ;;  %3551 = vmatpush.msra.mxu1 %v2739_v3  ;;  %v8959_v3 = vld [vmem:[%s12080_s22] ss:$0 sm:$0xff]  ;;  %s12084_s22 = sld [smem:[#allocation48_spill]] }
 0x944   : > { %3480 = vmatpush.msrb.mxu2 %v2693_v6  ;;  %3503 = vmatpush.msra.mxu3 %v2709_v7 }
 0x945   : > { %3529 = vmatpush.msra.mxu0 %v2722_v9  ;;  %3552 = vmatpush.msra.mxu1 %v2738_v11 }
 0x946   : > { %3481 = vmatpush.msrb.mxu2 %v2692_v13  ;;  %3504 = vmatpush.msra.mxu3 %v2708_v14 }
 0x947   : > { %3530 = vmatpush.msra.mxu0 %v2721_v29  ;;  %3553 = vmatpush.msra.mxu1 %v2737_v15 }
 0x948   : > { %3482 = vmatpush.msrb.mxu2 %v2691_v16  ;;  %3505 = vmatpush.msra.mxu3 %v2707_v17 }
 0x949   : > { %3531 = vmatpush.msra.mxu0 %v2720_v20  ;;  %3554 = vmatpush.msra.mxu1 %v2736_v21  ;;  %s12085_s4 = smov %s12084_s22 }
 0x94a   : > { %3483 = vmatpush.msrb.mxu2 %v2690_v23  ;;  %3506 = vmatpush.msra.mxu3 %v2706_v42 }
 0x94b   : > { %3532 = vmatpush.msra.mxu0 %v2719_v26  ;;  %3555 = vmatpush.msra.mxu1 %v2735_v27 }
 0x94c   : > { %3533 = vmatmul.f32.vlgmr.msra.gmra.mxu0 %v3174_v28  ;;  %3556 = vmatmul.f32.vlgmr.msra.gmra.mxu1 %v3175_v32 }
 0x94d   : > { %3484 = vmatpush.msrb.mxu2 %v2689_v33  ;;  %3507 = vmatpush.msra.mxu3 %v2705_v34 }
 0x94f   : > { %3485 = vmatpush.msrb.mxu2 %v2688_v38  ;;  %3508 = vmatpush.msra.mxu3 %v2704_v39 }
 0x951   : > { %3486 = vmatpush.msrb.mxu2 %v2687_v41  ;;  %3509 = vmatpush.msra.mxu3 %v2703_v44 }
 0x952   : > { %3487 = vmatmul.f32.vlgmr.msrb.gmra.mxu2 %v3172_v45  ;;  %3510 = vmatmul.f32.vlgmr.msra.gmra.mxu3 %v3173_v12 }
 0x954   : > { %3536 = vmatmul.f32.gmra.mxu0 %v3190_v48  ;;  %3559 = vmatmul.f32.gmra.mxu1 %v3191_v49 }
 0x95a   : > { %3490 = vmatmul.f32.gmra.mxu2 %v3188_v56  ;;  %3513 = vmatmul.f32.gmra.mxu3 %v3189_v58 }
 0x97e   : > { %v3258_v61 = vpop.f32.mrf.mxu0  ;;  %v3281_v62 = vpop.f32.mrf.mxu1 }
 0x987   : > { %v3261_v1 = vpop.f32.mrf.mxu0  ;;  %v3284_v4 = vpop.f32.mrf.mxu1 }
 0x98a   : > { %v3212_v59 = vpop.f32.mrf.mxu2  ;;  %v3235_v36 = vpop.f32.mrf.mxu3 }
 0x98b   : > { %v3213_v5 = vadd.f32 %v8959_v3, %v3212_v59 }
 0x98d   : > { %v3236_v60 = vadd.f32 %v3235_v36, %v3213_v5 }
 0x98f   : > { %v3259_v11 = vadd.f32 %v3258_v61, %v3236_v60 }
 0x991   : > { %v3350_v8 = vpop.f32.mrf.mxu0  ;;  %v3373_v9 = vpop.f32.mrf.mxu1  ;;  %v3282_v29 = vadd.f32 %v3281_v62, %v3259_v11 }
 0x994   : > { %v3215_v63 = vpop.f32.mrf.mxu2  ;;  %v3238_v0 = vpop.f32.mrf.mxu3 }
 0x995   : > { %v3216_v13 = vadd.f32 %v8959_v3, %v3215_v63 }
 0x997   : > { %v3239_v14 = vadd.f32 %v3238_v0, %v3216_v13 }
 0x999   : > { %v3262_v19 = vadd.f32 %v3261_v1, %v3239_v14 }
 0x99b   : > { %v3353_v18 = vpop.f32.mrf.mxu0  ;;  %v3376_v20 = vpop.f32.mrf.mxu1  ;;  %v3285_v31 = vadd.f32 %v3284_v4, %v3262_v19 }
 0x99e   : > { %v3304_v6 = vpop.f32.mrf.mxu2  ;;  %v3327_v7 = vpop.f32.mrf.mxu3 }
 0x99f   : > { %v3305_v17 = vadd.f32 %v3304_v6, %v3282_v29 }
 0x9a1   : > { %v3328_v21 = vadd.f32 %v3327_v7, %v3305_v17  ;;  %v8212_v17 = vld [vmem:[%s12047_s3 + $0x28] sm:$0xff] }
 0x9a3   : > { %v3351_v22 = vadd.f32 %v3350_v8, %v3328_v21 }
 0x9a5   : > { %v3374_v27 = vadd.f32 %v3373_v9, %v3351_v22 }
 0x9a7   : > { %v3442_v25 = vpop.f32.mrf.mxu0  ;;  %v3465_v28 = vpop.f32.mrf.mxu1 }
 0x9a8   : > { %v3307_v15 = vpop.f32.mrf.mxu2  ;;  %v3330_v16 = vpop.f32.mrf.mxu3 }
 0x9a9   : > { %v3308_v23 = vadd.f32 %v3307_v15, %v3285_v31  ;;  %v8214_v15 = vld [vmem:[%s12047_s3 + $0x38] sm:$0xff] }
 0x9aa   : > { %3656 = vmatpush.msra.mxu2 %v8214_v15 }
 0x9ab   : > { %v3331_v26 = vadd.f32 %v3330_v16, %v3308_v23  ;;  %v8213_v16 = vld [vmem:[%s12047_s3 + $0x30] sm:$0xff] }
 0x9ac   : > { %3657 = vmatpush.msra.mxu2 %v8213_v16 }
 0x9ad   : > { %v3354_v33 = vadd.f32 %v3353_v18, %v3331_v26  ;;  %v8211_v18 = vld [vmem:[%s12047_s3 + $0x20] sm:$0xff]  ;;  %s12088_s3 = smov 88  }
 0x9ae   : > { %3658 = vmatpush.msra.mxu2 %v8212_v17 }
 0x9af   : > { %v3377_v2 = vadd.f32 %v3376_v20, %v3354_v33 }
 0x9b0   : > { %3659 = vmatpush.msra.mxu2 %v8211_v18 }
 0x9b1   : > { %v3445_v43 = vpop.f32.mrf.mxu0  ;;  %v3468_v40 = vpop.f32.mrf.mxu1 }
 0x9b4   : > { %v3396_v42 = vpop.f32.mrf.mxu2  ;;  %v3419_v24 = vpop.f32.mrf.mxu3 }
 0x9b5   : > { %v3397_v32 = vadd.f32 %v3396_v42, %v3374_v27 }
 0x9b7   : > { %v3420_v34 = vadd.f32 %v3419_v24, %v3397_v32 }
 0x9b9   : > { %v3443_v38 = vadd.f32 %v3442_v25, %v3420_v34  ;;  %v8960_v34 = vld [vmem:[%s12082_s28] ss:$0 sm:$0xff]  ;;  %s12086_s28 = smov 96  }
 0x9bb   : > { %v3466_v41 = vadd.f32 %v3465_v28, %v3443_v38 }
 0x9be   : > { %v3399_v35 = vpop.f32.mrf.mxu2  ;;  %v3422_v37 = vpop.f32.mrf.mxu3 }
 0x9bf   : > { %v3400_v39 = vadd.f32 %v3399_v35, %v3377_v2  ;;  %v8961_v2 = vld [vmem:[%s12084_s22] ss:$0 sm:$0xff]  ;;  %s12087_s22 = smov 64  }
 0x9c1   : > { %v3423_v10 = vadd.f32 %v3422_v37, %v3400_v39 }
 0x9c3   : > { %v3446_v30 = vadd.f32 %v3445_v43, %v3423_v10 }
 0x9c5   : > { %v3469_v54 = vadd.f32 %v3468_v40, %v3446_v30  ;;  %v8962_v30 = vld [vmem:[%s12062_s9 + $0x1] ss:$0 sm:$0xff]  ;;  %s12091_s9 = smov 112  }
 0x9c9   : > { %v3534_v46 = vpop.f32.mrf.mxu0  ;;  %v3557_v49 = vpop.f32.mrf.mxu1 }
 0x9d1   : > { %v3537_v0 = vpop.f32.mrf.mxu0  ;;  %v3560_v3 = vpop.f32.mrf.mxu1 }
 0x9d5   : > { %v3488_v44 = vpop.f32.mrf.mxu2  ;;  %v3511_v45 = vpop.f32.mrf.mxu3 }
 0x9d6   : > { %v3489_v12 = vadd.f32 %v3488_v44, %v3466_v41 }
 0x9d8   : > { %v3512_v48 = vadd.f32 %v3511_v45, %v3489_v12 }
 0x9da   : > { %v3535_v53 = vadd.f32 %v3534_v46, %v3512_v48 }
 0x9dc   : > { %v3558_v56 = vadd.f32 %v3557_v49, %v3535_v53 }
 0x9dd   : > { %v3491_v58 = vpop.f32.mrf.mxu2  ;;  %v3514_v61 = vpop.f32.mrf.mxu3 }
 0x9de   : > { %v3492_v59 = vadd.f32 %v3491_v58, %v3469_v54  ;;  %v3563_v36 = vadd.f32 %v3558_v56, %v10292_v55 }
 0x9e0   : > { %v3515_v62 = vadd.f32 %v3514_v61, %v3492_v59  ;;  %v3567_v63 = vsel %vm1714_vm3, %v3563_v36, 0.0 }
 0x9e1   : > { %3568 = vadd.xlane.f32.xlu1 %v3567_v63 }
 0x9e2   : > { %v3538_v1 = vadd.f32 %v3537_v0, %v3515_v62 }
 0x9e4   : > { %v3561_v4 = vadd.f32 %v3560_v3, %v3538_v1 }
 0x9e6   : > { %v3564_v5 = vadd.f32 %v3561_v4, %v10315_v57 }
 0x9e8   : > { %v3570_v6 = vsel %vm1714_vm3, %v3564_v5, 0.0 }
 0x9e9   : > { %3571 = vadd.xlane.f32.xlu0 %v3570_v6 }
 0xa54   : > { %v3569_v7 = vpop.xlane.xlu1 %3568 }
 0xa55   : > { %v3573_v55 = vmul.f32 %v3569_v7, %v10241_v47 }
 0xa57   : > { %v3575_v60 = vsub.f32 %v3563_v36, %v3573_v55 }
 0xa59   : > { %v3577_v8 = vmul.f32 %v3575_v60, %v3575_v60 }
 0xa5b   : > { %v3579_v9 = vsel %vm1714_vm3, %v3577_v8, 0.0 }
 0xa5c   : > { %3580 = vadd.xlane.f32.xlu1 %v3579_v9  ;;  %v3572_v11 = vpop.xlane.xlu0 %3571 }
 0xa5d   : > { %v3574_v13 = vmul.f32 %v3572_v11, %v10241_v47 }
 0xa5f   : > { %v3576_v14 = vsub.f32 %v3564_v5, %v3574_v13 }
 0xa61   : > { %v3578_v29 = vmul.f32 %v3576_v14, %v3576_v14 }
 0xa63   : > { %v3582_v57 = vsel %vm1714_vm3, %v3578_v29, 0.0 }
 0xa64   : > { %3583 = vadd.xlane.f32.xlu0 %v3582_v57  ;;  %v8216_v57 = vld [vmem:[%s12065_s18 + $0x20] sm:$0xff] }
 0xacf   : > { %v3581_v19 = vpop.xlane.xlu1 %3580 }
 0xad0   : > { %v3585_v20 = vmul.f32 %v3581_v19, %v10241_v47 }
 0xad2   : > { %v3587_v21 = vadd.f32 1e-05, %v3585_v20 }
 0xad4   : > { %9022 = vrsqrt.f32 %v3587_v21  ;;  %vm3595_vm12 = vweird.f32 %v3587_v21 }
 0xad7   : > { %v3584_v31 = vpop.xlane.xlu0 %3583 }
 0xad8   : > { %v3586_v22 = vmul.f32 %v3584_v31, %v10241_v47 }
 0xada   : > { %v9023_v23 = vpop.eup %9022  ;;  %v3588_v42 = vadd.f32 1e-05, %v3586_v22 }
 0xadb   : > { %v3590_v24 = vmul.f32 %v9023_v23, %v3587_v21  ;;  %vm3596_vm11 = vweird.f32 %v9023_v23 }
 0xadc   : > { %9024 = vrsqrt.f32 %v3588_v42  ;;  %vm3597_vm13 = vmor %vm3595_vm12, %vm3596_vm11  ;;  %vm3605_vm15 = vweird.f32 %v3588_v42 }
 0xadd   : > { %v3591_v25 = vmul.f32 %v9023_v23, %v3590_v24 }
 0xadf   : > { %v3592_v26 = vmul.f32 0.5, %v3591_v25 }
 0xae1   : > { %v3593_v27 = vsub.f32 1.5, %v3592_v26 }
 0xae2   : > { %v9025_v28 = vpop.eup %9024 }
 0xae3   : > { %v3594_v32 = vmul.f32 %v9023_v23, %v3593_v27  ;;  %v3600_v33 = vmul.f32 %v9025_v28, %v3588_v42  ;;  %vm3606_vm14 = vweird.f32 %v9025_v28 }
 0xae4   : > { %vm3607_vm5 = vmor %vm3605_vm15, %vm3606_vm14 }
 0xae5   : > { %v3598_v35 = vsel %vm3597_vm13, %v9023_v23, %v3594_v32  ;;  %v3601_v37 = vmul.f32 %v9025_v28, %v3600_v33 }
 0xae6   : > { %v3609_v43 = vmul.f32 %v3598_v35, %v3575_v60 }
 0xae7   : > { %v3602_v38 = vmul.f32 0.5, %v3601_v37 }
 0xae8   : > { %v3614_v39 = vmul.f32 %v8960_v34, %v3609_v43 }
 0xae9   : > { %v3603_v40 = vsub.f32 1.5, %v3602_v38 }
 0xaea   : > { %v10720_v10 = vadd.f32 %v8961_v2, %v3614_v39 }
 0xaeb   : > { %v3604_v41 = vmul.f32 %v9025_v28, %v3603_v40 }
 0xaec   : > { %8221 = vmatmul.msk.f32.vlgmr.msra.gmra.mxu2 %vm1714_vm3, %v10720_v10 }
 0xaed   : > { %v3608_v44 = vsel %vm3607_vm5, %v9025_v28, %v3604_v41 }
 0xaee   : > { %v3610_v45 = vmul.f32 %v3608_v44, %v3576_v14 }
 0xaf0   : > { %v3615_v12 = vmul.f32 %v8960_v34, %v3610_v45 }
 0xaf2   : > { %v10724_v46 = vadd.f32 %v8961_v2, %v3615_v12 }
 0xaf4   : > { %8222 = vmatmul.msk.f32.gmra.mxu2 %vm1714_vm3, %v10724_v46 }
 0xb6f   : > { %v3661_v48 = vpop.f32.mrf.mxu2 }
 0xb70   : > { %v3662_v49 = vadd.f32 %v8962_v30, %v3661_v48 }
 0xb72   : > { %3669 = vrot.lane.b32.xlu1 %v3662_v49, %s12086_s28 }
 0xb77   : > { %v3664_v53 = vpop.f32.mrf.mxu2 }
 0xb78   : > { %v3665_v54 = vadd.f32 %v8962_v30, %v3664_v53 }
 0xb7a   : > { %3671 = vrot.lane.b32.xlu2 %v3665_v54, %s12086_s28  ;;  %v10731_v56 = vpack.i.bf16 %v3662_v49, %v3665_v54 }
 0xb7c   : > { %8906 = vrot.lane.b32.xlu1 %v10731_v56, %s12087_s22 }
 0xb84   : > { %3793 = vrot.lane.b32.xlu1 %v3662_v49, %s12088_s3 }
 0xb8c   : > { %3789 = vrot.lane.b32.xlu1 %v3662_v49, %s12089_s5 }
 0xb94   : > { %3977 = vrot.lane.b32.xlu1 %v3665_v54, %s12090_s6 }
 0xb9c   : > { %3971 = vrot.lane.b32.xlu1 %v3662_v49, %s12091_s9 }
 0xba4   : > { %3973 = vrot.lane.b32.xlu1 %v3665_v54, %s12091_s9 }
 0xbac   : > { %4128 = vrot.lane.b32.xlu1 %v3665_v54, %s12092_s12 }
 0xbd4   : > { %v3672_v58 = vpop.permute.xlu2 %3671 }
 0xbd5   : > { %8223 = vmatpush.xpose.msk.msrb.mxu3 %vm1498_vm0, %v3672_v58 }
 0xbe4   : > { %v3670_v59 = vpop.permute.xlu1 %3669 }
 0xbe5   : > { %8224 = vmatpush.xpose.msk.msrb.mxu3 %vm1498_vm0, %v3670_v59 }
 0xbe8   : > { %8225 = vmatmul.msk.f32.vlgmr.msrb.gmra.mxu3 %vm1498_vm0, %v3662_v49 }
 0xbee   : > { %v8907_v36 = vpop.permute.xlu1 %8906 }
 0xbef   : > { %v8908_v61 = vunpack.i.l.bf16 %v8907_v36  ;;  %v8909_v62 = vunpack.i.h.bf16 %v8907_v36 }
 0xbf0   : > { %8226 = vmatmul.msk.f32.gmra.mxu3 %vm1498_vm0, %v3665_v54 }
 0xbf1   : > { %3780 = vmatpush.msrb.mxu0 %v8908_v61 }
 0xbf3   : > { %3781 = vmatpush.msrb.mxu0 %v8909_v62 }
 0xbf5   : > { %3963 = vmatpush.msra.mxu0 %v8216_v57 }
 0xbf6   : > { %v3794_v16 = vpop.permute.xlu1 %3793 }
 0xbfe   : > { %v3790_v23 = vpop.permute.xlu1 %3789 }
 0xc06   : > { %v3978_v40 = vpop.permute.xlu1 %3977 }
 0xc0e   : > { %v3972_v48 = vpop.permute.xlu1 %3971 }
 0xc16   : > { %v3974_v53 = vpop.permute.xlu1 %3973 }
 0xc6b   : > { %v3698_v63 = vpop.f32.mrf.mxu3 }
 0xc6c   : > { %v3704_v0 = vmul.f32 0.35355338, %v3698_v63 }
 0xc6e   : > { %v3706_v1 = vsel %vm1783_vm4, %v3704_v0, -inf }
 0xc6f   : > { %3707 = vmax.xlane.f32.xlu0 %v3706_v1 }
 0xc73   : > { %v3701_v3 = vpop.f32.mrf.mxu3 }
 0xc74   : > { %v3705_v4 = vmul.f32 0.35355338, %v3701_v3 }
 0xc76   : > { %v3709_v5 = vsel %vm1783_vm4, %v3705_v4, -inf }
 0xc77   : > { %3710 = vmax.xlane.f32.xlu0 %v3709_v5 }
 0xce2   : > { %v3708_v6 = vpop.xlane.xlu0 %3707 }
 0xce3   : > { %v3712_v7 = vsub.f32 %v3704_v0, %v3708_v6 }
 0xce5   : > { %v3714_v55 = vmul.f32 1.442695, %v3712_v7 }
 0xce7   : > { %9026 = vpow2.f32 %v3714_v55 }
 0xcea   : > { %v3711_v60 = vpop.xlane.xlu0 %3710 }
 0xceb   : > { %v3713_v8 = vsub.f32 %v3705_v4, %v3711_v60  ;;  %v4129_v4 = vpop.permute.xlu1 %4128 }
 0xced   : > { %v9027_v9 = vpop.eup %9026  ;;  %v3716_v11 = vmul.f32 1.442695, %v3713_v8 }
 0xcee   : > { %v3718_v13 = vsel %vm1783_vm4, %v9027_v9, 0.0 }
 0xcef   : > { %9028 = vpow2.f32 %v3716_v11  ;;  %3719 = vadd.xlane.f32.xlu0 %v3718_v13 }
 0xcf5   : > { %v9029_v14 = vpop.eup %9028 }
 0xcf6   : > { %v3721_v29 = vsel %vm1783_vm4, %v9029_v14, 0.0 }
 0xcf7   : > { %3722 = vadd.xlane.f32.xlu2 %v3721_v29 }
 0xd03   : > { %3795 = vrot.lane.b32.xlu0 %v3665_v54, %s12088_s3 }
 0xd0b   : > { %3791 = vrot.lane.b32.xlu0 %v3665_v54, %s12089_s5 }
 0xd0f   : > { %4132 = vrot.lane.b32.xlu2 %v3665_v54, %s12093_s13 }
 0xd13   : > { %3975 = vrot.lane.b32.xlu0 %v3662_v49, %s12090_s6 }
 0xd1b   : > { %4130 = vrot.lane.b32.xlu0 %v3662_v49, %s12093_s13 }
 0xd23   : > { %4126 = vrot.lane.b32.xlu0 %v3662_v49, %s12092_s12 }
 0xd62   : > { %v3720_v15 = vpop.xlane.xlu0 %3719 }
 0xd63   : > { %9030 = vrcp.f32 %v3720_v15  ;;  %v3735_v21 = vand.u32 2147483648, %v3720_v15  ;;  %v3733_v22 = vand.u32 2147483647, %v3720_v15  ;;  %vm3729_vm7 = vweird.f32 %v3720_v15 }
 0xd65   : > { %v3736_v25 = vor.u32 1.1754944e-38, %v3735_v21  ;;  %vm3734_vm9 = vcmp.eq.f32.partialorder %v3733_v22, 8.507059e+37 }
 0xd69   : > { %v9031_v17 = vpop.eup %9030 }
 0xd6a   : > { %v3725_v18 = vmul.f32 %v9031_v17, %v3720_v15  ;;  %v3723_v19 = vpop.xlane.xlu2 %3722  ;;  %vm3730_vm6 = vweird.f32 %v9031_v17 }
 0xd6b   : > { %9032 = vrcp.f32 %v3723_v19  ;;  %vm3731_vm8 = vmor %vm3729_vm7, %vm3730_vm6  ;;  %v3750_v34 = vand.u32 2147483648, %v3723_v19  ;;  %v3748_v2 = vand.u32 2147483647, %v3723_v19  ;;  %vm3744_vm11 = vweird.f32 %v3723_v19 }
 0xd6c   : > { %v3726_v20 = vsub.f32 1.0, %v3725_v18 }
 0xd6d   : > { %v3751_v39 = vor.u32 1.1754944e-38, %v3750_v34  ;;  %vm3749_vm13 = vcmp.eq.f32.partialorder %v3748_v2, 8.507059e+37 }
 0xd6e   : > { %v3727_v31 = vmul.f32 %v9031_v17, %v3726_v20 }
 0xd70   : > { %v3728_v42 = vadd.f32 %v9031_v17, %v3727_v31 }
 0xd71   : > { %v9033_v24 = vpop.eup %9032 }
 0xd72   : > { %v3732_v26 = vsel %vm3731_vm8, %v9031_v17, %v3728_v42  ;;  %v3740_v27 = vmul.f32 %v9033_v24, %v3723_v19  ;;  %vm3745_vm10 = vweird.f32 %v9033_v24  ;;  %v4133_v43 = vpop.permute.xlu2 %4132 }
 0xd73   : > { %v3737_v28 = vsel %vm3734_vm9, %v3736_v25, %v3732_v26  ;;  %vm3746_vm12 = vmor %vm3744_vm11, %vm3745_vm10 }
 0xd74   : > { %v3738_v32 = vmul.f32 %v9027_v9, %v3737_v28  ;;  %v3741_v33 = vsub.f32 1.0, %v3740_v27 }
 0xd75   : > { %v3796_v35 = vpop.permute.xlu0 %3795 }
 0xd76   : > { %v3742_v37 = vmul.f32 %v9033_v24, %v3741_v33  ;;  %8227 = vmatmul.msk.f32.vlgmr.msrb.gmra.mxu0 %vm1783_vm4, %v3738_v32  ;;  %8229 = vmatpush.xpose.msk.msrb.mxu1 %vm1498_vm0, %v3796_v35 }
 0xd77   : > { %8247 = vmatpush.xpose.msk.msrb.mxu0 %vm1498_vm0, %v4133_v43 }
 0xd78   : > { %v3743_v38 = vadd.f32 %v9033_v24, %v3742_v37 }
 0xd7a   : > { %8230 = vmatpush.xpose.msk.msrb.mxu1 %vm1498_vm0, %v3794_v16  ;;  %v3747_v41 = vsel %vm3746_vm12, %v9033_v24, %v3743_v38 }
 0xd7b   : > { %v3752_v44 = vsel %vm3749_vm13, %v3751_v39, %v3747_v41 }
 0xd7c   : > { %v3753_v45 = vmul.f32 %v9029_v14, %v3752_v44 }
 0xd7d   : > { %8231 = vmatmul.msk.f32.vlgmr.msrb.gmra.mxu1 %vm1498_vm0, %v3790_v23  ;;  %v3792_v12 = vpop.permute.xlu0 %3791 }
 0xd7e   : > { %8239 = vmatpush.xpose.msk.msra.mxu1 %vm1498_vm0, %v3978_v40  ;;  %8228 = vmatmul.msk.f32.gmra.mxu0 %vm1783_vm4, %v3753_v45 }
 0xd85   : > { %8232 = vmatmul.msk.f32.gmra.mxu1 %vm1498_vm0, %v3792_v12  ;;  %v3976_v30 = vpop.permute.xlu0 %3975 }
 0xd86   : > { %8240 = vmatpush.xpose.msk.msra.mxu1 %vm1498_vm0, %v3976_v30 }
 0xd8d   : > { %8241 = vmatmul.msk.f32.vlgmr.msra.gmra.mxu1 %vm1498_vm0, %v3972_v48  ;;  %v4131_v49 = vpop.permute.xlu0 %4130 }
 0xd8e   : > { %8248 = vmatpush.xpose.msk.msrb.mxu0 %vm1498_vm0, %v4131_v49 }
 0xd95   : > { %8242 = vmatmul.msk.f32.gmra.mxu1 %vm1498_vm0, %v3974_v53  ;;  %v4127_v63 = vpop.permute.xlu0 %4126 }
 0xdf3   : > { %v3783_v54 = vpop.f32.mrf.mxu0 }
 0xdf4   : > { %8237 = vmatmul.msk.f32.vlgmr.msra.gmra.mxu0 %vm1498_vm0, %v3783_v54 }
 0xdfa   : > { %v3822_v58 = vpop.f32.mrf.mxu1 }
 0xdfb   : > { %v3828_v59 = vmul.f32 0.35355338, %v3822_v58  ;;  %v3786_v36 = vpop.f32.mrf.mxu0 }
 0xdfc   : > { %8238 = vmatmul.msk.f32.gmra.mxu0 %vm1498_vm0, %v3786_v36 }
 0xdfd   : > { %v3830_v61 = vsel %vm1783_vm4, %v3828_v59, -inf }
 0xdfe   : > { %3831 = vmax.xlane.f32.xlu0 %v3830_v61 }
 0xe02   : > { %v3825_v62 = vpop.f32.mrf.mxu1 }
 0xe03   : > { %v3829_v0 = vmul.f32 0.35355338, %v3825_v62 }
 0xe04   : > { %8249 = vmatmul.msk.f32.vlgmr.msrb.gmra.mxu0 %vm1498_vm0, %v4127_v63 }
 0xe05   : > { %v3833_v1 = vsel %vm1783_vm4, %v3829_v0, -inf }
 0xe06   : > { %3834 = vmax.xlane.f32.xlu1 %v3833_v1 }
 0xe0a   : > { %v4004_v3 = vpop.f32.mrf.mxu1 }
 0xe0b   : > { %v4010_v5 = vmul.f32 0.35355338, %v4004_v3 }
 0xe0c   : > { %8250 = vmatmul.msk.f32.gmra.mxu0 %vm1498_vm0, %v4129_v4 }
 0xe0d   : > { %v4012_v6 = vsel %vm1783_vm4, %v4010_v5, -inf }
 0xe0e   : > { %4013 = vmax.xlane.f32.xlu2 %v4012_v6 }
 0xe12   : > { %v4007_v7 = vpop.f32.mrf.mxu1 }
 0xe13   : > { %v4011_v55 = vmul.f32 0.35355338, %v4007_v7 }
 0xe15   : > { %v4015_v60 = vsel %vm1783_vm4, %v4011_v55, -inf }
 0xe16   : > { %4016 = vmax.xlane.f32.xlu0 %v4015_v60 }
 0xe71   : > { %v10776_v8 = vpop.f32.mrf.mxu0  ;;  %v3832_v9 = vpop.xlane.xlu0 %3831 }
 0xe72   : > { %v3836_v11 = vsub.f32 %v3828_v59, %v3832_v9 }
 0xe74   : > { %v3838_v13 = vmul.f32 1.442695, %v3836_v11 }
 0xe76   : > { %9034 = vpow2.f32 %v3838_v13 }
 0xe79   : > { %v10778_v14 = vpop.f32.mrf.mxu0  ;;  %v3835_v29 = vpop.xlane.xlu1 %3834 }
 0xe7a   : > { %v3837_v57 = vsub.f32 %v3829_v0, %v3835_v29 }
 0xe7c   : > { %v10780_v15 = vpop.eup %9034  ;;  %v3840_v17 = vmul.f32 1.442695, %v3837_v57 }
 0xe7d   : > { %v3842_v16 = vsel %vm1783_vm4, %v10780_v15, 0.0 }
 0xe7e   : > { %3843 = vadd.xlane.f32.xlu0 %v3842_v16  ;;  %9036 = vpow2.f32 %v3840_v17 }
 0xe81   : > { %v4014_v18 = vpop.xlane.xlu2 %4013  ;;  %v4159_v19 = vpop.f32.mrf.mxu0 }
 0xe82   : > { %v4165_v20 = vmul.f32 0.35355338, %v4159_v19  ;;  %v4018_v21 = vsub.f32 %v4010_v5, %v4014_v18 }
 0xe84   : > { %v4167_v31 = vsel %vm1783_vm4, %v4165_v20, -inf  ;;  %v4020_v22 = vmul.f32 1.442695, %v4018_v21  ;;  %v10785_v23 = vpop.eup %9036 }
 0xe85   : > { %4168 = vmax.xlane.f32.xlu1 %v4167_v31  ;;  %v3845_v28 = vsel %vm1783_vm4, %v10785_v23, 0.0  ;;  %v8217_v31 = vld [vmem:[%s12065_s18 + $0x28] sm:$0xff] }
 0xe86   : > { %9038 = vpow2.f32 %v4020_v22  ;;  %3934 = vmatpush.msra.mxu3 %v8217_v31  ;;  %v8219_v31 = vld [vmem:[%s12065_s18 + $0x38] sm:$0xff] }
 0xe89   : > { %v4162_v42 = vpop.f32.mrf.mxu0  ;;  %v4017_v24 = vpop.xlane.xlu0 %4016 }
 0xe8a   : > { %v4166_v25 = vmul.f32 0.35355338, %v4162_v42  ;;  %v4019_v26 = vsub.f32 %v4011_v55, %v4017_v24 }
 0xe8c   : > { %v4022_v27 = vmul.f32 1.442695, %v4019_v26  ;;  %v4170_v32 = vsel %vm1783_vm4, %v4166_v25, -inf  ;;  %v10790_v33 = vpop.eup %9038 }
 0xe8d   : > { %3846 = vadd.xlane.f32.xlu1 %v3845_v28  ;;  %4171 = vmax.xlane.f32.xlu2 %v4170_v32  ;;  %v4024_v35 = vsel %vm1783_vm4, %v10790_v33, 0.0 }
 0xe8e   : > { %9040 = vpow2.f32 %v4022_v27 }
 0xe92   : > { %8911 = vrot.lane.b32.xlu0 %v10731_v56, %s12094_s17 }
 0xe94   : > { %v10794_v34 = vpop.eup %9040 }
 0xe95   : > { %4025 = vadd.xlane.f32.xlu2 %v4024_v35  ;;  %v4027_v37 = vsel %vm1783_vm4, %v10794_v34, 0.0 }
 0xe96   : > { %4028 = vadd.xlane.f32.xlu1 %v4027_v37 }
 0xef1   : > { %v3844_v2 = vpop.xlane.xlu0 %3843 }
 0xef2   : > { %9042 = vrcp.f32 %v3844_v2  ;;  %v3859_v30 = vand.u32 2147483648, %v3844_v2  ;;  %vm3853_vm15 = vweird.f32 %v3844_v2  ;;  %v3857_v48 = vand.u32 2147483647, %v3844_v2 }
 0xef4   : > { %v3860_v36 = vor.u32 1.1754944e-38, %v3859_v30  ;;  %vm3858_vm6 = vcmp.eq.f32.partialorder %v3857_v48, 8.507059e+37 }
 0xef8   : > { %v9043_v43 = vpop.eup %9042  ;;  %v4169_v38 = vpop.xlane.xlu1 %4168 }
 0xef9   : > { %v3849_v39 = vmul.f32 %v9043_v43, %v3844_v2  ;;  %v4173_v40 = vsub.f32 %v4165_v20, %v4169_v38  ;;  %vm3854_vm14 = vweird.f32 %v9043_v43 }
 0xefa   : > { %vm3855_vm5 = vmor %vm3853_vm15, %vm3854_vm14 }
 0xefb   : > { %v3850_v41 = vsub.f32 1.0, %v3849_v39  ;;  %v4175_v44 = vmul.f32 1.442695, %v4173_v40 }
 0xefd   : > { %v3851_v45 = vmul.f32 %v9043_v43, %v3850_v41  ;;  %9044 = vpow2.f32 %v4175_v44 }
 0xeff   : > { %v3852_v12 = vadd.f32 %v9043_v43, %v3851_v45 }
 0xf00   : > { %v3847_v49 = vpop.xlane.xlu1 %3846  ;;  %v4172_v53 = vpop.xlane.xlu2 %4171 }
 0xf01   : > { %9046 = vrcp.f32 %v3847_v49  ;;  %v3856_v54 = vsel %vm3855_vm5, %v9043_v43, %v3852_v12  ;;  %v4174_v58 = vsub.f32 %v4166_v25, %v4172_v53  ;;  %v3874_v55 = vand.u32 2147483648, %v3847_v49 }
 0xf02   : > { %v3861_v0 = vsel %vm3858_vm6, %v3860_v36, %v3856_v54  ;;  %v3872_v11 = vand.u32 2147483647, %v3847_v49  ;;  %vm3868_vm8 = vweird.f32 %v3847_v49 }
 0xf03   : > { %v10800_v59 = vpop.eup %9044  ;;  %v4177_v61 = vmul.f32 1.442695, %v4174_v58  ;;  %v3862_v5 = vmul.f32 %v10780_v15, %v3861_v0  ;;  %v3875_v57 = vor.u32 1.1754944e-38, %v3874_v55 }
 0xf04   : > { %v8912_v62 = vpop.permute.xlu0 %8911  ;;  %v4179_v63 = vsel %vm1783_vm4, %v10800_v59, 0.0  ;;  %vm3873_vm10 = vcmp.eq.f32.partialorder %v3872_v11, 8.507059e+37 }
 0xf05   : > { %v8913_v1 = vunpack.i.l.bf16 %v8912_v62  ;;  %4180 = vadd.xlane.f32.xlu2 %v4179_v63  ;;  %9048 = vpow2.f32 %v4177_v61  ;;  %v8914_v4 = vunpack.i.h.bf16 %v8912_v62 }
 0xf07   : > { %v9047_v3 = vpop.eup %9046  ;;  %3904 = vmatpush.msrb.mxu2 %v8913_v1 }
 0xf08   : > { %v3864_v6 = vmul.f32 %v9047_v3, %v3847_v49  ;;  %vm3869_vm7 = vweird.f32 %v9047_v3  ;;  %v4026_v18 = vpop.xlane.xlu2 %4025 }
 0xf09   : > { %3905 = vmatpush.msrb.mxu2 %v8914_v4  ;;  %vm3870_vm9 = vmor %vm3868_vm8, %vm3869_vm7  ;;  %9050 = vrcp.f32 %v4026_v18  ;;  %v4029_v19 = vpop.xlane.xlu1 %4028  ;;  %v4041_v28 = vand.u32 2147483648, %v4026_v18  ;;  %vm4035_vm12 = vweird.f32 %v4026_v18  ;;  %v4039_v32 = vand.u32 2147483647, %v4026_v18 }
 0xf0a   : > { %v3865_v7 = vsub.f32 1.0, %v3864_v6  ;;  %8233 = vmatmul.msk.f32.vlgmr.msrb.gmra.mxu2 %vm1783_vm4, %v3862_v5  ;;  %9052 = vrcp.f32 %v4029_v19  ;;  %v4056_v40 = vand.u32 2147483648, %v4029_v19  ;;  %vm4050_vm5 = vweird.f32 %v4029_v19 }
 0xf0b   : > { %v10806_v60 = vpop.eup %9048  ;;  %v4042_v37 = vor.u32 1.1754944e-38, %v4041_v28  ;;  %vm4040_vm14 = vcmp.eq.f32.partialorder %v4039_v32, 8.507059e+37  ;;  %v4054_v30 = vand.u32 2147483647, %v4029_v19  ;;  %v8963_v28 = vld [vmem:[%s12069_s10 + $0x1] ss:$0 sm:$0xff] }
 0xf0c   : > { %v3866_v9 = vmul.f32 %v9047_v3, %v3865_v7  ;;  %v4182_v13 = vsel %vm1783_vm4, %v10806_v60, 0.0  ;;  %v4057_v49 = vor.u32 1.1754944e-38, %v4056_v40 }
 0xf0d   : > { %4183 = vadd.xlane.f32.xlu1 %v4182_v13  ;;  %vm4055_vm7 = vcmp.eq.f32.partialorder %v4054_v30, 8.507059e+37 }
 0xf0e   : > { %v3867_v29 = vadd.f32 %v9047_v3, %v3866_v9 }
 0xf0f   : > { %v9051_v20 = vpop.eup %9050 }
 0xf10   : > { %v3871_v15 = vsel %vm3870_vm9, %v9047_v3, %v3867_v29  ;;  %v4031_v21 = vmul.f32 %v9051_v20, %v4026_v18  ;;  %v9053_v42 = vpop.eup %9052  ;;  %vm4036_vm11 = vweird.f32 %v9051_v20 }
 0xf11   : > { %v3876_v16 = vsel %vm3873_vm10, %v3875_v57, %v3871_v15  ;;  %vm4037_vm13 = vmor %vm4035_vm12, %vm4036_vm11  ;;  %vm4051_vm15 = vweird.f32 %v9053_v42 }
 0xf12   : > { %v3877_v17 = vmul.f32 %v10785_v23, %v3876_v16  ;;  %v4032_v22 = vsub.f32 1.0, %v4031_v21  ;;  %v4046_v23 = vmul.f32 %v9053_v42, %v4029_v19  ;;  %vm4052_vm6 = vmor %vm4050_vm5, %vm4051_vm15  ;;  %v8218_v21 = vld [vmem:[%s12065_s18 + $0x30] sm:$0xff] }
 0xf13   : > { %4116 = vmatpush.msrb.mxu3 %v8218_v21 }
 0xf14   : > { %8234 = vmatmul.msk.f32.gmra.mxu2 %vm1783_vm4, %v3877_v17  ;;  %v4033_v24 = vmul.f32 %v9051_v20, %v4032_v22  ;;  %v4047_v27 = vsub.f32 1.0, %v4046_v23 }
 0xf16   : > { %v4034_v26 = vadd.f32 %v9051_v20, %v4033_v24  ;;  %v4048_v35 = vmul.f32 %v9053_v42, %v4047_v27 }
 0xf18   : > { %v4049_v39 = vadd.f32 %v9053_v42, %v4048_v35 }
 0xf1a   : > { %v4053_v48 = vsel %vm4052_vm6, %v9053_v42, %v4049_v39 }
 0xf1b   : > { %v4058_v54 = vsel %vm4055_vm7, %v4057_v49, %v4053_v48 }
 0xf1c   : > { %v4059_v61 = vmul.f32 %v10794_v34, %v4058_v54 }
 0xf1d   : > { %8916 = vrot.lane.b32.xlu2 %v10731_v56, %s12095_s19 }
 0xf26   : > { %8921 = vrot.lane.b32.xlu1 %v10731_v56, %s12096_s20  ;;  %v4038_v56 = vsel %vm4037_vm13, %v9051_v20, %v4034_v26 }
 0xf27   : > { %v4043_v43 = vsel %vm4040_vm14, %v4042_v37, %v4038_v56 }
 0xf28   : > { %v4044_v12 = vmul.f32 %v10790_v33, %v4043_v43 }
 0xf78   : > { %v4181_v25 = vpop.xlane.xlu2 %4180 }
 0xf79   : > { %9054 = vrcp.f32 %v4181_v25  ;;  %v4196_v3 = vand.u32 2147483648, %v4181_v25  ;;  %vm4190_vm9 = vweird.f32 %v4181_v25  ;;  %v4194_v4 = vand.u32 2147483647, %v4181_v25 }
 0xf7b   : > { %v4197_v55 = vor.u32 1.1754944e-38, %v4196_v3  ;;  %vm4195_vm11 = vcmp.eq.f32.partialorder %v4194_v4, 8.507059e+37  ;;  %v8292_v3 = vld [vmem:[%s12071_s1 + $0x318] sm:$0xff]  ;;  %v8273_v4 = vld [vmem:[%s12071_s1 + $0x280] sm:$0xff] }
 0xf7f   : > { %v9055_v45 = vpop.eup %9054 }
 0xf80   : > { %v8917_v2 = vpop.permute.xlu2 %8916  ;;  %v4184_v44 = vpop.xlane.xlu1 %4183  ;;  %v4186_v53 = vmul.f32 %v9055_v45, %v4181_v25  ;;  %vm4191_vm8 = vweird.f32 %v9055_v45 }
 0xf81   : > { %v8918_v38 = vunpack.i.l.bf16 %v8917_v2  ;;  %v8919_v41 = vunpack.i.h.bf16 %v8917_v2  ;;  %9056 = vrcp.f32 %v4184_v44  ;;  %vm4192_vm10 = vmor %vm4190_vm9, %vm4191_vm8  ;;  %v4211_v29 = vand.u32 2147483648, %v4184_v44 }
 0xf82   : > { %v4187_v58 = vsub.f32 1.0, %v4186_v53  ;;  %vm4205_vm13 = vweird.f32 %v4184_v44  ;;  %v4209_v16 = vand.u32 2147483647, %v4184_v44 }
 0xf83   : > { %4086 = vmatpush.msra.mxu2 %v8918_v38  ;;  %v4212_v18 = vor.u32 1.1754944e-38, %v4211_v29 }
 0xf84   : > { %v4188_v33 = vmul.f32 %v9055_v45, %v4187_v58  ;;  %vm4210_vm15 = vcmp.eq.f32.partialorder %v4209_v16, 8.507059e+37  ;;  %v8310_v16 = vld [vmem:[%s12071_s1 + $0x3a8] sm:$0xff] }
 0xf85   : > { %4087 = vmatpush.msra.mxu2 %v8919_v41 }
 0xf86   : > { %8243 = vmatmul.msk.f32.vlgmr.msra.gmra.mxu2 %vm1783_vm4, %v4044_v12  ;;  %v4189_v0 = vadd.f32 %v9055_v45, %v4188_v33  ;;  %v8308_v33 = vld [vmem:[%s12071_s1 + $0x398] sm:$0xff] }
 0xf87   : > { %v9057_v36 = vpop.eup %9056  ;;  %4271 = vmatpush.msrb.mxu2 %v8219_v31  ;;  %v8295_v31 = vld [vmem:[%s12071_s1 + $0x330] sm:$0xff] }
 0xf88   : > { %v4201_v63 = vmul.f32 %v9057_v36, %v4184_v44  ;;  %v4193_v5 = vsel %vm4192_vm10, %v9055_v45, %v4189_v0  ;;  %vm4206_vm12 = vweird.f32 %v9057_v36  ;;  %v8290_v0 = vld [vmem:[%s12071_s1 + $0x308] sm:$0xff] }
 0xf89   : > { %v4198_v9 = vsel %vm4195_vm11, %v4197_v55, %v4193_v5  ;;  %vm4207_vm14 = vmor %vm4205_vm13, %vm4206_vm12  ;;  %4794 = vmatpush.msra.mxu2 %v8308_v33  ;;  %v8274_v5 = vld [vmem:[%s12071_s1 + $0x288] sm:$0xff]  ;;  %v8257_v55 = vld [vmem:[%s12071_s1 + $0x200] sm:$0xff] }
 0xf8a   : > { %v4202_v1 = vsub.f32 1.0, %v4201_v63  ;;  %v4199_v15 = vmul.f32 %v10800_v59, %v4198_v9  ;;  %v8289_v63 = vld [vmem:[%s12071_s1 + $0x300] sm:$0xff]  ;;  %v8259_v9 = vld [vmem:[%s12071_s1 + $0x210] sm:$0xff]  ;;  %v8298_v33 = vld [vmem:[%s12071_s1 + $0x348] sm:$0xff] }
 0xf8b   : > { %4795 = vmatpush.msra.mxu2 %v8292_v3  ;;  %v8281_v3 = vld [vmem:[%s12071_s1 + $0x2c0] sm:$0xff] }
 0xf8c   : > { %v4203_v6 = vmul.f32 %v9057_v36, %v4202_v1  ;;  %v8291_v1 = vld [vmem:[%s12071_s1 + $0x310] sm:$0xff] }
 0xf8d   : > { %v3907_v62 = vpop.f32.mrf.mxu2 }
 0xf8e   : > { %8235 = vmatmul.msk.f32.vlgmr.msra.gmra.mxu3 %vm1498_vm0, %v3907_v62  ;;  %8244 = vmatmul.msk.f32.gmra.mxu2 %vm1783_vm4, %v4059_v61  ;;  %v4204_v13 = vadd.f32 %v9057_v36, %v4203_v6  ;;  %v8306_v61 = vld [vmem:[%s12071_s1 + $0x388] sm:$0xff]  ;;  %v8307_v62 = vld [vmem:[%s12071_s1 + $0x390] sm:$0xff] }
 0xf8f   : > { %4748 = vmatpush.msra.mxu0 %v8306_v61  ;;  %v8275_v6 = vld [vmem:[%s12071_s1 + $0x290] sm:$0xff] }
 0xf90   : > { %v4208_v17 = vsel %vm4207_vm14, %v9057_v36, %v4204_v13  ;;  %v8305_v36 = vld [vmem:[%s12071_s1 + $0x380] sm:$0xff] }
 0xf91   : > { %v4213_v19 = vsel %vm4210_vm15, %v4212_v18, %v4208_v17  ;;  %4725 = vmatpush.msra.mxu3 %v8305_v36  ;;  %4749 = vmatpush.msra.mxu0 %v8290_v0  ;;  %v8311_v17 = vld [vmem:[%s12071_s1 + $0x3b0] sm:$0xff]  ;;  %v8312_v18 = vld [vmem:[%s12071_s1 + $0x3b8] sm:$0xff] }
 0xf92   : > { %v4214_v20 = vmul.f32 %v10806_v60, %v4213_v19  ;;  %v8293_v19 = vld [vmem:[%s12071_s1 + $0x320] sm:$0xff]  ;;  %v8316_v36 = vld [vmem:[%s12071_s1 + $0x3d8] sm:$0xff]  ;;  %v8299_v0 = vld [vmem:[%s12071_s1 + $0x350] sm:$0xff] }
 0xf93   : > { %4726 = vmatpush.msra.mxu3 %v8289_v63  ;;  %4750 = vmatpush.msra.mxu0 %v8274_v5 }
 0xf95   : > { %4727 = vmatpush.msra.mxu3 %v8273_v4  ;;  %v8282_v4 = vld [vmem:[%s12071_s1 + $0x2c8] sm:$0xff] }
 0xf97   : > { %v3910_v7 = vpop.f32.mrf.mxu2  ;;  %4728 = vmatpush.msra.mxu3 %v8257_v55  ;;  %v8265_v55 = vld [vmem:[%s12071_s1 + $0x240] sm:$0xff] }
 0xf98   : > { %8236 = vmatmul.msk.f32.gmra.mxu3 %vm1498_vm0, %v3910_v7  ;;  %v8922_v34 = vpop.permute.xlu1 %8921  ;;  %v8276_v7 = vld [vmem:[%s12071_s1 + $0x298] sm:$0xff] }
 0xf99   : > { %v8923_v11 = vunpack.i.l.bf16 %v8922_v34  ;;  %v8924_v57 = vunpack.i.h.bf16 %v8922_v34  ;;  %4796 = vmatpush.msra.mxu2 %v8276_v7  ;;  %v8258_v34 = vld [vmem:[%s12071_s1 + $0x208] sm:$0xff]  ;;  %v8284_v7 = vld [vmem:[%s12071_s1 + $0x2d8] sm:$0xff] }
 0xf9a   : > { %4751 = vmatpush.msra.mxu0 %v8258_v34  ;;  %v8266_v34 = vld [vmem:[%s12071_s1 + $0x248] sm:$0xff] }
 0xf9b   : > { %4241 = vmatpush.msrb.mxu1 %v8923_v11  ;;  %v8260_v11 = vld [vmem:[%s12071_s1 + $0x218] sm:$0xff] }
 0xf9c   : > { %4797 = vmatpush.msra.mxu2 %v8260_v11  ;;  %4840 = vmatpush.msrb.mxu0 %v8310_v16  ;;  %v8268_v11 = vld [vmem:[%s12071_s1 + $0x258] sm:$0xff]  ;;  %v8301_v16 = vld [vmem:[%s12071_s1 + $0x360] sm:$0xff] }
 0xf9d   : > { %4242 = vmatpush.msrb.mxu1 %v8924_v57 }
 0xf9e   : > { %8251 = vmatmul.msk.f32.vlgmr.msrb.gmra.mxu1 %vm1783_vm4, %v4199_v15  ;;  %v8309_v15 = vld [vmem:[%s12071_s1 + $0x3a0] sm:$0xff] }
 0xf9f   : > { %4771 = vmatpush.msra.mxu1 %v8307_v62  ;;  %v8297_v62 = vld [vmem:[%s12071_s1 + $0x340] sm:$0xff] }
 0xfa1   : > { %4772 = vmatpush.msra.mxu1 %v8291_v1  ;;  %v8300_v1 = vld [vmem:[%s12071_s1 + $0x358] sm:$0xff] }
 0xfa3   : > { %4773 = vmatpush.msra.mxu1 %v8275_v6  ;;  %v8283_v6 = vld [vmem:[%s12071_s1 + $0x2d0] sm:$0xff] }
 0xfa5   : > { %4774 = vmatpush.msra.mxu1 %v8259_v9  ;;  %v8267_v9 = vld [vmem:[%s12071_s1 + $0x250] sm:$0xff] }
 0xfa6   : > { %8252 = vmatmul.msk.f32.gmra.mxu1 %vm1783_vm4, %v4214_v20  ;;  %v8294_v20 = vld [vmem:[%s12071_s1 + $0x328] sm:$0xff] }
 0xfa7   : > { %4863 = vmatpush.msrb.mxu1 %v8311_v17  ;;  %4841 = vmatpush.msrb.mxu0 %v8294_v20  ;;  %v8302_v17 = vld [vmem:[%s12071_s1 + $0x368] sm:$0xff]  ;;  %v8285_v20 = vld [vmem:[%s12071_s1 + $0x2e0] sm:$0xff] }
 0xfa9   : > { %4864 = vmatpush.msrb.mxu1 %v8295_v31  ;;  %v8287_v31 = vld [vmem:[%s12071_s1 + $0x2f0] sm:$0xff] }
0x1009   : > { %v4089_v59 = vpop.f32.mrf.mxu2 }
0x100a   : > { %8245 = vmatmul.msk.f32.vlgmr.msrb.gmra.mxu3 %vm1498_vm0, %v4089_v59  ;;  %v8296_v59 = vld [vmem:[%s12071_s1 + $0x338] sm:$0xff] }
0x100b   : > { %4817 = vmatpush.msrb.mxu3 %v8309_v15  ;;  %v8320_v15 = vld [vmem:[%s12071_s1 + $0x3f8] sm:$0xff] }
0x100d   : > { %4818 = vmatpush.msrb.mxu3 %v8293_v19  ;;  %v8304_v19 = vld [vmem:[%s12071_s1 + $0x378] sm:$0xff] }
0x1011   : > { %v4092_v22 = vpop.f32.mrf.mxu2  ;;  %v3936_v60 = vpop.f32.mrf.mxu3 }
0x1012   : > { %8246 = vmatmul.msk.f32.gmra.mxu3 %vm1498_vm0, %v4092_v22  ;;  %v3966_v26 = vadd.f32 %v10776_v8, %v3936_v60  ;;  %v8277_v22 = vld [vmem:[%s12071_s1 + $0x2a0] sm:$0xff]  ;;  %v8279_v60 = vld [vmem:[%s12071_s1 + $0x2b0] sm:$0xff] }
0x1013   : > { %4819 = vmatpush.msrb.mxu3 %v8277_v22  ;;  %4865 = vmatpush.msrb.mxu1 %v8279_v60  ;;  %v8269_v22 = vld [vmem:[%s12071_s1 + $0x260] sm:$0xff]  ;;  %v8272_v60 = vld [vmem:[%s12071_s1 + $0x278] sm:$0xff] }
0x101b   : > { %v4244_v42 = vpop.f32.mrf.mxu1  ;;  %v3939_v23 = vpop.f32.mrf.mxu3 }
0x101c   : > { %8253 = vmatmul.msk.f32.vlgmr.msrb.gmra.mxu2 %vm1498_vm0, %v4244_v42  ;;  %v3969_v2 = vadd.f32 %v10778_v14, %v3939_v23  ;;  %v8280_v23 = vld [vmem:[%s12071_s1 + $0x2b8] sm:$0xff] }
0x101d   : > { %4886 = vmatpush.msrb.mxu2 %v8312_v18  ;;  %v8303_v18 = vld [vmem:[%s12071_s1 + $0x370] sm:$0xff] }
0x101f   : > { %4887 = vmatpush.msrb.mxu2 %v8296_v59  ;;  %v8288_v59 = vld [vmem:[%s12071_s1 + $0x2f8] sm:$0xff] }
0x1021   : > { %4888 = vmatpush.msrb.mxu2 %v8280_v23  ;;  %v8354_v23 = vld [vmem:[%s12077_s7 + $0x8f8] sm:$0xff] }
0x1023   : > { %v4247_v24 = vpop.f32.mrf.mxu1 }
0x1024   : > { %8254 = vmatmul.msk.f32.gmra.mxu2 %vm1498_vm0, %v4247_v24  ;;  %v8278_v24 = vld [vmem:[%s12071_s1 + $0x2a8] sm:$0xff] }
0x1025   : > { %4842 = vmatpush.msrb.mxu0 %v8278_v24  ;;  %v8271_v24 = vld [vmem:[%s12071_s1 + $0x270] sm:$0xff] }
0x108d   : > { %v4118_v25 = vpop.f32.mrf.mxu3 }
0x108e   : > { %v4124_v27 = vadd.f32 %v4118_v25, %v3966_v26  ;;  %v8261_v25 = vld [vmem:[%s12071_s1 + $0x220] sm:$0xff]  ;;  %v8262_v26 = vld [vmem:[%s12071_s1 + $0x228] sm:$0xff] }
0x108f   : > { %4820 = vmatpush.msrb.mxu3 %v8261_v25  ;;  %4843 = vmatpush.msrb.mxu0 %v8262_v26  ;;  %v8370_v25 = vld [vmem:[%s12077_s7 + $0x978] sm:$0xff] }
0x1090   : > { %v8338_v26 = vld [vmem:[%s12077_s7 + $0x878] sm:$0xff] }
0x1095   : > { %v4121_v37 = vpop.f32.mrf.mxu3 }
0x1096   : > { %v4125_v38 = vadd.f32 %v4121_v37, %v3969_v2 }
0x109f   : > { %v4273_v32 = vpop.f32.mrf.mxu2 }
0x10a0   : > { %v4279_v56 = vadd.f32 %v4273_v32, %v4124_v27  ;;  %v8263_v32 = vld [vmem:[%s12071_s1 + $0x230] sm:$0xff] }
0x10a1   : > { %4866 = vmatpush.msrb.mxu1 %v8263_v32  ;;  %v8369_v32 = vld [vmem:[%s12077_s7 + $0x970] sm:$0xff] }
0x10a2   : > { %v4284_v35 = vadd.f32 %v8963_v28, %v4279_v56  ;;  %v8264_v56 = vld [vmem:[%s12071_s1 + $0x238] sm:$0xff] }
0x10a3   : > { %4889 = vmatpush.msrb.mxu2 %v8264_v56  ;;  %v8337_v56 = vld [vmem:[%s12077_s7 + $0x870] sm:$0xff] }
0x10a4   : > { %v4286_v43 = vadd.f32 %v4284_v35, %v10720_v10 }
0x10a6   : > { %v4292_v39 = vsel %vm1714_vm3, %v4286_v43, 0.0 }
0x10a7   : > { %v4276_v40 = vpop.f32.mrf.mxu2  ;;  %4293 = vadd.xlane.f32.xlu0 %v4292_v39 }
0x10a8   : > { %v4280_v41 = vadd.f32 %v4276_v40, %v4125_v38 }
0x10aa   : > { %v4285_v44 = vadd.f32 %v8963_v28, %v4280_v41  ;;  %v8964_v41 = vld [vmem:[%s12073_s8 + $0x1] ss:$0 sm:$0xff]  ;;  %s12098_s8 = sld [smem:[#allocation36_spill]] }
0x10ac   : > { %v4287_v8 = vadd.f32 %v4285_v44, %v10724_v46 }
0x10ae   : > { %v4295_v45 = vsel %vm1714_vm3, %v4287_v8, 0.0 }
0x10af   : > { %4296 = vadd.xlane.f32.xlu2 %v4295_v45  ;;  %v8965_v45 = vld [vmem:[%s12075_s15 + $0x1] ss:$0 sm:$0xff] }
0x111a   : > { %v4294_v12 = vpop.xlane.xlu0 %4293 }
0x111b   : > { %v4298_v14 = vmul.f32 %v4294_v12, %v10241_v47 }
0x111d   : > { %v10841_v10 = vsub.f32 %v4286_v43, %v4298_v14 }
0x111f   : > { %v4302_v30 = vmul.f32 %v10841_v10, %v10841_v10 }
0x1121   : > { %v4304_v48 = vsel %vm1714_vm3, %v4302_v30, 0.0 }
0x1122   : > { %4305 = vadd.xlane.f32.xlu1 %v4304_v48  ;;  %v4297_v46 = vpop.xlane.xlu2 %4296 }
0x1123   : > { %v4299_v49 = vmul.f32 %v4297_v46, %v10241_v47 }
0x1125   : > { %v10847_v53 = vsub.f32 %v4287_v8, %v4299_v49 }
0x1127   : > { %v4303_v54 = vmul.f32 %v10847_v53, %v10847_v53 }
0x1129   : > { %v4307_v58 = vsel %vm1714_vm3, %v4303_v54, 0.0  ;;  %v8313_v54 = vld [vmem:[%s12071_s1 + $0x3c0] sm:$0xff] }
0x112a   : > { %4308 = vadd.xlane.f32.xlu0 %v4307_v58  ;;  %v8314_v58 = vld [vmem:[%s12071_s1 + $0x3c8] sm:$0xff] }
0x1195   : > { %v4306_v13 = vpop.xlane.xlu1 %4305 }
0x1196   : > { %v4310_v29 = vmul.f32 %v4306_v13, %v10241_v47  ;;  %v8317_v13 = vld [vmem:[%s12071_s1 + $0x3e0] sm:$0xff] }
0x1198   : > { %v4312_v57 = vadd.f32 1e-05, %v4310_v29  ;;  %v8318_v29 = vld [vmem:[%s12071_s1 + $0x3e8] sm:$0xff] }
0x119a   : > { %9058 = vrsqrt.f32 %v4312_v57  ;;  %vm4320_vm6 = vweird.f32 %v4312_v57 }
0x119d   : > { %v4309_v21 = vpop.xlane.xlu0 %4308 }
0x119e   : > { %v4311_v42 = vmul.f32 %v4309_v21, %v10241_v47  ;;  %v8286_v21 = vld [vmem:[%s12071_s1 + $0x2e8] sm:$0xff] }
0x11a0   : > { %v9059_v27 = vpop.eup %9058  ;;  %v4313_v28 = vadd.f32 1e-05, %v4311_v42  ;;  %v8270_v42 = vld [vmem:[%s12071_s1 + $0x268] sm:$0xff] }
0x11a1   : > { %v4315_v35 = vmul.f32 %v9059_v27, %v4312_v57  ;;  %vm4321_vm5 = vweird.f32 %v9059_v27  ;;  %v8319_v57 = vld [vmem:[%s12071_s1 + $0x3f0] sm:$0xff] }
0x11a2   : > { %9060 = vrsqrt.f32 %v4313_v28  ;;  %vm4322_vm7 = vmor %vm4320_vm6, %vm4321_vm5  ;;  %vm4330_vm9 = vweird.f32 %v4313_v28 }
0x11a3   : > { %v4316_v37 = vmul.f32 %v9059_v27, %v4315_v35  ;;  %v8385_v35 = vld [vmem:[%s12077_s7 + $0x9f0] sm:$0xff] }
0x11a5   : > { %v4317_v2 = vmul.f32 0.5, %v4316_v37  ;;  %v8352_v37 = vld [vmem:[%s12077_s7 + $0x8e8] sm:$0xff] }
0x11a7   : > { %v4318_v43 = vsub.f32 1.5, %v4317_v2  ;;  %v8368_v2 = vld [vmem:[%s12077_s7 + $0x968] sm:$0xff] }
0x11a8   : > { %v9061_v38 = vpop.eup %9060 }
0x11a9   : > { %v4319_v39 = vmul.f32 %v9059_v27, %v4318_v43  ;;  %v4325_v40 = vmul.f32 %v9061_v38, %v4313_v28  ;;  %vm4331_vm8 = vweird.f32 %v9061_v38  ;;  %v8353_v28 = vld [vmem:[%s12077_s7 + $0x8f0] sm:$0xff]  ;;  %v8336_v43 = vld [vmem:[%s12077_s7 + $0x868] sm:$0xff] }
0x11aa   : > { %vm4332_vm10 = vmor %vm4330_vm9, %vm4331_vm8 }
0x11ab   : > { %v4323_v44 = vsel %vm4322_vm7, %v9059_v27, %v4319_v39  ;;  %v4326_v8 = vmul.f32 %v9061_v38, %v4325_v40  ;;  %v8386_v27 = vld [vmem:[%s12077_s7 + $0x9f8] sm:$0xff]  ;;  %v8351_v39 = vld [vmem:[%s12077_s7 + $0x8e0] sm:$0xff] }
0x11ac   : > { %v4334_v12 = vmul.f32 %v4323_v44, %v10841_v10  ;;  %v8315_v10 = vld [vmem:[%s12071_s1 + $0x3d0] sm:$0xff]  ;;  %v8367_v40 = vld [vmem:[%s12077_s7 + $0x960] sm:$0xff]  ;;  %s12097_s1 = sld [smem:[#allocation51_spill]] }
0x11ad   : > { %v4327_v14 = vmul.f32 0.5, %v4326_v8  ;;  %v8383_v44 = vld [vmem:[%s12077_s7 + $0x9e0] sm:$0xff]  ;;  %v8350_v8 = vld [vmem:[%s12077_s7 + $0x8d8] sm:$0xff] }
0x11ae   : > { %v4339_v30 = vmul.f32 %v8964_v41, %v4334_v12  ;;  %v8334_v12 = vld [vmem:[%s12077_s7 + $0x858] sm:$0xff] }
0x11af   : > { %v4328_v48 = vsub.f32 1.5, %v4327_v14  ;;  %v8382_v14 = vld [vmem:[%s12077_s7 + $0x9d8] sm:$0xff] }
0x11b0   : > { %v10889_v46 = vadd.f32 %v8965_v45, %v4339_v30  ;;  %v8349_v30 = vld [vmem:[%s12077_s7 + $0x8d0] sm:$0xff] }
0x11b1   : > { %v4329_v49 = vmul.f32 %v9061_v38, %v4328_v48  ;;  %v8365_v48 = vld [vmem:[%s12077_s7 + $0x950] sm:$0xff] }
0x11b2   : > { %8580 = vmatmul.msk.f32.vlgmr.msra.gmra.mxu3 %vm1714_vm3, %v10889_v46  ;;  %8582 = vmatmul.msk.f32.vlgmr.msra.gmra.mxu0 %vm1714_vm3, %v10889_v46 }
0x11b3   : > { %v4333_v61 = vsel %vm4332_vm10, %v9061_v38, %v4329_v49  ;;  %8584 = vmatmul.msk.f32.vlgmr.msra.gmra.mxu1 %vm1714_vm3, %v10889_v46  ;;  %8586 = vmatmul.msk.f32.vlgmr.msra.gmra.mxu2 %vm1714_vm3, %v10889_v46  ;;  %v8384_v38 = vld [vmem:[%s12077_s7 + $0x9e8] sm:$0xff]  ;;  %v8333_v49 = vld [vmem:[%s12077_s7 + $0x850] sm:$0xff] }
0x11b4   : > { %v4335_v63 = vmul.f32 %v4333_v61, %v10847_v53  ;;  %4909 = vmatpush.msra.mxu3 %v8313_v54  ;;  %4932 = vmatpush.msra.mxu0 %v8314_v58  ;;  %v8381_v54 = vld [vmem:[%s12077_s7 + $0x9d0] sm:$0xff]  ;;  %v8348_v58 = vld [vmem:[%s12077_s7 + $0x8c8] sm:$0xff] }
0x11b5   : > { %4955 = vmatpush.msra.mxu1 %v8315_v10  ;;  %4978 = vmatpush.msra.mxu2 %v8316_v36  ;;  %v8364_v10 = vld [vmem:[%s12077_s7 + $0x948] sm:$0xff] }
0x11b6   : > { %v4340_v5 = vmul.f32 %v8964_v41, %v4335_v63  ;;  %4910 = vmatpush.msra.mxu3 %v8297_v62  ;;  %4933 = vmatpush.msra.mxu0 %v8298_v33  ;;  %v8335_v41 = vld [vmem:[%s12077_s7 + $0x860] sm:$0xff]  ;;  %v8332_v36 = vld [vmem:[%s12077_s7 + $0x848] sm:$0xff] }
0x11b7   : > { %4956 = vmatpush.msra.mxu1 %v8299_v0  ;;  %4979 = vmatpush.msra.mxu2 %v8300_v1  ;;  %v8380_v61 = vld [vmem:[%s12077_s7 + $0x9c8] sm:$0xff]  ;;  %v8347_v62 = vld [vmem:[%s12077_s7 + $0x8c0] sm:$0xff]  ;;  %v8346_v1 = vld [vmem:[%s12077_s7 + $0x8b8] sm:$0xff] }
0x11b8   : > { %v10912_v53 = vadd.f32 %v8965_v45, %v4340_v5  ;;  %4911 = vmatpush.msra.mxu3 %v8281_v3  ;;  %4934 = vmatpush.msra.mxu0 %v8282_v4  ;;  %v8366_v45 = vld [vmem:[%s12077_s7 + $0x958] sm:$0xff]  ;;  %v8363_v33 = vld [vmem:[%s12077_s7 + $0x940] sm:$0xff] }
0x11b9   : > { %4957 = vmatpush.msra.mxu1 %v8283_v6  ;;  %4980 = vmatpush.msra.mxu2 %v8284_v7  ;;  %v8331_v63 = vld [vmem:[%s12077_s7 + $0x840] sm:$0xff]  ;;  %v8362_v3 = vld [vmem:[%s12077_s7 + $0x938] sm:$0xff]  ;;  %v8345_v6 = vld [vmem:[%s12077_s7 + $0x8b0] sm:$0xff] }
0x11ba   : > { %8581 = vmatmul.msk.f32.gmra.mxu3 %vm1714_vm3, %v10912_v53  ;;  %8583 = vmatmul.msk.f32.gmra.mxu0 %vm1714_vm3, %v10912_v53  ;;  %v8379_v0 = vld [vmem:[%s12077_s7 + $0x9c0] sm:$0xff]  ;;  %v8330_v4 = vld [vmem:[%s12077_s7 + $0x838] sm:$0xff]  ;;  %v8361_v7 = vld [vmem:[%s12077_s7 + $0x930] sm:$0xff] }
0x11bb   : > { %8585 = vmatmul.msk.f32.gmra.mxu1 %vm1714_vm3, %v10912_v53  ;;  %8587 = vmatmul.msk.f32.gmra.mxu2 %vm1714_vm3, %v10912_v53  ;;  %v8378_v5 = vld [vmem:[%s12077_s7 + $0x9b8] sm:$0xff] }
0x11bc   : > { %4912 = vmatpush.msra.mxu3 %v8265_v55  ;;  %4935 = vmatpush.msra.mxu0 %v8266_v34  ;;  %v8329_v55 = vld [vmem:[%s12077_s7 + $0x830] sm:$0xff] }
0x11bd   : > { %4958 = vmatpush.msra.mxu1 %v8267_v9  ;;  %4981 = vmatpush.msra.mxu2 %v8268_v11  ;;  %v8377_v34 = vld [vmem:[%s12077_s7 + $0x9b0] sm:$0xff]  ;;  %v8344_v9 = vld [vmem:[%s12077_s7 + $0x8a8] sm:$0xff] }
0x11be   : > { %v8360_v11 = vld [vmem:[%s12077_s7 + $0x928] sm:$0xff] }
0x11c2   : > { %8588 = vmatmul.msk.f32.vlgmr.msrb.gmra.mxu3 %vm1714_vm3, %v10889_v46  ;;  %8590 = vmatmul.msk.f32.vlgmr.msrb.gmra.mxu0 %vm1714_vm3, %v10889_v46 }
0x11c3   : > { %8592 = vmatmul.msk.f32.vlgmr.msrb.gmra.mxu1 %vm1714_vm3, %v10889_v46  ;;  %8594 = vmatmul.msk.f32.vlgmr.msrb.gmra.mxu2 %vm1714_vm3, %v10889_v46 }
0x11c4   : > { %5001 = vmatpush.msrb.mxu3 %v8317_v13  ;;  %5024 = vmatpush.msrb.mxu0 %v8318_v29  ;;  %v8328_v13 = vld [vmem:[%s12077_s7 + $0x828] sm:$0xff] }
0x11c5   : > { %5047 = vmatpush.msrb.mxu1 %v8319_v57  ;;  %5070 = vmatpush.msrb.mxu2 %v8320_v15  ;;  %v8376_v29 = vld [vmem:[%s12077_s7 + $0x9a8] sm:$0xff]  ;;  %v8343_v57 = vld [vmem:[%s12077_s7 + $0x8a0] sm:$0xff] }
0x11c6   : > { %5002 = vmatpush.msrb.mxu3 %v8301_v16  ;;  %5025 = vmatpush.msrb.mxu0 %v8302_v17  ;;  %v8359_v15 = vld [vmem:[%s12077_s7 + $0x920] sm:$0xff] }
0x11c7   : > { %5048 = vmatpush.msrb.mxu1 %v8303_v18  ;;  %5071 = vmatpush.msrb.mxu2 %v8304_v19  ;;  %v8327_v16 = vld [vmem:[%s12077_s7 + $0x820] sm:$0xff]  ;;  %v8342_v18 = vld [vmem:[%s12077_s7 + $0x898] sm:$0xff] }
0x11c8   : > { %5003 = vmatpush.msrb.mxu3 %v8285_v20  ;;  %5026 = vmatpush.msrb.mxu0 %v8286_v21  ;;  %v8375_v17 = vld [vmem:[%s12077_s7 + $0x9a0] sm:$0xff]  ;;  %v8358_v19 = vld [vmem:[%s12077_s7 + $0x918] sm:$0xff] }
0x11c9   : > { %5049 = vmatpush.msrb.mxu1 %v8287_v31  ;;  %5072 = vmatpush.msrb.mxu2 %v8288_v59  ;;  %v8326_v20 = vld [vmem:[%s12077_s7 + $0x818] sm:$0xff]  ;;  %v8341_v31 = vld [vmem:[%s12077_s7 + $0x890] sm:$0xff] }
0x11ca   : > { %8589 = vmatmul.msk.f32.gmra.mxu3 %vm1714_vm3, %v10912_v53  ;;  %8591 = vmatmul.msk.f32.gmra.mxu0 %vm1714_vm3, %v10912_v53  ;;  %v8374_v21 = vld [vmem:[%s12077_s7 + $0x998] sm:$0xff]  ;;  %v8357_v59 = vld [vmem:[%s12077_s7 + $0x910] sm:$0xff] }
0x11cb   : > { %8593 = vmatmul.msk.f32.gmra.mxu1 %vm1714_vm3, %v10912_v53  ;;  %8595 = vmatmul.msk.f32.gmra.mxu2 %vm1714_vm3, %v10912_v53 }
0x11cc   : > { %5004 = vmatpush.msrb.mxu3 %v8269_v22  ;;  %5027 = vmatpush.msrb.mxu0 %v8270_v42  ;;  %v8325_v22 = vld [vmem:[%s12077_s7 + $0x810] sm:$0xff] }
0x11cd   : > { %5050 = vmatpush.msrb.mxu1 %v8271_v24  ;;  %5073 = vmatpush.msrb.mxu2 %v8272_v60  ;;  %v8373_v42 = vld [vmem:[%s12077_s7 + $0x990] sm:$0xff]  ;;  %v8340_v24 = vld [vmem:[%s12077_s7 + $0x888] sm:$0xff] }
0x11ce   : > { %v8356_v60 = vld [vmem:[%s12077_s7 + $0x908] sm:$0xff] }
0x11d2   : > { %8596 = vmatmul.msk.f32.vlgmr.msra.gmra.mxu3 %vm1714_vm3, %v10889_v46  ;;  %8598 = vmatmul.msk.f32.vlgmr.msra.gmra.mxu0 %vm1714_vm3, %v10889_v46 }
0x11d3   : > { %8600 = vmatmul.msk.f32.vlgmr.msra.gmra.mxu1 %vm1714_vm3, %v10889_v46  ;;  %8602 = vmatmul.msk.f32.vlgmr.msra.gmra.mxu2 %vm1714_vm3, %v10889_v46 }
0x11d4   : > { %5139 = vmatpush.msra.mxu0 %v8354_v23  ;;  %5162 = vmatpush.msra.mxu1 %v8370_v25  ;;  %v8324_v23 = vld [vmem:[%s12077_s7 + $0x808] sm:$0xff] }
0x11d5   : > { %5116 = vmatpush.msra.mxu3 %v8338_v26  ;;  %5185 = vmatpush.msra.mxu2 %v8386_v27  ;;  %v8372_v25 = vld [vmem:[%s12077_s7 + $0x988] sm:$0xff]  ;;  %v8339_v26 = vld [vmem:[%s12077_s7 + $0x880] sm:$0xff] }
0x11d6   : > { %5140 = vmatpush.msra.mxu0 %v8353_v28  ;;  %5163 = vmatpush.msra.mxu1 %v8369_v32  ;;  %v8355_v27 = vld [vmem:[%s12077_s7 + $0x900] sm:$0xff]  ;;  %v8418_v28 = vld [vmem:[%s12077_s7 + $0xaf8] sm:$0xff] }
0x11d7   : > { %5117 = vmatpush.msra.mxu3 %v8337_v56  ;;  %5186 = vmatpush.msra.mxu2 %v8385_v35  ;;  %v8434_v32 = vld [vmem:[%s12077_s7 + $0xb78] sm:$0xff]  ;;  %v8323_v56 = vld [vmem:[%s12077_s7 + $0x800] sm:$0xff] }
0x11d8   : > { %5141 = vmatpush.msra.mxu0 %v8352_v37  ;;  %5164 = vmatpush.msra.mxu1 %v8368_v2  ;;  %v8371_v35 = vld [vmem:[%s12077_s7 + $0x980] sm:$0xff]  ;;  %v8417_v37 = vld [vmem:[%s12077_s7 + $0xaf0] sm:$0xff] }
0x11d9   : > { %5118 = vmatpush.msra.mxu3 %v8336_v43  ;;  %5187 = vmatpush.msra.mxu2 %v8384_v38  ;;  %v8433_v2 = vld [vmem:[%s12077_s7 + $0xb70] sm:$0xff]  ;;  %v8402_v43 = vld [vmem:[%s12077_s7 + $0xa78] sm:$0xff] }
0x11da   : > { %8597 = vmatmul.msk.f32.gmra.mxu3 %vm1714_vm3, %v10912_v53  ;;  %8599 = vmatmul.msk.f32.gmra.mxu0 %vm1714_vm3, %v10912_v53  ;;  %v8450_v38 = vld [vmem:[%s12077_s7 + $0xbf8] sm:$0xff] }
0x11db   : > { %8601 = vmatmul.msk.f32.gmra.mxu1 %vm1714_vm3, %v10912_v53  ;;  %8603 = vmatmul.msk.f32.gmra.mxu2 %vm1714_vm3, %v10912_v53 }
0x11dc   : > { %5142 = vmatpush.msra.mxu0 %v8351_v39  ;;  %5165 = vmatpush.msra.mxu1 %v8367_v40  ;;  %v8416_v39 = vld [vmem:[%s12077_s7 + $0xae8] sm:$0xff] }
0x11dd   : > { %5119 = vmatpush.msra.mxu3 %v8335_v41  ;;  %5188 = vmatpush.msra.mxu2 %v8383_v44  ;;  %v8432_v40 = vld [vmem:[%s12077_s7 + $0xb68] sm:$0xff]  ;;  %v8401_v41 = vld [vmem:[%s12077_s7 + $0xa70] sm:$0xff] }
0x11de   : > { %5143 = vmatpush.msra.mxu0 %v8350_v8  ;;  %5166 = vmatpush.msra.mxu1 %v8366_v45  ;;  %v8449_v44 = vld [vmem:[%s12077_s7 + $0xbf0] sm:$0xff]  ;;  %v8415_v8 = vld [vmem:[%s12077_s7 + $0xae0] sm:$0xff] }
0x11df   : > { %5120 = vmatpush.msra.mxu3 %v8334_v12  ;;  %5189 = vmatpush.msra.mxu2 %v8382_v14  ;;  %v8431_v45 = vld [vmem:[%s12077_s7 + $0xb60] sm:$0xff]  ;;  %v8400_v12 = vld [vmem:[%s12077_s7 + $0xa68] sm:$0xff] }
0x11e0   : > { %5144 = vmatpush.msra.mxu0 %v8349_v30  ;;  %5167 = vmatpush.msra.mxu1 %v8365_v48  ;;  %v8448_v14 = vld [vmem:[%s12077_s7 + $0xbe8] sm:$0xff]  ;;  %v8414_v30 = vld [vmem:[%s12077_s7 + $0xad8] sm:$0xff] }
0x11e1   : > { %5121 = vmatpush.msra.mxu3 %v8333_v49  ;;  %5190 = vmatpush.msra.mxu2 %v8381_v54  ;;  %v8430_v48 = vld [vmem:[%s12077_s7 + $0xb58] sm:$0xff]  ;;  %v8399_v49 = vld [vmem:[%s12077_s7 + $0xa60] sm:$0xff] }
0x11e2   : > { %8604 = vmatmul.msk.f32.vlgmr.msrb.gmra.mxu3 %vm1714_vm3, %v10889_v46  ;;  %8606 = vmatmul.msk.f32.vlgmr.msrb.gmra.mxu0 %vm1714_vm3, %v10889_v46  ;;  %v8447_v54 = vld [vmem:[%s12077_s7 + $0xbe0] sm:$0xff] }
0x11e3   : > { %8608 = vmatmul.msk.f32.vlgmr.msrb.gmra.mxu1 %vm1714_vm3, %v10889_v46  ;;  %8610 = vmatmul.msk.f32.vlgmr.msrb.gmra.mxu2 %vm1714_vm3, %v10889_v46 }
0x11e4   : > { %5145 = vmatpush.msra.mxu0 %v8348_v58  ;;  %5168 = vmatpush.msra.mxu1 %v8364_v10  ;;  %v8413_v58 = vld [vmem:[%s12077_s7 + $0xad0] sm:$0xff] }
0x11e5   : > { %5122 = vmatpush.msra.mxu3 %v8332_v36  ;;  %5191 = vmatpush.msra.mxu2 %v8380_v61  ;;  %v8429_v10 = vld [vmem:[%s12077_s7 + $0xb50] sm:$0xff]  ;;  %v8398_v36 = vld [vmem:[%s12077_s7 + $0xa58] sm:$0xff] }
0x11e6   : > { %5146 = vmatpush.msra.mxu0 %v8347_v62  ;;  %5169 = vmatpush.msra.mxu1 %v8363_v33  ;;  %v8446_v61 = vld [vmem:[%s12077_s7 + $0xbd8] sm:$0xff]  ;;  %v8412_v62 = vld [vmem:[%s12077_s7 + $0xac8] sm:$0xff] }
0x11e7   : > { %5123 = vmatpush.msra.mxu3 %v8331_v63  ;;  %5192 = vmatpush.msra.mxu2 %v8379_v0  ;;  %v8428_v33 = vld [vmem:[%s12077_s7 + $0xb48] sm:$0xff]  ;;  %v8397_v63 = vld [vmem:[%s12077_s7 + $0xa50] sm:$0xff] }
0x11e8   : > { %5147 = vmatpush.msra.mxu0 %v8346_v1  ;;  %5170 = vmatpush.msra.mxu1 %v8362_v3  ;;  %v8445_v0 = vld [vmem:[%s12077_s7 + $0xbd0] sm:$0xff]  ;;  %v8411_v1 = vld [vmem:[%s12077_s7 + $0xac0] sm:$0xff] }
0x11e9   : > { %5124 = vmatpush.msra.mxu3 %v8330_v4  ;;  %5193 = vmatpush.msra.mxu2 %v8378_v5  ;;  %v8427_v3 = vld [vmem:[%s12077_s7 + $0xb40] sm:$0xff]  ;;  %v8396_v4 = vld [vmem:[%s12077_s7 + $0xa48] sm:$0xff] }
0x11ea   : > { %8605 = vmatmul.msk.f32.gmra.mxu3 %vm1714_vm3, %v10912_v53  ;;  %8607 = vmatmul.msk.f32.gmra.mxu0 %vm1714_vm3, %v10912_v53  ;;  %v8444_v5 = vld [vmem:[%s12077_s7 + $0xbc8] sm:$0xff] }
0x11eb   : > { %8609 = vmatmul.msk.f32.gmra.mxu1 %vm1714_vm3, %v10912_v53  ;;  %8611 = vmatmul.msk.f32.gmra.mxu2 %vm1714_vm3, %v10912_v53 }
0x11ec   : > { %5148 = vmatpush.msra.mxu0 %v8345_v6  ;;  %5171 = vmatpush.msra.mxu1 %v8361_v7  ;;  %v8410_v6 = vld [vmem:[%s12077_s7 + $0xab8] sm:$0xff] }
0x11ed   : > { %5125 = vmatpush.msra.mxu3 %v8329_v55  ;;  %5194 = vmatpush.msra.mxu2 %v8377_v34  ;;  %v8426_v7 = vld [vmem:[%s12077_s7 + $0xb38] sm:$0xff]  ;;  %v8395_v55 = vld [vmem:[%s12077_s7 + $0xa40] sm:$0xff] }
0x11ee   : > { %5149 = vmatpush.msra.mxu0 %v8344_v9  ;;  %5172 = vmatpush.msra.mxu1 %v8360_v11  ;;  %v8443_v34 = vld [vmem:[%s12077_s7 + $0xbc0] sm:$0xff]  ;;  %v8409_v9 = vld [vmem:[%s12077_s7 + $0xab0] sm:$0xff] }
0x11ef   : > { %5126 = vmatpush.msra.mxu3 %v8328_v13  ;;  %5195 = vmatpush.msra.mxu2 %v8376_v29  ;;  %v8425_v11 = vld [vmem:[%s12077_s7 + $0xb30] sm:$0xff]  ;;  %v8394_v13 = vld [vmem:[%s12077_s7 + $0xa38] sm:$0xff] }
0x11f0   : > { %5150 = vmatpush.msra.mxu0 %v8343_v57  ;;  %5173 = vmatpush.msra.mxu1 %v8359_v15  ;;  %v8442_v29 = vld [vmem:[%s12077_s7 + $0xbb8] sm:$0xff]  ;;  %v8408_v57 = vld [vmem:[%s12077_s7 + $0xaa8] sm:$0xff] }
0x11f1   : > { %5127 = vmatpush.msra.mxu3 %v8327_v16  ;;  %5196 = vmatpush.msra.mxu2 %v8375_v17  ;;  %v8424_v15 = vld [vmem:[%s12077_s7 + $0xb28] sm:$0xff]  ;;  %v8393_v16 = vld [vmem:[%s12077_s7 + $0xa30] sm:$0xff] }
0x11f2   : > { %5151 = vmatpush.msra.mxu0 %v8342_v18  ;;  %5174 = vmatpush.msra.mxu1 %v8358_v19  ;;  %v8441_v17 = vld [vmem:[%s12077_s7 + $0xbb0] sm:$0xff]  ;;  %v8407_v18 = vld [vmem:[%s12077_s7 + $0xaa0] sm:$0xff] }
0x11f3   : > { %5128 = vmatpush.msra.mxu3 %v8326_v20  ;;  %5197 = vmatpush.msra.mxu2 %v8374_v21  ;;  %v8423_v19 = vld [vmem:[%s12077_s7 + $0xb20] sm:$0xff]  ;;  %v8406_v20 = vld [vmem:[%s12077_s7 + $0xa98] sm:$0xff] }
0x11f4   : > { %5152 = vmatpush.msra.mxu0 %v8341_v31  ;;  %5175 = vmatpush.msra.mxu1 %v8357_v59  ;;  %v8422_v21 = vld [vmem:[%s12077_s7 + $0xb18] sm:$0xff]  ;;  %v8392_v31 = vld [vmem:[%s12077_s7 + $0xa28] sm:$0xff]  ;;  %v8405_v59 = vld [vmem:[%s12077_s7 + $0xa90] sm:$0xff] }
0x11f5   : > { %5129 = vmatpush.msra.mxu3 %v8325_v22  ;;  %5198 = vmatpush.msra.mxu2 %v8373_v42  ;;  %v8421_v22 = vld [vmem:[%s12077_s7 + $0xb10] sm:$0xff]  ;;  %v8440_v42 = vld [vmem:[%s12077_s7 + $0xba8] sm:$0xff] }
0x11f6   : > { %5153 = vmatpush.msra.mxu0 %v8340_v24  ;;  %5176 = vmatpush.msra.mxu1 %v8356_v60  ;;  %v8391_v24 = vld [vmem:[%s12077_s7 + $0xa20] sm:$0xff]  ;;  %v8404_v60 = vld [vmem:[%s12077_s7 + $0xa88] sm:$0xff] }
0x11f7   : > { %5130 = vmatpush.msra.mxu3 %v8324_v23  ;;  %5199 = vmatpush.msra.mxu2 %v8372_v25  ;;  %v8420_v23 = vld [vmem:[%s12077_s7 + $0xb08] sm:$0xff]  ;;  %v8439_v25 = vld [vmem:[%s12077_s7 + $0xba0] sm:$0xff] }
0x11f8   : > { %5154 = vmatpush.msra.mxu0 %v8339_v26  ;;  %5177 = vmatpush.msra.mxu1 %v8355_v27  ;;  %v8390_v26 = vld [vmem:[%s12077_s7 + $0xa18] sm:$0xff]  ;;  %v8403_v27 = vld [vmem:[%s12077_s7 + $0xa80] sm:$0xff] }
0x11f9   : > { %5131 = vmatpush.msra.mxu3 %v8323_v56  ;;  %5200 = vmatpush.msra.mxu2 %v8371_v35  ;;  %v8389_v56 = vld [vmem:[%s12077_s7 + $0xa10] sm:$0xff] }
0x11fa   : > { %5231 = vmatpush.msrb.mxu0 %v8418_v28  ;;  %5254 = vmatpush.msrb.mxu1 %v8434_v32  ;;  %v8419_v28 = vld [vmem:[%s12077_s7 + $0xb00] sm:$0xff]  ;;  %v8438_v32 = vld [vmem:[%s12077_s7 + $0xb98] sm:$0xff]  ;;  %v8437_v35 = vld [vmem:[%s12077_s7 + $0xb90] sm:$0xff] }
0x11fb   : > { %5208 = vmatpush.msrb.mxu3 %v8402_v43  ;;  %5277 = vmatpush.msrb.mxu2 %v8450_v38  ;;  %v8387_v43 = vld [vmem:[%s12077_s7 + $0xa00] sm:$0xff] }
0x11fc   : > { %5232 = vmatpush.msrb.mxu0 %v8417_v37  ;;  %5255 = vmatpush.msrb.mxu1 %v8433_v2  ;;  %v8388_v37 = vld [vmem:[%s12077_s7 + $0xa08] sm:$0xff]  ;;  %v8435_v38 = vld [vmem:[%s12077_s7 + $0xb80] sm:$0xff] }
0x11fd   : > { %5209 = vmatpush.msrb.mxu3 %v8401_v41  ;;  %5278 = vmatpush.msrb.mxu2 %v8449_v44  ;;  %v8436_v2 = vld [vmem:[%s12077_s7 + $0xb88] sm:$0xff] }
0x11fe   : > { %5233 = vmatpush.msrb.mxu0 %v8416_v39  ;;  %5256 = vmatpush.msrb.mxu1 %v8432_v40  ;;  %v11119_v39 = vld [vmem:[%s12079_s16 + $0x10] sm:$0xff] }
0x11ff   : > { %5210 = vmatpush.msrb.mxu3 %v8400_v12  ;;  %5279 = vmatpush.msrb.mxu2 %v8448_v14  ;;  %v4676_v40 = vperm.slane %v11119_v39, 1  ;;  %v4677_v41 = vperm.slane %v11119_v39, 2 }
0x1200   : > { %5234 = vmatpush.msrb.mxu0 %v8415_v8  ;;  %5257 = vmatpush.msrb.mxu1 %v8431_v45 }
0x1201   : > { %5211 = vmatpush.msrb.mxu3 %v8399_v49  ;;  %5280 = vmatpush.msrb.mxu2 %v8447_v54  ;;  %v8498_v54 = vld [vmem:[%s12077_s7 + $0xd78] sm:$0xff] }
0x1202   : > { %5235 = vmatpush.msrb.mxu0 %v8414_v30  ;;  %5258 = vmatpush.msrb.mxu1 %v8430_v48  ;;  %v8482_v30 = vld [vmem:[%s12077_s7 + $0xcf8] sm:$0xff]  ;;  %v4675_v48 = vperm.slane %v11119_v39, 0 }
0x1203   : > { %5212 = vmatpush.msrb.mxu3 %v8398_v36  ;;  %5281 = vmatpush.msrb.mxu2 %v8446_v61  ;;  %v8497_v61 = vld [vmem:[%s12077_s7 + $0xd70] sm:$0xff] }
0x1204   : > { %5236 = vmatpush.msrb.mxu0 %v8413_v58  ;;  %5259 = vmatpush.msrb.mxu1 %v8429_v10  ;;  %v4678_v58 = vperm.slane %v11119_v39, 3  ;;  %v8481_v10 = vld [vmem:[%s12077_s7 + $0xcf0] sm:$0xff] }
0x1205   : > { %5213 = vmatpush.msrb.mxu3 %v8397_v63  ;;  %5282 = vmatpush.msrb.mxu2 %v8445_v0  ;;  %v8480_v63 = vld [vmem:[%s12077_s7 + $0xce8] sm:$0xff] }
0x1206   : > { %5237 = vmatpush.msrb.mxu0 %v8412_v62  ;;  %5260 = vmatpush.msrb.mxu1 %v8428_v33 }
0x1207   : > { %5214 = vmatpush.msrb.mxu3 %v8396_v4  ;;  %5283 = vmatpush.msrb.mxu2 %v8444_v5 }
0x1208   : > { %5238 = vmatpush.msrb.mxu0 %v8411_v1  ;;  %5261 = vmatpush.msrb.mxu1 %v8427_v3  ;;  %v8496_v3 = vld [vmem:[%s12077_s7 + $0xd68] sm:$0xff] }
0x1209   : > { %5215 = vmatpush.msrb.mxu3 %v8395_v55  ;;  %5284 = vmatpush.msrb.mxu2 %v8443_v34 }
0x120a   : > { %5239 = vmatpush.msrb.mxu0 %v8410_v6  ;;  %5262 = vmatpush.msrb.mxu1 %v8426_v7  ;;  %v8466_v7 = vld [vmem:[%s12077_s7 + $0xc78] sm:$0xff] }
0x120b   : > { %5216 = vmatpush.msrb.mxu3 %v8394_v13  ;;  %5285 = vmatpush.msrb.mxu2 %v8442_v29  ;;  %v8514_v29 = vld [vmem:[%s12077_s7 + $0xdf8] sm:$0xff] }
0x120c   : > { %5240 = vmatpush.msrb.mxu0 %v8409_v9  ;;  %5263 = vmatpush.msrb.mxu1 %v8425_v11  ;;  %v8479_v9 = vld [vmem:[%s12077_s7 + $0xce0] sm:$0xff] }
0x120d   : > { %5217 = vmatpush.msrb.mxu3 %v8393_v16  ;;  %5286 = vmatpush.msrb.mxu2 %v8441_v17  ;;  %v8495_v11 = vld [vmem:[%s12077_s7 + $0xd60] sm:$0xff]  ;;  %v8478_v16 = vld [vmem:[%s12077_s7 + $0xcd8] sm:$0xff] }
0x120e   : > { %5241 = vmatpush.msrb.mxu0 %v8408_v57  ;;  %5264 = vmatpush.msrb.mxu1 %v8424_v15  ;;  %v8465_v15 = vld [vmem:[%s12077_s7 + $0xc70] sm:$0xff]  ;;  %v8494_v17 = vld [vmem:[%s12077_s7 + $0xd58] sm:$0xff] }
0x120f   : > { %5218 = vmatpush.msrb.mxu3 %v8392_v31  ;;  %5287 = vmatpush.msrb.mxu2 %v8440_v42  ;;  %v4681_v31 = vperm.slane %v11119_v39, 6  ;;  %v8477_v42 = vld [vmem:[%s12077_s7 + $0xcd0] sm:$0xff] }
0x1210   : > { %5242 = vmatpush.msrb.mxu0 %v8407_v18  ;;  %5265 = vmatpush.msrb.mxu1 %v8423_v19  ;;  %v4680_v18 = vperm.slane %v11119_v39, 5  ;;  %v8513_v19 = vld [vmem:[%s12077_s7 + $0xdf0] sm:$0xff] }
0x1211   : > { %5219 = vmatpush.msrb.mxu3 %v8391_v24  ;;  %5288 = vmatpush.msrb.mxu2 %v8439_v25  ;;  %v8493_v24 = vld [vmem:[%s12077_s7 + $0xd50] sm:$0xff] }
0x1212   : > { %5243 = vmatpush.msrb.mxu0 %v8406_v20  ;;  %5266 = vmatpush.msrb.mxu1 %v8422_v21  ;;  %v8464_v21 = vld [vmem:[%s12077_s7 + $0xc68] sm:$0xff] }
0x1213   : > { %5220 = vmatpush.msrb.mxu3 %v8390_v26  ;;  %5289 = vmatpush.msrb.mxu2 %v8438_v32  ;;  %v8463_v26 = vld [vmem:[%s12077_s7 + $0xc60] sm:$0xff] }
0x1214   : > { %5244 = vmatpush.msrb.mxu0 %v8405_v59  ;;  %5267 = vmatpush.msrb.mxu1 %v8421_v22 }
0x1215   : > { %5221 = vmatpush.msrb.mxu3 %v8389_v56  ;;  %5290 = vmatpush.msrb.mxu2 %v8437_v35  ;;  %v8476_v56 = vld [vmem:[%s12077_s7 + $0xcc8] sm:$0xff] }
0x1216   : > { %5245 = vmatpush.msrb.mxu0 %v8404_v60  ;;  %5268 = vmatpush.msrb.mxu1 %v8420_v23  ;;  %v8512_v23 = vld [vmem:[%s12077_s7 + $0xde8] sm:$0xff] }
0x1217   : > { %5222 = vmatpush.msrb.mxu3 %v8388_v37  ;;  %5291 = vmatpush.msrb.mxu2 %v8436_v2  ;;  %v8492_v35 = vld [vmem:[%s12077_s7 + $0xd48] sm:$0xff] }
0x1218   : > { %5246 = vmatpush.msrb.mxu0 %v8403_v27  ;;  %5269 = vmatpush.msrb.mxu1 %v8419_v28 }
0x1219   : > { %5223 = vmatpush.msrb.mxu3 %v8387_v43  ;;  %5292 = vmatpush.msrb.mxu2 %v8435_v38  ;;  %v8511_v43 = vld [vmem:[%s12077_s7 + $0xde0] sm:$0xff]  ;;  %v8462_v38 = vld [vmem:[%s12077_s7 + $0xc58] sm:$0xff] }
0x122f   : > { %v4753_v44 = vpop.f32.mrf.mxu0 }
0x1230   : > { %v4754_v8 = vadd.f32 %v4753_v44, %v4676_v40  ;;  %v4776_v45 = vpop.f32.mrf.mxu1  ;;  %v8475_v44 = vld [vmem:[%s12077_s7 + $0xcc0] sm:$0xff] }
0x1231   : > { %v4777_v12 = vadd.f32 %v4776_v45, %v4677_v41  ;;  %v4682_v45 = vperm.slane %v11119_v39, 7 }
0x1232   : > { %v5082_v14 = vmax.f32 %v4754_v8, 0.0  ;;  %v8491_v8 = vld [vmem:[%s12077_s7 + $0xd40] sm:$0xff] }
0x1233   : > { %v5083_v49 = vmax.f32 %v4777_v12, 0.0 }
0x1234   : > { %5155 = vmatmul.f32.vlgmr.msra.gmra.mxu0 %v5082_v14  ;;  %v8510_v14 = vld [vmem:[%s12077_s7 + $0xdd8] sm:$0xff] }
0x1235   : > { %5178 = vmatmul.f32.vlgmr.msra.gmra.mxu1 %v5083_v49  ;;  %5323 = vmatpush.msra.mxu0 %v8482_v30  ;;  %v4730_v36 = vpop.f32.mrf.mxu3  ;;  %v8461_v30 = vld [vmem:[%s12077_s7 + $0xc50] sm:$0xff]  ;;  %v8474_v49 = vld [vmem:[%s12077_s7 + $0xcb8] sm:$0xff] }
0x1236   : > { %5346 = vmatpush.msra.mxu1 %v8498_v54  ;;  %v4731_v62 = vadd.f32 %v4730_v36, %v4675_v48  ;;  %v4799_v33 = vpop.f32.mrf.mxu2  ;;  %v8490_v54 = vld [vmem:[%s12077_s7 + $0xd38] sm:$0xff]  ;;  %v8509_v36 = vld [vmem:[%s12077_s7 + $0xdd0] sm:$0xff] }
0x1237   : > { %v4800_v0 = vadd.f32 %v4799_v33, %v4678_v58  ;;  %5324 = vmatpush.msra.mxu0 %v8481_v10  ;;  %v4756_v1 = vpop.f32.mrf.mxu0 }
0x1238   : > { %v5081_v4 = vmax.f32 %v4731_v62, 0.0  ;;  %5347 = vmatpush.msra.mxu1 %v8497_v61  ;;  %v4757_v5 = vadd.f32 %v4756_v1, %v4676_v40  ;;  %v4779_v6 = vpop.f32.mrf.mxu1  ;;  %v4679_v40 = vperm.slane %v11119_v39, 4  ;;  %v8460_v62 = vld [vmem:[%s12077_s7 + $0xc48] sm:$0xff]  ;;  %v8455_v39 = vld [vmem:[%s12077_s7 + $0xc20] sm:$0xff] }
0x1239   : > { %v5084_v55 = vmax.f32 %v4800_v0, 0.0  ;;  %v4780_v34 = vadd.f32 %v4779_v6, %v4677_v41  ;;  %5325 = vmatpush.msra.mxu0 %v8480_v63  ;;  %v8473_v63 = vld [vmem:[%s12077_s7 + $0xcb0] sm:$0xff] }
0x123a   : > { %v5098_v13 = vmax.f32 %v4757_v5, 0.0  ;;  %5348 = vmatpush.msra.mxu1 %v8496_v3  ;;  %5132 = vmatmul.f32.vlgmr.msra.gmra.mxu3 %v5081_v4  ;;  %v8489_v0 = vld [vmem:[%s12077_s7 + $0xd30] sm:$0xff]  ;;  %v8508_v3 = vld [vmem:[%s12077_s7 + $0xdc8] sm:$0xff]  ;;  %v8459_v5 = vld [vmem:[%s12077_s7 + $0xc40] sm:$0xff] }
0x123b   : > { %v5099_v57 = vmax.f32 %v4780_v34, 0.0  ;;  %5201 = vmatmul.f32.vlgmr.msra.gmra.mxu2 %v5084_v55  ;;  %5300 = vmatpush.msra.mxu3 %v8466_v7  ;;  %v8472_v55 = vld [vmem:[%s12077_s7 + $0xca8] sm:$0xff] }
0x123c   : > { %5326 = vmatpush.msra.mxu0 %v8479_v9  ;;  %5349 = vmatpush.msra.mxu1 %v8495_v11  ;;  %v8488_v34 = vld [vmem:[%s12077_s7 + $0xd28] sm:$0xff]  ;;  %v8507_v11 = vld [vmem:[%s12077_s7 + $0xdc0] sm:$0xff] }
0x123d   : > { %5369 = vmatpush.msra.mxu2 %v8514_v29  ;;  %5158 = vmatmul.f32.gmra.mxu0 %v5098_v13  ;;  %v4733_v20 = vpop.f32.mrf.mxu3  ;;  %v8458_v13 = vld [vmem:[%s12077_s7 + $0xc38] sm:$0xff] }
0x123e   : > { %5181 = vmatmul.f32.gmra.mxu1 %v5099_v57  ;;  %5301 = vmatpush.msra.mxu3 %v8465_v15  ;;  %v4734_v59 = vadd.f32 %v4733_v20, %v4675_v48  ;;  %v4802_v22 = vpop.f32.mrf.mxu2  ;;  %v8471_v57 = vld [vmem:[%s12077_s7 + $0xca0] sm:$0xff]  ;;  %v11184_v20 = vld [vmem:[%s12079_s16 + $0x18] sm:$0xff] }
0x123f   : > { %5327 = vmatpush.msra.mxu0 %v8478_v16  ;;  %5350 = vmatpush.msra.mxu1 %v8494_v17  ;;  %v4803_v60 = vadd.f32 %v4802_v22, %v4678_v58  ;;  %v4845_v25 = vpop.f32.mrf.mxu0  ;;  %v8487_v15 = vld [vmem:[%s12077_s7 + $0xd20] sm:$0xff] }
0x1240   : > { %5370 = vmatpush.msra.mxu2 %v8513_v19  ;;  %v5097_v27 = vmax.f32 %v4734_v59, 0.0  ;;  %5302 = vmatpush.msra.mxu3 %v8464_v21  ;;  %v4846_v28 = vadd.f32 %v4845_v25, %v4680_v18  ;;  %v4868_v32 = vpop.f32.mrf.mxu1  ;;  %v8457_v21 = vld [vmem:[%s12077_s7 + $0xc30] sm:$0xff]  ;;  %v8486_v59 = vld [vmem:[%s12077_s7 + $0xd18] sm:$0xff]  ;;  %v4685_v25 = vperm.slane %v11184_v20, 2 }
0x1241   : > { %v5100_v37 = vmax.f32 %v4803_v60, 0.0  ;;  %5328 = vmatpush.msra.mxu0 %v8477_v42  ;;  %5351 = vmatpush.msra.mxu1 %v8493_v24  ;;  %v4869_v2 = vadd.f32 %v4868_v32, %v4681_v31  ;;  %v8505_v42 = vld [vmem:[%s12077_s7 + $0xdb0] sm:$0xff]  ;;  %v8456_v60 = vld [vmem:[%s12077_s7 + $0xc28] sm:$0xff] }
0x1242   : > { %5371 = vmatpush.msra.mxu2 %v8512_v23  ;;  %5303 = vmatpush.msra.mxu3 %v8463_v26  ;;  %v5086_v41 = vmax.f32 %v4846_v28, 0.0  ;;  %v4684_v23 = vperm.slane %v11184_v20, 1  ;;  %v8469_v26 = vld [vmem:[%s12077_s7 + $0xc90] sm:$0xff] }
0x1243   : > { %5329 = vmatpush.msra.mxu0 %v8476_v56  ;;  %5352 = vmatpush.msra.mxu1 %v8492_v35  ;;  %v5087_v12 = vmax.f32 %v4869_v2, 0.0  ;;  %v8504_v56 = vld [vmem:[%s12077_s7 + $0xda8] sm:$0xff] }
0x1244   : > { %5372 = vmatpush.msra.mxu2 %v8511_v43  ;;  %5135 = vmatmul.f32.gmra.mxu3 %v5097_v27  ;;  %v8485_v27 = vld [vmem:[%s12077_s7 + $0xd10] sm:$0xff]  ;;  %v8484_v2 = vld [vmem:[%s12077_s7 + $0xd08] sm:$0xff] }
0x1245   : > { %5204 = vmatmul.f32.gmra.mxu2 %v5100_v37  ;;  %5304 = vmatpush.msra.mxu3 %v8462_v38  ;;  %v4822_v48 = vpop.f32.mrf.mxu3  ;;  %v8468_v37 = vld [vmem:[%s12077_s7 + $0xc88] sm:$0xff] }
0x1246   : > { %5330 = vmatpush.msra.mxu0 %v8475_v44  ;;  %5353 = vmatpush.msra.mxu1 %v8491_v8  ;;  %v4823_v58 = vadd.f32 %v4822_v48, %v4679_v40  ;;  %v4891_v10 = vpop.f32.mrf.mxu2  ;;  %v8454_v44 = vld [vmem:[%s12077_s7 + $0xc18] sm:$0xff]  ;;  %v8467_v8 = vld [vmem:[%s12077_s7 + $0xc80] sm:$0xff] }
0x1247   : > { %5373 = vmatpush.msra.mxu2 %v8510_v14  ;;  %5247 = vmatmul.f32.vlgmr.msrb.gmra.mxu0 %v5086_v41  ;;  %v4892_v61 = vadd.f32 %v4891_v10, %v4682_v45  ;;  %v4848_v33 = vpop.f32.mrf.mxu0  ;;  %v8503_v41 = vld [vmem:[%s12077_s7 + $0xda0] sm:$0xff]  ;;  %v8546_v14 = vld [vmem:[%s12077_s7 + $0xef8] sm:$0xff] }
0x1248   : > { %5270 = vmatmul.f32.vlgmr.msrb.gmra.mxu1 %v5087_v12  ;;  %5305 = vmatpush.msra.mxu3 %v8461_v30  ;;  %v4871_v1 = vpop.f32.mrf.mxu1  ;;  %v4849_v4 = vadd.f32 %v4848_v33, %v4680_v18  ;;  %v5085_v6 = vmax.f32 %v4823_v58, 0.0  ;;  %v8506_v18 = vld [vmem:[%s12077_s7 + $0xdb8] sm:$0xff]  ;;  %v4683_v30 = vperm.slane %v11184_v20, 0  ;;  %v8453_v58 = vld [vmem:[%s12077_s7 + $0xc10] sm:$0xff] }
0x1249   : > { %5331 = vmatpush.msra.mxu0 %v8474_v49  ;;  %5354 = vmatpush.msra.mxu1 %v8490_v54  ;;  %v4872_v7 = vadd.f32 %v4871_v1, %v4681_v31  ;;  %v5088_v9 = vmax.f32 %v4892_v61, 0.0  ;;  %v8470_v31 = vld [vmem:[%s12077_s7 + $0xc98] sm:$0xff]  ;;  %v8545_v33 = vld [vmem:[%s12077_s7 + $0xef0] sm:$0xff]  ;;  %v8452_v1 = vld [vmem:[%s12077_s7 + $0xc08] sm:$0xff] }
0x124a   : > { %5374 = vmatpush.msra.mxu2 %v8509_v36  ;;  %5306 = vmatpush.msra.mxu3 %v8460_v62  ;;  %v5102_v29 = vmax.f32 %v4849_v4, 0.0  ;;  %v8502_v12 = vld [vmem:[%s12077_s7 + $0xd98] sm:$0xff]  ;;  %v4686_v36 = vperm.slane %v11184_v20, 3  ;;  %v8501_v62 = vld [vmem:[%s12077_s7 + $0xd90] sm:$0xff] }
0x124b   : > { %5332 = vmatpush.msra.mxu0 %v8473_v63  ;;  %5355 = vmatpush.msra.mxu1 %v8489_v0  ;;  %v5103_v17 = vmax.f32 %v4872_v7, 0.0  ;;  %v8562_v54 = vld [vmem:[%s12077_s7 + $0xf78] sm:$0xff]  ;;  %v8561_v0 = vld [vmem:[%s12077_s7 + $0xf70] sm:$0xff]  ;;  %v8544_v7 = vld [vmem:[%s12077_s7 + $0xee8] sm:$0xff] }
0x124c   : > { %5375 = vmatpush.msra.mxu2 %v8508_v3  ;;  %5307 = vmatpush.msra.mxu3 %v8459_v5  ;;  %v8500_v5 = vld [vmem:[%s12077_s7 + $0xd88] sm:$0xff] }
0x124d   : > { %5333 = vmatpush.msra.mxu0 %v8472_v55  ;;  %5356 = vmatpush.msra.mxu1 %v8488_v34  ;;  %v4825_v16 = vpop.f32.mrf.mxu3  ;;  %v8560_v55 = vld [vmem:[%s12077_s7 + $0xf68] sm:$0xff]  ;;  %v8451_v34 = vld [vmem:[%s12077_s7 + $0xc00] sm:$0xff] }
0x124e   : > { %5376 = vmatpush.msra.mxu2 %v8507_v11  ;;  %5224 = vmatmul.f32.vlgmr.msrb.gmra.mxu3 %v5085_v6  ;;  %v4894_v19 = vpop.f32.mrf.mxu2  ;;  %v4826_v22 = vadd.f32 %v4825_v16, %v4679_v40  ;;  %v8499_v11 = vld [vmem:[%s12077_s7 + $0xd80] sm:$0xff] }
0x124f   : > { %5293 = vmatmul.f32.vlgmr.msrb.gmra.mxu2 %v5088_v9  ;;  %5308 = vmatpush.msra.mxu3 %v8458_v13  ;;  %v4895_v24 = vadd.f32 %v4894_v19, %v4682_v45  ;;  %v4937_v28 = vpop.f32.mrf.mxu0  ;;  %v8483_v45 = vld [vmem:[%s12077_s7 + $0xd00] sm:$0xff]  ;;  %v8530_v13 = vld [vmem:[%s12077_s7 + $0xe78] sm:$0xff]  ;;  %v8529_v19 = vld [vmem:[%s12077_s7 + $0xe70] sm:$0xff] }
0x1250   : > { %5334 = vmatpush.msra.mxu0 %v8471_v57  ;;  %5357 = vmatpush.msra.mxu1 %v8487_v15  ;;  %v4960_v32 = vpop.f32.mrf.mxu1  ;;  %v5101_v35 = vmax.f32 %v4826_v22, 0.0  ;;  %v4938_v38 = vadd.f32 %v4937_v28, %v4684_v23  ;;  %v8543_v15 = vld [vmem:[%s12077_s7 + $0xee0] sm:$0xff] }
0x1251   : > { %5377 = vmatpush.msra.mxu2 %v8506_v18  ;;  %5250 = vmatmul.f32.gmra.mxu0 %v5102_v29  ;;  %v5104_v43 = vmax.f32 %v4895_v24, 0.0  ;;  %v4961_v40 = vadd.f32 %v4960_v32, %v4685_v25  ;;  %v8559_v16 = vld [vmem:[%s12077_s7 + $0xf60] sm:$0xff]  ;;  %v8578_v18 = vld [vmem:[%s12077_s7 + $0xff8] sm:$0xff]  ;;  %v8577_v24 = vld [vmem:[%s12077_s7 + $0xff0] sm:$0xff] }
0x1252   : > { %5273 = vmatmul.f32.gmra.mxu1 %v5103_v17  ;;  %5309 = vmatpush.msra.mxu3 %v8457_v21  ;;  %v5090_v48 = vmax.f32 %v4938_v38, 0.0  ;;  %v8576_v32 = vld [vmem:[%s12077_s7 + $0xfe8] sm:$0xff]  ;;  %v8539_v38 = vld [vmem:[%s12077_s7 + $0xec0] sm:$0xff] }
0x1253   : > { %5335 = vmatpush.msra.mxu0 %v8470_v31  ;;  %5358 = vmatpush.msra.mxu1 %v8486_v59  ;;  %v5091_v49 = vmax.f32 %v4961_v40, 0.0  ;;  %v8542_v31 = vld [vmem:[%s12077_s7 + $0xed8] sm:$0xff]  ;;  %v8555_v40 = vld [vmem:[%s12077_s7 + $0xf40] sm:$0xff] }
0x1254   : > { %5378 = vmatpush.msra.mxu2 %v8505_v42  ;;  %5310 = vmatpush.msra.mxu3 %v8456_v60  ;;  %v8558_v59 = vld [vmem:[%s12077_s7 + $0xf58] sm:$0xff] }
0x1255   : > { %5336 = vmatpush.msra.mxu0 %v8469_v26  ;;  %5359 = vmatpush.msra.mxu1 %v8485_v27  ;;  %v4914_v10 = vpop.f32.mrf.mxu3  ;;  %v8541_v26 = vld [vmem:[%s12077_s7 + $0xed0] sm:$0xff] }
0x1256   : > { %5379 = vmatpush.msra.mxu2 %v8504_v56  ;;  %5311 = vmatpush.msra.mxu3 %v8455_v39  ;;  %v4983_v61 = vpop.f32.mrf.mxu2  ;;  %v4915_v63 = vadd.f32 %v4914_v10, %v4683_v30  ;;  %v8557_v27 = vld [vmem:[%s12077_s7 + $0xf50] sm:$0xff]  ;;  %v8527_v56 = vld [vmem:[%s12077_s7 + $0xe60] sm:$0xff]  ;;  %v8540_v39 = vld [vmem:[%s12077_s7 + $0xec8] sm:$0xff] }
0x1257   : > { %5337 = vmatpush.msra.mxu0 %v8468_v37  ;;  %5360 = vmatpush.msra.mxu1 %v8484_v2  ;;  %v4940_v3 = vpop.f32.mrf.mxu0  ;;  %v4984_v4 = vadd.f32 %v4983_v61, %v4686_v36  ;;  %v8575_v37 = vld [vmem:[%s12077_s7 + $0xfe0] sm:$0xff]  ;;  %v8526_v2 = vld [vmem:[%s12077_s7 + $0xe58] sm:$0xff]  ;;  %v8536_v10 = vld [vmem:[%s12077_s7 + $0xea8] sm:$0xff] }
0x1258   : > { %5380 = vmatpush.msra.mxu2 %v8503_v41  ;;  %5227 = vmatmul.f32.gmra.mxu3 %v5101_v35  ;;  %v4963_v6 = vpop.f32.mrf.mxu1  ;;  %v4941_v9 = vadd.f32 %v4940_v3, %v4684_v23  ;;  %v5089_v29 = vmax.f32 %v4915_v63, 0.0  ;;  %v8528_v23 = vld [vmem:[%s12077_s7 + $0xe68] sm:$0xff]  ;;  %v8571_v61 = vld [vmem:[%s12077_s7 + $0xfc0] sm:$0xff]  ;;  %v8521_v3 = vld [vmem:[%s12077_s7 + $0xe30] sm:$0xff] }
0x1259   : > { %5296 = vmatmul.f32.gmra.mxu2 %v5104_v43  ;;  %5312 = vmatpush.msra.mxu3 %v8454_v44  ;;  %v4964_v57 = vadd.f32 %v4963_v6, %v4685_v25  ;;  %v5092_v17 = vmax.f32 %v4984_v4, 0.0  ;;  %v8556_v35 = vld [vmem:[%s12077_s7 + $0xf48] sm:$0xff]  ;;  %v8574_v44 = vld [vmem:[%s12077_s7 + $0xfd8] sm:$0xff]  ;;  %v8551_v63 = vld [vmem:[%s12077_s7 + $0xf20] sm:$0xff]  ;;  %v4688_v4 = vperm.slane %v11184_v20, 5 }
0x125a   : > { %5338 = vmatpush.msra.mxu0 %v8467_v8  ;;  %5361 = vmatpush.msra.mxu1 %v8483_v45  ;;  %v5106_v21 = vmax.f32 %v4941_v9, 0.0  ;;  %v8525_v8 = vld [vmem:[%s12077_s7 + $0xe50] sm:$0xff]  ;;  %v8538_v45 = vld [vmem:[%s12077_s7 + $0xeb8] sm:$0xff]  ;;  %v8520_v9 = vld [vmem:[%s12077_s7 + $0xe28] sm:$0xff] }
0x125b   : > { %5381 = vmatpush.msra.mxu2 %v8502_v12  ;;  %5313 = vmatpush.msra.mxu3 %v8453_v58  ;;  %v5107_v42 = vmax.f32 %v4964_v57, 0.0  ;;  %v8554_v12 = vld [vmem:[%s12077_s7 + $0xf38] sm:$0xff]  ;;  %v8523_v58 = vld [vmem:[%s12077_s7 + $0xe40] sm:$0xff] }
0x125c   : > { %5415 = vmatpush.msrb.mxu0 %v8546_v14  ;;  %5438 = vmatpush.msrb.mxu1 %v8562_v54  ;;  %v8573_v14 = vld [vmem:[%s12077_s7 + $0xfd0] sm:$0xff]  ;;  %v8572_v54 = vld [vmem:[%s12077_s7 + $0xfc8] sm:$0xff]  ;;  %v8534_v6 = vld [vmem:[%s12077_s7 + $0xe98] sm:$0xff] }
0x125d   : > { %5339 = vmatmul.f32.vlgmr.msra.gmra.mxu0 %v5090_v48  ;;  %5362 = vmatmul.f32.vlgmr.msra.gmra.mxu1 %v5091_v49  ;;  %v4917_v22 = vpop.f32.mrf.mxu3  ;;  %v8537_v48 = vld [vmem:[%s12077_s7 + $0xeb0] sm:$0xff]  ;;  %v8519_v57 = vld [vmem:[%s12077_s7 + $0xe20] sm:$0xff] }
0x125e   : > { %5382 = vmatpush.msra.mxu2 %v8501_v62  ;;  %5416 = vmatpush.msrb.mxu0 %v8545_v33  ;;  %v4986_v60 = vpop.f32.mrf.mxu2  ;;  %v4918_v25 = vadd.f32 %v4917_v22, %v4683_v30  ;;  %v8524_v30 = vld [vmem:[%s12077_s7 + $0xe48] sm:$0xff]  ;;  %v8553_v49 = vld [vmem:[%s12077_s7 + $0xf30] sm:$0xff]  ;;  %v8522_v62 = vld [vmem:[%s12077_s7 + $0xe38] sm:$0xff] }
0x125f   : > { %5439 = vmatpush.msrb.mxu1 %v8561_v0  ;;  %5314 = vmatpush.msra.mxu3 %v8452_v1  ;;  %v4987_v28 = vadd.f32 %v4986_v60, %v4686_v36  ;;  %v8552_v36 = vld [vmem:[%s12077_s7 + $0xf28] sm:$0xff]  ;;  %v8535_v33 = vld [vmem:[%s12077_s7 + $0xea0] sm:$0xff]  ;;  %v5029_v0 = vpop.f32.mrf.mxu0  ;;  %v8570_v1 = vld [vmem:[%s12077_s7 + $0xfb8] sm:$0xff]  ;;  %v4690_v60 = vperm.slane %v11184_v20, 7 }
0x1260   : > { %5383 = vmatpush.msra.mxu2 %v8500_v5  ;;  %5417 = vmatpush.msrb.mxu0 %v8544_v7  ;;  %v5105_v43 = vmax.f32 %v4918_v25, 0.0  ;;  %v5052_v5 = vpop.f32.mrf.mxu1  ;;  %v8550_v7 = vld [vmem:[%s12077_s7 + $0xf18] sm:$0xff] }
0x1261   : > { %5440 = vmatpush.msrb.mxu1 %v8560_v55  ;;  %5315 = vmatpush.msra.mxu3 %v8451_v34  ;;  %v5108_v41 = vmax.f32 %v4987_v28, 0.0  ;;  %v4689_v55 = vperm.slane %v11184_v20, 6  ;;  %v8569_v34 = vld [vmem:[%s12077_s7 + $0xfb0] sm:$0xff] }
0x1262   : > { %5384 = vmatpush.msra.mxu2 %v8499_v11  ;;  %5418 = vmatpush.msrb.mxu0 %v8543_v15  ;;  %v8533_v11 = vld [vmem:[%s12077_s7 + $0xe90] sm:$0xff]  ;;  %v5030_v15 = vadd.f32 %v5029_v0, %v4688_v4 }
0x1263   : > { %5392 = vmatpush.msrb.mxu3 %v8530_v13  ;;  %5441 = vmatpush.msrb.mxu1 %v8559_v16  ;;  %v8549_v13 = vld [vmem:[%s12077_s7 + $0xf10] sm:$0xff]  ;;  %v8532_v16 = vld [vmem:[%s12077_s7 + $0xe88] sm:$0xff] }
0x1264   : > { %5461 = vmatpush.msrb.mxu2 %v8578_v18  ;;  %5316 = vmatmul.f32.vlgmr.msra.gmra.mxu3 %v5089_v29  ;;  %v8568_v29 = vld [vmem:[%s12077_s7 + $0xfa8] sm:$0xff]  ;;  %v5053_v18 = vadd.f32 %v5052_v5, %v4689_v55  ;;  %v5094_v25 = vmax.f32 %v5030_v15, 0.0 }
0x1265   : > { %5385 = vmatmul.f32.vlgmr.msra.gmra.mxu2 %v5092_v17  ;;  %5393 = vmatpush.msrb.mxu3 %v8529_v19  ;;  %v8548_v17 = vld [vmem:[%s12077_s7 + $0xf08] sm:$0xff]  ;;  %v5006_v19 = vpop.f32.mrf.mxu3 }
0x1266   : > { %5419 = vmatpush.msrb.mxu0 %v8542_v31  ;;  %5442 = vmatpush.msrb.mxu1 %v8558_v59  ;;  %v8518_v31 = vld [vmem:[%s12077_s7 + $0xe18] sm:$0xff]  ;;  %v4687_v59 = vperm.slane %v11184_v20, 4  ;;  %v5075_v22 = vpop.f32.mrf.mxu2  ;;  %v8516_v20 = vld [vmem:[%s12077_s7 + $0xe08] sm:$0xff] }
0x1267   : > { %5462 = vmatpush.msrb.mxu2 %v8577_v24  ;;  %5342 = vmatmul.f32.gmra.mxu0 %v5106_v21  ;;  %v8567_v21 = vld [vmem:[%s12077_s7 + $0xfa0] sm:$0xff]  ;;  %v5032_v28 = vpop.f32.mrf.mxu0 }
0x1268   : > { %5365 = vmatmul.f32.gmra.mxu1 %v5107_v42  ;;  %5394 = vmatpush.msrb.mxu3 %v8528_v23  ;;  %v8531_v42 = vld [vmem:[%s12077_s7 + $0xe80] sm:$0xff]  ;;  %v8566_v23 = vld [vmem:[%s12077_s7 + $0xf98] sm:$0xff] }
0x1269   : > { %5420 = vmatpush.msrb.mxu0 %v8541_v26  ;;  %5443 = vmatpush.msrb.mxu1 %v8557_v27  ;;  %v8547_v24 = vld [vmem:[%s12077_s7 + $0xf00] sm:$0xff]  ;;  %v8517_v26 = vld [vmem:[%s12077_s7 + $0xe10] sm:$0xff]  ;;  %v5095_v27 = vmax.f32 %v5053_v18, 0.0 }
0x126a   : > { %5463 = vmatpush.msrb.mxu2 %v8576_v32  ;;  %5395 = vmatpush.msrb.mxu3 %v8527_v56  ;;  %v8565_v32 = vld [vmem:[%s12077_s7 + $0xf90] sm:$0xff]  ;;  %v5007_v56 = vadd.f32 %v5006_v19, %v4687_v59 }
0x126b   : > { %5421 = vmatpush.msrb.mxu0 %v8540_v39  ;;  %5444 = vmatpush.msrb.mxu1 %v8556_v35  ;;  %v5055_v39 = vpop.f32.mrf.mxu1  ;;  %v5076_v35 = vadd.f32 %v5075_v22, %v4690_v60 }
0x126c   : > { %5464 = vmatpush.msrb.mxu2 %v8575_v37  ;;  %5396 = vmatpush.msrb.mxu3 %v8526_v2  ;;  %v8564_v37 = vld [vmem:[%s12077_s7 + $0xf88] sm:$0xff]  ;;  %v5033_v2 = vadd.f32 %v5032_v28, %v4688_v4 }
0x126d   : > { %5422 = vmatpush.msrb.mxu0 %v8539_v38  ;;  %5445 = vmatpush.msrb.mxu1 %v8555_v40  ;;  %v5056_v38 = vadd.f32 %v5055_v39, %v4689_v55  ;;  %v8563_v40 = vld [vmem:[%s12077_s7 + $0xf80] sm:$0xff] }
0x126e   : > { %5465 = vmatpush.msrb.mxu2 %v8574_v44  ;;  %5319 = vmatmul.f32.gmra.mxu3 %v5105_v43  ;;  %v8515_v43 = vld [vmem:[%s12077_s7 + $0xe00] sm:$0xff]  ;;  %v5603_v44 = vld [vmem:[%s12097_s1 + $0x18] sm:$0xff] }
0x126f   : > { %5388 = vmatmul.f32.gmra.mxu2 %v5108_v41  ;;  %5397 = vmatpush.msrb.mxu3 %v8525_v8  ;;  %v5093_v41 = vmax.f32 %v5007_v56, 0.0  ;;  %v5096_v8 = vmax.f32 %v5076_v35, 0.0 }
0x1270   : > { %5423 = vmatpush.msrb.mxu0 %v8538_v45  ;;  %5446 = vmatpush.msrb.mxu1 %v8554_v12  ;;  %v5009_v45 = vpop.f32.mrf.mxu3  ;;  %v5110_v12 = vmax.f32 %v5033_v2, 0.0 }
0x1271   : > { %5466 = vmatpush.msrb.mxu2 %v8573_v14  ;;  %5398 = vmatpush.msrb.mxu3 %v8524_v30  ;;  %v5078_v14 = vpop.f32.mrf.mxu2  ;;  %v5602_v30 = vld [vmem:[%s12097_s1 + $0x10] sm:$0xff] }
0x1272   : > { %5424 = vmatpush.msrb.mxu0 %v8537_v48  ;;  %5447 = vmatpush.msrb.mxu1 %v8553_v49  ;;  %v5111_v48 = vmax.f32 %v5056_v38, 0.0  ;;  %v5010_v49 = vadd.f32 %v5009_v45, %v4687_v59 }
0x1273   : > { %5467 = vmatpush.msrb.mxu2 %v8572_v54  ;;  %5399 = vmatpush.msrb.mxu3 %v8523_v58  ;;  %v5601_v54 = vld [vmem:[%s12097_s1 + $0x8] sm:$0xff]  ;;  %v5079_v58 = vadd.f32 %v5078_v14, %v4690_v60 }
0x1274   : > { %5425 = vmatpush.msrb.mxu0 %v8536_v10  ;;  %5448 = vmatpush.msrb.mxu1 %v8552_v36  ;;  %v5600_v10 = vld [vmem:[%s12097_s1] sm:$0xff]  ;;  %v1671_v36 = vadd.f32 %v10149_v52, %v10145_v50 }
0x1275   : > { %5468 = vmatpush.msrb.mxu2 %v8571_v61  ;;  %5400 = vmatpush.msrb.mxu3 %v8522_v62  ;;  %v5109_v61 = vmax.f32 %v5010_v49, 0.0  ;;  %v5112_v62 = vmax.f32 %v5079_v58, 0.0 }
0x1276   : > { %5426 = vmatpush.msrb.mxu0 %v8535_v33  ;;  %5449 = vmatpush.msrb.mxu1 %v8551_v63  ;;  %v1698_v33 = vadd.f32 %v10147_v51, %v1671_v36  ;;  %v1699_v63 = vld [vmem:[%s12098_s8] sm:$0xff]  ;;  %s12099_s8 = sld [smem:[#allocation52_spill]] }
0x1277   : > { %5469 = vmatpush.msrb.mxu2 %v8570_v1  ;;  %5401 = vmatpush.msrb.mxu3 %v8521_v3  ;;  %v8966_v1 = vld [vmem:[%s12081_s11 + $0x1] ss:$0 sm:$0xff] }
0x1278   : > { %5427 = vmatpush.msrb.mxu0 %v8534_v6  ;;  %5450 = vmatpush.msrb.mxu1 %v8550_v7  ;;  %v11308_v0 = vadd.f32 %v1699_v63, %v1698_v33 }
0x1279   : > { %5470 = vmatpush.msrb.mxu2 %v8569_v34  ;;  %5402 = vmatpush.msrb.mxu3 %v8520_v9 }
0x127a   : > { %5428 = vmatpush.msrb.mxu0 %v8533_v11  ;;  %5451 = vmatpush.msrb.mxu1 %v8549_v13 }
0x127b   : > { %5471 = vmatpush.msrb.mxu2 %v8568_v29  ;;  %5403 = vmatpush.msrb.mxu3 %v8519_v57 }
0x127c   : > { %5429 = vmatpush.msrb.mxu0 %v8532_v16  ;;  %5452 = vmatpush.msrb.mxu1 %v8548_v17  ;;  %v8967_v63 = vld [vmem:[%s12099_s8] ss:$0 sm:$0xff]  ;;  %s12100_s8 = sld [smem:[#allocation53_spill]] }
0x127d   : > { %5472 = vmatpush.msrb.mxu2 %v8567_v21  ;;  %5404 = vmatpush.msrb.mxu3 %v8518_v31 }
0x127e   : > { %5430 = vmatpush.msrb.mxu0 %v8531_v42  ;;  %5453 = vmatpush.msrb.mxu1 %v8547_v24 }
0x127f   : > { %5473 = vmatpush.msrb.mxu2 %v8566_v23  ;;  %5431 = vmatmul.f32.vlgmr.msrb.gmra.mxu0 %v5094_v25 }
0x1280   : > { %5454 = vmatmul.f32.vlgmr.msrb.gmra.mxu1 %v5095_v27  ;;  %5405 = vmatpush.msrb.mxu3 %v8517_v26 }
0x1281   : > { %5474 = vmatpush.msrb.mxu2 %v8565_v32 }
0x1282   : > { %5406 = vmatpush.msrb.mxu3 %v8516_v20 }
0x1283   : > { %5475 = vmatpush.msrb.mxu2 %v8564_v37 }
0x1284   : > { %5407 = vmatpush.msrb.mxu3 %v8515_v43 }
0x1285   : > { %5476 = vmatpush.msrb.mxu2 %v8563_v40  ;;  %5408 = vmatmul.f32.vlgmr.msrb.gmra.mxu3 %v5093_v41 }
0x1286   : > { %5477 = vmatmul.f32.vlgmr.msrb.gmra.mxu2 %v5096_v8  ;;  %5628 = vmatpush.msra.mxu3 %v5603_v44 }
0x1287   : > { %5434 = vmatmul.f32.gmra.mxu0 %v5110_v12 }
0x1288   : > { %5457 = vmatmul.f32.gmra.mxu1 %v5111_v48  ;;  %5629 = vmatpush.msra.mxu3 %v5602_v30 }
0x128a   : > { %5630 = vmatpush.msra.mxu3 %v5601_v54 }
0x128c   : > { %5631 = vmatpush.msra.mxu3 %v5600_v10 }
0x128d   : > { %5411 = vmatmul.f32.gmra.mxu3 %v5109_v61 }
0x128e   : > { %5480 = vmatmul.f32.gmra.mxu2 %v5112_v62 }
0x1295   : > { %8614 = vmatmul.msk.f32.vlgmr.msra.gmra.mxu3 %vm1714_vm3, %v11308_v0 }
0x12b1   : > { %v5156_v5 = vpop.f32.mrf.mxu0 }
0x12b2   : > { %v5179_v7 = vpop.f32.mrf.mxu1 }
0x12ba   : > { %v5159_v11 = vpop.f32.mrf.mxu0 }
0x12bb   : > { %v5182_v51 = vpop.f32.mrf.mxu1 }
0x12bd   : > { %v5133_v3 = vpop.f32.mrf.mxu3 }
0x12be   : > { %v5134_v4 = vadd.f32 %v8966_v1, %v5133_v3  ;;  %v5202_v52 = vpop.f32.mrf.mxu2 }
0x12c0   : > { %v5157_v6 = vadd.f32 %v5156_v5, %v5134_v4 }
0x12c2   : > { %v5180_v50 = vadd.f32 %v5179_v7, %v5157_v6 }
0x12c4   : > { %v5203_v55 = vadd.f32 %v5202_v52, %v5180_v50  ;;  %v5248_v16 = vpop.f32.mrf.mxu0 }
0x12c5   : > { %v5271_v18 = vpop.f32.mrf.mxu1 }
0x12c7   : > { %v5136_v34 = vpop.f32.mrf.mxu3 }
0x12c8   : > { %v5137_v9 = vadd.f32 %v8966_v1, %v5136_v34  ;;  %v5205_v29 = vpop.f32.mrf.mxu2 }
0x12ca   : > { %v5160_v13 = vadd.f32 %v5159_v11, %v5137_v9 }
0x12cc   : > { %v5183_v19 = vadd.f32 %v5182_v51, %v5160_v13 }
0x12ce   : > { %v5206_v22 = vadd.f32 %v5205_v29, %v5183_v19  ;;  %v5251_v60 = vpop.f32.mrf.mxu0 }
0x12cf   : > { %v5274_v25 = vpop.f32.mrf.mxu1 }
0x12d1   : > { %v5225_v57 = vpop.f32.mrf.mxu3 }
0x12d2   : > { %v5226_v15 = vadd.f32 %v5225_v57, %v5203_v55  ;;  %v5294_v31 = vpop.f32.mrf.mxu2  ;;  %v5605_v57 = vld [vmem:[%s12100_s8] sm:$0xff] }
0x12d4   : > { %v5249_v17 = vadd.f32 %v5248_v16, %v5226_v15 }
0x12d6   : > { %v5272_v21 = vadd.f32 %v5271_v18, %v5249_v17 }
0x12d8   : > { %v5295_v59 = vadd.f32 %v5294_v31, %v5272_v21 }
0x12da   : > { %v5340_v32 = vpop.f32.mrf.mxu0  ;;  %v5363_v39 = vpop.f32.mrf.mxu1 }
0x12db   : > { %v5228_v42 = vpop.f32.mrf.mxu3 }
0x12dc   : > { %v5229_v24 = vadd.f32 %v5228_v42, %v5206_v22  ;;  %v5297_v26 = vpop.f32.mrf.mxu2 }
0x12de   : > { %v5252_v23 = vadd.f32 %v5251_v60, %v5229_v24 }
0x12e0   : > { %v5275_v20 = vadd.f32 %v5274_v25, %v5252_v23 }
0x12e2   : > { %v5298_v43 = vadd.f32 %v5297_v26, %v5275_v20 }
0x12e4   : > { %v5343_v41 = vpop.f32.mrf.mxu0 }
0x12e5   : > { %v5366_v8 = vpop.f32.mrf.mxu1 }
0x12e7   : > { %v5317_v27 = vpop.f32.mrf.mxu3 }
0x12e8   : > { %v5318_v28 = vadd.f32 %v5317_v27, %v5295_v59  ;;  %v5386_v37 = vpop.f32.mrf.mxu2 }
0x12ea   : > { %v5341_v56 = vadd.f32 %v5340_v32, %v5318_v28 }
0x12ec   : > { %v5364_v35 = vadd.f32 %v5363_v39, %v5341_v56 }
0x12ee   : > { %v5387_v2 = vadd.f32 %v5386_v37, %v5364_v35 }
0x12f1   : > { %v5320_v38 = vpop.f32.mrf.mxu3 }
0x12f2   : > { %v5321_v40 = vadd.f32 %v5320_v38, %v5298_v43  ;;  %v5389_v45 = vpop.f32.mrf.mxu2 }
0x12f4   : > { %v5344_v44 = vadd.f32 %v5343_v41, %v5321_v40 }
0x12f6   : > { %v5367_v48 = vadd.f32 %v5366_v8, %v5344_v44 }
0x12f8   : > { %v5390_v36 = vadd.f32 %v5389_v45, %v5367_v48 }
0x12fc   : > { %v5432_v30 = vpop.f32.mrf.mxu0 }
0x12fd   : > { %v5455_v54 = vpop.f32.mrf.mxu1 }
0x1304   : > { %v11335_v7 = vpop.f32.mrf.mxu0 }
0x1308   : > { %v5409_v12 = vpop.f32.mrf.mxu3 }
0x1309   : > { %v5410_v14 = vadd.f32 %v5409_v12, %v5387_v2  ;;  %v5478_v10 = vpop.f32.mrf.mxu2 }
0x130b   : > { %v5433_v49 = vadd.f32 %v5432_v30, %v5410_v14 }
0x130d   : > { %v5456_v58 = vadd.f32 %v5455_v54, %v5433_v49 }
0x130f   : > { %v11313_v61 = vadd.f32 %v5478_v10, %v5456_v58  ;;  %v5458_v10 = vpop.f32.mrf.mxu1 }
0x1310   : > { %v5412_v62 = vpop.f32.mrf.mxu3 }
0x1311   : > { %v11315_v33 = vadd.f32 %v5412_v62, %v5390_v36  ;;  %v5481_v62 = vpop.f32.mrf.mxu2 }
0x1313   : > { %v5436_v58 = vadd.f32 %v11335_v7, %v11315_v33 }
0x1315   : > { %v5459_v36 = vadd.f32 %v5458_v10, %v5436_v58 }
0x1318   : > { %v5633_v1 = vpop.f32.mrf.mxu3 }
0x1319   : > { %v11318_v3 = vadd.f32 %v8967_v63, %v5633_v1  ;;  %v5482_v63 = vadd.f32 %v5481_v62, %v5459_v36 }
0x131b   : > { %5637 = vrot.lane.b32.xlu0 %v11318_v3, %s12086_s28  ;;  %v5485_v1 = vadd.f32 %v5482_v63, %v10912_v53 }
0x1323   : > { %5716 = vrot.lane.b32.xlu0 %v11318_v3, %s12088_s3 }
0x132b   : > { %5841 = vrot.lane.b32.xlu0 %v11318_v3, %s12090_s6 }
0x1333   : > { %5944 = vrot.lane.b32.xlu0 %v11318_v3, %s12093_s13 }
0x133b   : > { %5942 = vrot.lane.b32.xlu0 %v11318_v3, %s12092_s12 }
0x138d   : > { %v5638_v4 = vpop.permute.xlu0 %5637 }
0x138e   : > { %8615 = vmatpush.xpose.msk.msra.mxu0 %vm1498_vm0, %v5638_v4  ;;  %v5493_v4 = vsel %vm1714_vm3, %v5485_v1, 0.0 }
0x1391   : > { %8616 = vmatmul.msk.f32.vlgmr.msra.gmra.mxu0 %vm1498_vm0, %v11318_v3 }
0x1395   : > { %v5717_v5 = vpop.permute.xlu0 %5716 }
0x1396   : > { %8618 = vmatpush.xpose.msk.msrb.mxu0 %vm1498_vm0, %v5717_v5 }
0x139d   : > { %v5842_v6 = vpop.permute.xlu0 %5841 }
0x139e   : > { %8623 = vmatpush.xpose.msk.msra.mxu0 %vm1498_vm0, %v5842_v6 }
0x13a5   : > { %v5945_v23 = vpop.permute.xlu0 %5944 }
0x13ad   : > { %v5943_v20 = vpop.permute.xlu0 %5942 }
0x140e   : > { %v5660_v50 = vpop.f32.mrf.mxu0 }
0x140f   : > { %v5663_v52 = vmul.f32 0.35355338, %v5660_v50 }
0x1411   : > { %v5664_v55 = vsel %vm1498_vm0, %v5663_v52, -inf }
0x1412   : > { %5665 = vmax.xlane.f32.xlu2 %v5664_v55 }
0x142a   : > { %5688 = vrot.lane.b32.xlu2 %v11318_v3, %s12087_s22  ;;  %s12104_s22 = sld [smem:[#allocation50_spill]] }
0x1432   : > { %5839 = vrot.lane.b32.xlu2 %v11318_v3, %s12091_s9 }
0x1485   : > { %v5666_v34 = vpop.xlane.xlu2 %5665 }
0x1486   : > { %v5667_v9 = vsub.f32 %v5663_v52, %v5666_v34 }
0x1488   : > { %v5668_v11 = vmul.f32 1.442695, %v5667_v9 }
0x148a   : > { %9062 = vpow2.f32 %v5668_v11 }
0x148d   : > { %v5689_v13 = vpop.permute.xlu2 %5688 }
0x148e   : > { %5709 = vmatpush.msrb.mxu3 %v5689_v13 }
0x1490   : > { %v9063_v51 = vpop.eup %9062  ;;  %5834 = vmatpush.msra.mxu3 %v5605_v57 }
0x1491   : > { %v5670_v29 = vsel %vm1498_vm0, %v9063_v51, 0.0 }
0x1492   : > { %5671 = vadd.xlane.f32.xlu1 %v5670_v29 }
0x1495   : > { %v5840_v26 = vpop.permute.xlu2 %5839 }
0x14ab   : > { %5714 = vrot.lane.b32.xlu1 %v11318_v3, %s12089_s5 }
0x1505   : > { %v5672_v15 = vpop.xlane.xlu1 %5671 }
0x1506   : > { %9064 = vrcp.f32 %v5672_v15  ;;  %v5684_v19 = vand.u32 2147483648, %v5672_v15  ;;  %v5682_v31 = vand.u32 2147483647, %v5672_v15  ;;  %vm5678_vm12 = vweird.f32 %v5672_v15 }
0x1508   : > { %v5685_v22 = vor.u32 1.1754944e-38, %v5684_v19  ;;  %vm5683_vm14 = vcmp.eq.f32.partialorder %v5682_v31, 8.507059e+37 }
0x150c   : > { %v9065_v16 = vpop.eup %9064 }
0x150d   : > { %v5674_v17 = vmul.f32 %v9065_v16, %v5672_v15  ;;  %vm5679_vm11 = vweird.f32 %v9065_v16 }
0x150e   : > { %vm5680_vm13 = vmor %vm5678_vm12, %vm5679_vm11 }
0x150f   : > { %v5675_v18 = vsub.f32 1.0, %v5674_v17 }
0x1511   : > { %v5676_v21 = vmul.f32 %v9065_v16, %v5675_v18 }
0x1513   : > { %v5677_v59 = vadd.f32 %v9065_v16, %v5676_v21 }
0x1515   : > { %v5681_v42 = vsel %vm5680_vm13, %v9065_v16, %v5677_v59 }
0x1516   : > { %v5686_v24 = vsel %vm5683_vm14, %v5685_v22, %v5681_v42 }
0x1517   : > { %v5687_v60 = vmul.f32 %v9063_v51, %v5686_v24 }
0x1519   : > { %8617 = vmatmul.msk.f32.vlgmr.msrb.gmra.mxu3 %vm1498_vm0, %v5687_v60 }
0x151a   : > { %8627 = vmatpush.xpose.msk.msrb.mxu3 %vm1498_vm0, %v5945_v23 }
0x151d   : > { %v5715_v25 = vpop.permute.xlu1 %5714 }
0x151e   : > { %8619 = vmatmul.msk.f32.vlgmr.msrb.gmra.mxu0 %vm1498_vm0, %v5715_v25 }
0x1526   : > { %8624 = vmatmul.msk.f32.vlgmr.msra.gmra.mxu0 %vm1498_vm0, %v5840_v26 }
0x159b   : > { %v5739_v27 = vpop.f32.mrf.mxu0 }
0x159c   : > { %v5742_v28 = vmul.f32 0.35355338, %v5739_v27  ;;  %v5711_v32 = vpop.f32.mrf.mxu3 }
0x159d   : > { %8622 = vmatmul.msk.f32.vlgmr.msra.gmra.mxu3 %vm1498_vm0, %v5711_v32 }
0x159e   : > { %v5743_v56 = vsel %vm1498_vm0, %v5742_v28, -inf }
0x159f   : > { %5744 = vmax.xlane.f32.xlu1 %v5743_v56 }
0x15a3   : > { %v5864_v39 = vpop.f32.mrf.mxu0 }
0x15a4   : > { %v5867_v35 = vmul.f32 0.35355338, %v5864_v39 }
0x15a5   : > { %8628 = vmatmul.msk.f32.vlgmr.msrb.gmra.mxu3 %vm1498_vm0, %v5943_v20 }
0x15a6   : > { %v5868_v37 = vsel %vm1498_vm0, %v5867_v35, -inf }
0x15a7   : > { %5869 = vmax.xlane.f32.xlu2 %v5868_v37 }
0x1612   : > { %v5745_v2 = vpop.xlane.xlu1 %5744 }
0x1613   : > { %v5746_v43 = vsub.f32 %v5742_v28, %v5745_v2  ;;  %v5606_v2 = vld [vmem:[%s12100_s8 + $0x8] sm:$0xff] }
0x1614   : > { %5811 = vmatpush.msra.mxu2 %v5606_v2 }
0x1615   : > { %v5747_v38 = vmul.f32 1.442695, %v5746_v43  ;;  %v5607_v43 = vld [vmem:[%s12100_s8 + $0x10] sm:$0xff] }
0x1616   : > { %5936 = vmatpush.msrb.mxu2 %v5607_v43 }
0x1617   : > { %9066 = vpow2.f32 %v5747_v38 }
0x161a   : > { %v5870_v40 = vpop.xlane.xlu2 %5869 }
0x161b   : > { %v5871_v41 = vsub.f32 %v5867_v35, %v5870_v40  ;;  %v5484_v35 = vadd.f32 %v11313_v61, %v10889_v46 }
0x161d   : > { %v9067_v44 = vpop.eup %9066  ;;  %v5872_v8 = vmul.f32 1.442695, %v5871_v41  ;;  %v5490_v37 = vsel %vm1714_vm3, %v5484_v35, 0.0 }
0x161e   : > { %v5749_v45 = vsel %vm1498_vm0, %v9067_v44, 0.0 }
0x161f   : > { %9068 = vpow2.f32 %v5872_v8  ;;  %5750 = vadd.xlane.f32.xlu2 %v5749_v45 }
0x1620   : > { %v11355_v12 = vpop.f32.mrf.mxu3 }
0x1625   : > { %v9069_v14 = vpop.eup %9068 }
0x1626   : > { %v5874_v30 = vsel %vm1498_vm0, %v9069_v14, 0.0 }
0x1627   : > { %5875 = vadd.xlane.f32.xlu1 %v5874_v30 }
0x1628   : > { %v5967_v48 = vpop.f32.mrf.mxu3 }
0x1629   : > { %v5970_v49 = vmul.f32 0.35355338, %v5967_v48 }
0x162b   : > { %v5971_v54 = vsel %vm1498_vm0, %v5970_v49, -inf }
0x162c   : > { %5972 = vmax.xlane.f32.xlu0 %v5971_v54 }
0x1637   : > { %5767 = vrot.lane.b32.xlu2 %v11318_v3, %s12094_s17  ;;  %s12101_s17 = sld [smem:[#allocation54_spill]] }
0x1640   : > { %5892 = vrot.lane.b32.xlu1 %v11318_v3, %s12095_s19  ;;  %s12102_s19 = sld [smem:[#allocation55_spill]] }
0x1660   : > { %5494 = vadd.xlane.f32.xlu2 %v5493_v4 }
0x1692   : > { %v5751_v5 = vpop.xlane.xlu2 %5750 }
0x1693   : > { %9070 = vrcp.f32 %v5751_v5  ;;  %v5763_v9 = vand.u32 2147483648, %v5751_v5  ;;  %v5761_v7 = vand.u32 2147483647, %v5751_v5  ;;  %vm5757_vm5 = vweird.f32 %v5751_v5 }
0x1695   : > { %v5764_v29 = vor.u32 1.1754944e-38, %v5763_v9  ;;  %vm5762_vm7 = vcmp.eq.f32.partialorder %v5761_v7, 8.507059e+37 }
0x1699   : > { %v9071_v6 = vpop.eup %9070 }
0x169a   : > { %v5753_v50 = vmul.f32 %v9071_v6, %v5751_v5  ;;  %v5876_v52 = vpop.xlane.xlu1 %5875  ;;  %v5768_v55 = vpop.permute.xlu2 %5767  ;;  %vm5758_vm15 = vweird.f32 %v9071_v6 }
0x169b   : > { %9072 = vrcp.f32 %v5876_v52  ;;  %5788 = vmatpush.msra.mxu1 %v5768_v55  ;;  %vm5759_vm6 = vmor %vm5757_vm5, %vm5758_vm15  ;;  %v5888_v59 = vand.u32 2147483648, %v5876_v52  ;;  %vm5882_vm9 = vweird.f32 %v5876_v52  ;;  %v5886_v42 = vand.u32 2147483647, %v5876_v52 }
0x169c   : > { %v5754_v34 = vsub.f32 1.0, %v5753_v50 }
0x169d   : > { %v5889_v23 = vor.u32 1.1754944e-38, %v5888_v59  ;;  %vm5887_vm11 = vcmp.eq.f32.partialorder %v5886_v42, 8.507059e+37 }
0x169e   : > { %v5755_v33 = vmul.f32 %v9071_v6, %v5754_v34 }
0x169f   : > { %v5973_v11 = vpop.xlane.xlu0 %5972 }
0x16a0   : > { %v5756_v13 = vadd.f32 %v9071_v6, %v5755_v33  ;;  %v5974_v53 = vsub.f32 %v5970_v49, %v5973_v11  ;;  %v8968_v33 = vld [vmem:[%s12083_s2 + $0x1] ss:$0 sm:$0xff] }
0x16a1   : > { %v9073_v51 = vpop.eup %9072 }
0x16a2   : > { %v5760_v57 = vsel %vm5759_vm6, %v9071_v6, %v5756_v13  ;;  %v5878_v15 = vmul.f32 %v9073_v51, %v5876_v52  ;;  %v5975_v16 = vmul.f32 1.442695, %v5974_v53  ;;  %vm5883_vm8 = vweird.f32 %v9073_v51  ;;  %v8969_v53 = vld [vmem:[%s12085_s4 + $0x1] ss:$0 sm:$0xff] }
0x16a3   : > { %v5765_v17 = vsel %vm5762_vm7, %v5764_v29, %v5760_v57  ;;  %vm5884_vm10 = vmor %vm5882_vm9, %vm5883_vm8 }
0x16a4   : > { %v5766_v18 = vmul.f32 %v9067_v44, %v5765_v17  ;;  %v5879_v19 = vsub.f32 1.0, %v5878_v15  ;;  %9074 = vpow2.f32 %v5975_v16  ;;  %v5608_v15 = vld [vmem:[%s12100_s8 + $0x18] sm:$0xff] }
0x16a6   : > { %v5880_v21 = vmul.f32 %v9073_v51, %v5879_v19  ;;  %8620 = vmatmul.msk.f32.vlgmr.msra.gmra.mxu1 %vm1498_vm0, %v5766_v18 }
0x16a8   : > { %v5881_v31 = vadd.f32 %v9073_v51, %v5880_v21 }
0x16aa   : > { %v9075_v22 = vpop.eup %9074  ;;  %v5885_v60 = vsel %vm5884_vm10, %v9073_v51, %v5881_v31 }
0x16ab   : > { %v5977_v24 = vsel %vm1498_vm0, %v9075_v22, 0.0  ;;  %v5890_v25 = vsel %vm5887_vm11, %v5889_v23, %v5885_v60 }
0x16ac   : > { %5978 = vadd.xlane.f32.xlu0 %v5977_v24  ;;  %v5891_v26 = vmul.f32 %v9069_v14, %v5890_v25 }
0x16b2   : > { %v5893_v27 = vpop.permute.xlu1 %5892 }
0x16b3   : > { %5913 = vmatpush.msrb.mxu1 %v5893_v27 }
0x16b4   : > { %8625 = vmatmul.msk.f32.vlgmr.msrb.gmra.mxu1 %vm1498_vm0, %v5891_v26 }
0x16b5   : > { %6039 = vmatpush.msra.mxu1 %v5608_v15 }
0x16c0   : > { %5995 = vrot.lane.b32.xlu0 %v11318_v3, %s12096_s20  ;;  %s12103_s20 = sld [smem:[#allocation49_spill]] }
0x16d3   : > { %v5495_v28 = vpop.xlane.xlu2 %5494 }
0x16d4   : > { %v5497_v32 = vmul.f32 %v5495_v28, %v10241_v47 }
0x16d6   : > { %v5499_v56 = vsub.f32 %v5485_v1, %v5497_v32 }
0x16d8   : > { %v5501_v39 = vmul.f32 %v5499_v56, %v5499_v56 }
0x16da   : > { %v5505_v20 = vsel %vm1714_vm3, %v5501_v39, 0.0 }
0x16db   : > { %5506 = vadd.xlane.f32.xlu2 %v5505_v20 }
0x16ea   : > { %5491 = vadd.xlane.f32.xlu0 %v5490_v37 }
0x171f   : > { %v5979_v38 = vpop.xlane.xlu0 %5978 }
0x1720   : > { %9076 = vrcp.f32 %v5979_v38  ;;  %v5991_v8 = vand.u32 2147483648, %v5979_v38  ;;  %v5989_v14 = vand.u32 2147483647, %v5979_v38  ;;  %vm5985_vm13 = vweird.f32 %v5979_v38 }
0x1722   : > { %v5992_v61 = vor.u32 1.1754944e-38, %v5991_v8  ;;  %vm5990_vm15 = vcmp.eq.f32.partialorder %v5989_v14, 8.507059e+37  ;;  %v6084_v14 = vld [vmem:[%s12102_s19 + $0x10] sm:$0xff] }
0x1723   : > { %v5790_v3 = vpop.f32.mrf.mxu1 }
0x1724   : > { %8621 = vmatmul.msk.f32.vlgmr.msra.gmra.mxu2 %vm1498_vm0, %v5790_v3 }
0x1726   : > { %v9077_v40 = vpop.eup %9076 }
0x1727   : > { %v5981_v41 = vmul.f32 %v9077_v40, %v5979_v38  ;;  %vm5986_vm12 = vweird.f32 %v9077_v40  ;;  %v8970_v38 = vld [vmem:[%s12101_s17] ss:$0 sm:$0xff]  ;;  %s12111_s17 = sld [smem:[#allocation66_spill]] }
0x1728   : > { %vm5987_vm14 = vmor %vm5985_vm13, %vm5986_vm12 }
0x1729   : > { %v5982_v44 = vsub.f32 1.0, %v5981_v41 }
0x172b   : > { %v5983_v45 = vmul.f32 %v9077_v40, %v5982_v44 }
0x172d   : > { %v5984_v46 = vadd.f32 %v9077_v40, %v5983_v45  ;;  %v6085_v45 = vld [vmem:[%s12102_s19 + $0x18] sm:$0xff] }
0x172e   : > { %6110 = vmatpush.msra.mxu2 %v6085_v45 }
0x172f   : > { %v5988_v30 = vsel %vm5987_vm14, %v9077_v40, %v5984_v46  ;;  %v6082_v46 = vld [vmem:[%s12102_s19] sm:$0xff] }
0x1730   : > { %v5993_v48 = vsel %vm5990_vm15, %v5992_v61, %v5988_v30  ;;  %6111 = vmatpush.msra.mxu2 %v6084_v14  ;;  %v6083_v61 = vld [vmem:[%s12102_s19 + $0x8] sm:$0xff] }
0x1731   : > { %v5994_v49 = vmul.f32 %v9075_v22, %v5993_v48  ;;  %v5915_v54 = vpop.f32.mrf.mxu1  ;;  %v8930_v30 = vpack.i.bf16 %v6082_v46, %v6083_v61 }
0x1732   : > { %8626 = vmatmul.msk.f32.vlgmr.msrb.gmra.mxu2 %vm1498_vm0, %v5915_v54  ;;  %v5996_v58 = vpop.permute.xlu0 %5995 }
0x1733   : > { %6016 = vmatpush.msrb.mxu0 %v5996_v58  ;;  %6112 = vmatpush.msra.mxu2 %v6083_v61  ;;  %v8925_v58 = vpack.i.bf16 %v6084_v14, %v6085_v45 }
0x1734   : > { %8629 = vmatmul.msk.f32.vlgmr.msrb.gmra.mxu0 %vm1498_vm0, %v5994_v49 }
0x1735   : > { %6113 = vmatpush.msra.mxu2 %v6082_v46 }
0x174e   : > { %v5507_v10 = vpop.xlane.xlu2 %5506 }
0x174f   : > { %v5509_v36 = vmul.f32 %v5507_v10, %v10241_v47 }
0x1751   : > { %v5511_v62 = vadd.f32 1e-05, %v5509_v36 }
0x1753   : > { %9078 = vrsqrt.f32 %v5511_v62  ;;  %vm5528_vm6 = vweird.f32 %v5511_v62 }
0x1759   : > { %v9079_v63 = vpop.eup %9078 }
0x175a   : > { %v5523_v1 = vmul.f32 %v9079_v63, %v5511_v62  ;;  %vm5529_vm5 = vweird.f32 %v9079_v63 }
0x175b   : > { %vm5530_vm7 = vmor %vm5528_vm6, %vm5529_vm5 }
0x175c   : > { %v5524_v4 = vmul.f32 %v9079_v63, %v5523_v1 }
0x175d   : > { %v5492_v5 = vpop.xlane.xlu0 %5491 }
0x175e   : > { %v5525_v6 = vmul.f32 0.5, %v5524_v4  ;;  %v5496_v50 = vmul.f32 %v5492_v5, %v10241_v47 }
0x1760   : > { %v5526_v52 = vsub.f32 1.5, %v5525_v6  ;;  %v5498_v55 = vsub.f32 %v5484_v35, %v5496_v50 }
0x1762   : > { %v5527_v34 = vmul.f32 %v9079_v63, %v5526_v52  ;;  %v5500_v9 = vmul.f32 %v5498_v55, %v5498_v55 }
0x1764   : > { %v5502_v7 = vsel %vm1714_vm3, %v5500_v9, 0.0  ;;  %v5531_v11 = vsel %vm5530_vm7, %v9079_v63, %v5527_v34 }
0x1765   : > { %5503 = vadd.xlane.f32.xlu1 %v5502_v7  ;;  %v5533_v13 = vmul.f32 %v5531_v11, %v5499_v56 }
0x1767   : > { %v5538_v51 = vmul.f32 %v8968_v33, %v5533_v13 }
0x1769   : > { %v5543_v29 = vadd.f32 %v8969_v53, %v5538_v51 }
0x176b   : > { %v5549_v57 = vsel %vm1714_vm3, %v5543_v29, 0.0 }
0x176d   : > { %5550 = vadd.xlane.f32.xlu1 %v5549_v57 }
0x17a7   : > { %v5813_v35 = vpop.f32.mrf.mxu2 }
0x17a8   : > { %v5837_v2 = vadd.f32 %v11355_v12, %v5813_v35 }
0x17b1   : > { %v6018_v16 = vpop.f32.mrf.mxu0 }
0x17b2   : > { %8630 = vmatmul.msk.f32.vlgmr.msra.gmra.mxu1 %vm1498_vm0, %v6018_v16 }
0x17b5   : > { %v5938_v37 = vpop.f32.mrf.mxu2 }
0x17b6   : > { %v5941_v43 = vadd.f32 %v5938_v37, %v5837_v2 }
0x17d8   : > { %v5504_v17 = vpop.xlane.xlu1 %5503 }
0x17d9   : > { %v5508_v18 = vmul.f32 %v5504_v17, %v10241_v47 }
0x17db   : > { %v5510_v19 = vadd.f32 1e-05, %v5508_v18 }
0x17dd   : > { %9080 = vrsqrt.f32 %v5510_v19  ;;  %vm5518_vm9 = vweird.f32 %v5510_v19 }
0x17e0   : > { %v5551_v21 = vpop.xlane.xlu1 %5550 }
0x17e1   : > { %v5553_v31 = vmul.f32 %v5551_v21, %v10241_v47 }
0x17e3   : > { %v9081_v59 = vpop.eup %9080  ;;  %v11392_v22 = vsub.f32 %v5543_v29, %v5553_v31 }
0x17e4   : > { %v5513_v42 = vmul.f32 %v9081_v59, %v5510_v19  ;;  %vm5519_vm8 = vweird.f32 %v9081_v59 }
0x17e5   : > { %v5557_v24 = vmul.f32 %v11392_v22, %v11392_v22  ;;  %vm5520_vm10 = vmor %vm5518_vm9, %vm5519_vm8 }
0x17e6   : > { %v5514_v60 = vmul.f32 %v9081_v59, %v5513_v42  ;;  %v8971_v42 = vld [vmem:[%s12103_s20] ss:$0 sm:$0xff] }
0x17e7   : > { %v5561_v23 = vsel %vm1714_vm3, %v5557_v24, 0.0 }
0x17e8   : > { %v5515_v25 = vmul.f32 0.5, %v5514_v60  ;;  %5562 = vadd.xlane.f32.xlu1 %v5561_v23 }
0x17ea   : > { %v5516_v26 = vsub.f32 1.5, %v5515_v25  ;;  %v8972_v25 = vld [vmem:[%s12104_s22] ss:$0 sm:$0xff] }
0x17ec   : > { %v5517_v27 = vmul.f32 %v9081_v59, %v5516_v26 }
0x17ee   : > { %v5521_v28 = vsel %vm5520_vm10, %v9081_v59, %v5517_v27 }
0x17ef   : > { %v5532_v32 = vmul.f32 %v5521_v28, %v5498_v55 }
0x17f1   : > { %v5537_v56 = vmul.f32 %v8968_v33, %v5532_v32 }
0x17f3   : > { %v5542_v39 = vadd.f32 %v8969_v53, %v5537_v56 }
0x17f5   : > { %v5546_v20 = vsel %vm1714_vm3, %v5542_v39, 0.0 }
0x17f6   : > { %5547 = vadd.xlane.f32.xlu0 %v5546_v20 }
0x1801   : > { %8931 = vrot.lane.b32.xlu1 %v8930_v30, %s12086_s28 }
0x182f   : > { %v6041_v3 = vpop.f32.mrf.mxu1 }
0x1830   : > { %v6044_v40 = vadd.f32 %v6041_v3, %v5941_v43 }
0x1832   : > { %v6048_v41 = vadd.f32 %v8970_v38, %v6044_v40 }
0x1834   : > { %v6049_v44 = vadd.f32 %v6048_v41, %v11308_v0  ;;  %v8973_v41 = vld [vmem:[#allocation10] ss:$0 sm:$0xff] }
0x1836   : > { %v6052_v8 = vsel %vm1714_vm3, %v6049_v44, 0.0 }
0x1837   : > { %6053 = vadd.xlane.f32.xlu2 %v6052_v8  ;;  %v8974_v8 = vld [vmem:[#allocation11] ss:$0 sm:$0xff] }
0x185b   : > { %v5563_v4 = vpop.xlane.xlu1 %5562 }
0x185c   : > { %v5565_v5 = vmul.f32 %v5563_v4, %v10241_v47 }
0x185e   : > { %v5567_v6 = vadd.f32 1e-05, %v5565_v5 }
0x1860   : > { %9082 = vrsqrt.f32 %v5567_v6  ;;  %vm5584_vm15 = vweird.f32 %v5567_v6 }
0x1866   : > { %v9083_v50 = vpop.eup %9082 }
0x1867   : > { %v5579_v34 = vmul.f32 %v9083_v50, %v5567_v6  ;;  %vm5585_vm12 = vweird.f32 %v9083_v50 }
0x1868   : > { %vm5586_vm5 = vmor %vm5584_vm15, %vm5585_vm12 }
0x1869   : > { %v5548_v12 = vpop.xlane.xlu0 %5547  ;;  %v5580_v33 = vmul.f32 %v9083_v50, %v5579_v34 }
0x186a   : > { %v5552_v48 = vmul.f32 %v5548_v12, %v10241_v47 }
0x186b   : > { %v5581_v11 = vmul.f32 0.5, %v5580_v33 }
0x186c   : > { %v5554_v49 = vsub.f32 %v5542_v39, %v5552_v48  ;;  %v8975_v39 = vld [vmem:[#allocation5] ss:$0 sm:$0xff] }
0x186d   : > { %v5582_v51 = vsub.f32 1.5, %v5581_v11 }
0x186e   : > { %v5556_v54 = vmul.f32 %v5554_v49, %v5554_v49 }
0x186f   : > { %v5583_v15 = vmul.f32 %v9083_v50, %v5582_v51 }
0x1870   : > { %v5558_v0 = vsel %vm1714_vm3, %v5556_v54, 0.0 }
0x1871   : > { %5559 = vadd.xlane.f32.xlu0 %v5558_v0  ;;  %v5587_v60 = vsel %vm5586_vm5, %v9083_v50, %v5583_v15 }
0x1872   : > { %v5589_v27 = vmul.f32 %v5587_v60, %v11392_v22 }
0x1873   : > { %v8932_v17 = vpop.permute.xlu1 %8931 }
0x1874   : > { %v8933_v59 = vunpack.i.l.bf16 %v8932_v17  ;;  %v8934_v23 = vunpack.i.h.bf16 %v8932_v17  ;;  %v5594_v32 = vmul.f32 %v8971_v42, %v5589_v27 }
0x1876   : > { %v5599_v56 = vadd.f32 %v8972_v25, %v5594_v32 }
0x1885   : > { %8926 = vrot.lane.b32.xlu0 %v8925_v58, %s12086_s28 }
0x18aa   : > { %v6054_v10 = vpop.xlane.xlu2 %6053 }
0x18ab   : > { %v6055_v36 = vmul.f32 %v6054_v10, %v10241_v47 }
0x18ad   : > { %v11411_v62 = vsub.f32 %v6049_v44, %v6055_v36 }
0x18af   : > { %v6057_v63 = vmul.f32 %v11411_v62, %v11411_v62 }
0x18b1   : > { %v6058_v1 = vsel %vm1714_vm3, %v6057_v63, 0.0 }
0x18b2   : > { %6059 = vadd.xlane.f32.xlu2 %v6058_v1 }
0x18ca   : > { %6134 = vrot.lane.b32.xlu2 %v8975_v39, %s12086_s28 }
0x18e4   : > { %v5560_v52 = vpop.xlane.xlu0 %5559 }
0x18e5   : > { %v5564_v55 = vmul.f32 %v5560_v52, %v10241_v47 }
0x18e7   : > { %v5566_v9 = vadd.f32 1e-05, %v5564_v55 }
0x18e9   : > { %9084 = vrsqrt.f32 %v5566_v9  ;;  %vm5574_vm13 = vweird.f32 %v5566_v9 }
0x18ef   : > { %v9085_v7 = vpop.eup %9084 }
0x18f0   : > { %v5569_v13 = vmul.f32 %v9085_v7, %v5566_v9  ;;  %vm5575_vm11 = vweird.f32 %v9085_v7 }
0x18f1   : > { %vm5576_vm14 = vmor %vm5574_vm13, %vm5575_vm11 }
0x18f2   : > { %v5570_v53 = vmul.f32 %v9085_v7, %v5569_v13 }
0x18f4   : > { %v5571_v29 = vmul.f32 0.5, %v5570_v53 }
0x18f6   : > { %v5572_v57 = vsub.f32 1.5, %v5571_v29 }
0x18f7   : > { %v8927_v16 = vpop.permute.xlu0 %8926 }
0x18f8   : > { %v5573_v18 = vmul.f32 %v9085_v7, %v5572_v57  ;;  %v8929_v19 = vunpack.i.h.bf16 %v8927_v16  ;;  %v8928_v21 = vunpack.i.l.bf16 %v8927_v16 }
0x18fa   : > { %v5577_v31 = vsel %vm5576_vm14, %v9085_v7, %v5573_v18  ;;  %6155 = vmatpush.msra.mxu3 %v8928_v21 }
0x18fb   : > { %v5588_v24 = vmul.f32 %v5577_v31, %v5554_v49 }
0x18fc   : > { %6156 = vmatpush.msra.mxu3 %v8929_v19 }
0x18fd   : > { %v5593_v26 = vmul.f32 %v8971_v42, %v5588_v24 }
0x18fe   : > { %6157 = vmatpush.msra.mxu3 %v8933_v59 }
0x18ff   : > { %v5598_v28 = vadd.f32 %v8972_v25, %v5593_v26 }
0x1900   : > { %6158 = vmatpush.msra.mxu3 %v8934_v23 }
0x1901   : > { %8632 = vmatmul.msk.f32.vlgmr.msra.gmra.mxu3 %vm1714_vm3, %v5598_v28 }
0x1909   : > { %8633 = vmatmul.msk.f32.gmra.mxu3 %vm1714_vm3, %v5599_v56 }
0x1925   : > { %v6060_v20 = vpop.xlane.xlu2 %6059 }
0x1926   : > { %v6061_v35 = vmul.f32 %v6060_v20, %v10241_v47 }
0x1928   : > { %v6062_v37 = vadd.f32 1e-05, %v6061_v35 }
0x192a   : > { %9086 = vrsqrt.f32 %v6062_v37  ;;  %vm6069_vm7 = vweird.f32 %v6062_v37 }
0x192d   : > { %v6135_v30 = vpop.permute.xlu2 %6134 }
0x1930   : > { %v9087_v2 = vpop.eup %9086 }
0x1931   : > { %v6064_v43 = vmul.f32 %v9087_v2, %v6062_v37  ;;  %vm6070_vm6 = vweird.f32 %v9087_v2 }
0x1932   : > { %vm6071_vm8 = vmor %vm6069_vm7, %vm6070_vm6 }
0x1933   : > { %v6065_v38 = vmul.f32 %v9087_v2, %v6064_v43 }
0x1935   : > { %v6066_v22 = vmul.f32 0.5, %v6065_v38 }
0x1937   : > { %v6067_v3 = vsub.f32 1.5, %v6066_v22 }
0x1939   : > { %v6068_v40 = vmul.f32 %v9087_v2, %v6067_v3 }
0x193b   : > { %v6072_v44 = vsel %vm6071_vm8, %v9087_v2, %v6068_v40 }
0x193c   : > { %v6073_v45 = vmul.f32 %v6072_v44, %v11411_v62 }
0x193e   : > { %v6077_v14 = vmul.f32 %v8973_v41, %v6073_v45 }
0x1940   : > { %v11426_v46 = vadd.f32 %v8974_v8, %v6077_v14 }
0x1942   : > { %8631 = vmatmul.msk.f32.vlgmr.msra.gmra.mxu2 %vm1714_vm3, %v11426_v46 }
0x1984   : > { %v6160_v61 = vpop.f32.mrf.mxu3 }
0x1985   : > { %v6161_v48 = vadd.f32 %v6160_v61, %v6135_v30 }
0x198c   : > { %v6163_v12 = vpop.f32.mrf.mxu3 }
0x198d   : > { %v6164_v49 = vadd.f32 %v6163_v12, %v6135_v30 }
0x198f   : > { %8634 = vmatpush.xpose.msk.msra.mxu0 %vm1498_vm0, %v6164_v49  ;;  %v11431_v54 = vpack.i.bf16 %v6161_v48, %v6164_v49 }
0x1991   : > { %8936 = vrot.lane.b32.xlu2 %v11431_v54, %s12086_s28  ;;  %s12110_s28 = sshll.u32 %s10030_s26, 3 }
0x1993   : > { %8635 = vmatpush.xpose.msk.msra.mxu0 %vm1498_vm0, %v6161_v48 }
0x1999   : > { %6253 = vrot.lane.b32.xlu2 %v6164_v49, %s12089_s5 }
0x19a1   : > { %6251 = vrot.lane.b32.xlu2 %v6161_v48, %s12089_s5 }
0x19c5   : > { %v6115_v0 = vpop.f32.mrf.mxu2 }
0x19c6   : > { %v6116_v58 = vadd.f32 %v8975_v39, %v6115_v0 }
0x19c8   : > { %6249 = vrot.lane.b32.xlu2 %v6116_v58, %s12089_s5  ;;  %8636 = vmatmul.msk.f32.vlgmr.msra.gmra.mxu0 %vm1498_vm0, %v6116_v58  ;;  %s12105_s5 = sld [smem:[#allocation57_spill]] }
0x19ce   : > { %v6087_v11 = vld [vmem:[%s12105_s5] sm:$0xff] }
0x19d0   : > { %6385 = vrot.lane.b32.xlu2 %v6164_v49, %s12091_s9 }
0x19d8   : > { %6491 = vrot.lane.b32.xlu2 %v6116_v58, %s12092_s12 }
0x19e0   : > { %6383 = vrot.lane.b32.xlu2 %v6161_v48, %s12091_s9 }
0x19eb   : > { %v8937_v10 = vpop.permute.xlu2 %8936 }
0x19ec   : > { %v8938_v36 = vunpack.i.l.bf16 %v8937_v10  ;;  %v8939_v62 = vunpack.i.h.bf16 %v8937_v10 }
0x19ee   : > { %6243 = vmatpush.msrb.mxu1 %v8938_v36 }
0x19f0   : > { %6244 = vmatpush.msrb.mxu1 %v8939_v62 }
0x19f3   : > { %v6254_v63 = vpop.permute.xlu2 %6253 }
0x19f4   : > { %8638 = vmatpush.xpose.msk.msrb.mxu2 %vm1498_vm0, %v6254_v63 }
0x19fb   : > { %v6252_v1 = vpop.permute.xlu2 %6251 }
0x19fc   : > { %8639 = vmatpush.xpose.msk.msrb.mxu2 %vm1498_vm0, %v6252_v1  ;;  %v6088_v1 = vld [vmem:[%s12105_s5 + $0x8] sm:$0xff] }
0x19fd   : > { %6353 = vmatpush.msra.mxu1 %v6088_v1 }
0x1a00   : > { %6376 = vmatpush.msra.mxu2 %v6087_v11 }
0x1a22   : > { %v6250_v4 = vpop.permute.xlu2 %6249 }
0x1a23   : > { %8640 = vmatmul.msk.f32.vlgmr.msrb.gmra.mxu2 %vm1498_vm0, %v6250_v4 }
0x1a2a   : > { %v6386_v5 = vpop.permute.xlu2 %6385 }
0x1a2b   : > { %8644 = vmatpush.xpose.msk.msrb.mxu3 %vm1498_vm0, %v6386_v5 }
0x1a32   : > { %v11447_v6 = vpop.permute.xlu2 %6491 }
0x1a3a   : > { %v6384_v50 = vpop.permute.xlu2 %6383 }
0x1a3b   : > { %8645 = vmatpush.xpose.msk.msrb.mxu3 %vm1498_vm0, %v6384_v50 }
0x1a45   : > { %v6192_v52 = vpop.f32.mrf.mxu0 }
0x1a46   : > { %v6195_v55 = vmul.f32 0.35355338, %v6192_v52 }
0x1a48   : > { %v6196_v34 = vsel %vm1783_vm4, %v6195_v55, -inf }
0x1a49   : > { %6197 = vmax.xlane.f32.xlu0 %v6196_v34 }
0x1a5d   : > { %6495 = vrot.lane.b32.xlu0 %v6164_v49, %s12092_s12 }
0x1a65   : > { %6381 = vrot.lane.b32.xlu0 %v6116_v58, %s12091_s9  ;;  %s1472_s9 = sand.u32 1, %s9518_s23  }
0x1a66   : > { %s8131_s22 = sshll.u32 %s1472_s9, 3 }
0x1a67   : > { %s1474_s1 = scalar_lea.vmem [#allocation23], %s8131_s22  ;;  %s9460_s22 = scalar_lea.hbm %s12111_s17, 16 }
0x1aa6   : > { %v6278_v9 = vpop.f32.mrf.mxu2 }
0x1aa7   : > { %v6281_v33 = vmul.f32 0.35355338, %v6278_v9 }
0x1aa9   : > { %v6282_v7 = vsel %vm1783_vm4, %v6281_v33, -inf }
0x1aaa   : > { %6283 = vmax.xlane.f32.xlu2 %v6282_v7 }
0x1abc   : > { %v6198_v13 = vpop.xlane.xlu0 %6197 }
0x1abd   : > { %v6199_v53 = vsub.f32 %v6195_v55, %v6198_v13 }
0x1abf   : > { %v6200_v51 = vmul.f32 1.442695, %v6199_v53 }
0x1ac1   : > { %9088 = vpow2.f32 %v6200_v51 }
0x1ac7   : > { %v9089_v29 = vpop.eup %9088 }
0x1ac8   : > { %v6202_v57 = vsel %vm1783_vm4, %v9089_v29, 0.0 }
0x1ac9   : > { %6203 = vadd.xlane.f32.xlu1 %v6202_v57 }
0x1acf   : > { %v6496_v15 = vpop.permute.xlu0 %6495 }
0x1ad0   : > { %8649 = vmatpush.xpose.msk.msrb.mxu2 %vm1498_vm0, %v6496_v15 }
0x1ad7   : > { %v6382_v16 = vpop.permute.xlu0 %6381 }
0x1ad8   : > { %8646 = vmatmul.msk.f32.vlgmr.msrb.gmra.mxu3 %vm1498_vm0, %v6382_v16 }
0x1ae2   : > { %6493 = vrot.lane.b32.xlu1 %v6161_v48, %s12092_s12  ;;  %s12109_s12 = sld [smem:[#allocation33_spill]] }
0x1ae8   : > { %s1492_s20 = scalar_lea.vmem %s12109_s12, %s12110_s28  ;;  %s7847_s28 = sshll.u32 %s1474_s1, 4  ;;  %s7848_s28 = int_to_ptr.vmem [resolvable:$true] %s7847_s28 }
0x1b1d   : > { %v6284_v17 = vpop.xlane.xlu2 %6283 }
0x1b1e   : > { %v6285_v18 = vsub.f32 %v6281_v33, %v6284_v17 }
0x1b20   : > { %v6286_v19 = vmul.f32 1.442695, %v6285_v18 }
0x1b22   : > { %9090 = vpow2.f32 %v6286_v19  ;;  %v6089_v19 = vld [vmem:[%s12105_s5 + $0x10] sm:$0xff] }
0x1b28   : > { %v9091_v21 = vpop.eup %9090 }
0x1b29   : > { %v6288_v31 = vsel %vm1783_vm4, %v9091_v21, 0.0 }
0x1b2a   : > { %6289 = vadd.xlane.f32.xlu2 %v6288_v31 }
0x1b3c   : > { %v6204_v59 = vpop.xlane.xlu1 %6203 }
0x1b3d   : > { %9092 = vrcp.f32 %v6204_v59  ;;  %v6216_v23 = vand.u32 2147483648, %v6204_v59  ;;  %v6214_v26 = vand.u32 2147483647, %v6204_v59  ;;  %vm6210_vm10 = vweird.f32 %v6204_v59 }
0x1b3f   : > { %v6217_v28 = vor.u32 1.1754944e-38, %v6216_v23  ;;  %vm6215_vm12 = vcmp.eq.f32.partialorder %v6214_v26, 8.507059e+37 }
0x1b42   : > { %8941 = vrot.lane.b32.xlu2 %v11431_v54, %s12088_s3  ;;  %s12107_s3 = sld [smem:[#allocation63_spill]] }
0x1b43   : > { %v9093_v42 = vpop.eup %9092 }
0x1b44   : > { %v6206_v24 = vmul.f32 %v9093_v42, %v6204_v59  ;;  %vm6211_vm9 = vweird.f32 %v9093_v42 }
0x1b45   : > { %vm6212_vm11 = vmor %vm6210_vm10, %vm6211_vm9 }
0x1b46   : > { %v6207_v60 = vsub.f32 1.0, %v6206_v24 }
0x1b48   : > { %v6208_v25 = vmul.f32 %v9093_v42, %v6207_v60 }
0x1b4a   : > { %v6209_v27 = vadd.f32 %v9093_v42, %v6208_v25 }
0x1b4c   : > { %v6213_v32 = vsel %vm6212_vm11, %v9093_v42, %v6209_v27 }
0x1b4d   : > { %v6218_v56 = vsel %vm6215_vm12, %v6217_v28, %v6213_v32 }
0x1b4e   : > { %v6219_v39 = vmul.f32 %v9089_v29, %v6218_v56 }
0x1b50   : > { %8637 = vmatmul.msk.f32.vlgmr.msrb.gmra.mxu1 %vm1783_vm4, %v6219_v39 }
0x1b51   : > { %6485 = vmatpush.msrb.mxu1 %v6089_v19 }
0x1b54   : > { %v6494_v20 = vpop.permute.xlu1 %6493 }
0x1b55   : > { %8650 = vmatpush.xpose.msk.msrb.mxu2 %vm1498_vm0, %v6494_v20 }
0x1b5b   : > { %v6410_v35 = vpop.f32.mrf.mxu3 }
0x1b5c   : > { %v6413_v37 = vmul.f32 0.35355338, %v6410_v35 }
0x1b5e   : > { %v6414_v2 = vsel %vm1783_vm4, %v6413_v37, -inf }
0x1b5f   : > { %6415 = vmax.xlane.f32.xlu1 %v6414_v2 }
0x1b9d   : > { %v6290_v43 = vpop.xlane.xlu2 %6289 }
0x1b9e   : > { %9094 = vrcp.f32 %v6290_v43  ;;  %v6302_v44 = vand.u32 2147483648, %v6290_v43  ;;  %v6300_v14 = vand.u32 2147483647, %v6290_v43  ;;  %vm6296_vm14 = vweird.f32 %v6290_v43 }
0x1ba0   : > { %v6303_v30 = vor.u32 1.1754944e-38, %v6302_v44  ;;  %vm6301_vm5 = vcmp.eq.f32.partialorder %v6300_v14, 8.507059e+37 }
0x1ba4   : > { %v9095_v38 = vpop.eup %9094 }
0x1ba5   : > { %v6292_v22 = vmul.f32 %v9095_v38, %v6290_v43  ;;  %v8942_v3 = vpop.permute.xlu2 %8941  ;;  %vm6297_vm13 = vweird.f32 %v9095_v38 }
0x1ba6   : > { %v8943_v40 = vunpack.i.l.bf16 %v8942_v3  ;;  %v8944_v8 = vunpack.i.h.bf16 %v8942_v3  ;;  %vm6298_vm15 = vmor %vm6296_vm14, %vm6297_vm13 }
0x1ba7   : > { %v6293_v41 = vsub.f32 1.0, %v6292_v22  ;;  %v6090_v22 = vld [vmem:[%s12105_s5 + $0x18] sm:$0xff]  ;;  %s7832_s5 = scalar_lea.sflag [#allocation7], %s1472_s9 }
0x1ba8   : > { %6329 = vmatpush.msrb.mxu0 %v8943_v40 }
0x1ba9   : > { %v6294_v45 = vmul.f32 %v9095_v38, %v6293_v41 }
0x1baa   : > { %6330 = vmatpush.msrb.mxu0 %v8944_v8 }
0x1bab   : > { %v6295_v61 = vadd.f32 %v9095_v38, %v6294_v45  ;;  %v8976_v45 = vld [vmem:[#allocation8] ss:$0 sm:$0xff] }
0x1bad   : > { %v6299_v12 = vsel %vm6298_vm15, %v9095_v38, %v6295_v61 }
0x1bae   : > { %v6304_v48 = vsel %vm6301_vm5, %v6303_v30, %v6299_v12 }
0x1baf   : > { %v6305_v49 = vmul.f32 %v9091_v21, %v6304_v48 }
0x1bb1   : > { %8641 = vmatmul.msk.f32.vlgmr.msrb.gmra.mxu0 %vm1783_vm4, %v6305_v49 }
0x1bcd   : > { %v6246_v0 = vpop.f32.mrf.mxu1 }
0x1bce   : > { %8643 = vmatmul.msk.f32.vlgmr.msra.gmra.mxu2 %vm1498_vm0, %v6246_v0 }
0x1bd2   : > { %v6416_v58 = vpop.xlane.xlu1 %6415 }
0x1bd3   : > { %v6417_v10 = vsub.f32 %v6413_v37, %v6416_v58 }
0x1bd5   : > { %v6418_v36 = vmul.f32 1.442695, %v6417_v10 }
0x1bd6   : > { %8651 = vmatmul.msk.f32.vlgmr.msrb.gmra.mxu2 %vm1498_vm0, %v11447_v6 }
0x1bd7   : > { %9096 = vpow2.f32 %v6418_v36 }
0x1bdd   : > { %v9097_v62 = vpop.eup %9096 }
0x1bde   : > { %v6420_v63 = vsel %vm1783_vm4, %v9097_v62, 0.0 }
0x1bdf   : > { %6421 = vadd.xlane.f32.xlu1 %v6420_v63 }
0x1bf8   : > { %8951 = vrot.lane.b32.xlu1 %v11431_v54, %s12090_s6  ;;  %s12108_s6 = sld [smem:[#allocation62_spill]] }
0x1c2e   : > { %v6332_v4 = vpop.f32.mrf.mxu0 }
0x1c2f   : > { %8642 = vmatmul.msk.f32.vlgmr.msra.gmra.mxu1 %vm1498_vm0, %v6332_v4 }
0x1c51   : > { %v11474_v5 = vpop.f32.mrf.mxu2 }
0x1c52   : > { %v6422_v50 = vpop.xlane.xlu1 %6421 }
0x1c53   : > { %9098 = vrcp.f32 %v6422_v50  ;;  %v6434_v13 = vand.u32 2147483648, %v6422_v50  ;;  %vm6428_vm7 = vweird.f32 %v6422_v50  ;;  %v6432_v53 = vand.u32 2147483647, %v6422_v50 }
0x1c55   : > { %v6435_v29 = vor.u32 1.1754944e-38, %v6434_v13  ;;  %vm6433_vm9 = vcmp.eq.f32.partialorder %v6432_v53, 8.507059e+37 }
0x1c59   : > { %v9099_v52 = vpop.eup %9098  ;;  %v6520_v55 = vpop.f32.mrf.mxu2 }
0x1c5a   : > { %v6424_v6 = vmul.f32 %v9099_v52, %v6422_v50  ;;  %v6523_v34 = vmul.f32 0.35355338, %v6520_v55  ;;  %vm6429_vm6 = vweird.f32 %v9099_v52 }
0x1c5b   : > { %vm6430_vm8 = vmor %vm6428_vm7, %vm6429_vm6 }
0x1c5c   : > { %v6425_v9 = vsub.f32 1.0, %v6424_v6  ;;  %v6524_v33 = vsel %vm1783_vm4, %v6523_v34, -inf }
0x1c5d   : > { %6525 = vmax.xlane.f32.xlu0 %v6524_v33 }
0x1c5e   : > { %v6426_v7 = vmul.f32 %v9099_v52, %v6425_v9 }
0x1c60   : > { %v6427_v11 = vadd.f32 %v9099_v52, %v6426_v7 }
0x1c62   : > { %v6431_v51 = vsel %vm6430_vm8, %v9099_v52, %v6427_v11 }
0x1c63   : > { %v6436_v15 = vsel %vm6433_vm9, %v6435_v29, %v6431_v51 }
0x1c64   : > { %v6437_v18 = vmul.f32 %v9097_v62, %v6436_v15 }
0x1c6a   : > { %v8952_v57 = vpop.permute.xlu1 %8951 }
0x1c6b   : > { %v8953_v16 = vunpack.i.l.bf16 %v8952_v57  ;;  %v8954_v17 = vunpack.i.h.bf16 %v8952_v57 }
0x1c6d   : > { %6461 = vmatpush.msra.mxu0 %v8953_v16 }
0x1c6f   : > { %6462 = vmatpush.msra.mxu0 %v8954_v17 }
0x1c70   : > { %8647 = vmatmul.msk.f32.vlgmr.msra.gmra.mxu0 %vm1783_vm4, %v6437_v18 }
0x1c71   : > { %6595 = vmatpush.msrb.mxu0 %v6090_v22 }
0x1cac   : > { %v6355_v40 = vpop.f32.mrf.mxu1 }
0x1cad   : > { %v6379_v44 = vadd.f32 %v11474_v5, %v6355_v40 }
0x1cd0   : > { %v6526_v21 = vpop.xlane.xlu0 %6525 }
0x1cd1   : > { %v6527_v31 = vsub.f32 %v6523_v34, %v6526_v21 }
0x1cd3   : > { %v6528_v59 = vmul.f32 1.442695, %v6527_v31 }
0x1cd5   : > { %9100 = vpow2.f32 %v6528_v59 }
0x1cdb   : > { %v9101_v42 = vpop.eup %9100 }
0x1cdc   : > { %v6530_v24 = vsel %vm1783_vm4, %v9101_v42, 0.0 }
0x1cdd   : > { %6531 = vadd.xlane.f32.xlu0 %v6530_v24 }
0x1ced   : > { %v6464_v60 = vpop.f32.mrf.mxu0 }
0x1cee   : > { %8648 = vmatmul.msk.f32.vlgmr.msrb.gmra.mxu1 %vm1498_vm0, %v6464_v60 }
0x1cf1   : > { %8946 = vrot.lane.b32.xlu0 %v11431_v54, %s12093_s13  ;;  %s12106_s13 = sld [smem:[#allocation61_spill]] }
0x1cf7   : > { %v6686_v62 = vld [vmem:[%s12106_s13 + $0x180] sm:$0xff]  ;;  %v6688_v63 = vld [vmem:[%s12106_s13 + $0x190] sm:$0xff]  ;;  %v6689_v1 = vld [vmem:[%s12106_s13 + $0x198] sm:$0xff] }
0x1cf8   : > { %7010 = vmatpush.msra.mxu1 %v6686_v62  ;;  %7070 = vmatpush.msra.mxu0 %v6689_v1  ;;  %v6670_v4 = vld [vmem:[%s12106_s13 + $0x100] sm:$0xff]  ;;  %v6671_v5 = vld [vmem:[%s12106_s13 + $0x108] sm:$0xff]  ;;  %v6672_v50 = vld [vmem:[%s12106_s13 + $0x110] sm:$0xff] }
0x1cf9   : > { %v6673_v52 = vld [vmem:[%s12106_s13 + $0x118] sm:$0xff]  ;;  %v6654_v55 = vld [vmem:[%s12106_s13 + $0x80] sm:$0xff]  ;;  %v6655_v6 = vld [vmem:[%s12106_s13 + $0x88] sm:$0xff] }
0x1cfa   : > { %7011 = vmatpush.msra.mxu1 %v6670_v4  ;;  %7071 = vmatpush.msra.mxu0 %v6673_v52  ;;  %v6656_v34 = vld [vmem:[%s12106_s13 + $0x90] sm:$0xff]  ;;  %v6657_v9 = vld [vmem:[%s12106_s13 + $0x98] sm:$0xff]  ;;  %v6638_v33 = vld [vmem:[%s12106_s13] sm:$0xff] }
0x1cfb   : > { %v6639_v7 = vld [vmem:[%s12106_s13 + $0x8] sm:$0xff]  ;;  %v6640_v11 = vld [vmem:[%s12106_s13 + $0x10] sm:$0xff]  ;;  %v6641_v13 = vld [vmem:[%s12106_s13 + $0x18] sm:$0xff] }
0x1cfc   : > { %7012 = vmatpush.msra.mxu1 %v6654_v55  ;;  %7072 = vmatpush.msra.mxu0 %v6657_v9  ;;  %v6690_v53 = vld [vmem:[%s12106_s13 + $0x1a0] sm:$0xff]  ;;  %v6691_v51 = vld [vmem:[%s12106_s13 + $0x1a8] sm:$0xff]  ;;  %v6692_v29 = vld [vmem:[%s12106_s13 + $0x1b0] sm:$0xff] }
0x1cfd   : > { %v6693_v57 = vld [vmem:[%s12106_s13 + $0x1b8] sm:$0xff]  ;;  %v6674_v15 = vld [vmem:[%s12106_s13 + $0x120] sm:$0xff]  ;;  %v6675_v16 = vld [vmem:[%s12106_s13 + $0x128] sm:$0xff] }
0x1cfe   : > { %7013 = vmatpush.msra.mxu1 %v6638_v33  ;;  %7073 = vmatpush.msra.mxu0 %v6641_v13  ;;  %v6676_v18 = vld [vmem:[%s12106_s13 + $0x130] sm:$0xff]  ;;  %v6677_v19 = vld [vmem:[%s12106_s13 + $0x138] sm:$0xff]  ;;  %v6658_v21 = vld [vmem:[%s12106_s13 + $0xa0] sm:$0xff] }
0x1cff   : > { %v6659_v59 = vld [vmem:[%s12106_s13 + $0xa8] sm:$0xff]  ;;  %v6661_v24 = vld [vmem:[%s12106_s13 + $0xb8] sm:$0xff]  ;;  %v6642_v60 = vld [vmem:[%s12106_s13 + $0x20] sm:$0xff] }
0x1d00   : > { %7090 = vmatpush.msrb.mxu1 %v6690_v53  ;;  %v6695_v40 = vld [vmem:[%s12106_s13 + $0x1c8] sm:$0xff]  ;;  %v6698_v62 = vld [vmem:[%s12106_s13 + $0x1e0] sm:$0xff]  ;;  %v6701_v1 = vld [vmem:[%s12106_s13 + $0x1f8] sm:$0xff] }
0x1d01   : > { %v6682_v4 = vld [vmem:[%s12106_s13 + $0x160] sm:$0xff]  ;;  %v6685_v52 = vld [vmem:[%s12106_s13 + $0x178] sm:$0xff] }
0x1d02   : > { %7091 = vmatpush.msrb.mxu1 %v6674_v15  ;;  %v6666_v55 = vld [vmem:[%s12106_s13 + $0xe0] sm:$0xff]  ;;  %v6669_v9 = vld [vmem:[%s12106_s13 + $0xf8] sm:$0xff]  ;;  %v6718_v15 = vld [vmem:[%s12107_s3 + $0x70] sm:$0xff] }
0x1d03   : > { %v6650_v33 = vld [vmem:[%s12106_s13 + $0x60] sm:$0xff]  ;;  %v6653_v13 = vld [vmem:[%s12106_s13 + $0x78] sm:$0xff] }
0x1d04   : > { %7092 = vmatpush.msrb.mxu1 %v6658_v21  ;;  %v6719_v53 = vld [vmem:[%s12107_s3 + $0x78] sm:$0xff]  ;;  %v6765_v21 = vld [vmem:[%s12107_s3 + $0x1e8] sm:$0xff] }
0x1d06   : > { %7093 = vmatpush.msrb.mxu1 %v6642_v60  ;;  %v6732_v60 = vld [vmem:[%s12107_s3 + $0xe0] sm:$0xff] }
0x1d50   : > { %v6532_v23 = vpop.xlane.xlu0 %6531 }
0x1d51   : > { %9102 = vrcp.f32 %v6532_v23  ;;  %v6544_v56 = vand.u32 2147483648, %v6532_v23  ;;  %vm6538_vm11 = vweird.f32 %v6532_v23  ;;  %v6542_v39 = vand.u32 2147483647, %v6532_v23 }
0x1d53   : > { %v6545_v35 = vor.u32 1.1754944e-38, %v6544_v56  ;;  %vm6543_vm13 = vcmp.eq.f32.partialorder %v6542_v39, 8.507059e+37 }
0x1d57   : > { %v9103_v25 = vpop.eup %9102 }
0x1d58   : > { %v6534_v26 = vmul.f32 %v9103_v25, %v6532_v23  ;;  %vm6539_vm10 = vweird.f32 %v9103_v25  ;;  %v6643_v23 = vld [vmem:[%s12106_s13 + $0x28] sm:$0xff] }
0x1d59   : > { %vm6540_vm12 = vmor %vm6538_vm11, %vm6539_vm10 }
0x1d5a   : > { %v6535_v27 = vsub.f32 1.0, %v6534_v26  ;;  %v6644_v26 = vld [vmem:[%s12106_s13 + $0x30] sm:$0xff] }
0x1d5c   : > { %v6536_v28 = vmul.f32 %v9103_v25, %v6535_v27  ;;  %v6645_v27 = vld [vmem:[%s12106_s13 + $0x38] sm:$0xff] }
0x1d5e   : > { %v6537_v32 = vadd.f32 %v9103_v25, %v6536_v28 }
0x1d60   : > { %v6541_v20 = vsel %vm6540_vm12, %v9103_v25, %v6537_v32 }
0x1d61   : > { %v6546_v2 = vsel %vm6543_vm13, %v6545_v35, %v6541_v20 }
0x1d62   : > { %v6547_v38 = vmul.f32 %v9101_v42, %v6546_v2  ;;  %v6660_v42 = vld [vmem:[%s12106_s13 + $0xb0] sm:$0xff] }
0x1d63   : > { %v8947_v37 = vpop.permute.xlu0 %8946 }
0x1d64   : > { %v8948_v43 = vunpack.i.l.bf16 %v8947_v37  ;;  %v8949_v54 = vunpack.i.h.bf16 %v8947_v37  ;;  %v8977_v37 = vld [vmem:[#allocation13] ss:$0 sm:$0xff] }
0x1d66   : > { %6571 = vmatpush.msra.mxu3 %v8948_v43  ;;  %v8978_v43 = vld [vmem:[#allocation14] ss:$0 sm:$0xff] }
0x1d68   : > { %6572 = vmatpush.msra.mxu3 %v8949_v54 }
0x1d69   : > { %8652 = vmatmul.msk.f32.vlgmr.msra.gmra.mxu3 %vm1783_vm4, %v6547_v38 }
0x1d6a   : > { %7050 = vmatpush.msrb.mxu3 %v6688_v63  ;;  %v6700_v63 = vld [vmem:[%s12106_s13 + $0x1f0] sm:$0xff] }
0x1d6b   : > { %v6487_v41 = vpop.f32.mrf.mxu1 }
0x1d6c   : > { %v6490_v8 = vadd.f32 %v6487_v41, %v6379_v44  ;;  %7051 = vmatpush.msrb.mxu3 %v6672_v50  ;;  %v6696_v41 = vld [vmem:[%s12106_s13 + $0x1d0] sm:$0xff]  ;;  %v6697_v44 = vld [vmem:[%s12106_s13 + $0x1d8] sm:$0xff] }
0x1d6d   : > { %v6684_v50 = vld [vmem:[%s12106_s13 + $0x170] sm:$0xff] }
0x1d6e   : > { %7052 = vmatpush.msrb.mxu3 %v6656_v34  ;;  %v6668_v34 = vld [vmem:[%s12106_s13 + $0xf0] sm:$0xff] }
0x1d70   : > { %7053 = vmatpush.msrb.mxu3 %v6640_v11  ;;  %v6652_v11 = vld [vmem:[%s12106_s13 + $0x70] sm:$0xff] }
0x1d72   : > { %7130 = vmatpush.msra.mxu3 %v6692_v29  ;;  %v6735_v29 = vld [vmem:[%s12107_s3 + $0xf8] sm:$0xff] }
0x1d74   : > { %7131 = vmatpush.msra.mxu3 %v6676_v18  ;;  %v6750_v18 = vld [vmem:[%s12107_s3 + $0x170] sm:$0xff] }
0x1d76   : > { %7132 = vmatpush.msra.mxu3 %v6660_v42  ;;  %v6716_v42 = vld [vmem:[%s12107_s3 + $0x60] sm:$0xff] }
0x1d78   : > { %7133 = vmatpush.msra.mxu3 %v6644_v26  ;;  %v6763_v26 = vld [vmem:[%s12107_s3 + $0x1d8] sm:$0xff] }
0x1dec   : > { %v6574_v3 = vpop.f32.mrf.mxu3 }
0x1ded   : > { %8653 = vmatmul.msk.f32.vlgmr.msrb.gmra.mxu0 %vm1498_vm0, %v6574_v3  ;;  %v6694_v3 = vld [vmem:[%s12106_s13 + $0x1c0] sm:$0xff] }
0x1dee   : > { %7150 = vmatpush.msrb.mxu0 %v6693_v57  ;;  %v6751_v57 = vld [vmem:[%s12107_s3 + $0x178] sm:$0xff] }
0x1df0   : > { %7151 = vmatpush.msrb.mxu0 %v6677_v19  ;;  %v6717_v19 = vld [vmem:[%s12107_s3 + $0x68] sm:$0xff] }
0x1df2   : > { %7152 = vmatpush.msrb.mxu0 %v6661_v24  ;;  %v6764_v24 = vld [vmem:[%s12107_s3 + $0x1e0] sm:$0xff] }
0x1df4   : > { %7153 = vmatpush.msrb.mxu0 %v6645_v27  ;;  %v6731_v27 = vld [vmem:[%s12107_s3 + $0xd8] sm:$0xff] }
0x1e6a   : > { %v6597_v14 = vpop.f32.mrf.mxu0 }
0x1e6b   : > { %v6600_v61 = vadd.f32 %v6597_v14, %v6490_v8  ;;  %v6678_v8 = vld [vmem:[%s12106_s13 + $0x140] sm:$0xff]  ;;  %v6680_v14 = vld [vmem:[%s12106_s13 + $0x150] sm:$0xff] }
0x1e6d   : > { %v6604_v30 = vadd.f32 %v8976_v45, %v6600_v61  ;;  %v6679_v45 = vld [vmem:[%s12106_s13 + $0x148] sm:$0xff]  ;;  %v6681_v61 = vld [vmem:[%s12106_s13 + $0x158] sm:$0xff] }
0x1e6f   : > { %v6605_v12 = vadd.f32 %v6604_v30, %v11426_v46  ;;  %v6687_v46 = vld [vmem:[%s12106_s13 + $0x188] sm:$0xff]  ;;  %v6662_v30 = vld [vmem:[%s12106_s13 + $0xc0] sm:$0xff] }
0x1e70   : > { %7030 = vmatpush.msra.mxu2 %v6687_v46  ;;  %v6699_v46 = vld [vmem:[%s12106_s13 + $0x1e8] sm:$0xff] }
0x1e71   : > { %v6608_v48 = vsel %vm1714_vm3, %v6605_v12, 0.0 }
0x1e72   : > { %6609 = vadd.xlane.f32.xlu0 %v6608_v48  ;;  %7031 = vmatpush.msra.mxu2 %v6671_v5  ;;  %v6664_v48 = vld [vmem:[%s12106_s13 + $0xd0] sm:$0xff]  ;;  %v6683_v5 = vld [vmem:[%s12106_s13 + $0x168] sm:$0xff] }
0x1e74   : > { %7032 = vmatpush.msra.mxu2 %v6655_v6  ;;  %v6667_v6 = vld [vmem:[%s12106_s13 + $0xe8] sm:$0xff] }
0x1e76   : > { %7033 = vmatpush.msra.mxu2 %v6639_v7  ;;  %v6651_v7 = vld [vmem:[%s12106_s13 + $0x68] sm:$0xff] }
0x1e78   : > { %7110 = vmatpush.msrb.mxu2 %v6691_v51  ;;  %v6767_v51 = vld [vmem:[%s12107_s3 + $0x1f8] sm:$0xff] }
0x1e7a   : > { %7111 = vmatpush.msrb.mxu2 %v6675_v16  ;;  %v6766_v16 = vld [vmem:[%s12107_s3 + $0x1f0] sm:$0xff] }
0x1e7c   : > { %7112 = vmatpush.msrb.mxu2 %v6659_v59  ;;  %v6749_v59 = vld [vmem:[%s12107_s3 + $0x168] sm:$0xff] }
0x1e7e   : > { %7113 = vmatpush.msrb.mxu2 %v6643_v23  ;;  %v6748_v23 = vld [vmem:[%s12107_s3 + $0x160] sm:$0xff] }
0x1ee5   : > { %v6610_v49 = vpop.xlane.xlu0 %6609 }
0x1ee6   : > { %v6611_v0 = vmul.f32 %v6610_v49, %v10241_v47  ;;  %v6665_v49 = vld [vmem:[%s12106_s13 + $0xd8] sm:$0xff] }
0x1ee8   : > { %v11490_v58 = vsub.f32 %v6605_v12, %v6611_v0  ;;  %v6663_v12 = vld [vmem:[%s12106_s13 + $0xc8] sm:$0xff]  ;;  %v6646_v0 = vld [vmem:[%s12106_s13 + $0x40] sm:$0xff] }
0x1eea   : > { %v6613_v10 = vmul.f32 %v11490_v58, %v11490_v58 }
0x1eec   : > { %v6614_v36 = vsel %vm1714_vm3, %v6613_v10, 0.0  ;;  %v6648_v10 = vld [vmem:[%s12106_s13 + $0x50] sm:$0xff] }
0x1eed   : > { %6615 = vadd.xlane.f32.xlu2 %v6614_v36  ;;  %v6649_v36 = vld [vmem:[%s12106_s13 + $0x58] sm:$0xff] }
0x1f60   : > { %v6616_v17 = vpop.xlane.xlu2 %6615 }
0x1f61   : > { %v6617_v31 = vmul.f32 %v6616_v17, %v10241_v47  ;;  %v6734_v17 = vld [vmem:[%s12107_s3 + $0xf0] sm:$0xff] }
0x1f63   : > { %v6618_v25 = vadd.f32 1e-05, %v6617_v31  ;;  %v6733_v31 = vld [vmem:[%s12107_s3 + $0xe8] sm:$0xff] }
0x1f65   : > { %9104 = vrsqrt.f32 %v6618_v25  ;;  %vm6625_vm14 = vweird.f32 %v6618_v25 }
0x1f6b   : > { %v9105_v28 = vpop.eup %9104 }
0x1f6c   : > { %v6620_v32 = vmul.f32 %v9105_v28, %v6618_v25  ;;  %vm6626_vm4 = vweird.f32 %v9105_v28  ;;  %v6715_v25 = vld [vmem:[%s12107_s3 + $0x58] sm:$0xff] }
0x1f6d   : > { %vm6627_vm15 = vmor %vm6625_vm14, %vm6626_vm4 }
0x1f6e   : > { %v6621_v56 = vmul.f32 %v9105_v28, %v6620_v32  ;;  %v6714_v32 = vld [vmem:[%s12107_s3 + $0x50] sm:$0xff] }
0x1f70   : > { %v6622_v39 = vmul.f32 0.5, %v6621_v56  ;;  %v6762_v56 = vld [vmem:[%s12107_s3 + $0x1d0] sm:$0xff] }
0x1f72   : > { %v6623_v20 = vsub.f32 1.5, %v6622_v39  ;;  %v6730_v39 = vld [vmem:[%s12107_s3 + $0xd0] sm:$0xff] }
0x1f74   : > { %v6624_v35 = vmul.f32 %v9105_v28, %v6623_v20  ;;  %v6746_v20 = vld [vmem:[%s12107_s3 + $0x150] sm:$0xff] }
0x1f76   : > { %v6628_v2 = vsel %vm6627_vm15, %v9105_v28, %v6624_v35  ;;  %v6747_v28 = vld [vmem:[%s12107_s3 + $0x158] sm:$0xff]  ;;  %v6713_v35 = vld [vmem:[%s12107_s3 + $0x48] sm:$0xff] }
0x1f77   : > { %v6629_v54 = vmul.f32 %v6628_v2, %v11490_v58  ;;  %v6647_v58 = vld [vmem:[%s12106_s13 + $0x48] sm:$0xff] }
0x1f78   : > { %v6729_v2 = vld [vmem:[%s12107_s3 + $0xc8] sm:$0xff] }
0x1f79   : > { %v6633_v38 = vmul.f32 %v8977_v37, %v6629_v54  ;;  %v6761_v37 = vld [vmem:[%s12107_s3 + $0x1c8] sm:$0xff]  ;;  %v6712_v54 = vld [vmem:[%s12107_s3 + $0x40] sm:$0xff] }
0x1f7b   : > { %v11529_v22 = vadd.f32 %v8978_v43, %v6633_v38  ;;  %v6745_v43 = vld [vmem:[%s12107_s3 + $0x148] sm:$0xff]  ;;  %v6760_v38 = vld [vmem:[%s12107_s3 + $0x1c0] sm:$0xff] }
0x1f7d   : > { %8654 = vmatmul.msk.f32.vlgmr.msra.gmra.mxu1 %vm1714_vm3, %v11529_v22  ;;  %8655 = vmatmul.msk.f32.vlgmr.msra.gmra.mxu2 %vm1714_vm3, %v11529_v22 }
0x1f7e   : > { %8656 = vmatmul.msk.f32.vlgmr.msrb.gmra.mxu3 %vm1714_vm3, %v11529_v22  ;;  %8657 = vmatmul.msk.f32.vlgmr.msra.gmra.mxu0 %vm1714_vm3, %v11529_v22 }
0x1f7f   : > { %7170 = vmatpush.msra.mxu1 %v6694_v3  ;;  %7190 = vmatpush.msra.mxu2 %v6695_v40  ;;  %v6728_v3 = vld [vmem:[%s12107_s3 + $0xc0] sm:$0xff] }
0x1f80   : > { %7210 = vmatpush.msrb.mxu3 %v6696_v41  ;;  %7230 = vmatpush.msra.mxu0 %v6697_v44  ;;  %v6744_v40 = vld [vmem:[%s12107_s3 + $0x140] sm:$0xff]  ;;  %v6711_v41 = vld [vmem:[%s12107_s3 + $0x38] sm:$0xff] }
0x1f81   : > { %7171 = vmatpush.msra.mxu1 %v6678_v8  ;;  %7191 = vmatpush.msra.mxu2 %v6679_v45  ;;  %v6759_v44 = vld [vmem:[%s12107_s3 + $0x1b8] sm:$0xff] }
0x1f82   : > { %7211 = vmatpush.msrb.mxu3 %v6680_v14  ;;  %7231 = vmatpush.msra.mxu0 %v6681_v61  ;;  %v6727_v8 = vld [vmem:[%s12107_s3 + $0xb8] sm:$0xff]  ;;  %v6710_v14 = vld [vmem:[%s12107_s3 + $0x30] sm:$0xff] }
0x1f83   : > { %7172 = vmatpush.msra.mxu1 %v6662_v30  ;;  %7192 = vmatpush.msra.mxu2 %v6663_v12  ;;  %v6743_v45 = vld [vmem:[%s12107_s3 + $0x138] sm:$0xff]  ;;  %v6758_v61 = vld [vmem:[%s12107_s3 + $0x1b0] sm:$0xff] }
0x1f84   : > { %7212 = vmatpush.msrb.mxu3 %v6664_v48  ;;  %7232 = vmatpush.msra.mxu0 %v6665_v49  ;;  %v6726_v30 = vld [vmem:[%s12107_s3 + $0xb0] sm:$0xff]  ;;  %v6709_v48 = vld [vmem:[%s12107_s3 + $0x28] sm:$0xff] }
0x1f85   : > { %8658 = vmatmul.msk.f32.vlgmr.msrb.gmra.mxu1 %vm1714_vm3, %v11529_v22  ;;  %8659 = vmatmul.msk.f32.vlgmr.msrb.gmra.mxu2 %vm1714_vm3, %v11529_v22  ;;  %v6742_v12 = vld [vmem:[%s12107_s3 + $0x130] sm:$0xff]  ;;  %v6757_v49 = vld [vmem:[%s12107_s3 + $0x1a8] sm:$0xff] }
0x1f86   : > { %8660 = vmatmul.msk.f32.vlgmr.msra.gmra.mxu3 %vm1714_vm3, %v11529_v22  ;;  %8661 = vmatmul.msk.f32.vlgmr.msrb.gmra.mxu0 %vm1714_vm3, %v11529_v22 }
0x1f87   : > { %7173 = vmatpush.msra.mxu1 %v6646_v0  ;;  %7193 = vmatpush.msra.mxu2 %v6647_v58  ;;  %v6725_v0 = vld [vmem:[%s12107_s3 + $0xa8] sm:$0xff] }
0x1f88   : > { %7213 = vmatpush.msrb.mxu3 %v6648_v10  ;;  %7233 = vmatpush.msra.mxu0 %v6649_v36  ;;  %v6741_v58 = vld [vmem:[%s12107_s3 + $0x128] sm:$0xff]  ;;  %v6708_v10 = vld [vmem:[%s12107_s3 + $0x20] sm:$0xff] }
0x1f89   : > { %7250 = vmatpush.msrb.mxu1 %v6698_v62  ;;  %7270 = vmatpush.msrb.mxu2 %v6699_v46  ;;  %v6756_v36 = vld [vmem:[%s12107_s3 + $0x1a0] sm:$0xff] }
0x1f8a   : > { %7290 = vmatpush.msra.mxu3 %v6700_v63  ;;  %7310 = vmatpush.msrb.mxu0 %v6701_v1  ;;  %v6724_v62 = vld [vmem:[%s12107_s3 + $0xa0] sm:$0xff]  ;;  %v6707_v63 = vld [vmem:[%s12107_s3 + $0x18] sm:$0xff] }
0x1f8b   : > { %7251 = vmatpush.msrb.mxu1 %v6682_v4  ;;  %7271 = vmatpush.msrb.mxu2 %v6683_v5  ;;  %v6740_v46 = vld [vmem:[%s12107_s3 + $0x120] sm:$0xff]  ;;  %v6755_v1 = vld [vmem:[%s12107_s3 + $0x198] sm:$0xff] }
0x1f8c   : > { %7291 = vmatpush.msra.mxu3 %v6684_v50  ;;  %7311 = vmatpush.msrb.mxu0 %v6685_v52  ;;  %v6723_v4 = vld [vmem:[%s12107_s3 + $0x98] sm:$0xff]  ;;  %v6706_v50 = vld [vmem:[%s12107_s3 + $0x10] sm:$0xff] }
0x1f8d   : > { %8662 = vmatmul.msk.f32.vlgmr.msra.gmra.mxu1 %vm1714_vm3, %v11529_v22  ;;  %8663 = vmatmul.msk.f32.vlgmr.msra.gmra.mxu2 %vm1714_vm3, %v11529_v22  ;;  %v6739_v5 = vld [vmem:[%s12107_s3 + $0x118] sm:$0xff]  ;;  %v6754_v52 = vld [vmem:[%s12107_s3 + $0x190] sm:$0xff] }
0x1f8e   : > { %8664 = vmatmul.msk.f32.vlgmr.msrb.gmra.mxu3 %vm1714_vm3, %v11529_v22  ;;  %8665 = vmatmul.msk.f32.vlgmr.msra.gmra.mxu0 %vm1714_vm3, %v11529_v22 }
0x1f8f   : > { %7252 = vmatpush.msrb.mxu1 %v6666_v55  ;;  %7272 = vmatpush.msrb.mxu2 %v6667_v6  ;;  %v6722_v55 = vld [vmem:[%s12107_s3 + $0x90] sm:$0xff] }
0x1f90   : > { %7292 = vmatpush.msra.mxu3 %v6668_v34  ;;  %7312 = vmatpush.msrb.mxu0 %v6669_v9  ;;  %v6738_v6 = vld [vmem:[%s12107_s3 + $0x110] sm:$0xff]  ;;  %v6705_v34 = vld [vmem:[%s12107_s3 + $0x8] sm:$0xff] }
0x1f91   : > { %7253 = vmatpush.msrb.mxu1 %v6650_v33  ;;  %7273 = vmatpush.msrb.mxu2 %v6651_v7  ;;  %v6753_v9 = vld [vmem:[%s12107_s3 + $0x188] sm:$0xff] }
0x1f92   : > { %7293 = vmatpush.msra.mxu3 %v6652_v11  ;;  %7313 = vmatpush.msrb.mxu0 %v6653_v13  ;;  %v6721_v33 = vld [vmem:[%s12107_s3 + $0x88] sm:$0xff]  ;;  %v6704_v11 = vld [vmem:[%s12107_s3] sm:$0xff] }
0x1f93   : > { %7337 = vmatpush.msra.mxu1 %v6719_v53  ;;  %7357 = vmatpush.msra.mxu2 %v6735_v29  ;;  %v6737_v7 = vld [vmem:[%s12107_s3 + $0x108] sm:$0xff]  ;;  %v6752_v13 = vld [vmem:[%s12107_s3 + $0x180] sm:$0xff]  ;;  %v6783_v53 = vld [vmem:[%s12107_s3 + $0x278] sm:$0xff] }
0x1f94   : > { %7397 = vmatpush.msra.mxu0 %v6767_v51  ;;  %7377 = vmatpush.msrb.mxu3 %v6751_v57  ;;  %v6831_v51 = vld [vmem:[%s12107_s3 + $0x3f8] sm:$0xff]  ;;  %v6720_v29 = vld [vmem:[%s12107_s3 + $0x80] sm:$0xff] }
0x1f95   : > { %8666 = vmatmul.msk.f32.vlgmr.msrb.gmra.mxu1 %vm1714_vm3, %v11529_v22  ;;  %8667 = vmatmul.msk.f32.vlgmr.msrb.gmra.mxu2 %vm1714_vm3, %v11529_v22  ;;  %v6736_v57 = vld [vmem:[%s12107_s3 + $0x100] sm:$0xff] }
0x1f96   : > { %8668 = vmatmul.msk.f32.vlgmr.msra.gmra.mxu3 %vm1714_vm3, %v11529_v22  ;;  %8669 = vmatmul.msk.f32.vlgmr.msrb.gmra.mxu0 %vm1714_vm3, %v11529_v22 }
0x1f97   : > { %7338 = vmatpush.msra.mxu1 %v6718_v15  ;;  %7398 = vmatpush.msra.mxu0 %v6766_v16  ;;  %v6782_v15 = vld [vmem:[%s12107_s3 + $0x270] sm:$0xff] }
0x1f98   : > { %7358 = vmatpush.msra.mxu2 %v6734_v17  ;;  %7378 = vmatpush.msrb.mxu3 %v6750_v18  ;;  %v6830_v16 = vld [vmem:[%s12107_s3 + $0x3f0] sm:$0xff]  ;;  %v6799_v17 = vld [vmem:[%s12107_s3 + $0x2f8] sm:$0xff] }
0x1f99   : > { %7339 = vmatpush.msra.mxu1 %v6717_v19  ;;  %7399 = vmatpush.msra.mxu0 %v6765_v21  ;;  %v6815_v18 = vld [vmem:[%s12107_s3 + $0x378] sm:$0xff]  ;;  %v6781_v19 = vld [vmem:[%s12107_s3 + $0x268] sm:$0xff] }
0x1f9a   : > { %7359 = vmatpush.msra.mxu2 %v6733_v31  ;;  %7379 = vmatpush.msrb.mxu3 %v6749_v59  ;;  %v6829_v21 = vld [vmem:[%s12107_s3 + $0x3e8] sm:$0xff]  ;;  %v6798_v31 = vld [vmem:[%s12107_s3 + $0x2f0] sm:$0xff] }
0x1f9b   : > { %7340 = vmatpush.msra.mxu1 %v6716_v42  ;;  %7400 = vmatpush.msra.mxu0 %v6764_v24  ;;  %v6814_v59 = vld [vmem:[%s12107_s3 + $0x370] sm:$0xff]  ;;  %v6780_v42 = vld [vmem:[%s12107_s3 + $0x260] sm:$0xff] }
0x1f9c   : > { %7360 = vmatpush.msra.mxu2 %v6732_v60  ;;  %7380 = vmatpush.msrb.mxu3 %v6748_v23  ;;  %v6828_v24 = vld [vmem:[%s12107_s3 + $0x3e0] sm:$0xff]  ;;  %v6797_v60 = vld [vmem:[%s12107_s3 + $0x2e8] sm:$0xff] }
0x1f9d   : > { %7341 = vmatpush.msra.mxu1 %v6715_v25  ;;  %7401 = vmatpush.msra.mxu0 %v6763_v26  ;;  %v6813_v23 = vld [vmem:[%s12107_s3 + $0x368] sm:$0xff]  ;;  %v6779_v25 = vld [vmem:[%s12107_s3 + $0x258] sm:$0xff] }
0x1f9e   : > { %7361 = vmatpush.msra.mxu2 %v6731_v27  ;;  %7381 = vmatpush.msrb.mxu3 %v6747_v28  ;;  %v6827_v26 = vld [vmem:[%s12107_s3 + $0x3d8] sm:$0xff]  ;;  %v6796_v27 = vld [vmem:[%s12107_s3 + $0x2e0] sm:$0xff] }
0x1f9f   : > { %7342 = vmatpush.msra.mxu1 %v6714_v32  ;;  %7402 = vmatpush.msra.mxu0 %v6762_v56  ;;  %v6812_v28 = vld [vmem:[%s12107_s3 + $0x360] sm:$0xff]  ;;  %v6778_v32 = vld [vmem:[%s12107_s3 + $0x250] sm:$0xff] }
0x1fa0   : > { %7362 = vmatpush.msra.mxu2 %v6730_v39  ;;  %7382 = vmatpush.msrb.mxu3 %v6746_v20  ;;  %v6826_v56 = vld [vmem:[%s12107_s3 + $0x3d0] sm:$0xff]  ;;  %v6795_v39 = vld [vmem:[%s12107_s3 + $0x2d8] sm:$0xff] }
0x1fa1   : > { %7343 = vmatpush.msra.mxu1 %v6713_v35  ;;  %7403 = vmatpush.msra.mxu0 %v6761_v37  ;;  %v6811_v20 = vld [vmem:[%s12107_s3 + $0x358] sm:$0xff]  ;;  %v6777_v35 = vld [vmem:[%s12107_s3 + $0x248] sm:$0xff] }
0x1fa2   : > { %7363 = vmatpush.msra.mxu2 %v6729_v2  ;;  %7383 = vmatpush.msrb.mxu3 %v6745_v43  ;;  %v6825_v37 = vld [vmem:[%s12107_s3 + $0x3c8] sm:$0xff]  ;;  %v6794_v2 = vld [vmem:[%s12107_s3 + $0x2d0] sm:$0xff] }
0x1fa3   : > { %7344 = vmatpush.msra.mxu1 %v6712_v54  ;;  %7404 = vmatpush.msra.mxu0 %v6760_v38  ;;  %v6810_v43 = vld [vmem:[%s12107_s3 + $0x350] sm:$0xff]  ;;  %v6776_v54 = vld [vmem:[%s12107_s3 + $0x240] sm:$0xff] }
0x1fa4   : > { %7364 = vmatpush.msra.mxu2 %v6728_v3  ;;  %7384 = vmatpush.msrb.mxu3 %v6744_v40  ;;  %v6824_v38 = vld [vmem:[%s12107_s3 + $0x3c0] sm:$0xff]  ;;  %v6793_v3 = vld [vmem:[%s12107_s3 + $0x2c8] sm:$0xff] }
0x1fa5   : > { %7345 = vmatpush.msra.mxu1 %v6711_v41  ;;  %7405 = vmatpush.msra.mxu0 %v6759_v44  ;;  %v6809_v40 = vld [vmem:[%s12107_s3 + $0x348] sm:$0xff]  ;;  %v6775_v41 = vld [vmem:[%s12107_s3 + $0x238] sm:$0xff] }
0x1fa6   : > { %7365 = vmatpush.msra.mxu2 %v6727_v8  ;;  %7385 = vmatpush.msrb.mxu3 %v6743_v45  ;;  %v6823_v44 = vld [vmem:[%s12107_s3 + $0x3b8] sm:$0xff]  ;;  %v6792_v8 = vld [vmem:[%s12107_s3 + $0x2c0] sm:$0xff] }
0x1fa7   : > { %7346 = vmatpush.msra.mxu1 %v6710_v14  ;;  %7406 = vmatpush.msra.mxu0 %v6758_v61  ;;  %v6808_v45 = vld [vmem:[%s12107_s3 + $0x340] sm:$0xff]  ;;  %v6774_v14 = vld [vmem:[%s12107_s3 + $0x230] sm:$0xff] }
0x1fa8   : > { %7366 = vmatpush.msra.mxu2 %v6726_v30  ;;  %7386 = vmatpush.msrb.mxu3 %v6742_v12  ;;  %v6822_v61 = vld [vmem:[%s12107_s3 + $0x3b0] sm:$0xff]  ;;  %v6791_v30 = vld [vmem:[%s12107_s3 + $0x2b8] sm:$0xff] }
0x1fa9   : > { %7347 = vmatpush.msra.mxu1 %v6709_v48  ;;  %7407 = vmatpush.msra.mxu0 %v6757_v49  ;;  %v6807_v12 = vld [vmem:[%s12107_s3 + $0x338] sm:$0xff]  ;;  %v6773_v48 = vld [vmem:[%s12107_s3 + $0x228] sm:$0xff] }
0x1faa   : > { %7367 = vmatpush.msra.mxu2 %v6725_v0  ;;  %7387 = vmatpush.msrb.mxu3 %v6741_v58  ;;  %v6821_v49 = vld [vmem:[%s12107_s3 + $0x3a8] sm:$0xff]  ;;  %v6790_v0 = vld [vmem:[%s12107_s3 + $0x2b0] sm:$0xff] }
0x1fab   : > { %7348 = vmatpush.msra.mxu1 %v6708_v10  ;;  %7408 = vmatpush.msra.mxu0 %v6756_v36  ;;  %v6806_v58 = vld [vmem:[%s12107_s3 + $0x330] sm:$0xff]  ;;  %v6772_v10 = vld [vmem:[%s12107_s3 + $0x220] sm:$0xff] }
0x1fac   : > { %7368 = vmatpush.msra.mxu2 %v6724_v62  ;;  %7388 = vmatpush.msrb.mxu3 %v6740_v46  ;;  %v6820_v36 = vld [vmem:[%s12107_s3 + $0x3a0] sm:$0xff]  ;;  %v6771_v62 = vld [vmem:[%s12107_s3 + $0x218] sm:$0xff] }
0x1fad   : > { %7349 = vmatpush.msra.mxu1 %v6707_v63  ;;  %7409 = vmatpush.msra.mxu0 %v6755_v1  ;;  %v6819_v46 = vld [vmem:[%s12107_s3 + $0x398] sm:$0xff]  ;;  %v6770_v63 = vld [vmem:[%s12107_s3 + $0x210] sm:$0xff]  ;;  %v6789_v1 = vld [vmem:[%s12107_s3 + $0x2a8] sm:$0xff] }
0x1fae   : > { %7369 = vmatpush.msra.mxu2 %v6723_v4  ;;  %7389 = vmatpush.msrb.mxu3 %v6739_v5  ;;  %v6805_v4 = vld [vmem:[%s12107_s3 + $0x328] sm:$0xff]  ;;  %v6818_v5 = vld [vmem:[%s12107_s3 + $0x390] sm:$0xff] }
0x1faf   : > { %7350 = vmatpush.msra.mxu1 %v6706_v50  ;;  %7410 = vmatpush.msra.mxu0 %v6754_v52  ;;  %v6769_v50 = vld [vmem:[%s12107_s3 + $0x208] sm:$0xff]  ;;  %v6788_v52 = vld [vmem:[%s12107_s3 + $0x2a0] sm:$0xff] }
0x1fb0   : > { %7370 = vmatpush.msra.mxu2 %v6722_v55  ;;  %7390 = vmatpush.msrb.mxu3 %v6738_v6  ;;  %v6804_v55 = vld [vmem:[%s12107_s3 + $0x320] sm:$0xff]  ;;  %v6817_v6 = vld [vmem:[%s12107_s3 + $0x388] sm:$0xff] }
0x1fb1   : > { %7351 = vmatpush.msra.mxu1 %v6705_v34  ;;  %7411 = vmatpush.msra.mxu0 %v6753_v9  ;;  %v6768_v34 = vld [vmem:[%s12107_s3 + $0x200] sm:$0xff]  ;;  %v6787_v9 = vld [vmem:[%s12107_s3 + $0x298] sm:$0xff] }
0x1fb2   : > { %7371 = vmatpush.msra.mxu2 %v6721_v33  ;;  %7391 = vmatpush.msrb.mxu3 %v6737_v7  ;;  %v6803_v33 = vld [vmem:[%s12107_s3 + $0x318] sm:$0xff]  ;;  %v6816_v7 = vld [vmem:[%s12107_s3 + $0x380] sm:$0xff] }
0x1fb3   : > { %7352 = vmatpush.msra.mxu1 %v6704_v11  ;;  %7412 = vmatpush.msra.mxu0 %v6752_v13  ;;  %v6786_v11 = vld [vmem:[%s12107_s3 + $0x290] sm:$0xff] }
0x1fb4   : > { %7372 = vmatpush.msra.mxu2 %v6720_v29  ;;  %7392 = vmatpush.msrb.mxu3 %v6736_v57  ;;  %v6802_v13 = vld [vmem:[%s12107_s3 + $0x310] sm:$0xff]  ;;  %v6784_v29 = vld [vmem:[%s12107_s3 + $0x280] sm:$0xff] }
0x1fb5   : > { %7417 = vmatpush.msrb.mxu1 %v6783_v53  ;;  %7477 = vmatpush.msrb.mxu0 %v6831_v51  ;;  %v6785_v53 = vld [vmem:[%s12107_s3 + $0x288] sm:$0xff]  ;;  %v6800_v57 = vld [vmem:[%s12107_s3 + $0x300] sm:$0xff] }
0x1fb6   : > { %7437 = vmatpush.msrb.mxu2 %v6799_v17  ;;  %7457 = vmatpush.msra.mxu3 %v6815_v18  ;;  %v6801_v51 = vld [vmem:[%s12107_s3 + $0x308] sm:$0xff] }
0x1fb7   : > { %7418 = vmatpush.msrb.mxu1 %v6782_v15  ;;  %7478 = vmatpush.msrb.mxu0 %v6830_v16  ;;  %v11724_v15 = vld [vmem:[%s12108_s6] sm:$0xff] }
0x1fb8   : > { %7438 = vmatpush.msrb.mxu2 %v6798_v31  ;;  %7458 = vmatpush.msra.mxu3 %v6814_v59  ;;  %v6963_v16 = vperm.slane %v11724_v15, 0  ;;  %v6966_v17 = vperm.slane %v11724_v15, 3 }
0x1fb9   : > { %7419 = vmatpush.msrb.mxu1 %v6781_v19  ;;  %7479 = vmatpush.msrb.mxu0 %v6829_v21 }
0x1fba   : > { %7439 = vmatpush.msrb.mxu2 %v6797_v60  ;;  %7459 = vmatpush.msra.mxu3 %v6813_v23  ;;  %v6895_v23 = vld [vmem:[%s12107_s3 + $0x5f8] sm:$0xff] }
0x1fbb   : > { %7420 = vmatpush.msrb.mxu1 %v6780_v42  ;;  %7480 = vmatpush.msrb.mxu0 %v6828_v24  ;;  %v6847_v42 = vld [vmem:[%s12107_s3 + $0x478] sm:$0xff]  ;;  %v6964_v24 = vperm.slane %v11724_v15, 1 }
0x1fbc   : > { %7440 = vmatpush.msrb.mxu2 %v6796_v27  ;;  %7460 = vmatpush.msra.mxu3 %v6812_v28  ;;  %v6967_v27 = vperm.slane %v11724_v15, 4 }
0x1fbd   : > { %7421 = vmatpush.msrb.mxu1 %v6779_v25  ;;  %7481 = vmatpush.msrb.mxu0 %v6827_v26  ;;  %v6965_v25 = vperm.slane %v11724_v15, 2  ;;  %v6846_v26 = vld [vmem:[%s12107_s3 + $0x470] sm:$0xff] }
0x1fbe   : > { %7441 = vmatpush.msrb.mxu2 %v6795_v39  ;;  %7461 = vmatpush.msra.mxu3 %v6811_v20 }
0x1fbf   : > { %7422 = vmatpush.msrb.mxu1 %v6778_v32  ;;  %7482 = vmatpush.msrb.mxu0 %v6826_v56  ;;  %v6894_v32 = vld [vmem:[%s12107_s3 + $0x5f0] sm:$0xff]  ;;  %v6970_v56 = vperm.slane %v11724_v15, 7 }
0x1fc0   : > { %7442 = vmatpush.msrb.mxu2 %v6794_v2  ;;  %7462 = vmatpush.msra.mxu3 %v6810_v43  ;;  %v6893_v43 = vld [vmem:[%s12107_s3 + $0x5e8] sm:$0xff] }
0x1fc1   : > { %7423 = vmatpush.msrb.mxu1 %v6777_v35  ;;  %7483 = vmatpush.msrb.mxu0 %v6825_v37  ;;  %v6845_v35 = vld [vmem:[%s12107_s3 + $0x468] sm:$0xff] }
0x1fc2   : > { %7443 = vmatpush.msrb.mxu2 %v6793_v3  ;;  %7463 = vmatpush.msra.mxu3 %v6809_v40  ;;  %v6844_v40 = vld [vmem:[%s12107_s3 + $0x460] sm:$0xff] }
0x1fc3   : > { %7424 = vmatpush.msrb.mxu1 %v6776_v54  ;;  %7484 = vmatpush.msrb.mxu0 %v6824_v38 }
0x1fc4   : > { %7444 = vmatpush.msrb.mxu2 %v6792_v8  ;;  %7464 = vmatpush.msra.mxu3 %v6808_v45  ;;  %v6863_v8 = vld [vmem:[%s12107_s3 + $0x4f8] sm:$0xff] }
0x1fc5   : > { %7425 = vmatpush.msrb.mxu1 %v6775_v41  ;;  %7485 = vmatpush.msrb.mxu0 %v6823_v44  ;;  %v6879_v45 = vld [vmem:[%s12107_s3 + $0x578] sm:$0xff] }
0x1fc6   : > { %7445 = vmatpush.msrb.mxu2 %v6791_v30  ;;  %7465 = vmatpush.msra.mxu3 %v6807_v12  ;;  %v6968_v30 = vperm.slane %v11724_v15, 5 }
0x1fc7   : > { %7426 = vmatpush.msrb.mxu1 %v6774_v14  ;;  %7486 = vmatpush.msrb.mxu0 %v6822_v61  ;;  %v6892_v61 = vld [vmem:[%s12107_s3 + $0x5e0] sm:$0xff] }
0x1fc8   : > { %7446 = vmatpush.msrb.mxu2 %v6790_v0  ;;  %7466 = vmatpush.msra.mxu3 %v6806_v58  ;;  %v6862_v0 = vld [vmem:[%s12107_s3 + $0x4f0] sm:$0xff] }
0x1fc9   : > { %7427 = vmatpush.msrb.mxu1 %v6773_v48  ;;  %7487 = vmatpush.msrb.mxu0 %v6821_v49  ;;  %v6843_v48 = vld [vmem:[%s12107_s3 + $0x458] sm:$0xff]  ;;  %v6969_v49 = vperm.slane %v11724_v15, 6  ;;  %v6878_v58 = vld [vmem:[%s12107_s3 + $0x570] sm:$0xff] }
0x1fca   : > { %7447 = vmatpush.msrb.mxu2 %v6789_v1  ;;  %7467 = vmatpush.msra.mxu3 %v6805_v4  ;;  %v6861_v1 = vld [vmem:[%s12107_s3 + $0x4e8] sm:$0xff]  ;;  %v6887_v15 = vld [vmem:[%s12107_s3 + $0x5b8] sm:$0xff] }
0x1fcb   : > { %7428 = vmatpush.msrb.mxu1 %v6772_v10  ;;  %7488 = vmatpush.msrb.mxu0 %v6820_v36  ;;  %v6891_v10 = vld [vmem:[%s12107_s3 + $0x5d8] sm:$0xff]  ;;  %v6877_v4 = vld [vmem:[%s12107_s3 + $0x568] sm:$0xff] }
0x1fcc   : > { %7448 = vmatpush.msrb.mxu2 %v6788_v52  ;;  %7468 = vmatpush.msra.mxu3 %v6804_v55  ;;  %v6841_v52 = vld [vmem:[%s12107_s3 + $0x448] sm:$0xff] }
0x1fcd   : > { %7429 = vmatpush.msrb.mxu1 %v6771_v62  ;;  %7489 = vmatpush.msrb.mxu0 %v6819_v46  ;;  %v6842_v62 = vld [vmem:[%s12107_s3 + $0x450] sm:$0xff] }
0x1fce   : > { %7449 = vmatpush.msrb.mxu2 %v6787_v9  ;;  %7469 = vmatpush.msra.mxu3 %v6803_v33  ;;  %v6889_v33 = vld [vmem:[%s12107_s3 + $0x5c8] sm:$0xff] }
0x1fcf   : > { %7430 = vmatpush.msrb.mxu1 %v6770_v63  ;;  %7490 = vmatpush.msrb.mxu0 %v6818_v5 }
0x1fd0   : > { %7450 = vmatpush.msrb.mxu2 %v6786_v11  ;;  %7470 = vmatpush.msra.mxu3 %v6802_v13  ;;  %v6859_v11 = vld [vmem:[%s12107_s3 + $0x4d8] sm:$0xff] }
0x1fd1   : > { %7431 = vmatpush.msrb.mxu1 %v6769_v50  ;;  %7491 = vmatpush.msrb.mxu0 %v6817_v6  ;;  %v6890_v50 = vld [vmem:[%s12107_s3 + $0x5d0] sm:$0xff]  ;;  %v6860_v6 = vld [vmem:[%s12107_s3 + $0x4e0] sm:$0xff]  ;;  %v6875_v13 = vld [vmem:[%s12107_s3 + $0x558] sm:$0xff] }
0x1fd2   : > { %7451 = vmatpush.msrb.mxu2 %v6785_v53  ;;  %7471 = vmatpush.msra.mxu3 %v6801_v51  ;;  %v6888_v53 = vld [vmem:[%s12107_s3 + $0x5c0] sm:$0xff]  ;;  %v6839_v51 = vld [vmem:[%s12107_s3 + $0x438] sm:$0xff] }
0x1fd3   : > { %7432 = vmatpush.msrb.mxu1 %v6768_v34  ;;  %7492 = vmatpush.msrb.mxu0 %v6816_v7  ;;  %v6876_v34 = vld [vmem:[%s12107_s3 + $0x560] sm:$0xff] }
0x1fd4   : > { %7452 = vmatpush.msrb.mxu2 %v6784_v29  ;;  %7472 = vmatpush.msra.mxu3 %v6800_v57  ;;  %v6840_v7 = vld [vmem:[%s12107_s3 + $0x440] sm:$0xff]  ;;  %v6858_v29 = vld [vmem:[%s12107_s3 + $0x4d0] sm:$0xff] }
0x1fd5   : > { %v6874_v57 = vld [vmem:[%s12107_s3 + $0x550] sm:$0xff] }
0x1ffa   : > { %v7015_v18 = vpop.f32.mrf.mxu1 }
0x1ffb   : > { %v7016_v19 = vadd.f32 %v7015_v18, %v6963_v16  ;;  %v7075_v21 = vpop.f32.mrf.mxu0  ;;  %v6838_v16 = vld [vmem:[%s12107_s3 + $0x430] sm:$0xff]  ;;  %v6873_v18 = vld [vmem:[%s12107_s3 + $0x548] sm:$0xff] }
0x1ffc   : > { %v7076_v31 = vadd.f32 %v7075_v21, %v6966_v17  ;;  %v6857_v17 = vld [vmem:[%s12107_s3 + $0x4c8] sm:$0xff] }
0x1ffd   : > { %v7318_v59 = vmax.f32 %v7016_v19, 0.0  ;;  %v6886_v19 = vld [vmem:[%s12107_s3 + $0x5b0] sm:$0xff]  ;;  %v6837_v21 = vld [vmem:[%s12107_s3 + $0x428] sm:$0xff] }
0x1ffe   : > { %v7321_v60 = vmax.f32 %v7076_v31, 0.0  ;;  %v6856_v31 = vld [vmem:[%s12107_s3 + $0x4c0] sm:$0xff] }
0x1fff   : > { %7353 = vmatmul.f32.vlgmr.msra.gmra.mxu1 %v7318_v59  ;;  %v6872_v59 = vld [vmem:[%s12107_s3 + $0x540] sm:$0xff] }
0x2000   : > { %7413 = vmatmul.f32.vlgmr.msra.gmra.mxu0 %v7321_v60  ;;  %7497 = vmatpush.msra.mxu1 %v6847_v42  ;;  %v7035_v28 = vpop.f32.mrf.mxu2  ;;  %v11772_v42 = vld [vmem:[%s12108_s6 + $0x8] sm:$0xff]  ;;  %v6836_v60 = vld [vmem:[%s12107_s3 + $0x420] sm:$0xff] }
0x2001   : > { %7557 = vmatpush.msra.mxu0 %v6895_v23  ;;  %v7036_v39 = vadd.f32 %v7035_v28, %v6964_v24  ;;  %v7055_v20 = vpop.f32.mrf.mxu3  ;;  %v6885_v24 = vld [vmem:[%s12107_s3 + $0x5a8] sm:$0xff]  ;;  %v6855_v23 = vld [vmem:[%s12107_s3 + $0x4b8] sm:$0xff]  ;;  %v6971_v28 = vperm.slane %v11772_v42, 0 }
0x2002   : > { %v7056_v37 = vadd.f32 %v7055_v20, %v6965_v25  ;;  %7498 = vmatpush.msra.mxu1 %v6846_v26  ;;  %v7095_v2 = vpop.f32.mrf.mxu1  ;;  %v6871_v25 = vld [vmem:[%s12107_s3 + $0x538] sm:$0xff]  ;;  %v6884_v26 = vld [vmem:[%s12107_s3 + $0x5a0] sm:$0xff]  ;;  %v6974_v20 = vperm.slane %v11772_v42, 3 }
0x2003   : > { %v7319_v54 = vmax.f32 %v7036_v39, 0.0  ;;  %7558 = vmatpush.msra.mxu0 %v6894_v32  ;;  %v7096_v38 = vadd.f32 %v7095_v2, %v6967_v27  ;;  %v7155_v3 = vpop.f32.mrf.mxu0  ;;  %v6835_v27 = vld [vmem:[%s12107_s3 + $0x418] sm:$0xff]  ;;  %v6854_v32 = vld [vmem:[%s12107_s3 + $0x4b0] sm:$0xff] }
0x2004   : > { %v7320_v41 = vmax.f32 %v7056_v37, 0.0  ;;  %v7156_v44 = vadd.f32 %v7155_v3, %v6970_v56  ;;  %7499 = vmatpush.msra.mxu1 %v6845_v35  ;;  %v6870_v56 = vld [vmem:[%s12107_s3 + $0x530] sm:$0xff]  ;;  %v6883_v35 = vld [vmem:[%s12107_s3 + $0x598] sm:$0xff]  ;;  %v6833_v3 = vld [vmem:[%s12107_s3 + $0x408] sm:$0xff] }
0x2005   : > { %v7322_v14 = vmax.f32 %v7096_v38, 0.0  ;;  %7559 = vmatpush.msra.mxu0 %v6893_v43  ;;  %7373 = vmatmul.f32.vlgmr.msra.gmra.mxu2 %v7319_v54  ;;  %v6834_v37 = vld [vmem:[%s12107_s3 + $0x410] sm:$0xff]  ;;  %v6853_v43 = vld [vmem:[%s12107_s3 + $0x4a8] sm:$0xff] }
0x2006   : > { %v7325_v12 = vmax.f32 %v7156_v44, 0.0  ;;  %7393 = vmatmul.f32.vlgmr.msrb.gmra.mxu3 %v7320_v41  ;;  %7500 = vmatpush.msra.mxu1 %v6844_v40  ;;  %v6869_v54 = vld [vmem:[%s12107_s3 + $0x528] sm:$0xff]  ;;  %v6882_v38 = vld [vmem:[%s12107_s3 + $0x590] sm:$0xff]  ;;  %v6852_v41 = vld [vmem:[%s12107_s3 + $0x4a0] sm:$0xff] }
0x2007   : > { %7517 = vmatpush.msra.mxu2 %v6863_v8  ;;  %7537 = vmatpush.msrb.mxu3 %v6879_v45  ;;  %v6868_v44 = vld [vmem:[%s12107_s3 + $0x520] sm:$0xff]  ;;  %v6881_v45 = vld [vmem:[%s12107_s3 + $0x588] sm:$0xff] }
0x2008   : > { %7560 = vmatpush.msra.mxu0 %v6892_v61  ;;  %7433 = vmatmul.f32.vlgmr.msrb.gmra.mxu1 %v7322_v14  ;;  %v7115_v36 = vpop.f32.mrf.mxu2  ;;  %v6832_v14 = vld [vmem:[%s12107_s3 + $0x400] sm:$0xff]  ;;  %v6851_v61 = vld [vmem:[%s12107_s3 + $0x498] sm:$0xff] }
0x2009   : > { %7493 = vmatmul.f32.vlgmr.msrb.gmra.mxu0 %v7325_v12  ;;  %7501 = vmatpush.msra.mxu1 %v6843_v48  ;;  %v7116_v46 = vadd.f32 %v7115_v36, %v6968_v30  ;;  %v7135_v63 = vpop.f32.mrf.mxu3  ;;  %v6867_v30 = vld [vmem:[%s12107_s3 + $0x518] sm:$0xff]  ;;  %v6972_v12 = vperm.slane %v11772_v42, 1  ;;  %v6880_v48 = vld [vmem:[%s12107_s3 + $0x580] sm:$0xff] }
0x200a   : > { %7518 = vmatpush.msra.mxu2 %v6862_v0  ;;  %7538 = vmatpush.msrb.mxu3 %v6878_v58  ;;  %v7136_v5 = vadd.f32 %v7135_v63, %v6969_v49  ;;  %v7175_v39 = vpop.f32.mrf.mxu1  ;;  %v6973_v58 = vperm.slane %v11772_v42, 2  ;;  %v6850_v63 = vld [vmem:[%s12107_s3 + $0x490] sm:$0xff] }
0x200b   : > { %7561 = vmatpush.msra.mxu0 %v6891_v10  ;;  %v7323_v55 = vmax.f32 %v7116_v46, 0.0  ;;  %7502 = vmatpush.msra.mxu1 %v6842_v62  ;;  %v7235_v2 = vpop.f32.mrf.mxu0  ;;  %v7176_v40 = vadd.f32 %v7175_v39, %v6971_v28  ;;  %v6911_v10 = vld [vmem:[%s12107_s3 + $0x678] sm:$0xff]  ;;  %v6922_v39 = vld [vmem:[%s12107_s3 + $0x6d0] sm:$0xff] }
0x200c   : > { %v7324_v9 = vmax.f32 %v7136_v5, 0.0  ;;  %7519 = vmatpush.msra.mxu2 %v6861_v1  ;;  %7539 = vmatpush.msrb.mxu3 %v6877_v4  ;;  %v7236_v8 = vadd.f32 %v7235_v2, %v6974_v20  ;;  %v6959_v46 = vld [vmem:[%s12107_s3 + $0x7f8] sm:$0xff]  ;;  %v6866_v1 = vld [vmem:[%s12107_s3 + $0x510] sm:$0xff]  ;;  %v6921_v2 = vld [vmem:[%s12107_s3 + $0x6c8] sm:$0xff] }
0x200d   : > { %7562 = vmatpush.msra.mxu0 %v6890_v50  ;;  %7503 = vmatpush.msra.mxu1 %v6841_v52  ;;  %v7326_v49 = vmax.f32 %v7176_v40, 0.0  ;;  %v6910_v4 = vld [vmem:[%s12107_s3 + $0x670] sm:$0xff]  ;;  %v6849_v52 = vld [vmem:[%s12107_s3 + $0x488] sm:$0xff]  ;;  %v6939_v28 = vld [vmem:[%s12107_s3 + $0x758] sm:$0xff] }
0x200e   : > { %7520 = vmatpush.msra.mxu2 %v6860_v6  ;;  %7540 = vmatpush.msrb.mxu3 %v6876_v34  ;;  %v7329_v36 = vmax.f32 %v7236_v8, 0.0  ;;  %v6958_v50 = vld [vmem:[%s12107_s3 + $0x7f0] sm:$0xff]  ;;  %v6865_v6 = vld [vmem:[%s12107_s3 + $0x508] sm:$0xff]  ;;  %v6936_v40 = vld [vmem:[%s12107_s3 + $0x740] sm:$0xff] }
0x200f   : > { %7563 = vmatpush.msra.mxu0 %v6889_v33  ;;  %7453 = vmatmul.f32.vlgmr.msrb.gmra.mxu2 %v7323_v55  ;;  %v6909_v34 = vld [vmem:[%s12107_s3 + $0x668] sm:$0xff]  ;;  %v6848_v33 = vld [vmem:[%s12107_s3 + $0x480] sm:$0xff]  ;;  %v6938_v20 = vld [vmem:[%s12107_s3 + $0x750] sm:$0xff] }
0x2010   : > { %7473 = vmatmul.f32.vlgmr.msra.gmra.mxu3 %v7324_v9  ;;  %7504 = vmatpush.msra.mxu1 %v6840_v7  ;;  %v7195_v0 = vpop.f32.mrf.mxu2  ;;  %v6957_v9 = vld [vmem:[%s12107_s3 + $0x7e8] sm:$0xff]  ;;  %v6864_v7 = vld [vmem:[%s12107_s3 + $0x500] sm:$0xff]  ;;  %v6919_v8 = vld [vmem:[%s12107_s3 + $0x6b8] sm:$0xff] }
0x2011   : > { %7521 = vmatpush.msra.mxu2 %v6859_v11  ;;  %7541 = vmatpush.msrb.mxu3 %v6875_v13  ;;  %v7215_v62 = vpop.f32.mrf.mxu3  ;;  %v7196_v5 = vadd.f32 %v7195_v0, %v6972_v12  ;;  %v6908_v13 = vld [vmem:[%s12107_s3 + $0x660] sm:$0xff]  ;;  %v6918_v12 = vld [vmem:[%s12107_s3 + $0x6b0] sm:$0xff]  ;;  %v6978_v0 = vperm.slane %v11772_v42, 7 }
0x2012   : > { %7564 = vmatpush.msra.mxu0 %v6888_v53  ;;  %7505 = vmatpush.msra.mxu1 %v6839_v51  ;;  %v7216_v55 = vadd.f32 %v7215_v62, %v6973_v58  ;;  %v6927_v51 = vld [vmem:[%s12107_s3 + $0x6f8] sm:$0xff]  ;;  %v6917_v62 = vld [vmem:[%s12107_s3 + $0x6a8] sm:$0xff] }
0x2013   : > { %7522 = vmatpush.msra.mxu2 %v6858_v29  ;;  %7542 = vmatpush.msrb.mxu3 %v6874_v57  ;;  %v7327_v11 = vmax.f32 %v7196_v5, 0.0  ;;  %v6943_v29 = vld [vmem:[%s12107_s3 + $0x778] sm:$0xff]  ;;  %v6956_v57 = vld [vmem:[%s12107_s3 + $0x7e0] sm:$0xff] }
0x2014   : > { %7565 = vmatpush.msra.mxu0 %v6887_v15  ;;  %7506 = vmatpush.msra.mxu1 %v6838_v16  ;;  %v7328_v53 = vmax.f32 %v7216_v55, 0.0  ;;  %v6907_v15 = vld [vmem:[%s12107_s3 + $0x658] sm:$0xff]  ;;  %v6926_v16 = vld [vmem:[%s12107_s3 + $0x6f0] sm:$0xff]  ;;  %v6916_v5 = vld [vmem:[%s12107_s3 + $0x6a0] sm:$0xff] }
0x2015   : > { %7523 = vmatpush.msra.mxu2 %v6857_v17  ;;  %7543 = vmatpush.msrb.mxu3 %v6873_v18  ;;  %v6942_v17 = vld [vmem:[%s12107_s3 + $0x770] sm:$0xff]  ;;  %v6955_v18 = vld [vmem:[%s12107_s3 + $0x7d8] sm:$0xff]  ;;  %v6945_v55 = vld [vmem:[%s12107_s3 + $0x788] sm:$0xff] }
0x2016   : > { %7566 = vmatpush.msra.mxu0 %v6886_v19  ;;  %7507 = vmatpush.msra.mxu1 %v6837_v21  ;;  %v6906_v19 = vld [vmem:[%s12107_s3 + $0x650] sm:$0xff]  ;;  %v6925_v21 = vld [vmem:[%s12107_s3 + $0x6e8] sm:$0xff]  ;;  %v6947_v58 = vld [vmem:[%s12107_s3 + $0x798] sm:$0xff] }
0x2017   : > { %7524 = vmatpush.msra.mxu2 %v6856_v31  ;;  %7544 = vmatpush.msrb.mxu3 %v6872_v59  ;;  %v6941_v31 = vld [vmem:[%s12107_s3 + $0x768] sm:$0xff]  ;;  %v6954_v59 = vld [vmem:[%s12107_s3 + $0x7d0] sm:$0xff] }
0x2018   : > { %7567 = vmatpush.msra.mxu0 %v6885_v24  ;;  %7508 = vmatpush.msra.mxu1 %v6836_v60  ;;  %v6905_v24 = vld [vmem:[%s12107_s3 + $0x648] sm:$0xff]  ;;  %v6924_v60 = vld [vmem:[%s12107_s3 + $0x6e0] sm:$0xff] }
0x2019   : > { %7525 = vmatpush.msra.mxu2 %v6855_v23  ;;  %7545 = vmatpush.msrb.mxu3 %v6871_v25  ;;  %v6940_v23 = vld [vmem:[%s12107_s3 + $0x760] sm:$0xff]  ;;  %v6953_v25 = vld [vmem:[%s12107_s3 + $0x7c8] sm:$0xff] }
0x201a   : > { %7568 = vmatpush.msra.mxu0 %v6884_v26  ;;  %7509 = vmatpush.msra.mxu1 %v6835_v27  ;;  %v6904_v26 = vld [vmem:[%s12107_s3 + $0x640] sm:$0xff]  ;;  %v6923_v27 = vld [vmem:[%s12107_s3 + $0x6d8] sm:$0xff] }
0x201b   : > { %7526 = vmatpush.msra.mxu2 %v6854_v32  ;;  %7546 = vmatpush.msrb.mxu3 %v6870_v56  ;;  %v6952_v32 = vld [vmem:[%s12107_s3 + $0x7c0] sm:$0xff]  ;;  %v6903_v56 = vld [vmem:[%s12107_s3 + $0x638] sm:$0xff] }
0x201c   : > { %7569 = vmatpush.msra.mxu0 %v6883_v35  ;;  %7510 = vmatpush.msra.mxu1 %v6834_v37  ;;  %v6951_v35 = vld [vmem:[%s12107_s3 + $0x7b8] sm:$0xff]  ;;  %v6902_v37 = vld [vmem:[%s12107_s3 + $0x630] sm:$0xff] }
0x201d   : > { %7527 = vmatpush.msra.mxu2 %v6853_v43  ;;  %7547 = vmatpush.msrb.mxu3 %v6869_v54  ;;  %v6937_v43 = vld [vmem:[%s12107_s3 + $0x748] sm:$0xff]  ;;  %v6950_v54 = vld [vmem:[%s12107_s3 + $0x7b0] sm:$0xff] }
0x201e   : > { %7570 = vmatpush.msra.mxu0 %v6882_v38  ;;  %7511 = vmatpush.msra.mxu1 %v6833_v3  ;;  %v6901_v38 = vld [vmem:[%s12107_s3 + $0x628] sm:$0xff]  ;;  %v6920_v3 = vld [vmem:[%s12107_s3 + $0x6c0] sm:$0xff] }
0x201f   : > { %7528 = vmatpush.msra.mxu2 %v6852_v41  ;;  %7548 = vmatpush.msrb.mxu3 %v6868_v44  ;;  %v6949_v41 = vld [vmem:[%s12107_s3 + $0x7a8] sm:$0xff]  ;;  %v6900_v44 = vld [vmem:[%s12107_s3 + $0x620] sm:$0xff] }
0x2020   : > { %7571 = vmatpush.msra.mxu0 %v6881_v45  ;;  %7512 = vmatpush.msra.mxu1 %v6832_v14  ;;  %v6935_v45 = vld [vmem:[%s12107_s3 + $0x738] sm:$0xff]  ;;  %v6948_v14 = vld [vmem:[%s12107_s3 + $0x7a0] sm:$0xff] }
0x2021   : > { %7529 = vmatpush.msra.mxu2 %v6851_v61  ;;  %7549 = vmatpush.msrb.mxu3 %v6867_v30  ;;  %v6899_v61 = vld [vmem:[%s12107_s3 + $0x618] sm:$0xff]  ;;  %v6975_v30 = vperm.slane %v11772_v42, 4 }
0x2022   : > { %7572 = vmatpush.msra.mxu0 %v6880_v48  ;;  %7513 = vmatmul.f32.vlgmr.msra.gmra.mxu1 %v7326_v49  ;;  %v6934_v48 = vld [vmem:[%s12107_s3 + $0x730] sm:$0xff]  ;;  %v7255_v49 = vpop.f32.mrf.mxu1 }
0x2023   : > { %7573 = vmatmul.f32.vlgmr.msra.gmra.mxu0 %v7329_v36  ;;  %7577 = vmatpush.msrb.mxu1 %v6911_v10  ;;  %v6898_v10 = vld [vmem:[%s12107_s3 + $0x610] sm:$0xff]  ;;  %v7315_v36 = vpop.f32.mrf.mxu0 }
0x2024   : > { %7637 = vmatpush.msrb.mxu0 %v6959_v46  ;;  %7530 = vmatpush.msra.mxu2 %v6850_v63  ;;  %v6933_v46 = vld [vmem:[%s12107_s3 + $0x728] sm:$0xff]  ;;  %v6946_v63 = vld [vmem:[%s12107_s3 + $0x790] sm:$0xff] }
0x2025   : > { %7550 = vmatpush.msrb.mxu3 %v6866_v1  ;;  %7578 = vmatpush.msrb.mxu1 %v6910_v4  ;;  %v6897_v1 = vld [vmem:[%s12107_s3 + $0x608] sm:$0xff]  ;;  %v7256_v4 = vadd.f32 %v7255_v49, %v6975_v30 }
0x2026   : > { %7638 = vmatpush.msrb.mxu0 %v6958_v50  ;;  %7531 = vmatpush.msra.mxu2 %v6849_v52  ;;  %v6932_v50 = vld [vmem:[%s12107_s3 + $0x720] sm:$0xff]  ;;  %v7316_v52 = vadd.f32 %v7315_v36, %v6978_v0 }
0x2027   : > { %7551 = vmatpush.msrb.mxu3 %v6865_v6  ;;  %7579 = vmatpush.msrb.mxu1 %v6909_v34  ;;  %v6896_v6 = vld [vmem:[%s12107_s3 + $0x600] sm:$0xff]  ;;  %v6976_v34 = vperm.slane %v11772_v42, 5 }
0x2028   : > { %7639 = vmatpush.msrb.mxu0 %v6957_v9  ;;  %7532 = vmatpush.msra.mxu2 %v6848_v33  ;;  %v6915_v9 = vld [vmem:[%s12107_s3 + $0x698] sm:$0xff] }
0x2029   : > { %7552 = vmatpush.msrb.mxu3 %v6864_v7  ;;  %7533 = vmatmul.f32.vlgmr.msra.gmra.mxu2 %v7327_v11  ;;  %v6931_v33 = vld [vmem:[%s12107_s3 + $0x718] sm:$0xff]  ;;  %v7275_v7 = vpop.f32.mrf.mxu2  ;;  %v6977_v11 = vperm.slane %v11772_v42, 6  ;;  %v6913_v42 = vld [vmem:[%s12107_s3 + $0x688] sm:$0xff] }
0x202a   : > { %7553 = vmatmul.f32.vlgmr.msrb.gmra.mxu3 %v7328_v53  ;;  %7580 = vmatpush.msrb.mxu1 %v6908_v13  ;;  %v6944_v13 = vld [vmem:[%s12107_s3 + $0x780] sm:$0xff]  ;;  %v7330_v53 = vmax.f32 %v7256_v4, 0.0 }
0x202b   : > { %7597 = vmatpush.msrb.mxu2 %v6927_v51  ;;  %7617 = vmatpush.msra.mxu3 %v6943_v29  ;;  %v7295_v51 = vpop.f32.mrf.mxu3  ;;  %v6914_v29 = vld [vmem:[%s12107_s3 + $0x690] sm:$0xff] }
0x202c   : > { %7640 = vmatpush.msrb.mxu0 %v6956_v57  ;;  %7581 = vmatpush.msrb.mxu1 %v6907_v15  ;;  %v7333_v57 = vmax.f32 %v7316_v52, 0.0  ;;  %v6930_v15 = vld [vmem:[%s12107_s3 + $0x710] sm:$0xff] }
0x202d   : > { %7598 = vmatpush.msrb.mxu2 %v6926_v16  ;;  %7618 = vmatpush.msra.mxu3 %v6942_v17  ;;  %v7276_v16 = vadd.f32 %v7275_v7, %v6976_v34  ;;  %v7296_v17 = vadd.f32 %v7295_v51, %v6977_v11 }
0x202e   : > { %7641 = vmatpush.msrb.mxu0 %v6955_v18  ;;  %7582 = vmatpush.msrb.mxu1 %v6906_v19  ;;  %v6929_v18 = vld [vmem:[%s12107_s3 + $0x708] sm:$0xff]  ;;  %v6912_v19 = vld [vmem:[%s12107_s3 + $0x680] sm:$0xff] }
0x202f   : > { %7599 = vmatpush.msrb.mxu2 %v6925_v21  ;;  %7619 = vmatpush.msra.mxu3 %v6941_v31  ;;  %v6928_v21 = vld [vmem:[%s12107_s3 + $0x700] sm:$0xff]  ;;  %v7331_v31 = vmax.f32 %v7276_v16, 0.0  ;;  %s8674_s3 = sshll.u32 %s9840_s0, 3 }
0x2030   : > { %7642 = vmatpush.msrb.mxu0 %v6954_v59  ;;  %7583 = vmatpush.msrb.mxu1 %v6905_v24  ;;  %v7332_v59 = vmax.f32 %v7296_v17, 0.0  ;;  %v8979_v24 = vld [vmem:[#allocation19] ss:$0 sm:$0xff]  ;;  %s7845_s12 = scalar_lea.hbm %s12111_s17, %s8674_s3 }
0x2031   : > { %7600 = vmatpush.msrb.mxu2 %v6924_v60  ;;  %7620 = vmatpush.msra.mxu3 %v6940_v23  ;;  %s7849_s4 = sshll.u32 %s7845_s12, 4  ;;  %s7850_s4 = int_to_ptr.hbm [resolvable:$true] %s7849_s4 }
0x2032   : > { %7643 = vmatpush.msrb.mxu0 %v6953_v25  ;;  %7584 = vmatpush.msrb.mxu1 %v6904_v26 }
0x2033   : > { %7601 = vmatpush.msrb.mxu2 %v6923_v27  ;;  %7621 = vmatpush.msra.mxu3 %v6939_v28 }
0x2034   : > { %7644 = vmatpush.msrb.mxu0 %v6952_v32  ;;  %7585 = vmatpush.msrb.mxu1 %v6903_v56 }
0x2035   : > { %7602 = vmatpush.msrb.mxu2 %v6922_v39  ;;  %7622 = vmatpush.msra.mxu3 %v6938_v20 }
0x2036   : > { %7645 = vmatpush.msrb.mxu0 %v6951_v35  ;;  %7586 = vmatpush.msrb.mxu1 %v6902_v37 }
0x2037   : > { %7603 = vmatpush.msrb.mxu2 %v6921_v2  ;;  %7623 = vmatpush.msra.mxu3 %v6937_v43 }
0x2038   : > { %7646 = vmatpush.msrb.mxu0 %v6950_v54  ;;  %7587 = vmatpush.msrb.mxu1 %v6901_v38 }
0x2039   : > { %7604 = vmatpush.msrb.mxu2 %v6920_v3  ;;  %7624 = vmatpush.msra.mxu3 %v6936_v40 }
0x203a   : > { %7647 = vmatpush.msrb.mxu0 %v6949_v41  ;;  %7588 = vmatpush.msrb.mxu1 %v6900_v44 }
0x203b   : > { %7605 = vmatpush.msrb.mxu2 %v6919_v8  ;;  %7625 = vmatpush.msra.mxu3 %v6935_v45 }
0x203c   : > { %7648 = vmatpush.msrb.mxu0 %v6948_v14  ;;  %7589 = vmatpush.msrb.mxu1 %v6899_v61 }
0x203d   : > { %7606 = vmatpush.msrb.mxu2 %v6918_v12  ;;  %7626 = vmatpush.msra.mxu3 %v6934_v48 }
0x203e   : > { %7649 = vmatpush.msrb.mxu0 %v6947_v58  ;;  %7590 = vmatpush.msrb.mxu1 %v6898_v10 }
0x203f   : > { %7607 = vmatpush.msrb.mxu2 %v6917_v62  ;;  %7627 = vmatpush.msra.mxu3 %v6933_v46 }
0x2040   : > { %7650 = vmatpush.msrb.mxu0 %v6946_v63  ;;  %7591 = vmatpush.msrb.mxu1 %v6897_v1 }
0x2041   : > { %7608 = vmatpush.msrb.mxu2 %v6916_v5  ;;  %7628 = vmatpush.msra.mxu3 %v6932_v50 }
0x2042   : > { %7651 = vmatpush.msrb.mxu0 %v6945_v55  ;;  %7592 = vmatpush.msrb.mxu1 %v6896_v6 }
0x2043   : > { %7609 = vmatpush.msrb.mxu2 %v6915_v9  ;;  %7629 = vmatpush.msra.mxu3 %v6931_v33 }
0x2044   : > { %7652 = vmatpush.msrb.mxu0 %v6944_v13  ;;  %7593 = vmatmul.f32.vlgmr.msrb.gmra.mxu1 %v7330_v53  ;;  %v8980_v13 = vld [vmem:[#allocation16] ss:$0 sm:$0xff] }
0x2045   : > { %7653 = vmatmul.f32.vlgmr.msrb.gmra.mxu0 %v7333_v57  ;;  %7610 = vmatpush.msrb.mxu2 %v6914_v29  ;;  %v8981_v29 = vld [vmem:[#allocation17] ss:$0 sm:$0xff] }
0x2046   : > { %7630 = vmatpush.msra.mxu3 %v6930_v15 }
0x2047   : > { %7611 = vmatpush.msrb.mxu2 %v6913_v42 }
0x2048   : > { %7631 = vmatpush.msra.mxu3 %v6929_v18 }
0x2049   : > { %7612 = vmatpush.msrb.mxu2 %v6912_v19 }
0x204a   : > { %7632 = vmatpush.msra.mxu3 %v6928_v21  ;;  %7613 = vmatmul.f32.vlgmr.msrb.gmra.mxu2 %v7331_v31  ;;  %v7733_v31 = vld [vmem:[%s9807_s14 + $0x38] sm:$0xff] }
0x204b   : > { %7633 = vmatmul.f32.vlgmr.msra.gmra.mxu3 %v7332_v59  ;;  %7753 = vmatpush.msra.mxu1 %v7733_v31  ;;  %v7732_v59 = vld [vmem:[%s9807_s14 + $0x30] sm:$0xff] }
0x204d   : > { %7754 = vmatpush.msra.mxu1 %v7732_v59 }
0x207c   : > { %v7354_v60 = vpop.f32.mrf.mxu1 }
0x207d   : > { %v7355_v25 = vadd.f32 %v8979_v24, %v7354_v60  ;;  %v7414_v32 = vpop.f32.mrf.mxu0  ;;  %v7731_v24 = vld [vmem:[%s9807_s14 + $0x28] sm:$0xff]  ;;  %v7730_v60 = vld [vmem:[%s9807_s14 + $0x20] sm:$0xff] }
0x207e   : > { %7755 = vmatpush.msra.mxu1 %v7731_v24 }
0x2080   : > { %7756 = vmatpush.msra.mxu1 %v7730_v60 }
0x2085   : > { %v7434_v39 = vpop.f32.mrf.mxu1 }
0x2086   : > { %v7494_v54 = vpop.f32.mrf.mxu0 }
0x2088   : > { %v7374_v23 = vpop.f32.mrf.mxu2 }
0x2089   : > { %v7375_v26 = vadd.f32 %v7374_v23, %v7355_v25  ;;  %v7394_v27 = vpop.f32.mrf.mxu3  ;;  %v7729_v23 = vld [vmem:[%s9807_s14 + $0x18] sm:$0xff] }
0x208a   : > { %v7737_v25 = vld [vmem:[%s9807_s14 + $0x58] sm:$0xff]  ;;  %7780 = vmatpush.msra.mxu2 %v7729_v23 }
0x208b   : > { %v7395_v28 = vadd.f32 %v7394_v27, %v7375_v26  ;;  %v7728_v26 = vld [vmem:[%s9807_s14 + $0x10] sm:$0xff]  ;;  %7805 = vmatpush.msrb.mxu3 %v7737_v25 }
0x208c   : > { %v7736_v27 = vld [vmem:[%s9807_s14 + $0x50] sm:$0xff]  ;;  %7781 = vmatpush.msra.mxu2 %v7728_v26 }
0x208d   : > { %v7415_v56 = vadd.f32 %v7414_v32, %v7395_v28  ;;  %v7727_v32 = vld [vmem:[%s9807_s14 + $0x8] sm:$0xff]  ;;  %7806 = vmatpush.msrb.mxu3 %v7736_v27 }
0x208e   : > { %7782 = vmatpush.msra.mxu2 %v7727_v32 }
0x208f   : > { %v7435_v20 = vadd.f32 %v7434_v39, %v7415_v56  ;;  %v7735_v56 = vld [vmem:[%s9807_s14 + $0x48] sm:$0xff] }
0x2090   : > { %7807 = vmatpush.msrb.mxu3 %v7735_v56 }
0x2092   : > { %v7454_v35 = vpop.f32.mrf.mxu2 }
0x2093   : > { %v7455_v37 = vadd.f32 %v7454_v35, %v7435_v20  ;;  %v7474_v2 = vpop.f32.mrf.mxu3  ;;  %v7726_v20 = vld [vmem:[%s9807_s14] sm:$0xff] }
0x2094   : > { %v7734_v35 = vld [vmem:[%s9807_s14 + $0x40] sm:$0xff]  ;;  %7783 = vmatpush.msra.mxu2 %v7726_v20 }
0x2095   : > { %v7475_v43 = vadd.f32 %v7474_v2, %v7455_v37  ;;  %7808 = vmatpush.msrb.mxu3 %v7734_v35 }
0x2097   : > { %v7495_v3 = vadd.f32 %v7494_v54, %v7475_v43 }
0x209f   : > { %v7514_v38 = vpop.f32.mrf.mxu1 }
0x20a0   : > { %v7515_v41 = vadd.f32 %v7514_v38, %v7495_v3  ;;  %v7574_v14 = vpop.f32.mrf.mxu0 }
0x20ac   : > { %v7534_v40 = vpop.f32.mrf.mxu2 }
0x20ad   : > { %v7535_v44 = vadd.f32 %v7534_v40, %v7515_v41  ;;  %v7554_v8 = vpop.f32.mrf.mxu3  ;;  %v8982_v41 = vld [vmem:[#allocation20] ss:$0 sm:$0xff] }
0x20af   : > { %v7555_v45 = vadd.f32 %v7554_v8, %v7535_v44  ;;  %v8983_v44 = vld [vmem:[#allocation22] ss:$0 sm:$0xff] }
0x20b1   : > { %v7575_v30 = vadd.f32 %v7574_v14, %v7555_v45 }
0x20c1   : > { %v7594_v61 = vpop.f32.mrf.mxu1 }
0x20c2   : > { %v7595_v12 = vadd.f32 %v7594_v61, %v7575_v30  ;;  %v7654_v10 = vpop.f32.mrf.mxu0 }
0x20cd   : > { %v7614_v48 = vpop.f32.mrf.mxu2 }
0x20ce   : > { %v7615_v49 = vadd.f32 %v7614_v48, %v7595_v12  ;;  %v7634_v0 = vpop.f32.mrf.mxu3 }
0x20d0   : > { %v7635_v58 = vadd.f32 %v7634_v0, %v7615_v49 }
0x20d2   : > { %v7655_v36 = vadd.f32 %v7654_v10, %v7635_v58 }
0x20d4   : > { %v7657_v62 = vadd.f32 %v7655_v36, %v11529_v22 }
0x20d6   : > { %v7660_v46 = vsel %vm1714_vm3, %v7657_v62, 0.0 }
0x20d7   : > { %7661 = vadd.xlane.f32.xlu1 %v7660_v46 }
0x214a   : > { %v7662_v63 = vpop.xlane.xlu1 %7661 }
0x214b   : > { %v7663_v1 = vmul.f32 %v7662_v63, %v10241_v47 }
0x214d   : > { %v7664_v4 = vsub.f32 %v7657_v62, %v7663_v1  ;;  %v7815_v1 = vld [vmem:[%s1492_s20] sm:$0xff]  ;;  %s9454_s20 = sshra.s32 %s7850_s4, 4  ;;  %s9455_s20 = int_to_ptr.hbm [resolvable:$true] %s9454_s20 }
0x214e   : > { %s9456_s6 = scalar_lea.hbm %s9455_s20, 8  ;;  %p9461_p7 = scmp.lt.s32.totalorder %s9455_s20, %s12111_s17 }
0x214f   : > { %v7665_v5 = vmul.f32 %v7664_v4, %v7664_v4  ;;  %p9457_p9 = scmp.ne.s32.totalorder %s9455_s20, %s9456_s6  ;;  %p9462_p8 = scmp.lt.s32.totalorder %s9460_s22, %s9456_s6 }
0x2151   : > { %v7666_v50 = vsel %vm1714_vm3, %v7665_v5, 0.0  ;;  %p9458_p12 = pnand %p9457_p9, %p9857_p5  ;;  %p9463_p11 = por %p9462_p8, %p9461_p7 }
0x2152   : > { %7667 = vadd.xlane.f32.xlu2 %v7666_v50 }
0x2153   : > { %p9459_p0 = pneg %p9458_p12 }
0x2155   : > { %p9464_p13 = pnand %p9463_p11, %p9459_p0 }
0x21c5   : > { %v7668_v52 = vpop.xlane.xlu2 %7667 }
0x21c6   : > { %v7669_v55 = vmul.f32 %v7668_v52, %v10241_v47 }
0x21c8   : > { %v7670_v6 = vadd.f32 1e-05, %v7669_v55 }
0x21ca   : > { %9106 = vrsqrt.f32 %v7670_v6  ;;  %vm7677_vm6 = vweird.f32 %v7670_v6 }
0x21d0   : > { %v9107_v34 = vpop.eup %9106 }
0x21d1   : > { %v7672_v9 = vmul.f32 %v9107_v34, %v7670_v6  ;;  %vm7678_vm5 = vweird.f32 %v9107_v34 }
0x21d2   : > { %vm7679_vm7 = vmor %vm7677_vm6, %vm7678_vm5 }
0x21d3   : > { %v7673_v33 = vmul.f32 %v9107_v34, %v7672_v9 }
0x21d5   : > { %v7674_v22 = vmul.f32 0.5, %v7673_v33 }
0x21d7   : > { %v7675_v7 = vsub.f32 1.5, %v7674_v22 }
0x21d9   : > { %v7676_v11 = vmul.f32 %v9107_v34, %v7675_v7 }
0x21db   : > { %v7680_v53 = vsel %vm7679_vm7, %v9107_v34, %v7676_v11 }
0x21dc   : > { %v7681_v51 = vmul.f32 %v7680_v53, %v7664_v4 }
0x21de   : > { %v7685_v57 = vmul.f32 %v8980_v13, %v7681_v51 }
0x21e0   : > { %v7689_v15 = vadd.f32 %v8981_v29, %v7685_v57 }
0x21e2   : > { %v7692_v16 = vsel %vm1714_vm3, %v7689_v15, 0.0 }
0x21e3   : > { %7693 = vadd.xlane.f32.xlu0 %v7692_v16 }
0x2256   : > { %v7694_v42 = vpop.xlane.xlu0 %7693 }
0x2257   : > { %v7695_v17 = vmul.f32 %v7694_v42, %v10241_v47 }
0x2259   : > { %v7696_v18 = vsub.f32 %v7689_v15, %v7695_v17 }
0x225b   : > { %v7697_v19 = vmul.f32 %v7696_v18, %v7696_v18 }
0x225d   : > { %v7698_v21 = vsel %vm1714_vm3, %v7697_v19, 0.0 }
0x225e   : > { %7699 = vadd.xlane.f32.xlu2 %v7698_v21 }
0x22d1   : > { %v7700_v28 = vpop.xlane.xlu2 %7699 }
0x22d2   : > { %v7701_v39 = vmul.f32 %v7700_v28, %v10241_v47 }
0x22d4   : > { %v7702_v37 = vadd.f32 1e-05, %v7701_v39 }
0x22d6   : > { %9108 = vrsqrt.f32 %v7702_v37  ;;  %vm7709_vm9 = vweird.f32 %v7702_v37 }
0x22dc   : > { %v9109_v2 = vpop.eup %9108 }
0x22dd   : > { %v7704_v43 = vmul.f32 %v9109_v2, %v7702_v37  ;;  %vm7710_vm8 = vweird.f32 %v9109_v2 }
0x22de   : > { %vm7711_vm10 = vmor %vm7709_vm9, %vm7710_vm8 }
0x22df   : > { %v7705_v54 = vmul.f32 %v9109_v2, %v7704_v43 }
0x22e1   : > { %v7706_v38 = vmul.f32 0.5, %v7705_v54 }
0x22e3   : > { %v7707_v3 = vsub.f32 1.5, %v7706_v38 }
0x22e5   : > { %v7708_v40 = vmul.f32 %v9109_v2, %v7707_v3 }
0x22e7   : > { %v7712_v47 = vsel %vm7711_vm10, %v9109_v2, %v7708_v40 }
0x22e8   : > { %v7713_v8 = vmul.f32 %v7712_v47, %v7696_v18 }
0x22ea   : > { %v7717_v45 = vmul.f32 %v8982_v41, %v7713_v8 }
0x22ec   : > { %v7721_v14 = vadd.f32 %v8983_v44, %v7717_v45 }
0x22ee   : > { %7722 = vst.msk [vmem:[#allocation4] sm:$0xff] %vm1714_vm3, %v7721_v14  ;;  %8670 = vmatmul.msk.f32.vlgmr.msra.gmra.mxu1 %vm1714_vm3, %v7721_v14 }
0x22ef   : > { %7723 = vst.msk [vmem:[#allocation4 + $0x8] sm:$0xff] %vm1714_vm3, %v7721_v14 }
0x22f5   : > { %v7724_v61 = vld [vmem:[#allocation4] sm:$0xff] }
0x22f6   : > { %v7725_v30 = vld [vmem:[#allocation4 + $0x8] sm:$0xff]  ;;  %v7763_v12 = vrot.slane %v7724_v61, 7  ;;  %v7788_v48 = vrot.slane %v7724_v61, 1 }
0x22f7   : > { %v7764_v49 = vrot.slane %v7725_v30, 7  ;;  %v7789_v0 = vrot.slane %v7725_v30, 1 }
0x22f9   : > { %v7765_v58 = vsel %vm1542_vm2, %v7763_v12, %v7764_v49  ;;  %v7790_v10 = vsel %vm1576_vm1, %v7788_v48, %v7789_v0 }
0x22fa   : > { %8671 = vmatmul.msk.f32.vlgmr.msra.gmra.mxu2 %vm1714_vm3, %v7765_v58  ;;  %8672 = vmatmul.msk.f32.vlgmr.msrb.gmra.mxu3 %vm1714_vm3, %v7790_v10 }
0x236b   : > { %v7758_v36 = vpop.f32.mrf.mxu1 }
0x237d   : > { %v7785_v62 = vpop.f32.mrf.mxu2  ;;  %v7810_v63 = vpop.f32.mrf.mxu3 }
0x237e   : > { %v7786_v46 = vadd.f32 %v7785_v62, %v7758_v36 }
0x2380   : > { %v7813_v4 = vadd.f32 %v7810_v63, %v7786_v46 }
0x2382   : > { %v7816_v5 = vsub.f32 %v7813_v4, %v7815_v1  ;;  %7814 = vst.msk [vmem:[%s1474_s1] sm:$0xff] %vm1498_vm0, %v7813_v4 }
0x2384   : > { %v7817_v50 = vmul.f32 %v7816_v5, %v7816_v5 }
0x2386   : > { %v7818_v52 = vsel %vm1498_vm0, %v7817_v50, 0.0 }
0x2387   : > { %7819 = vadd.xlane.f32.xlu0 %v7818_v52 }
0x2388   : > { %9467 = shalt.err (!%p9464_p13)
}
0x2389   : > { %s12113_s0 = sld [smem:[#allocation67_spill]]  ;;  %vm7829_vm0 = vcmask 0  }
0x238a   : > { %8724 = dma.vmem_to_hbm [thread:$0]  (%p9857_p5), %s7848_s28, 128, %s7850_s4, %s7832_s5  }
0x238f   : > { %s1495_s1 = scalar_lea.vmem %s12113_s0, %s10030_s26 }
0x23fa   : > { %v7820_v55 = vpop.xlane.xlu0 %7819 }
0x23fb   : > { %v7821_v6 = vrot.slane %v7820_v55, 4 }
0x23fd   : > { %v7822_v34 = vadd.f32 %v7821_v6, %v7820_v55 }
0x23ff   : > { %v7823_v9 = vrot.slane %v7822_v34, 2 }
0x2401   : > { %v7824_v33 = vadd.f32 %v7823_v9, %v7822_v34 }
0x2403   : > { %v7825_v22 = vrot.slane %v7824_v33, 1 }
0x2405   : > { %v7826_v7 = vadd.f32 %v7825_v22, %v7824_v33 }
0x2407   : > { %8678 = vpush %v7826_v7 }
0x2438   : > { %s8679_s3 = spop %8678 }
0x2439   : > { %v7828_v11 = vstv %s8679_s3 }
0x243a   : > { %7830 = vst.msk [vmem:[%s1495_s1] sm:$0x1] %vm7829_vm0, %v7828_v11 }
0x243b PF: > { %s12114_s6 = sld [smem:[#allocation70_spill]] }
0x243c   : > { %s12115_s9 = sld [smem:[#allocation68_spill]] }
0x2441   : > { %p8786_p1 = scmp.ge.s32.totalorder %s12114_s6, 2 }
0x2442   : > { %s7864_s12 = sand.u32 1, %s12115_s9  }
0x2443   : > { %p8761_p5 = pnand %p8786_p1, %p9861_p6  ;;  %s7865_s4 = scalar_lea.sflag [#allocation7], %s7864_s12 }
0x2445   : > { %p8762_p2 = pneg %p8761_p5 }
0x2447   : > { %9509 = dma.done.wait (%p8762_p2), %s7865_s4, 128  }
0x2448   : > { %9511 = vsyncadd (%p8762_p2), %s7865_s4, 4294967168  ;;  %s12117_s28 = sld [smem:[#allocation71_spill]]  ;;  %s12120_s22 = smov %s9518_s23 }
0x2449   : > { %s12118_s5 = sld [smem:[#allocation69_spill]] }
0x244a   : > { %s12119_s26 = sld [smem:[#allocation72_spill]] }
0x244e   : > { %p104_p3 = scmp.ge.s32.totalorder %s12117_s28, 4  }
0x244f   : > { %s12121_s23 = smov %s12118_s5 }
0x2450   :  { %106 = sbr.rel (!%p104_p3) target bundleno = 95 (0x5f), region = 341 }
0x2455   :  { %7877 = vsyncpa [#allocation6], 1 }
0x2456   :  { %7879 = vsyncpa [#allocation6 + $0x1], 1 }
0x2457   :  { %7880 = vsyncpa [#allocation9], 1 }
0x2458   :  { %7881 = vsyncpa [#allocation12], 1 }
0x2459   :  { %7882 = vsyncpa [#allocation15], 1 }
0x245a   :  { %7883 = vsyncpa [#allocation18], 1 }
0x245b   :  { %7884 = vsyncpa [#allocation21], 1 }
0x245c   :  { %7885 = vsyncpa [#allocation7], 1 }
0x245d   :  { %7887 = vsyncpa [#allocation7 + $0x1], 1 }

</bundles_post_ra>
